<compile_context>
chip_gen: v7x
topology: tpu7x:2x2x1
jax: 0.10.0
libtpu: 0.0.40
codegen_flags: <defaults>
</compile_context>

<pallas_src>
import functools

import jax
import jax.numpy as jnp
from jax import lax
from jax.experimental import pallas as pl
from jax.experimental.pallas import tpu as pltpu

_EPS = 1e-5
_LANES = 128


def _round_up(c, m=_LANES):
    return ((c + m - 1) // m) * m


def _row_tile(rows, width, cout):
    """Output-row tile so the f32 accumulator stays ~<=64 KiB (fits vregs)."""
    cap_m = max(1, 128 // max(1, width))                  # ~128 matmul rows
    cap_acc = max(1, (64 * 1024) // (4 * width * cout))   # acc <= ~64 KiB
    return max(1, min(rows, cap_m, cap_acc))


def _vmem_cap_bytes():
    """Generation-aware cap (~75% of physical VMEM), with a safe fallback."""
    try:
        cap = int(pltpu.get_tpu_info().vmem_capacity_bytes)
        return max((cap * 3) // 4, 16 << 20)
    except Exception:
        return 48 << 20   # safe even on v7x (64 MiB physical per TensorCore)


def _wide_basic_kernel(x_ref, s1_ref, o1_ref, w1_ref, s2_ref, o2_ref, w2_ref,
                       b2_ref, *rest, stride, H, W, Cp_in, Cp_out, has_proj):
    """One batch element per grid step (NHWC, channels padded to 128-multiple).

    x_ref   : (1, H, W, Cp_in)        f32
    s*/o*   : (1, Cp)                 folded BN scale / offset (f32)
                                      (o2 already contains s2*conv1_bias)
    w1/w2   : (3, 3*Cp, Cp_out)       3x3 conv weights, kw taps concatenated
                                      along the contraction dim, bf16
    b2      : (1, Cp_out)             conv2 bias (+ projection bias if any)
    wsc     : (Cp_in, Cp_out) bf16    1x1 projection weight (proj shortcut only)
    out_ref : (1, Ho, Wo, Cp_out)     f32
    pad1/2  : VMEM bf16 scratch, zero-bordered activations (H+2, W+2, Cp)
    """
    if has_proj:
        wsc_ref, out_ref, pad1_ref, pad2_ref = rest
    else:
        out_ref, pad1_ref, pad2_ref = rest

    Ho = (H - 1) // stride + 1
    Wo = (W - 1) // stride + 1

    x = x_ref[0]                                              # (H, W, Cp_in) f32

    # ---- bn1 (folded, inference) + relu — f32 math, single bf16 cast on store
    a1 = jnp.maximum(x * s1_ref[...] + o1_ref[...], 0.0)

    # Zero only the 1-px border of both pad buffers (interior fully rewritten
    # each step).  Kept per-step (not pl.when(pid==0)) so it stays correct when
    # the batch axis is megacore-split on v7x (each core has its own scratch).
    zr1 = jnp.zeros((1, W + 2, Cp_in), jnp.bfloat16)
    zc1 = jnp.zeros((H, 1, Cp_in), jnp.bfloat16)
    pad1_ref[0:1, :, :] = zr1
    pad1_ref[H + 1:H + 2, :, :] = zr1
    pad1_ref[1:H + 1, 0:1, :] = zc1
    pad1_ref[1:H + 1, W + 1:W + 2, :] = zc1
    pad1_ref[1:H + 1, 1:W + 1, :] = a1.astype(jnp.bfloat16)

    zr2 = jnp.zeros((1, W + 2, Cp_out), jnp.bfloat16)
    zc2 = jnp.zeros((H, 1, Cp_out), jnp.bfloat16)
    pad2_ref[0:1, :, :] = zr2
    pad2_ref[H + 1:H + 2, :, :] = zr2
    pad2_ref[1:H + 1, 0:1, :] = zc2
    pad2_ref[1:H + 1, W + 1:W + 2, :] = zc2

    # ---- conv1: 3x3, stride 1, pad 1 — row-tiled, K-widened (3 dots, K=3*Cp)
    RT1 = _row_tile(H, W, Cp_out)
    r0 = 0
    while r0 < H:
        R = min(RT1, H - r0)
        M = R * W
        acc = jnp.zeros((M, Cp_out), jnp.float32)
        for kh in range(3):
            parts = [
                pad1_ref[r0 + kh:r0 + kh + R, kw:kw + W, :].reshape(M, Cp_in)
                for kw in range(3)
            ]
            patch = jnp.concatenate(parts, axis=-1)           # (M, 3*Cp_in) bf16
            acc = acc + jnp.dot(patch, w1_ref[kh],
                                preferred_element_type=jnp.float32)

        # dropout: eval-mode identity.
        # TODO(synk): training-mode dropout would need pltpu.prng_seed /
        # pltpu.prng_random_bits; eval mode is the identity.

        # bn2 (folded; conv1 bias already folded into o2) + relu
        a2 = jnp.maximum(acc * s2_ref[...] + o2_ref[...], 0.0)
        pad2_ref[1 + r0:1 + r0 + R, 1:W + 1, :] = (
            a2.reshape(R, W, Cp_out).astype(jnp.bfloat16))
        r0 += R

    # ---- stride != 1: deinterleave pad2 ONCE into stride^2 parity planes ----
    if stride != 1:
        p2 = pad2_ref[...]                                    # (H+2, W+2, Cp) bf16
        planes = []
        for dy in range(stride):
            row = []
            for dx in range(stride):
                row.append(lax.slice(p2, (dy, dx, 0), (H + 2, W + 2, Cp_out),
                                     (stride, stride, 1)))
            planes.append(row)
        # shortcut source, subsampled once
        if has_proj:
            xs_full = lax.slice(
                x, (0, 0, 0),
                ((Ho - 1) * stride + 1, (Wo - 1) * stride + 1, Cp_in),
                (stride, stride, 1))                          # (Ho, Wo, Cp_in)
    else:
        if has_proj:
            xs_full = x

    # ---- conv2: 3x3, stride `stride`, pad 1 + shortcut, row-tiled -----------
    RT2 = _row_tile(Ho, Wo, Cp_out)
    r0 = 0
    while r0 < Ho:
        R = min(RT2, Ho - r0)
        M = R * Wo
        acc = jnp.zeros((M, Cp_out), jnp.float32)
        for kh in range(3):
            parts = []
            for kw in range(3):
                if stride == 1:
                    win = pad2_ref[r0 + kh:r0 + kh + R, kw:kw + Wo, :]
                else:
                    pr = planes[kh % stride][kw % stride]
                    win = pr[kh // stride + r0:kh // stride + r0 + R,
                             kw // stride:kw // stride + Wo, :]
                parts.append(win.reshape(M, Cp_out))
            patch = jnp.concatenate(parts, axis=-1)           # (M, 3*Cp_out) bf16
            acc = acc + jnp.dot(patch, w2_ref[kh],
                                preferred_element_type=jnp.float32)
        y2 = acc + b2_ref[...]                                # (+ folded proj bias)

        if has_proj:
            xs = xs_full[r0:r0 + R].reshape(M, Cp_in).astype(jnp.bfloat16)
            out_tile = y2 + jnp.dot(xs, wsc_ref[...],
                                    preferred_element_type=jnp.float32)
        else:
            # identity shortcut: plain f32 add (stride==1, Cp_in==Cp_out)
            out_tile = y2 + x[r0:r0 + R].reshape(M, Cp_in)

        out_ref[0, r0:r0 + R, :, :] = (
            out_tile.reshape(R, Wo, Cp_out).astype(out_ref.dtype))
        r0 += R


def prepare_wide_basic_params(params, stride):
    """One-time conversion: fold BN + biases, OIHW->HWIO, K-concat kw taps,
    pad channels to 128, cast weights to bf16."""
    Cout, Cin = params["conv1_w"].shape[0], params["conv1_w"].shape[1]
    Cp_in, Cp_out = _round_up(Cin), _round_up(Cout)
    has_proj = (stride != 1) or (Cin != Cout)

    s1 = params["bn1_gamma"] / jnp.sqrt(params["bn1_var"] + _EPS)
    o1 = params["bn1_beta"] - params["bn1_mean"] * s1
    s2 = params["bn2_gamma"] / jnp.sqrt(params["bn2_var"] + _EPS)
    o2 = params["bn2_beta"] - params["bn2_mean"] * s2
    # exact folds: conv1 bias into bn2 offset, projection bias into conv2 bias
    o2 = o2 + s2 * params["conv1_b"]
    b2 = params["conv2_b"]
    if has_proj:
        b2 = b2 + params["sc_b"]

    def pad_vec(v, c):
        v = v.astype(jnp.float32)
        return jnp.pad(v, (0, c - v.shape[0])).reshape(1, c)

    def pad_w_cat(w_oihw, ci, co):
        # OIHW -> (kh, kw, Cin, Cout), zero-pad channels, then merge the 3 kw
        # taps into the contraction dim: (3, 3*ci, co), bf16 (kw-major K order
        # matching the kernel's patch concatenation).
        w = jnp.transpose(w_oihw, (2, 3, 1, 0))
        w = jnp.pad(w, ((0, 0), (0, 0),
                        (0, ci - w.shape[2]), (0, co - w.shape[3])))
        w = w.reshape(3, 3 * ci, co)
        return w.astype(jnp.bfloat16)

    prep = {
        "s1": pad_vec(s1, Cp_in), "o1": pad_vec(o1, Cp_in),
        "w1": pad_w_cat(params["conv1_w"], Cp_in, Cp_out),
        "s2": pad_vec(s2, Cp_out), "o2": pad_vec(o2, Cp_out),
        "w2": pad_w_cat(params["conv2_w"], Cp_out, Cp_out),
        "b2": pad_vec(b2, Cp_out),
    }
    if has_proj:
        wsc = params["sc_w"][:, :, 0, 0].T                    # (Cin, Cout)
        wsc = jnp.pad(wsc, ((0, Cp_in - Cin), (0, Cp_out - Cout)))
        prep["wsc"] = wsc.astype(jnp.bfloat16)
    return prep


def wide_basic_forward(x_nchw, prep, *, stride, cout):
    """x_nchw: (N, Cin, H, W) f32 (PyTorch layout). Returns (N, Cout, Ho, Wo)."""
    N, Cin, H, W = x_nchw.shape
    Cp_in = prep["w1"].shape[1] // 3
    Cp_out = prep["w1"].shape[2]
    Ho = (H - 1) // stride + 1
    Wo = (W - 1) // stride + 1
    has_proj = "wsc" in prep

    # NCHW -> NHWC and channel zero-pad to lane-dense width (done per block
    # here; a full WRN stack would keep this layout throughout).
    x = jnp.transpose(x_nchw, (0, 2, 3, 1)).astype(jnp.float32)
    if Cp_in != Cin:
        x = jnp.pad(x, ((0, 0), (0, 0), (0, 0), (0, Cp_in - Cin)))

    kernel = functools.partial(_wide_basic_kernel, stride=stride, H=H, W=W,
                               Cp_in=Cp_in, Cp_out=Cp_out, has_proj=has_proj)

    in_specs = [
        pl.BlockSpec((1, H, W, Cp_in), lambda n: (n, 0, 0, 0)),        # x
        pl.BlockSpec((1, Cp_in), lambda n: (0, 0)),                    # s1
        pl.BlockSpec((1, Cp_in), lambda n: (0, 0)),                    # o1
        pl.BlockSpec((3, 3 * Cp_in, Cp_out), lambda n: (0, 0, 0)),     # w1 (bf16)
        pl.BlockSpec((1, Cp_out), lambda n: (0, 0)),                   # s2
        pl.BlockSpec((1, Cp_out), lambda n: (0, 0)),                   # o2 (+s2*b1)
        pl.BlockSpec((3, 3 * Cp_out, Cp_out), lambda n: (0, 0, 0)),    # w2 (bf16)
        pl.BlockSpec((1, Cp_out), lambda n: (0, 0)),                   # b2 (+bsc)
    ]
    args = [x, prep["s1"], prep["o1"], prep["w1"],
            prep["s2"], prep["o2"], prep["w2"], prep["b2"]]
    if has_proj:
        in_specs.append(pl.BlockSpec((Cp_in, Cp_out), lambda n: (0, 0)))  # wsc
        args.append(prep["wsc"])

    # VMEM budget from actual block footprints (double-buffered I/O + weights,
    # bf16 pad scratch), capped generation-aware (~75% of physical VMEM).
    x_b = H * W * Cp_in * 4
    out_b = Ho * Wo * Cp_out * 4
    w_b = (9 * Cp_in * Cp_out + 9 * Cp_out * Cp_out) * 2
    if has_proj:
        w_b += Cp_in * Cp_out * 2
    vec_b = (2 * Cp_in + 3 * Cp_out) * 4
    pad_b = (H + 2) * (W + 2) * (Cp_in + Cp_out) * 2
    vmem_needed = 2 * (x_b + out_b + w_b + vec_b) + pad_b + (4 << 20)
    vmem_limit = min(max(vmem_needed, 16 << 20), _vmem_cap_bytes())

    out_nhwc = pl.pallas_call(
        kernel,
        out_shape=jax.ShapeDtypeStruct((N, Ho, Wo, Cp_out), jnp.float32),
        grid_spec=pltpu.PrefetchScalarGridSpec(
            num_scalar_prefetch=0,
            grid=(N,),
            in_specs=in_specs,
            out_specs=pl.BlockSpec((1, Ho, Wo, Cp_out), lambda n: (n, 0, 0, 0)),
            scratch_shapes=[
                pltpu.VMEM((H + 2, W + 2, Cp_in), jnp.bfloat16),
                pltpu.VMEM((H + 2, W + 2, Cp_out), jnp.bfloat16),
            ],
        ),
        compiler_params=pltpu.CompilerParams(
            dimension_semantics=("parallel",),
            vmem_limit_bytes=vmem_limit),
    )(*args)

    # slice padded channels away, back to NCHW
    return jnp.transpose(out_nhwc[..., :cout], (0, 3, 1, 2))


def _ref_forward(x, params, stride=1):
    """Pure-JAX (XLA conv) reference, NCHW end to end, f32."""
    def bn(v, g, b, m, var):
        return ((v - m[None, :, None, None]) /
                jnp.sqrt(var + _EPS)[None, :, None, None] *
                g[None, :, None, None] + b[None, :, None, None])

    dn = ("NCHW", "OIHW", "NCHW")
    a = jax.nn.relu(bn(x, params["bn1_gamma"], params["bn1_beta"],
                       params["bn1_mean"], params["bn1_var"]))
    out = lax.conv_general_dilated(a, params["conv1_w"], (1, 1),
                                   ((1, 1), (1, 1)), dimension_numbers=dn)
    out = out + params["conv1_b"][None, :, None, None]
    a = jax.nn.relu(bn(out, params["bn2_gamma"], params["bn2_beta"],
                       params["bn2_mean"], params["bn2_var"]))
    out = lax.conv_general_dilated(a, params["conv2_w"], (stride, stride),
                                   ((1, 1), (1, 1)), dimension_numbers=dn)
    out = out + params["conv2_b"][None, :, None, None]

    Cin, Cout = x.shape[1], params["conv1_w"].shape[0]
    if stride != 1 or Cin != Cout:
        sc = lax.conv_general_dilated(x, params["sc_w"], (stride, stride),
                                      ((0, 0), (0, 0)), dimension_numbers=dn)
        sc = sc + params["sc_b"][None, :, None, None]
    else:
        sc = x
    return out + sc


def _make_params(key, cin, cout):
    ks = jax.random.split(key, 16)
    return {
        "bn1_gamma": jax.random.uniform(ks[0], (cin,), jnp.float32, 0.5, 1.5),
        "bn1_beta":  0.1 * jax.random.normal(ks[1], (cin,), jnp.float32),
        "bn1_mean":  0.1 * jax.random.normal(ks[2], (cin,), jnp.float32),
        "bn1_var":   jax.random.uniform(ks[3], (cin,), jnp.float32, 0.5, 1.5),
        "conv1_w":   0.1 * jax.random.normal(ks[4], (cout, cin, 3, 3), jnp.float32),
        "conv1_b":   0.1 * jax.random.normal(ks[5], (cout,), jnp.float32),
        "bn2_gamma": jax.random.uniform(ks[6], (cout,), jnp.float32, 0.5, 1.5),
        "bn2_beta":  0.1 * jax.random.normal(ks[7], (cout,), jnp.float32),
        "bn2_mean":  0.1 * jax.random.normal(ks[8], (cout,), jnp.float32),
        "bn2_var":   jax.random.uniform(ks[9], (cout,), jnp.float32, 0.5, 1.5),
        "conv2_w":   0.1 * jax.random.normal(ks[10], (cout, cout, 3, 3), jnp.float32),
        "conv2_b":   0.1 * jax.random.normal(ks[11], (cout,), jnp.float32),
        "sc_w":      0.1 * jax.random.normal(ks[12], (cout, cin, 1, 1), jnp.float32),
        "sc_b":      0.1 * jax.random.normal(ks[13], (cout,), jnp.float32),
    }


if __name__ == "__main__":
    key = jax.random.PRNGKey(0)
    k_a, k_b, k_xa, k_xb = jax.random.split(key, 4)

    # Config A: projection shortcut (Cin != Cout), stride 1  (dropout p=0.3
    # would be identity in eval mode).
    N, Cin, Cout, H, W, stride = 2, 4, 8, 16, 16, 1
    params_a = _make_params(k_a, Cin, Cout)
    x_a = jax.random.normal(k_xa, (N, Cin, H, W), jnp.float32)
    prep_a = prepare_wide_basic_params(params_a, stride)
    fwd_a = jax.jit(functools.partial(wide_basic_forward, stride=stride, cout=Cout))
    out_a = jax.block_until_ready(fwd_a(x_a, prep_a))
    ref_a = _ref_forward(x_a, params_a, stride=stride)
    assert out_a.shape == ref_a.shape, (out_a.shape, ref_a.shape)
    if not jnp.allclose(out_a, ref_a, atol=2e-2, rtol=2e-2):
        raise AssertionError("Pallas output (projection shortcut) != reference")

    # Config B: identity shortcut (Cin == Cout, stride 1).
    Cin_b = Cout_b = 8
    params_b = _make_params(k_b, Cin_b, Cout_b)
    x_b = jax.random.normal(k_xb, (N, Cin_b, H, W), jnp.float32)
    prep_b = prepare_wide_basic_params(params_b, 1)
    fwd_b = jax.jit(functools.partial(wide_basic_forward, stride=1, cout=Cout_b))
    out_b = jax.block_until_ready(fwd_b(x_b, prep_b))
    ref_b = _ref_forward(x_b, params_b, stride=1)
    assert out_b.shape == ref_b.shape, (out_b.shape, ref_b.shape)
    if not jnp.allclose(out_b, ref_b, atol=2e-2, rtol=2e-2):
        raise AssertionError("Pallas output (identity shortcut) != reference")

    print("KERNEL_OK")
</pallas_src>

<mosaic_0001>
module attributes {stable_mosaic.version = 11 : i64} {
  func.func @_wide_basic_kernel(%arg0: i32, %arg1: memref<1x16x16x128xf32, #tpu.memory_space<vmem>>, %arg2: memref<1x128xf32, #tpu.memory_space<vmem>>, %arg3: memref<1x128xf32, #tpu.memory_space<vmem>>, %arg4: memref<3x384x128xbf16, #tpu.memory_space<vmem>>, %arg5: memref<1x128xf32, #tpu.memory_space<vmem>>, %arg6: memref<1x128xf32, #tpu.memory_space<vmem>>, %arg7: memref<3x384x128xbf16, #tpu.memory_space<vmem>>, %arg8: memref<1x128xf32, #tpu.memory_space<vmem>>, %arg9: memref<128x128xbf16, #tpu.memory_space<vmem>>, %arg10: memref<1x16x16x128xf32, #tpu.memory_space<vmem>>, %arg11: memref<18x18x128xbf16, #tpu.memory_space<vmem>>, %arg12: memref<18x18x128xbf16, #tpu.memory_space<vmem>>) attributes {dimension_semantics = [#tpu.dimension_semantics<parallel>], iteration_bounds = array<i64: 2>, scalar_prefetch = 0 : i64, scratch_operands = 2 : i64, tpu.core_type = #tpu.core_type<tc>, window_params = [{transform_indices = @transform_0, window_bounds = array<i64: 1, 16, 16, 128>}, {pipeline_mode = #tpu.pipeline_mode<synchronous>, transform_indices = @transform_1, window_bounds = array<i64: 1, 128>}, {pipeline_mode = #tpu.pipeline_mode<synchronous>, transform_indices = @transform_2, window_bounds = array<i64: 1, 128>}, {pipeline_mode = #tpu.pipeline_mode<synchronous>, transform_indices = @transform_3, window_bounds = array<i64: 3, 384, 128>}, {pipeline_mode = #tpu.pipeline_mode<synchronous>, transform_indices = @transform_4, window_bounds = array<i64: 1, 128>}, {pipeline_mode = #tpu.pipeline_mode<synchronous>, transform_indices = @transform_5, window_bounds = array<i64: 1, 128>}, {pipeline_mode = #tpu.pipeline_mode<synchronous>, transform_indices = @transform_6, window_bounds = array<i64: 3, 384, 128>}, {pipeline_mode = #tpu.pipeline_mode<synchronous>, transform_indices = @transform_7, window_bounds = array<i64: 1, 128>}, {pipeline_mode = #tpu.pipeline_mode<synchronous>, transform_indices = @transform_8, window_bounds = array<i64: 128, 128>}, {transform_indices = @transform_9, window_bounds = array<i64: 1, 16, 16, 128>}]} {
    %c0 = arith.constant 0 : index
    %c0_0 = arith.constant 0 : index
    %c0_1 = arith.constant 0 : index
    %c0_2 = arith.constant 0 : index
    %0 = vector.load %arg1[%c0, %c0_0, %c0_1, %c0_2] : memref<1x16x16x128xf32, #tpu.memory_space<vmem>>, vector<1x16x16x128xf32>
    %1 = vector.shape_cast %0 : vector<1x16x16x128xf32> to vector<16x16x128xf32>
    %c0_3 = arith.constant 0 : index
    %c0_4 = arith.constant 0 : index
    %2 = vector.load %arg2[%c0_3, %c0_4] : memref<1x128xf32, #tpu.memory_space<vmem>>, vector<1x128xf32>
    %3 = vector.shape_cast %2 : vector<1x128xf32> to vector<1x1x128xf32>
    %4 = vector.broadcast %3 : vector<1x1x128xf32> to vector<16x16x128xf32>
    %5 = arith.mulf %1, %4 : vector<16x16x128xf32>
    %c0_5 = arith.constant 0 : index
    %c0_6 = arith.constant 0 : index
    %6 = vector.load %arg3[%c0_5, %c0_6] : memref<1x128xf32, #tpu.memory_space<vmem>>, vector<1x128xf32>
    %7 = vector.shape_cast %6 : vector<1x128xf32> to vector<1x1x128xf32>
    %8 = vector.broadcast %7 : vector<1x1x128xf32> to vector<16x16x128xf32>
    %9 = arith.addf %5, %8 : vector<16x16x128xf32>
    %cst = arith.constant 0.000000e+00 : f32
    %10 = vector.broadcast %cst : f32 to vector<16x16x128xf32>
    %11 = arith.maximumf %9, %10 : vector<16x16x128xf32>
    %cst_7 = arith.constant 0.000000e+00 : bf16
    %12 = vector.broadcast %cst_7 : bf16 to vector<1x18x128xbf16>
    %cst_8 = arith.constant 0.000000e+00 : bf16
    %13 = vector.broadcast %cst_8 : bf16 to vector<16x1x128xbf16>
    %c0_9 = arith.constant 0 : index
    %c0_10 = arith.constant 0 : index
    %c0_11 = arith.constant 0 : index
    %14 = vector.load %arg11[%c0_9, %c0_10, %c0_11] : memref<18x18x128xbf16, #tpu.memory_space<vmem>>, vector<1x18x128xbf16>
    tpu.vector_store %arg11[%c0_9, %c0_10, %c0_11], %12 {strides = array<i32>} : memref<18x18x128xbf16, #tpu.memory_space<vmem>>, vector<1x18x128xbf16>,
    %c17 = arith.constant 17 : index
    %c0_12 = arith.constant 0 : index
    %c0_13 = arith.constant 0 : index
    %15 = vector.load %arg11[%c17, %c0_12, %c0_13] : memref<18x18x128xbf16, #tpu.memory_space<vmem>>, vector<1x18x128xbf16>
    tpu.vector_store %arg11[%c17, %c0_12, %c0_13], %12 {strides = array<i32>} : memref<18x18x128xbf16, #tpu.memory_space<vmem>>, vector<1x18x128xbf16>,
    %c1 = arith.constant 1 : index
    %c0_14 = arith.constant 0 : index
    %c0_15 = arith.constant 0 : index
    %16 = vector.load %arg11[%c1, %c0_14, %c0_15] : memref<18x18x128xbf16, #tpu.memory_space<vmem>>, vector<16x1x128xbf16>
    tpu.vector_store %arg11[%c1, %c0_14, %c0_15], %13 {strides = array<i32>} : memref<18x18x128xbf16, #tpu.memory_space<vmem>>, vector<16x1x128xbf16>,
    %c1_16 = arith.constant 1 : index
    %c17_17 = arith.constant 17 : index
    %c0_18 = arith.constant 0 : index
    %17 = vector.load %arg11[%c1_16, %c17_17, %c0_18] : memref<18x18x128xbf16, #tpu.memory_space<vmem>>, vector<16x1x128xbf16>
    tpu.vector_store %arg11[%c1_16, %c17_17, %c0_18], %13 {strides = array<i32>} : memref<18x18x128xbf16, #tpu.memory_space<vmem>>, vector<16x1x128xbf16>,
    %18 = arith.truncf %11 : vector<16x16x128xf32> to vector<16x16x128xbf16>
    %c1_19 = arith.constant 1 : index
    %c1_20 = arith.constant 1 : index
    %c0_21 = arith.constant 0 : index
    %19 = vector.load %arg11[%c1_19, %c1_20, %c0_21] : memref<18x18x128xbf16, #tpu.memory_space<vmem>>, vector<16x16x128xbf16>
    tpu.vector_store %arg11[%c1_19, %c1_20, %c0_21], %18 {strides = array<i32>} : memref<18x18x128xbf16, #tpu.memory_space<vmem>>, vector<16x16x128xbf16>,
    %cst_22 = arith.constant 0.000000e+00 : bf16
    %20 = vector.broadcast %cst_22 : bf16 to vector<1x18x128xbf16>
    %cst_23 = arith.constant 0.000000e+00 : bf16
    %21 = vector.broadcast %cst_23 : bf16 to vector<16x1x128xbf16>
    %c0_24 = arith.constant 0 : index
    %c0_25 = arith.constant 0 : index
    %c0_26 = arith.constant 0 : index
    %22 = vector.load %arg12[%c0_24, %c0_25, %c0_26] : memref<18x18x128xbf16, #tpu.memory_space<vmem>>, vector<1x18x128xbf16>
    tpu.vector_store %arg12[%c0_24, %c0_25, %c0_26], %20 {strides = array<i32>} : memref<18x18x128xbf16, #tpu.memory_space<vmem>>, vector<1x18x128xbf16>,
    %c17_27 = arith.constant 17 : index
    %c0_28 = arith.constant 0 : index
    %c0_29 = arith.constant 0 : index
    %23 = vector.load %arg12[%c17_27, %c0_28, %c0_29] : memref<18x18x128xbf16, #tpu.memory_space<vmem>>, vector<1x18x128xbf16>
    tpu.vector_store %arg12[%c17_27, %c0_28, %c0_29], %20 {strides = array<i32>} : memref<18x18x128xbf16, #tpu.memory_space<vmem>>, vector<1x18x128xbf16>,
    %c1_30 = arith.constant 1 : index
    %c0_31 = arith.constant 0 : index
    %c0_32 = arith.constant 0 : index
    %24 = vector.load %arg12[%c1_30, %c0_31, %c0_32] : memref<18x18x128xbf16, #tpu.memory_space<vmem>>, vector<16x1x128xbf16>
    tpu.vector_store %arg12[%c1_30, %c0_31, %c0_32], %21 {strides = array<i32>} : memref<18x18x128xbf16, #tpu.memory_space<vmem>>, vector<16x1x128xbf16>,
    %c1_33 = arith.constant 1 : index
    %c17_34 = arith.constant 17 : index
    %c0_35 = arith.constant 0 : index
    %25 = vector.load %arg12[%c1_33, %c17_34, %c0_35] : memref<18x18x128xbf16, #tpu.memory_space<vmem>>, vector<16x1x128xbf16>
    tpu.vector_store %arg12[%c1_33, %c17_34, %c0_35], %21 {strides = array<i32>} : memref<18x18x128xbf16, #tpu.memory_space<vmem>>, vector<16x1x128xbf16>,
    %cst_36 = arith.constant 0.000000e+00 : f32
    %26 = vector.broadcast %cst_36 : f32 to vector<128x128xf32>
    %c0_37 = arith.constant 0 : index
    %c0_38 = arith.constant 0 : index
    %c0_39 = arith.constant 0 : index
    %27 = vector.load %arg11[%c0_37, %c0_38, %c0_39] : memref<18x18x128xbf16, #tpu.memory_space<vmem>>, vector<8x16x128xbf16>
    %28 = vector.shape_cast %27 : vector<8x16x128xbf16> to vector<128x128xbf16>
    %c0_40 = arith.constant 0 : index
    %c1_41 = arith.constant 1 : index
    %c0_42 = arith.constant 0 : index
    %29 = vector.load %arg11[%c0_40, %c1_41, %c0_42] : memref<18x18x128xbf16, #tpu.memory_space<vmem>>, vector<8x16x128xbf16>
    %30 = vector.shape_cast %29 : vector<8x16x128xbf16> to vector<128x128xbf16>
    %c0_43 = arith.constant 0 : index
    %c2 = arith.constant 2 : index
    %c0_44 = arith.constant 0 : index
    %31 = vector.load %arg11[%c0_43, %c2, %c0_44] : memref<18x18x128xbf16, #tpu.memory_space<vmem>>, vector<8x16x128xbf16>
    %32 = vector.shape_cast %31 : vector<8x16x128xbf16> to vector<128x128xbf16>
    %33 = tpu.concatenate %28, %30, %32 in 1 : vector<128x128xbf16>, vector<128x128xbf16>, vector<128x128xbf16> -> vector<128x384xbf16>
    %c0_45 = arith.constant 0 : index
    %c0_46 = arith.constant 0 : index
    %c0_47 = arith.constant 0 : index
    %34 = vector.load %arg4[%c0_45, %c0_46, %c0_47] : memref<3x384x128xbf16, #tpu.memory_space<vmem>>, vector<1x384x128xbf16>
    %35 = vector.shape_cast %34 : vector<1x384x128xbf16> to vector<384x128xbf16>
    %cst_48 = arith.constant dense<0.000000e+00> : vector<128x128xf32>
    %36 = tpu.matmul %33, %35, %cst_48 {dimension_numbers = #tpu.dot_dimension_numbers<[1], [0], [0], [1], [0, 0, 1, 1], [], []>} : vector<128x384xbf16>, vector<384x128xbf16>, vector<128x128xf32> -> vector<128x128xf32>
    %37 = arith.addf %26, %36 : vector<128x128xf32>
    %c1_49 = arith.constant 1 : index
    %c0_50 = arith.constant 0 : index
    %c0_51 = arith.constant 0 : index
    %38 = vector.load %arg11[%c1_49, %c0_50, %c0_51] : memref<18x18x128xbf16, #tpu.memory_space<vmem>>, vector<8x16x128xbf16>
    %39 = vector.shape_cast %38 : vector<8x16x128xbf16> to vector<128x128xbf16>
    %c1_52 = arith.constant 1 : index
    %c1_53 = arith.constant 1 : index
    %c0_54 = arith.constant 0 : index
    %40 = vector.load %arg11[%c1_52, %c1_53, %c0_54] : memref<18x18x128xbf16, #tpu.memory_space<vmem>>, vector<8x16x128xbf16>
    %41 = vector.shape_cast %40 : vector<8x16x128xbf16> to vector<128x128xbf16>
    %c1_55 = arith.constant 1 : index
    %c2_56 = arith.constant 2 : index
    %c0_57 = arith.constant 0 : index
    %42 = vector.load %arg11[%c1_55, %c2_56, %c0_57] : memref<18x18x128xbf16, #tpu.memory_space<vmem>>, vector<8x16x128xbf16>
    %43 = vector.shape_cast %42 : vector<8x16x128xbf16> to vector<128x128xbf16>
    %44 = tpu.concatenate %39, %41, %43 in 1 : vector<128x128xbf16>, vector<128x128xbf16>, vector<128x128xbf16> -> vector<128x384xbf16>
    %c1_58 = arith.constant 1 : index
    %c0_59 = arith.constant 0 : index
    %c0_60 = arith.constant 0 : index
    %45 = vector.load %arg4[%c1_58, %c0_59, %c0_60] : memref<3x384x128xbf16, #tpu.memory_space<vmem>>, vector<1x384x128xbf16>
    %46 = vector.shape_cast %45 : vector<1x384x128xbf16> to vector<384x128xbf16>
    %cst_61 = arith.constant dense<0.000000e+00> : vector<128x128xf32>
    %47 = tpu.matmul %44, %46, %cst_61 {dimension_numbers = #tpu.dot_dimension_numbers<[1], [0], [0], [1], [0, 0, 1, 1], [], []>} : vector<128x384xbf16>, vector<384x128xbf16>, vector<128x128xf32> -> vector<128x128xf32>
    %48 = arith.addf %37, %47 : vector<128x128xf32>
    %c2_62 = arith.constant 2 : index
    %c0_63 = arith.constant 0 : index
    %c0_64 = arith.constant 0 : index
    %49 = vector.load %arg11[%c2_62, %c0_63, %c0_64] : memref<18x18x128xbf16, #tpu.memory_space<vmem>>, vector<8x16x128xbf16>
    %50 = vector.shape_cast %49 : vector<8x16x128xbf16> to vector<128x128xbf16>
    %c2_65 = arith.constant 2 : index
    %c1_66 = arith.constant 1 : index
    %c0_67 = arith.constant 0 : index
    %51 = vector.load %arg11[%c2_65, %c1_66, %c0_67] : memref<18x18x128xbf16, #tpu.memory_space<vmem>>, vector<8x16x128xbf16>
    %52 = vector.shape_cast %51 : vector<8x16x128xbf16> to vector<128x128xbf16>
    %c2_68 = arith.constant 2 : index
    %c2_69 = arith.constant 2 : index
    %c0_70 = arith.constant 0 : index
    %53 = vector.load %arg11[%c2_68, %c2_69, %c0_70] : memref<18x18x128xbf16, #tpu.memory_space<vmem>>, vector<8x16x128xbf16>
    %54 = vector.shape_cast %53 : vector<8x16x128xbf16> to vector<128x128xbf16>
    %55 = tpu.concatenate %50, %52, %54 in 1 : vector<128x128xbf16>, vector<128x128xbf16>, vector<128x128xbf16> -> vector<128x384xbf16>
    %c2_71 = arith.constant 2 : index
    %c0_72 = arith.constant 0 : index
    %c0_73 = arith.constant 0 : index
    %56 = vector.load %arg4[%c2_71, %c0_72, %c0_73] : memref<3x384x128xbf16, #tpu.memory_space<vmem>>, vector<1x384x128xbf16>
    %57 = vector.shape_cast %56 : vector<1x384x128xbf16> to vector<384x128xbf16>
    %cst_74 = arith.constant dense<0.000000e+00> : vector<128x128xf32>
    %58 = tpu.matmul %55, %57, %cst_74 {dimension_numbers = #tpu.dot_dimension_numbers<[1], [0], [0], [1], [0, 0, 1, 1], [], []>} : vector<128x384xbf16>, vector<384x128xbf16>, vector<128x128xf32> -> vector<128x128xf32>
    %59 = arith.addf %48, %58 : vector<128x128xf32>
    %c0_75 = arith.constant 0 : index
    %c0_76 = arith.constant 0 : index
    %60 = vector.load %arg5[%c0_75, %c0_76] : memref<1x128xf32, #tpu.memory_space<vmem>>, vector<1x128xf32>
    %61 = vector.broadcast %60 : vector<1x128xf32> to vector<128x128xf32>
    %62 = arith.mulf %59, %61 : vector<128x128xf32>
    %c0_77 = arith.constant 0 : index
    %c0_78 = arith.constant 0 : index
    %63 = vector.load %arg6[%c0_77, %c0_78] : memref<1x128xf32, #tpu.memory_space<vmem>>, vector<1x128xf32>
    %64 = vector.broadcast %63 : vector<1x128xf32> to vector<128x128xf32>
    %65 = arith.addf %62, %64 : vector<128x128xf32>
    %cst_79 = arith.constant 0.000000e+00 : f32
    %66 = vector.broadcast %cst_79 : f32 to vector<128x128xf32>
    %67 = arith.maximumf %65, %66 : vector<128x128xf32>
    %68 = vector.shape_cast %67 : vector<128x128xf32> to vector<8x16x128xf32>
    %69 = arith.truncf %68 : vector<8x16x128xf32> to vector<8x16x128xbf16>
    %c1_80 = arith.constant 1 : index
    %c1_81 = arith.constant 1 : index
    %c0_82 = arith.constant 0 : index
    %70 = vector.load %arg12[%c1_80, %c1_81, %c0_82] : memref<18x18x128xbf16, #tpu.memory_space<vmem>>, vector<8x16x128xbf16>
    tpu.vector_store %arg12[%c1_80, %c1_81, %c0_82], %69 {strides = array<i32>} : memref<18x18x128xbf16, #tpu.memory_space<vmem>>, vector<8x16x128xbf16>,
    %cst_83 = arith.constant 0.000000e+00 : f32
    %71 = vector.broadcast %cst_83 : f32 to vector<128x128xf32>
    %c8 = arith.constant 8 : index
    %c0_84 = arith.constant 0 : index
    %c0_85 = arith.constant 0 : index
    %72 = vector.load %arg11[%c8, %c0_84, %c0_85] : memref<18x18x128xbf16, #tpu.memory_space<vmem>>, vector<8x16x128xbf16>
    %73 = vector.shape_cast %72 : vector<8x16x128xbf16> to vector<128x128xbf16>
    %c8_86 = arith.constant 8 : index
    %c1_87 = arith.constant 1 : index
    %c0_88 = arith.constant 0 : index
    %74 = vector.load %arg11[%c8_86, %c1_87, %c0_88] : memref<18x18x128xbf16, #tpu.memory_space<vmem>>, vector<8x16x128xbf16>
    %75 = vector.shape_cast %74 : vector<8x16x128xbf16> to vector<128x128xbf16>
    %c8_89 = arith.constant 8 : index
    %c2_90 = arith.constant 2 : index
    %c0_91 = arith.constant 0 : index
    %76 = vector.load %arg11[%c8_89, %c2_90, %c0_91] : memref<18x18x128xbf16, #tpu.memory_space<vmem>>, vector<8x16x128xbf16>
    %77 = vector.shape_cast %76 : vector<8x16x128xbf16> to vector<128x128xbf16>
    %78 = tpu.concatenate %73, %75, %77 in 1 : vector<128x128xbf16>, vector<128x128xbf16>, vector<128x128xbf16> -> vector<128x384xbf16>
    %c0_92 = arith.constant 0 : index
    %c0_93 = arith.constant 0 : index
    %c0_94 = arith.constant 0 : index
    %79 = vector.load %arg4[%c0_92, %c0_93, %c0_94] : memref<3x384x128xbf16, #tpu.memory_space<vmem>>, vector<1x384x128xbf16>
    %80 = vector.shape_cast %79 : vector<1x384x128xbf16> to vector<384x128xbf16>
    %cst_95 = arith.constant dense<0.000000e+00> : vector<128x128xf32>
    %81 = tpu.matmul %78, %80, %cst_95 {dimension_numbers = #tpu.dot_dimension_numbers<[1], [0], [0], [1], [0, 0, 1, 1], [], []>} : vector<128x384xbf16>, vector<384x128xbf16>, vector<128x128xf32> -> vector<128x128xf32>
    %82 = arith.addf %71, %81 : vector<128x128xf32>
    %c9 = arith.constant 9 : index
    %c0_96 = arith.constant 0 : index
    %c0_97 = arith.constant 0 : index
    %83 = vector.load %arg11[%c9, %c0_96, %c0_97] : memref<18x18x128xbf16, #tpu.memory_space<vmem>>, vector<8x16x128xbf16>
    %84 = vector.shape_cast %83 : vector<8x16x128xbf16> to vector<128x128xbf16>
    %c9_98 = arith.constant 9 : index
    %c1_99 = arith.constant 1 : index
    %c0_100 = arith.constant 0 : index
    %85 = vector.load %arg11[%c9_98, %c1_99, %c0_100] : memref<18x18x128xbf16, #tpu.memory_space<vmem>>, vector<8x16x128xbf16>
    %86 = vector.shape_cast %85 : vector<8x16x128xbf16> to vector<128x128xbf16>
    %c9_101 = arith.constant 9 : index
    %c2_102 = arith.constant 2 : index
    %c0_103 = arith.constant 0 : index
    %87 = vector.load %arg11[%c9_101, %c2_102, %c0_103] : memref<18x18x128xbf16, #tpu.memory_space<vmem>>, vector<8x16x128xbf16>
    %88 = vector.shape_cast %87 : vector<8x16x128xbf16> to vector<128x128xbf16>
    %89 = tpu.concatenate %84, %86, %88 in 1 : vector<128x128xbf16>, vector<128x128xbf16>, vector<128x128xbf16> -> vector<128x384xbf16>
    %c1_104 = arith.constant 1 : index
    %c0_105 = arith.constant 0 : index
    %c0_106 = arith.constant 0 : index
    %90 = vector.load %arg4[%c1_104, %c0_105, %c0_106] : memref<3x384x128xbf16, #tpu.memory_space<vmem>>, vector<1x384x128xbf16>
    %91 = vector.shape_cast %90 : vector<1x384x128xbf16> to vector<384x128xbf16>
    %cst_107 = arith.constant dense<0.000000e+00> : vector<128x128xf32>
    %92 = tpu.matmul %89, %91, %cst_107 {dimension_numbers = #tpu.dot_dimension_numbers<[1], [0], [0], [1], [0, 0, 1, 1], [], []>} : vector<128x384xbf16>, vector<384x128xbf16>, vector<128x128xf32> -> vector<128x128xf32>
    %93 = arith.addf %82, %92 : vector<128x128xf32>
    %c10 = arith.constant 10 : index
    %c0_108 = arith.constant 0 : index
    %c0_109 = arith.constant 0 : index
    %94 = vector.load %arg11[%c10, %c0_108, %c0_109] : memref<18x18x128xbf16, #tpu.memory_space<vmem>>, vector<8x16x128xbf16>
    %95 = vector.shape_cast %94 : vector<8x16x128xbf16> to vector<128x128xbf16>
    %c10_110 = arith.constant 10 : index
    %c1_111 = arith.constant 1 : index
    %c0_112 = arith.constant 0 : index
    %96 = vector.load %arg11[%c10_110, %c1_111, %c0_112] : memref<18x18x128xbf16, #tpu.memory_space<vmem>>, vector<8x16x128xbf16>
    %97 = vector.shape_cast %96 : vector<8x16x128xbf16> to vector<128x128xbf16>
    %c10_113 = arith.constant 10 : index
    %c2_114 = arith.constant 2 : index
    %c0_115 = arith.constant 0 : index
    %98 = vector.load %arg11[%c10_113, %c2_114, %c0_115] : memref<18x18x128xbf16, #tpu.memory_space<vmem>>, vector<8x16x128xbf16>
    %99 = vector.shape_cast %98 : vector<8x16x128xbf16> to vector<128x128xbf16>
    %100 = tpu.concatenate %95, %97, %99 in 1 : vector<128x128xbf16>, vector<128x128xbf16>, vector<128x128xbf16> -> vector<128x384xbf16>
    %c2_116 = arith.constant 2 : index
    %c0_117 = arith.constant 0 : index
    %c0_118 = arith.constant 0 : index
    %101 = vector.load %arg4[%c2_116, %c0_117, %c0_118] : memref<3x384x128xbf16, #tpu.memory_space<vmem>>, vector<1x384x128xbf16>
    %102 = vector.shape_cast %101 : vector<1x384x128xbf16> to vector<384x128xbf16>
    %cst_119 = arith.constant dense<0.000000e+00> : vector<128x128xf32>
    %103 = tpu.matmul %100, %102, %cst_119 {dimension_numbers = #tpu.dot_dimension_numbers<[1], [0], [0], [1], [0, 0, 1, 1], [], []>} : vector<128x384xbf16>, vector<384x128xbf16>, vector<128x128xf32> -> vector<128x128xf32>
    %104 = arith.addf %93, %103 : vector<128x128xf32>
    %c0_120 = arith.constant 0 : index
    %c0_121 = arith.constant 0 : index
    %105 = vector.load %arg5[%c0_120, %c0_121] : memref<1x128xf32, #tpu.memory_space<vmem>>, vector<1x128xf32>
    %106 = vector.broadcast %105 : vector<1x128xf32> to vector<128x128xf32>
    %107 = arith.mulf %104, %106 : vector<128x128xf32>
    %c0_122 = arith.constant 0 : index
    %c0_123 = arith.constant 0 : index
    %108 = vector.load %arg6[%c0_122, %c0_123] : memref<1x128xf32, #tpu.memory_space<vmem>>, vector<1x128xf32>
    %109 = vector.broadcast %108 : vector<1x128xf32> to vector<128x128xf32>
    %110 = arith.addf %107, %109 : vector<128x128xf32>
    %cst_124 = arith.constant 0.000000e+00 : f32
    %111 = vector.broadcast %cst_124 : f32 to vector<128x128xf32>
    %112 = arith.maximumf %110, %111 : vector<128x128xf32>
    %113 = vector.shape_cast %112 : vector<128x128xf32> to vector<8x16x128xf32>
    %114 = arith.truncf %113 : vector<8x16x128xf32> to vector<8x16x128xbf16>
    %c9_125 = arith.constant 9 : index
    %c1_126 = arith.constant 1 : index
    %c0_127 = arith.constant 0 : index
    %115 = vector.load %arg12[%c9_125, %c1_126, %c0_127] : memref<18x18x128xbf16, #tpu.memory_space<vmem>>, vector<8x16x128xbf16>
    tpu.vector_store %arg12[%c9_125, %c1_126, %c0_127], %114 {strides = array<i32>} : memref<18x18x128xbf16, #tpu.memory_space<vmem>>, vector<8x16x128xbf16>,
    %cst_128 = arith.constant 0.000000e+00 : f32
    %116 = vector.broadcast %cst_128 : f32 to vector<128x128xf32>
    %c0_129 = arith.constant 0 : index
    %c0_130 = arith.constant 0 : index
    %c0_131 = arith.constant 0 : index
    %117 = vector.load %arg12[%c0_129, %c0_130, %c0_131] : memref<18x18x128xbf16, #tpu.memory_space<vmem>>, vector<8x16x128xbf16>
    %118 = vector.shape_cast %117 : vector<8x16x128xbf16> to vector<128x128xbf16>
    %c0_132 = arith.constant 0 : index
    %c1_133 = arith.constant 1 : index
    %c0_134 = arith.constant 0 : index
    %119 = vector.load %arg12[%c0_132, %c1_133, %c0_134] : memref<18x18x128xbf16, #tpu.memory_space<vmem>>, vector<8x16x128xbf16>
    %120 = vector.shape_cast %119 : vector<8x16x128xbf16> to vector<128x128xbf16>
    %c0_135 = arith.constant 0 : index
    %c2_136 = arith.constant 2 : index
    %c0_137 = arith.constant 0 : index
    %121 = vector.load %arg12[%c0_135, %c2_136, %c0_137] : memref<18x18x128xbf16, #tpu.memory_space<vmem>>, vector<8x16x128xbf16>
    %122 = vector.shape_cast %121 : vector<8x16x128xbf16> to vector<128x128xbf16>
    %123 = tpu.concatenate %118, %120, %122 in 1 : vector<128x128xbf16>, vector<128x128xbf16>, vector<128x128xbf16> -> vector<128x384xbf16>
    %c0_138 = arith.constant 0 : index
    %c0_139 = arith.constant 0 : index
    %c0_140 = arith.constant 0 : index
    %124 = vector.load %arg7[%c0_138, %c0_139, %c0_140] : memref<3x384x128xbf16, #tpu.memory_space<vmem>>, vector<1x384x128xbf16>
    %125 = vector.shape_cast %124 : vector<1x384x128xbf16> to vector<384x128xbf16>
    %cst_141 = arith.constant dense<0.000000e+00> : vector<128x128xf32>
    %126 = tpu.matmul %123, %125, %cst_141 {dimension_numbers = #tpu.dot_dimension_numbers<[1], [0], [0], [1], [0, 0, 1, 1], [], []>} : vector<128x384xbf16>, vector<384x128xbf16>, vector<128x128xf32> -> vector<128x128xf32>
    %127 = arith.addf %116, %126 : vector<128x128xf32>
    %c1_142 = arith.constant 1 : index
    %c0_143 = arith.constant 0 : index
    %c0_144 = arith.constant 0 : index
    %128 = vector.load %arg12[%c1_142, %c0_143, %c0_144] : memref<18x18x128xbf16, #tpu.memory_space<vmem>>, vector<8x16x128xbf16>
    %129 = vector.shape_cast %128 : vector<8x16x128xbf16> to vector<128x128xbf16>
    %c1_145 = arith.constant 1 : index
    %c1_146 = arith.constant 1 : index
    %c0_147 = arith.constant 0 : index
    %130 = vector.load %arg12[%c1_145, %c1_146, %c0_147] : memref<18x18x128xbf16, #tpu.memory_space<vmem>>, vector<8x16x128xbf16>
    %131 = vector.shape_cast %130 : vector<8x16x128xbf16> to vector<128x128xbf16>
    %c1_148 = arith.constant 1 : index
    %c2_149 = arith.constant 2 : index
    %c0_150 = arith.constant 0 : index
    %132 = vector.load %arg12[%c1_148, %c2_149, %c0_150] : memref<18x18x128xbf16, #tpu.memory_space<vmem>>, vector<8x16x128xbf16>
    %133 = vector.shape_cast %132 : vector<8x16x128xbf16> to vector<128x128xbf16>
    %134 = tpu.concatenate %129, %131, %133 in 1 : vector<128x128xbf16>, vector<128x128xbf16>, vector<128x128xbf16> -> vector<128x384xbf16>
    %c1_151 = arith.constant 1 : index
    %c0_152 = arith.constant 0 : index
    %c0_153 = arith.constant 0 : index
    %135 = vector.load %arg7[%c1_151, %c0_152, %c0_153] : memref<3x384x128xbf16, #tpu.memory_space<vmem>>, vector<1x384x128xbf16>
    %136 = vector.shape_cast %135 : vector<1x384x128xbf16> to vector<384x128xbf16>
    %cst_154 = arith.constant dense<0.000000e+00> : vector<128x128xf32>
    %137 = tpu.matmul %134, %136, %cst_154 {dimension_numbers = #tpu.dot_dimension_numbers<[1], [0], [0], [1], [0, 0, 1, 1], [], []>} : vector<128x384xbf16>, vector<384x128xbf16>, vector<128x128xf32> -> vector<128x128xf32>
    %138 = arith.addf %127, %137 : vector<128x128xf32>
    %c2_155 = arith.constant 2 : index
    %c0_156 = arith.constant 0 : index
    %c0_157 = arith.constant 0 : index
    %139 = vector.load %arg12[%c2_155, %c0_156, %c0_157] : memref<18x18x128xbf16, #tpu.memory_space<vmem>>, vector<8x16x128xbf16>
    %140 = vector.shape_cast %139 : vector<8x16x128xbf16> to vector<128x128xbf16>
    %c2_158 = arith.constant 2 : index
    %c1_159 = arith.constant 1 : index
    %c0_160 = arith.constant 0 : index
    %141 = vector.load %arg12[%c2_158, %c1_159, %c0_160] : memref<18x18x128xbf16, #tpu.memory_space<vmem>>, vector<8x16x128xbf16>
    %142 = vector.shape_cast %141 : vector<8x16x128xbf16> to vector<128x128xbf16>
    %c2_161 = arith.constant 2 : index
    %c2_162 = arith.constant 2 : index
    %c0_163 = arith.constant 0 : index
    %143 = vector.load %arg12[%c2_161, %c2_162, %c0_163] : memref<18x18x128xbf16, #tpu.memory_space<vmem>>, vector<8x16x128xbf16>
    %144 = vector.shape_cast %143 : vector<8x16x128xbf16> to vector<128x128xbf16>
    %145 = tpu.concatenate %140, %142, %144 in 1 : vector<128x128xbf16>, vector<128x128xbf16>, vector<128x128xbf16> -> vector<128x384xbf16>
    %c2_164 = arith.constant 2 : index
    %c0_165 = arith.constant 0 : index
    %c0_166 = arith.constant 0 : index
    %146 = vector.load %arg7[%c2_164, %c0_165, %c0_166] : memref<3x384x128xbf16, #tpu.memory_space<vmem>>, vector<1x384x128xbf16>
    %147 = vector.shape_cast %146 : vector<1x384x128xbf16> to vector<384x128xbf16>
    %cst_167 = arith.constant dense<0.000000e+00> : vector<128x128xf32>
    %148 = tpu.matmul %145, %147, %cst_167 {dimension_numbers = #tpu.dot_dimension_numbers<[1], [0], [0], [1], [0, 0, 1, 1], [], []>} : vector<128x384xbf16>, vector<384x128xbf16>, vector<128x128xf32> -> vector<128x128xf32>
    %149 = arith.addf %138, %148 : vector<128x128xf32>
    %c0_168 = arith.constant 0 : index
    %c0_169 = arith.constant 0 : index
    %150 = vector.load %arg8[%c0_168, %c0_169] : memref<1x128xf32, #tpu.memory_space<vmem>>, vector<1x128xf32>
    %151 = vector.broadcast %150 : vector<1x128xf32> to vector<128x128xf32>
    %152 = arith.addf %149, %151 : vector<128x128xf32>
    %153 = vector.extract_strided_slice %1 {offsets = [0, 0, 0], sizes = [8, 16, 128], strides = [1, 1, 1]} : vector<16x16x128xf32> to vector<8x16x128xf32>
    %154 = vector.shape_cast %153 : vector<8x16x128xf32> to vector<128x128xf32>
    %155 = arith.truncf %154 : vector<128x128xf32> to vector<128x128xbf16>
    %c0_170 = arith.constant 0 : index
    %c0_171 = arith.constant 0 : index
    %156 = vector.load %arg9[%c0_170, %c0_171] : memref<128x128xbf16, #tpu.memory_space<vmem>>, vector<128x128xbf16>
    %cst_172 = arith.constant dense<0.000000e+00> : vector<128x128xf32>
    %157 = tpu.matmul %155, %156, %cst_172 {dimension_numbers = #tpu.dot_dimension_numbers<[1], [0], [0], [1], [0, 0, 1, 1], [], []>} : vector<128x128xbf16>, vector<128x128xbf16>, vector<128x128xf32> -> vector<128x128xf32>
    %158 = arith.addf %152, %157 : vector<128x128xf32>
    %159 = vector.shape_cast %158 : vector<128x128xf32> to vector<8x16x128xf32>
    %c0_173 = arith.constant 0 : index
    %c0_174 = arith.constant 0 : index
    %c0_175 = arith.constant 0 : index
    %c0_176 = arith.constant 0 : index
    %160 = vector.load %arg10[%c0_173, %c0_174, %c0_175, %c0_176] : memref<1x16x16x128xf32, #tpu.memory_space<vmem>>, vector<1x8x16x128xf32>
    %161 = vector.shape_cast %160 : vector<1x8x16x128xf32> to vector<8x16x128xf32>
    %162 = vector.shape_cast %159 : vector<8x16x128xf32> to vector<1x8x16x128xf32>
    tpu.vector_store %arg10[%c0_173, %c0_174, %c0_175, %c0_176], %162 {strides = array<i32>} : memref<1x16x16x128xf32, #tpu.memory_space<vmem>>, vector<1x8x16x128xf32>,
    %cst_177 = arith.constant 0.000000e+00 : f32
    %163 = vector.broadcast %cst_177 : f32 to vector<128x128xf32>
    %c8_178 = arith.constant 8 : index
    %c0_179 = arith.constant 0 : index
    %c0_180 = arith.constant 0 : index
    %164 = vector.load %arg12[%c8_178, %c0_179, %c0_180] : memref<18x18x128xbf16, #tpu.memory_space<vmem>>, vector<8x16x128xbf16>
    %165 = vector.shape_cast %164 : vector<8x16x128xbf16> to vector<128x128xbf16>
    %c8_181 = arith.constant 8 : index
    %c1_182 = arith.constant 1 : index
    %c0_183 = arith.constant 0 : index
    %166 = vector.load %arg12[%c8_181, %c1_182, %c0_183] : memref<18x18x128xbf16, #tpu.memory_space<vmem>>, vector<8x16x128xbf16>
    %167 = vector.shape_cast %166 : vector<8x16x128xbf16> to vector<128x128xbf16>
    %c8_184 = arith.constant 8 : index
    %c2_185 = arith.constant 2 : index
    %c0_186 = arith.constant 0 : index
    %168 = vector.load %arg12[%c8_184, %c2_185, %c0_186] : memref<18x18x128xbf16, #tpu.memory_space<vmem>>, vector<8x16x128xbf16>
    %169 = vector.shape_cast %168 : vector<8x16x128xbf16> to vector<128x128xbf16>
    %170 = tpu.concatenate %165, %167, %169 in 1 : vector<128x128xbf16>, vector<128x128xbf16>, vector<128x128xbf16> -> vector<128x384xbf16>
    %c0_187 = arith.constant 0 : index
    %c0_188 = arith.constant 0 : index
    %c0_189 = arith.constant 0 : index
    %171 = vector.load %arg7[%c0_187, %c0_188, %c0_189] : memref<3x384x128xbf16, #tpu.memory_space<vmem>>, vector<1x384x128xbf16>
    %172 = vector.shape_cast %171 : vector<1x384x128xbf16> to vector<384x128xbf16>
    %cst_190 = arith.constant dense<0.000000e+00> : vector<128x128xf32>
    %173 = tpu.matmul %170, %172, %cst_190 {dimension_numbers = #tpu.dot_dimension_numbers<[1], [0], [0], [1], [0, 0, 1, 1], [], []>} : vector<128x384xbf16>, vector<384x128xbf16>, vector<128x128xf32> -> vector<128x128xf32>
    %174 = arith.addf %163, %173 : vector<128x128xf32>
    %c9_191 = arith.constant 9 : index
    %c0_192 = arith.constant 0 : index
    %c0_193 = arith.constant 0 : index
    %175 = vector.load %arg12[%c9_191, %c0_192, %c0_193] : memref<18x18x128xbf16, #tpu.memory_space<vmem>>, vector<8x16x128xbf16>
    %176 = vector.shape_cast %175 : vector<8x16x128xbf16> to vector<128x128xbf16>
    %c9_194 = arith.constant 9 : index
    %c1_195 = arith.constant 1 : index
    %c0_196 = arith.constant 0 : index
    %177 = vector.load %arg12[%c9_194, %c1_195, %c0_196] : memref<18x18x128xbf16, #tpu.memory_space<vmem>>, vector<8x16x128xbf16>
    %178 = vector.shape_cast %177 : vector<8x16x128xbf16> to vector<128x128xbf16>
    %c9_197 = arith.constant 9 : index
    %c2_198 = arith.constant 2 : index
    %c0_199 = arith.constant 0 : index
    %179 = vector.load %arg12[%c9_197, %c2_198, %c0_199] : memref<18x18x128xbf16, #tpu.memory_space<vmem>>, vector<8x16x128xbf16>
    %180 = vector.shape_cast %179 : vector<8x16x128xbf16> to vector<128x128xbf16>
    %181 = tpu.concatenate %176, %178, %180 in 1 : vector<128x128xbf16>, vector<128x128xbf16>, vector<128x128xbf16> -> vector<128x384xbf16>
    %c1_200 = arith.constant 1 : index
    %c0_201 = arith.constant 0 : index
    %c0_202 = arith.constant 0 : index
    %182 = vector.load %arg7[%c1_200, %c0_201, %c0_202] : memref<3x384x128xbf16, #tpu.memory_space<vmem>>, vector<1x384x128xbf16>
    %183 = vector.shape_cast %182 : vector<1x384x128xbf16> to vector<384x128xbf16>
    %cst_203 = arith.constant dense<0.000000e+00> : vector<128x128xf32>
    %184 = tpu.matmul %181, %183, %cst_203 {dimension_numbers = #tpu.dot_dimension_numbers<[1], [0], [0], [1], [0, 0, 1, 1], [], []>} : vector<128x384xbf16>, vector<384x128xbf16>, vector<128x128xf32> -> vector<128x128xf32>
    %185 = arith.addf %174, %184 : vector<128x128xf32>
    %c10_204 = arith.constant 10 : index
    %c0_205 = arith.constant 0 : index
    %c0_206 = arith.constant 0 : index
    %186 = vector.load %arg12[%c10_204, %c0_205, %c0_206] : memref<18x18x128xbf16, #tpu.memory_space<vmem>>, vector<8x16x128xbf16>
    %187 = vector.shape_cast %186 : vector<8x16x128xbf16> to vector<128x128xbf16>
    %c10_207 = arith.constant 10 : index
    %c1_208 = arith.constant 1 : index
    %c0_209 = arith.constant 0 : index
    %188 = vector.load %arg12[%c10_207, %c1_208, %c0_209] : memref<18x18x128xbf16, #tpu.memory_space<vmem>>, vector<8x16x128xbf16>
    %189 = vector.shape_cast %188 : vector<8x16x128xbf16> to vector<128x128xbf16>
    %c10_210 = arith.constant 10 : index
    %c2_211 = arith.constant 2 : index
    %c0_212 = arith.constant 0 : index
    %190 = vector.load %arg12[%c10_210, %c2_211, %c0_212] : memref<18x18x128xbf16, #tpu.memory_space<vmem>>, vector<8x16x128xbf16>
    %191 = vector.shape_cast %190 : vector<8x16x128xbf16> to vector<128x128xbf16>
    %192 = tpu.concatenate %187, %189, %191 in 1 : vector<128x128xbf16>, vector<128x128xbf16>, vector<128x128xbf16> -> vector<128x384xbf16>
    %c2_213 = arith.constant 2 : index
    %c0_214 = arith.constant 0 : index
    %c0_215 = arith.constant 0 : index
    %193 = vector.load %arg7[%c2_213, %c0_214, %c0_215] : memref<3x384x128xbf16, #tpu.memory_space<vmem>>, vector<1x384x128xbf16>
    %194 = vector.shape_cast %193 : vector<1x384x128xbf16> to vector<384x128xbf16>
    %cst_216 = arith.constant dense<0.000000e+00> : vector<128x128xf32>
    %195 = tpu.matmul %192, %194, %cst_216 {dimension_numbers = #tpu.dot_dimension_numbers<[1], [0], [0], [1], [0, 0, 1, 1], [], []>} : vector<128x384xbf16>, vector<384x128xbf16>, vector<128x128xf32> -> vector<128x128xf32>
    %196 = arith.addf %185, %195 : vector<128x128xf32>
    %c0_217 = arith.constant 0 : index
    %c0_218 = arith.constant 0 : index
    %197 = vector.load %arg8[%c0_217, %c0_218] : memref<1x128xf32, #tpu.memory_space<vmem>>, vector<1x128xf32>
    %198 = vector.broadcast %197 : vector<1x128xf32> to vector<128x128xf32>
    %199 = arith.addf %196, %198 : vector<128x128xf32>
    %200 = vector.extract_strided_slice %1 {offsets = [8, 0, 0], sizes = [8, 16, 128], strides = [1, 1, 1]} : vector<16x16x128xf32> to vector<8x16x128xf32>
    %201 = vector.shape_cast %200 : vector<8x16x128xf32> to vector<128x128xf32>
    %202 = arith.truncf %201 : vector<128x128xf32> to vector<128x128xbf16>
    %c0_219 = arith.constant 0 : index
    %c0_220 = arith.constant 0 : index
    %203 = vector.load %arg9[%c0_219, %c0_220] : memref<128x128xbf16, #tpu.memory_space<vmem>>, vector<128x128xbf16>
    %cst_221 = arith.constant dense<0.000000e+00> : vector<128x128xf32>
    %204 = tpu.matmul %202, %203, %cst_221 {dimension_numbers = #tpu.dot_dimension_numbers<[1], [0], [0], [1], [0, 0, 1, 1], [], []>} : vector<128x128xbf16>, vector<128x128xbf16>, vector<128x128xf32> -> vector<128x128xf32>
    %205 = arith.addf %199, %204 : vector<128x128xf32>
    %206 = vector.shape_cast %205 : vector<128x128xf32> to vector<8x16x128xf32>
    %c0_222 = arith.constant 0 : index
    %c8_223 = arith.constant 8 : index
    %c0_224 = arith.constant 0 : index
    %c0_225 = arith.constant 0 : index
    %207 = vector.load %arg10[%c0_222, %c8_223, %c0_224, %c0_225] : memref<1x16x16x128xf32, #tpu.memory_space<vmem>>, vector<1x8x16x128xf32>
    %208 = vector.shape_cast %207 : vector<1x8x16x128xf32> to vector<8x16x128xf32>
    %209 = vector.shape_cast %206 : vector<8x16x128xf32> to vector<1x8x16x128xf32>
    tpu.vector_store %arg10[%c0_222, %c8_223, %c0_224, %c0_225], %209 {strides = array<i32>} : memref<1x16x16x128xf32, #tpu.memory_space<vmem>>, vector<1x8x16x128xf32>,
    return
  }
  func.func @transform_0(%arg0: i32) -> (i32, i32, i32, i32) {
    %c0_i32 = arith.constant 0 : i32
    %c0_i32_0 = arith.constant 0 : i32
    %c0_i32_1 = arith.constant 0 : i32
    %c0_i32_2 = arith.constant 0 : i32
    return %arg0, %c0_i32, %c0_i32_0, %c0_i32_1 : i32, i32, i32, i32
  }
  func.func @transform_1(%arg0: i32) -> (i32, i32) {
    %c0_i32 = arith.constant 0 : i32
    %c0_i32_0 = arith.constant 0 : i32
    %c0_i32_1 = arith.constant 0 : i32
    return %c0_i32, %c0_i32_0 : i32, i32
  }
  func.func @transform_2(%arg0: i32) -> (i32, i32) {
    %c0_i32 = arith.constant 0 : i32
    %c0_i32_0 = arith.constant 0 : i32
    %c0_i32_1 = arith.constant 0 : i32
    return %c0_i32, %c0_i32_0 : i32, i32
  }
  func.func @transform_3(%arg0: i32) -> (i32, i32, i32) {
    %c0_i32 = arith.constant 0 : i32
    %c0_i32_0 = arith.constant 0 : i32
    %c0_i32_1 = arith.constant 0 : i32
    %c0_i32_2 = arith.constant 0 : i32
    return %c0_i32, %c0_i32_0, %c0_i32_1 : i32, i32, i32
  }
  func.func @transform_4(%arg0: i32) -> (i32, i32) {
    %c0_i32 = arith.constant 0 : i32
    %c0_i32_0 = arith.constant 0 : i32
    %c0_i32_1 = arith.constant 0 : i32
    return %c0_i32, %c0_i32_0 : i32, i32
  }
  func.func @transform_5(%arg0: i32) -> (i32, i32) {
    %c0_i32 = arith.constant 0 : i32
    %c0_i32_0 = arith.constant 0 : i32
    %c0_i32_1 = arith.constant 0 : i32
    return %c0_i32, %c0_i32_0 : i32, i32
  }
  func.func @transform_6(%arg0: i32) -> (i32, i32, i32) {
    %c0_i32 = arith.constant 0 : i32
    %c0_i32_0 = arith.constant 0 : i32
    %c0_i32_1 = arith.constant 0 : i32
    %c0_i32_2 = arith.constant 0 : i32
    return %c0_i32, %c0_i32_0, %c0_i32_1 : i32, i32, i32
  }
  func.func @transform_7(%arg0: i32) -> (i32, i32) {
    %c0_i32 = arith.constant 0 : i32
    %c0_i32_0 = arith.constant 0 : i32
    %c0_i32_1 = arith.constant 0 : i32
    return %c0_i32, %c0_i32_0 : i32, i32
  }
  func.func @transform_8(%arg0: i32) -> (i32, i32) {
    %c0_i32 = arith.constant 0 : i32
    %c0_i32_0 = arith.constant 0 : i32
    %c0_i32_1 = arith.constant 0 : i32
    return %c0_i32, %c0_i32_0 : i32, i32
  }
  func.func @transform_9(%arg0: i32) -> (i32, i32, i32, i32) {
    %c0_i32 = arith.constant 0 : i32
    %c0_i32_0 = arith.constant 0 : i32
    %c0_i32_1 = arith.constant 0 : i32
    %c0_i32_2 = arith.constant 0 : i32
    return %arg0, %c0_i32, %c0_i32_0, %c0_i32_1 : i32, i32, i32, i32
  }
}

</mosaic_0001>

<bundles_post_ra>
// kernel: wide_basic_forward.1
= control target key start
LH: loop header
LB: loop body
LE: loop exit
PB: predicated region body
PF: predicated region fallthrough
CT: control target
= control target key end

     0   :  { %s15595_s30 = smov 0   ;;  %s21149_s0 = inlined_call_operand.vmem [shape: f32[2,16,16,128], index: 0, kind: input, shape index: {}]   ;;  %s21150_s1 = inlined_call_operand.vmem [shape: f32[1,128], index: 1, kind: input, shape index: {}]   ;;  %s21151_s2 = inlined_call_operand.vmem [shape: f32[1,128], index: 2, kind: input, shape index: {}]   ;;  %s21152_s3 = inlined_call_operand.vmem [shape: bf16[3,384,128], index: 3, kind: input, shape index: {}]   ;;  %s21153_s4 = inlined_call_operand.vmem [shape: f32[1,128], index: 4, kind: input, shape index: {}]   ;;  %s21154_s5 = inlined_call_operand.vmem [shape: f32[1,128], index: 5, kind: input, shape index: {}]   ;;  %s21155_s6 = inlined_call_operand.vmem [shape: bf16[3,384,128], index: 6, kind: input, shape index: {}]   ;;  %s21156_s7 = inlined_call_operand.vmem [shape: f32[1,128], index: 7, kind: input, shape index: {}]   ;;  %s21157_s8 = inlined_call_operand.vmem [shape: bf16[128,128], index: 8, kind: input, shape index: {}]   ;;  %s21158_s9 = inlined_call_operand.vmem [shape: f32[2,16,16,128], index: 9, kind: output, shape index: {}]  }
   0x1 LB: > { %s11987_s10 = sadd.s32 4294967295, %s15542_s30   ;;  %p11991_p0 = scmp.ge.s32.totalorder %s15542_s30, 1  ;;  %s15542_s30 = sphi %s15595_s30, %s19_s30  }
   0x2   : > { %p287_p1 = scmp.lt.s32.totalorder %s15542_s30, 3 }
   0x4   : > { %p288_p2 = pnand %p11991_p0, %p287_p1 }
   0x6   : > { %291 = sbr.rel (%p288_p2) target bundleno = 1178 (0x49a), region = 56 }
   0xd   : > { %v15057_v0 = vld [vmem:[%s21152_s3 + $0x40] sm:$0xff]   ;;  %v15544_v2 = vmov 0   ;;  %v15059_v3 = vld [vmem:[%s21152_s3 + $0x48] sm:$0xff]   ;;  %v15063_v7 = vld [vmem:[%s21152_s3 + $0x50] sm:$0xff]   ;;  %p323_p3 = scmp.lt.s32.totalorder %s11987_s10, 1  ;;  %vm484_vm3 = vcmask 1040384  }
   0xe   : > { %v15058_v1 = vld [vmem:[%s21152_s3] sm:$0xff]   ;;  %476 = vst [vmem:[#allocation2] sm:$0xf] %v15544_v2  ;;  %477 = vst [vmem:[#allocation2 + $0x4] sm:$0xf] %v15544_v2  ;;  %13304 = vmatprep.subr.bf16.mxu1 %v15057_v0  ;;  %v15060_v4 = vld [vmem:[%s21152_s3 + $0x8] sm:$0xff]  }
   0xf   : > { %478 = vst [vmem:[#allocation2 + $0x8] sm:$0x1] %v15544_v2  ;;  %480 = vst [vmem:[#allocation2 + $0xcc] sm:$0xf] %v15544_v2  ;;  %13305 = vmatpush3.bf16.msra.mxu1 %v15058_v1  ;;  %v15061_v5 = vld [vmem:[%s21152_s3 + $0x100] sm:$0xff]   ;;  %v15064_v8 = vld [vmem:[%s21152_s3 + $0x10] sm:$0xff]  }
  0x10   : > { %481 = vst [vmem:[#allocation2 + $0xd0] sm:$0xf] %v15544_v2  ;;  %482 = vst [vmem:[#allocation2 + $0xd4] sm:$0x1] %v15544_v2  ;;  %13306 = vmatprep.subr.bf16.mxu1 %v15059_v3  ;;  %v15062_v6 = vld [vmem:[%s21152_s3 + $0xc0] sm:$0xff]   ;;  %13224 = vmatprep.subr.bf16.mxu0 %v15061_v5  ;;  %v15065_v9 = vld [vmem:[%s21152_s3 + $0x108] sm:$0xff]  }
  0x11   : > { %1117 = vst [vmem:[#allocation3] sm:$0xf] %v15544_v2  ;;  %1118 = vst [vmem:[#allocation3 + $0x4] sm:$0xf] %v15544_v2  ;;  %13225 = vmatpush3.bf16.msra.mxu0 %v15062_v6  ;;  %v15066_v10 = vld [vmem:[%s21152_s3 + $0xc8] sm:$0xff]   ;;  %v15067_v11 = vld [vmem:[%s21152_s3 + $0x58] sm:$0xff]  }
  0x12   : > { %1119 = vst [vmem:[#allocation3 + $0x8] sm:$0x1] %v15544_v2  ;;  %1121 = vst [vmem:[#allocation3 + $0xcc] sm:$0xf] %v15544_v2  ;;  %13226 = vmatprep.subr.bf16.mxu0 %v15065_v9  ;;  %v15068_v12 = vld [vmem:[%s21152_s3 + $0x18] sm:$0xff]   ;;  %v15069_v13 = vld [vmem:[%s21152_s3 + $0x110] sm:$0xff]  }
  0x13   : > { %1122 = vst [vmem:[#allocation3 + $0xd0] sm:$0xf] %v15544_v2  ;;  %1123 = vst [vmem:[#allocation3 + $0xd4] sm:$0x1] %v15544_v2  ;;  %13307 = vmatpush3.bf16.msra.mxu1 %v15060_v4  ;;  %v15070_v14 = vld [vmem:[%s21152_s3 + $0xd0] sm:$0xff]   ;;  %v15071_v15 = vld [vmem:[%s21152_s3 + $0x60] sm:$0xff]  }
  0x14   : > { %13308 = vmatprep.subr.bf16.mxu1 %v15063_v7  ;;  %v15072_v16 = vld [vmem:[%s21152_s3 + $0x20] sm:$0xff]   ;;  %v15073_v17 = vld [vmem:[%s21152_s3 + $0x118] sm:$0xff]   ;;  %v15075_v19 = vld [vmem:[%s21152_s3 + $0x68] sm:$0xff]   ;;  %s21476_s10 = smov (!%p323_p3, %s11987_s10), 1  ;;  %vm1245_vm0 = vsmask.f32 3328 }
  0x15   : > { %13227 = vmatpush3.bf16.msra.mxu0 %v15066_v10  ;;  %v15074_v18 = vld [vmem:[%s21152_s3 + $0xd8] sm:$0xff]   ;;  %v15076_v20 = vld [vmem:[%s21152_s3 + $0x28] sm:$0xff]   ;;  %v15077_v21 = vld [vmem:[%s21152_s3 + $0x120] sm:$0xff]   ;;  %s13158_s12 = sshll.u32 %s21476_s10, 8  ;;  %vm1246_vm1 = vsmask.f32 7440 }
  0x16   : > { %13228 = vmatprep.subr.bf16.mxu0 %v15069_v13  ;;  %v15078_v22 = vld [vmem:[%s21152_s3 + $0xe0] sm:$0xff]   ;;  %v15079_v23 = vld [vmem:[%s21152_s3 + $0x70] sm:$0xff]   ;;  %v15081_v25 = vld [vmem:[%s21152_s3 + $0x128] sm:$0xff]   ;;  %s15728_s21 = scalar_lea.vmem %s21149_s0, %s13158_s12  ;;  %vm1003_vm4 = vcmask 1043456   ;;  %vm485_vm5 = vsmask.f32 256  ;;  %s21017_s28 = scalar_lea.vmem %s21158_s9, %s13158_s12 }
  0x17   : > { %13309 = vmatpush3.bf16.msra.mxu1 %v15064_v8  ;;  %v15080_v24 = vld [vmem:[%s21152_s3 + $0x30] sm:$0xff]   ;;  %v15082_v26 = vld [vmem:[%s21152_s3 + $0xe8] sm:$0xff]   ;;  %v15083_v27 = vld [vmem:[%s21152_s3 + $0x78] sm:$0xff]   ;;  %v21198_v61 = vmov 0  ;;  %vm535_vm7 = vsmask.f32 7938 }
  0x18   : > { %13310 = vmatprep.subr.bf16.mxu1 %v15067_v11  ;;  %v15084_v28 = vld [vmem:[%s21152_s3 + $0x38] sm:$0xff]   ;;  %v15085_v29 = vld [vmem:[%s21152_s3 + $0x130] sm:$0xff]   ;;  %v15697_v30 = vld [vmem:[#allocation2] sm:$0xf]  ;;  %v21201_v4 = vmov 0  ;;  %vm1472_vm12 = vcmask 1042432  }
  0x19   : > { %13229 = vmatpush3.bf16.msra.mxu0 %v15070_v14  ;;  %v15699_v31 = vld [vmem:[#allocation2 + $0x4] sm:$0xf]  ;;  %v15701_v32 = vld [vmem:[#allocation2 + $0x8] sm:$0x1]  ;;  %v1249_v33 = vshrl.u32 %v15697_v30, 16  ;;  %v1252_v34 = vshll.u32 %v15697_v30, 16  ;;  %vm15716_vm2 = vmor %vm1245_vm0, %vm1246_vm1 }
  0x1a   : > { %13230 = vmatprep.subr.bf16.mxu0 %v15073_v17  ;;  %v1258_v35 = vshll.u32 %v15699_v31, 16  ;;  %v1262_v36 = vshrl.u32 %v15699_v31, 16  ;;  %v1268_v37 = vshll.u32 %v15701_v32, 16  ;;  %v15086_v40 = vld [vmem:[%s21152_s3 + $0xf0] sm:$0xff]   ;;  %v15714_v41 = vld [vmem:[%s21152_s3 + $0x80] sm:$0xff]   ;;  %v15089_v45 = vld [vmem:[%s21152_s3 + $0x138] sm:$0xff]   ;;  %v12038_v60 = vcombine.low %v15697_v30, %v15699_v31 }
  0x1b   : > { %13311 = vmatpush3.bf16.msra.mxu1 %v15068_v12  ;;  %v1251_v38 = vrot.slane %v1249_v33, 4  ;;  %v1254_v39 = vrot.slane %v1252_v34, 5  ;;  %v15090_v49 = vld [vmem:[%s21152_s3 + $0xf8] sm:$0xff]   ;;  %v1480_v51 = vrot.slane %v15701_v32, 5  ;;  %v334_v52 = vld [vmem:[%s15728_s21] sm:$0xff]  ;;  %v335_v53 = vld [vmem:[%s15728_s21 + $0x8] sm:$0xff] }
  0x1c   : > { %13312 = vmatprep.subr.bf16.mxu1 %v15071_v15  ;;  %v1260_v43 = vrot.slane %v1258_v35, 5  ;;  %v1264_v44 = vrot.slane %v1262_v36, 4  ;;  %v1270_v48 = vrot.slane %v1268_v37, 5  ;;  %v15740_v54 = vld [vmem:[%s21150_s1] ss:$0 sm:$0xff]  ;;  %vm15755_vm6 = vmand %vm484_vm3, %vm485_vm5  ;;  %v15093_v7 = vld [vmem:[%s21152_s3 + $0x88] sm:$0xff]  }
  0x1d   : > { %13231 = vmatpush3.bf16.msra.mxu0 %v15074_v18  ;;  %v1255_v46 = vor.u32 %v1254_v39, %v1251_v38  ;;  %v373_v56 = vmul.f32 %v15740_v54, %v334_v52  ;;  %v374_v57 = vmul.f32 %v15740_v54, %v335_v53  ;;  %v15747_v58 = vld [vmem:[%s21151_s2] ss:$0 sm:$0xff]  ;;  %v21199_v61 = vsel %vm15755_vm6, 4294967295, %v21198_v61  ;;  %v487_v62 = vld [vmem:[#allocation2 + $0xc] sm:$0x1]  ;;  %vm15767_vm8 = vmand %vm484_vm3, %vm535_vm7 }
  0x1e   : > { %13232 = vmatprep.subr.bf16.mxu0 %v15077_v21  ;;  %v1265_v47 = vor.u32 %v1264_v44, %v1260_v43  ;;  %21200 = vst [vmem:[#allocation4_spill] sm:$0xff] %v21199_v61  ;;  %v537_v63 = vld [vmem:[#allocation2 + $0x14] sm:$0x1]  ;;  %v488_v3 = vsel %vm15755_vm6, 0, %v487_v62  ;;  %v21202_v4 = vsel %vm15767_vm8, 4294967295, %v21201_v4  ;;  %v337_v9 = vld [vmem:[%s15728_s21 + $0x18] sm:$0xff]  ;;  %vm15803_vm10 = vmand %vm1003_vm4, %vm535_vm7 }
  0x1f   : > { %13313 = vmatpush3.bf16.msra.mxu1 %v15072_v16  ;;  %v1256_v50 = vrot.slane %v1255_v46, 4  ;;  %v412_v1 = vadd.f32 %v15747_v58, %v373_v56  ;;  %v413_v2 = vadd.f32 %v15747_v58, %v374_v57  ;;  %21203 = vst [vmem:[#allocation5_spill] sm:$0xff] %v21202_v4  ;;  %489 = vst [vmem:[#allocation2 + $0xc] sm:$0x1] %v488_v3  ;;  %v538_v6 = vsel %vm15767_vm8, 0, %v537_v63  ;;  %v336_v8 = vld [vmem:[%s15728_s21 + $0x10] sm:$0xff] }
  0x20   : > { %13314 = vmatprep.subr.bf16.mxu1 %v15075_v19  ;;  %v1266_v55 = vrot.slane %v1265_v47, 4  ;;  %vm681_vm9 = vsmask.f32 4368  ;;  %539 = vst [vmem:[#allocation2 + $0x14] sm:$0x1] %v538_v6  ;;  %v375_v12 = vmul.f32 %v15740_v54, %v336_v8  ;;  %v376_v13 = vmul.f32 %v15740_v54, %v337_v9  ;;  %v15799_v38 = vld [vmem:[%s21152_s3 + $0x140] sm:$0xff]  }
  0x21   : > { %13233 = vmatpush3.bf16.msra.mxu0 %v15078_v22  ;;  %v1261_v59 = vsel %vm15716_vm2, %v1256_v50, %v1260_v43  ;;  %v444_v10 = vmax.f32 %v412_v1, 0.0  ;;  %v445_v11 = vmax.f32 %v413_v2, 0.0  ;;  %v490_v14 = vld [vmem:[#allocation2 + $0x18] sm:$0x1]  ;;  %v540_v15 = vld [vmem:[#allocation2 + $0x20] sm:$0x1]  ;;  %vm15813_vm11 = vmor %vm485_vm5, %vm681_vm9 }
  0x22   : > { %13234 = vmatprep.subr.bf16.mxu0 %v15081_v25  ;;  %v1271_v0 = vsel %vm15716_vm2, %v1266_v55, %v1270_v48  ;;  %v491_v16 = vsel %vm15755_vm6, 0, %v490_v14  ;;  %v541_v17 = vsel %vm15767_vm8, 0, %v540_v15  ;;  %v415_v21 = vadd.f32 %v15747_v58, %v376_v13  ;;  %v15096_v22 = vld [vmem:[%s21152_s3 + $0x90] sm:$0xff]   ;;  %v341_v62 = vld [vmem:[%s15728_s21 + $0x38] sm:$0xff] }
  0x23   : > { %13315 = vmatpush3.bf16.msra.mxu1 %v15076_v20  ;;  %v12046_v5 = vcombine.low %v1261_v59, %v1271_v0  ;;  %v13160_v18 = vpack.c.bf16 %v444_v10, %v444_v10  ;;  %v13161_v19 = vpack.c.bf16 %v445_v11, %v445_v11  ;;  %v414_v20 = vadd.f32 %v15747_v58, %v375_v12  ;;  %v15099_v59 = vld [vmem:[%s21152_s3 + $0x98] sm:$0xff]   ;;  %v496_v3 = vld [vmem:[#allocation2 + $0x30] sm:$0x1] }
  0x24   : > { %13316 = vmatprep.subr.bf16.mxu1 %v15079_v23  ;;  %492 = vst [vmem:[#allocation2 + $0x18] sm:$0x1] %v491_v16  ;;  %542 = vst [vmem:[#allocation2 + $0x20] sm:$0x1] %v541_v17  ;;  %v338_v23 = vld [vmem:[%s15728_s21 + $0x20] sm:$0xff]  ;;  %v447_v35 = vmax.f32 %v415_v21, 0.0  ;;  %v380_v17 = vmul.f32 %v15740_v54, %v341_v62 }
  0x25   : > { %13235 = vmatpush3.bf16.msra.mxu0 %v15082_v26  ;;  %2654 = vmatprep.mubr.bf16.mxu1 %v12046_v5  ;;  %v377_v25 = vmul.f32 %v15740_v54, %v338_v23  ;;  %v687_v30 = vshll.u32 %v13160_v18, 16  ;;  %v692_v31 = vshrl.u32 %v13161_v19, 16  ;;  %v695_v33 = vshll.u32 %v13161_v19, 16  ;;  %v15103_v19 = vld [vmem:[%s21152_s3 + $0xa0] sm:$0xff]  }
  0x26   : > { %13236 = vmatprep.subr.bf16.mxu0 %v15085_v29  ;;  %v684_v29 = vshrl.u32 %v13160_v18, 16  ;;  %v446_v34 = vmax.f32 %v414_v20, 0.0  ;;  %v1005_v43 = vld [vmem:[#allocation2 + $0xc] sm:$0xf]  ;;  %v21207_v46 = vmov 0  ;;  %v497_v18 = vsel %vm15755_vm6, 0, %v496_v3 }
  0x27   : > { %13317 = vmatpush3.bf16.msra.mxu1 %v15080_v24  ;;  %v339_v24 = vld [vmem:[%s15728_s21 + $0x28] sm:$0xff]  ;;  %v416_v36 = vadd.f32 %v15747_v58, %v377_v25  ;;  %v21208_v46 = vsel %vm15813_vm11, 4294967295, %v21207_v46  ;;  %v1009_v47 = vld [vmem:[#allocation2 + $0x14] sm:$0x1]  ;;  %498 = vst [vmem:[#allocation2 + $0x30] sm:$0x1] %v497_v18 }
  0x28   : > { %13318 = vmatprep.subr.bf16.mxu1 %v15083_v27  ;;  %v378_v26 = vmul.f32 %v15740_v54, %v339_v24  ;;  %v493_v27 = vld [vmem:[#allocation2 + $0x24] sm:$0x1]  ;;  %v686_v39 = vrot.slane %v684_v29, 7  ;;  %21209 = vst [vmem:[#allocation7_spill] sm:$0xff] %v21208_v46  ;;  %v13162_v48 = vpack.c.bf16 %v446_v34, %v446_v34  ;;  %v546_v24 = vld [vmem:[#allocation2 + $0x38] sm:$0x1] }
  0x29   : > { %13237 = vmatpush3.bf16.msra.mxu0 %v15086_v40  ;;  %v694_v40 = vrot.slane %v692_v31, 7  ;;  %v494_v44 = vsel %vm15755_vm6, 0, %v493_v27  ;;  %v448_v50 = vmax.f32 %v416_v36, 0.0  ;;  %v342_v29 = vld [vmem:[%s15728_s21 + $0x40] sm:$0xff]  ;;  %v15846_v36 = vadd.f32 %v15747_v58, %v380_v17 }
  0x2a   : > { %13238 = vmatprep.subr.bf16.mxu0 %v15089_v45  ;;  %v417_v37 = vadd.f32 %v15747_v58, %v378_v26  ;;  %495 = vst [vmem:[#allocation2 + $0x24] sm:$0x1] %v494_v44  ;;  %v689_v53 = vor.u32 %v687_v30, %v686_v39  ;;  %v690_v55 = vrot.slane %v686_v39, 4  ;;  %v701_v63 = vshrl.u32 %v13162_v48, 16  ;;  %v343_v30 = vld [vmem:[%s15728_s21 + $0x48] sm:$0xff] }
  0x2b   : > { %13319 = vmatpush3.bf16.msra.mxu1 %v15084_v28  ;;  %v543_v28 = vld [vmem:[#allocation2 + $0x2c] sm:$0x1]  ;;  %v697_v56 = vor.u32 %v695_v33, %v694_v40  ;;  %v699_v57 = vrot.slane %v694_v40, 4  ;;  %v704_v0 = vshll.u32 %v13162_v48, 16  ;;  %v1012_v8 = vld [vmem:[#allocation2 + $0x18] sm:$0xf]  ;;  %v13164_v9 = vpack.c.bf16 %v448_v50, %v448_v50 }
  0x2c   : > { %14248 = vmatprep.subr.bf16.mxu1 %v15714_v41  ;;  %v544_v45 = vsel %vm15767_vm8, 0, %v543_v28  ;;  %v449_v52 = vmax.f32 %v417_v37, 0.0  ;;  %v1006_v6 = vsel %vm15803_vm10, %v689_v53, %v1005_v43  ;;  %v703_v10 = vrot.slane %v701_v63, 7  ;;  %v1016_v12 = vld [vmem:[#allocation2 + $0x20] sm:$0x1]  ;;  %v15107_v37 = vld [vmem:[%s21152_s3 + $0xa8] sm:$0xff]  }
  0x2d   : > { %13239 = vmatpush3.bf16.msra.mxu0 %v15090_v49  ;;  %v13163_v49 = vpack.c.bf16 %v447_v35, %v447_v35  ;;  %545 = vst [vmem:[#allocation2 + $0x2c] sm:$0x1] %v544_v45  ;;  %v698_v5 = vsel %vm15813_vm11, %v690_v55, %v697_v56  ;;  %1007 = vst [vmem:[#allocation2 + $0xc] sm:$0xf] %v1006_v6  ;;  %v718_v15 = vshrl.u32 %v13164_v9, 16  ;;  %v721_v16 = vshll.u32 %v13164_v9, 16 }
  0x2e   : > { %2655 = vmatmul.mubr.bf16.vlgmr.msra.gmra.mrb[0].mxu1 %v12038_v60  ;;  %14216 = vmatprep.subr.bf16.mxu0 %v15799_v38  ;;  %v340_v60 = vld [vmem:[%s15728_s21 + $0x30] sm:$0xff]  ;;  %1008 = vst [vmem:[#allocation2 + $0x10] sm:$0xf] %v698_v5  ;;  %v13165_v13 = vpack.c.bf16 %v449_v52, %v449_v52  ;;  %v706_v20 = vor.u32 %v704_v0, %v703_v10  ;;  %v707_v21 = vrot.slane %v703_v10, 4  ;;  %v547_v48 = vsel %vm15767_vm8, 0, %v546_v24 }
  0x2f   : > { %14249 = vmatpush3.bf16.msra.mxu1 %v15714_v41  ;;  %v21204_v41 = vmov 0  ;;  %v709_v1 = vshrl.u32 %v13163_v49, 16  ;;  %v712_v2 = vshll.u32 %v13163_v49, 16  ;;  %v379_v14 = vmul.f32 %v15740_v54, %v340_v60  ;;  %v344_v45 = vld [vmem:[%s15728_s21 + $0x50] sm:$0xff]  ;;  %548 = vst [vmem:[#allocation2 + $0x38] sm:$0x1] %v547_v48 }
  0x30   : > { %14250 = vmatprep.subr.bf16.mxu1 %v15093_v7  ;;  %v21205_v41 = vsel %vm15803_vm10, 4294967295, %v21204_v41  ;;  %v720_v25 = vrot.slane %v718_v15, 7  ;;  %v726_v26 = vshrl.u32 %v13165_v13, 16  ;;  %v729_v27 = vshll.u32 %v13165_v13, 16 }
  0x31   : > { %21206 = vst [vmem:[#allocation6_spill] sm:$0xff] %v21205_v41  ;;  %v711_v11 = vrot.slane %v709_v1, 7  ;;  %v418_v28 = vadd.f32 %v15747_v58, %v379_v14  ;;  %v1013_v33 = vsel %vm15803_vm10, %v706_v20, %v1012_v8  ;;  %v1019_v35 = vld [vmem:[#allocation2 + $0x24] sm:$0xf]  ;;  %v15858_v49 = vmul.f32 %v15740_v54, %v342_v29 }
  0x32   : > { %1014 = vst [vmem:[#allocation2 + $0x18] sm:$0xf] %v1013_v33  ;;  %v723_v39 = vor.u32 %v721_v16, %v720_v25  ;;  %v724_v40 = vrot.slane %v720_v25, 4  ;;  %v15851_v43 = vrot.slane %v726_v26, 7  ;;  %v15861_v50 = vmul.f32 %v15740_v54, %v343_v30 }
  0x33   : > { %14251 = vmatpush3.bf16.msra.mxu1 %v15093_v7  ;;  %v1010_v7 = vsel %vm15755_vm6, %v699_v57, %v1009_v47  ;;  %v716_v23 = vrot.slane %v711_v11, 4  ;;  %v450_v44 = vmax.f32 %v418_v28, 0.0  ;;  %v451_v47 = vmax.f32 %v15846_v36, 0.0 }
  0x34   : > { %14252 = vmatprep.subr.bf16.mxu1 %v15096_v22  ;;  %1011 = vst [vmem:[#allocation2 + $0x14] sm:$0x1] %v1010_v7  ;;  %v15863_v52 = vld [vmem:[#allocation2 + $0xc] sm:$0xf]  ;;  %v731_v56 = vor.u32 %v729_v27, %v15851_v43  ;;  %v1020_v57 = vsel %vm15803_vm10, %v723_v39, %v1019_v35  ;;  %v15875_v60 = vmul.f32 %v15740_v54, %v344_v45  ;;  %vm1473_vm13 = vcmask 1046532  }
  0x35   : > { %v1017_v34 = vsel %vm15755_vm6, %v716_v23, %v1016_v12  ;;  %v15865_v53 = vld [vmem:[#allocation2 + $0x10] sm:$0xf]  ;;  %v1708_v62 = vshrl.u32 %v15863_v52, 16  ;;  %v1711_v63 = vshll.u32 %v15863_v52, 16  ;;  %1021 = vst [vmem:[#allocation2 + $0x24] sm:$0xf] %v1020_v57  ;;  %v421_v36 = vadd.f32 %v15747_v58, %v15861_v50  ;;  %vm16202_vm14 = vmor %vm1472_vm12, %vm1473_vm13 }
  0x36   : > { %1018 = vst [vmem:[#allocation2 + $0x20] sm:$0x1] %v1017_v34  ;;  %v1717_v0 = vshll.u32 %v15865_v53, 16  ;;  %v1721_v1 = vshrl.u32 %v15865_v53, 16  ;;  %v12070_v6 = vcombine.low %v15863_v52, %v15865_v53  ;;  %v15887_v7 = vld [vmem:[#allocation2 + $0x10] sm:$0xf]  ;;  %v732_v9 = vsel %vm15813_vm11, %v724_v40, %v731_v56 }
  0x37   : > { %14253 = vmatpush3.bf16.msra.mxu1 %v15096_v22  ;;  %v714_v22 = vor.u32 %v712_v2, %v711_v11  ;;  %v15881_v2 = vld [vmem:[#allocation2 + $0xc] sm:$0xf]  ;;  %v1710_v10 = vrot.slane %v1708_v62, 4  ;;  %v1713_v11 = vrot.slane %v1711_v63, 5  ;;  %1022 = vst [vmem:[#allocation2 + $0x28] sm:$0xf] %v732_v9 }
  0x38   : > { %14254 = vmatprep.subr.bf16.mxu1 %v15099_v59  ;;  %v1719_v12 = vrot.slane %v1717_v0, 5  ;;  %v1723_v13 = vrot.slane %v1721_v1, 4  ;;  %v1273_v15 = vshrl.u32 %v15881_v2, 16  ;;  %v1276_v16 = vshll.u32 %v15881_v2, 16  ;;  %v15104_v52 = vld [vmem:[%s21152_s3 + $0x148] sm:$0xff]   ;;  %v15111_v0 = vld [vmem:[%s21152_s3 + $0xb0] sm:$0xff]  }
  0x39   : > { %v715_v31 = vsel %vm15813_vm11, %v707_v21, %v714_v22  ;;  %v1282_v17 = vshll.u32 %v15887_v7, 16  ;;  %v1714_v18 = vor.u32 %v1713_v11, %v1710_v10  ;;  %v1286_v20 = vshrl.u32 %v15887_v7, 16  ;;  %v15898_v22 = vld [vmem:[#allocation2 + $0x18] sm:$0xf] }
  0x3a   : > { %1015 = vst [vmem:[#allocation2 + $0x1c] sm:$0xf] %v715_v31  ;;  %v1275_v23 = vrot.slane %v1273_v15, 4  ;;  %v1278_v24 = vrot.slane %v1276_v16, 5  ;;  %v12039_v34 = vcombine.low %v15881_v2, %v15887_v7  ;;  %v1732_v39 = vshrl.u32 %v15898_v22, 16 }
  0x3b   : > { %14255 = vmatpush3.bf16.msra.mxu1 %v15099_v59  ;;  %v15867_v55 = vld [vmem:[#allocation2 + $0x14] sm:$0x1]  ;;  %v15872_v59 = vpack.c.bf16 %v450_v44, %v450_v44  ;;  %v1284_v25 = vrot.slane %v1282_v17, 5  ;;  %v1715_v28 = vrot.slane %v1714_v18, 4  ;;  %v1288_v30 = vrot.slane %v1286_v20, 4 }
  0x3c   : > { %14256 = vmatprep.subr.bf16.mxu1 %v15103_v19  ;;  %v1727_v3 = vshll.u32 %v15867_v55, 16  ;;  %v15889_v8 = vld [vmem:[#allocation2 + $0x14] sm:$0x1]  ;;  %v1279_v33 = vor.u32 %v1278_v24, %v1275_v23  ;;  %v1734_v57 = vrot.slane %v1732_v39, 4  ;;  %v15917_v63 = vld [vmem:[#allocation2 + $0x18] sm:$0xf] }
  0x3d   : > { %v1292_v21 = vshll.u32 %v15889_v8, 16  ;;  %v15905_v35 = vld [vmem:[#allocation2 + $0x20] sm:$0x1]  ;;  %v1720_v40 = vsel %vm15716_vm2, %v1715_v28, %v1719_v12  ;;  %v1289_v45 = vor.u32 %v1288_v30, %v1284_v25  ;;  %v1297_v18 = vshrl.u32 %v15917_v63, 16  ;;  %v1023_v28 = vld [vmem:[#allocation2 + $0x2c] sm:$0x1] }
  0x3e   : > { %v1729_v14 = vrot.slane %v1727_v3, 5  ;;  %v1280_v56 = vrot.slane %v1279_v33, 4  ;;  %v1751_v7 = vshll.u32 %v15905_v35, 16  ;;  %v15936_v20 = vld [vmem:[#allocation2 + $0x28] sm:$0xf]  ;;  %v1300_v24 = vshll.u32 %v15917_v63, 16 }
  0x3f   : > { %14257 = vmatpush3.bf16.msra.mxu1 %v15103_v19  ;;  %v1724_v19 = vor.u32 %v1723_v13, %v1719_v12  ;;  %v1294_v31 = vrot.slane %v1292_v21, 5  ;;  %v1290_v1 = vrot.slane %v1289_v45, 4  ;;  %v15108_v33 = vld [vmem:[%s21152_s3 + $0x150] sm:$0xff]  }
  0x40   : > { %14258 = vmatprep.subr.bf16.mxu1 %v15107_v37  ;;  %v1285_v10 = vsel %vm15716_vm2, %v1280_v56, %v1284_v25  ;;  %v1753_v17 = vrot.slane %v1751_v7, 5  ;;  %v15950_v56 = vld [vmem:[#allocation2 + $0x24] sm:$0xf]  ;;  %v1769_v7 = vshrl.u32 %v15936_v20, 16 }
  0x41   : > { %v15901_v27 = vld [vmem:[#allocation2 + $0x1c] sm:$0xf]  ;;  %v1725_v29 = vrot.slane %v1724_v19, 4  ;;  %v1295_v15 = vsel %vm15716_vm2, %v1290_v1, %v1294_v31  ;;  %v15934_v19 = vld [vmem:[#allocation2 + $0x24] sm:$0xf]  ;;  %v1765_v1 = vshll.u32 %v15936_v20, 16 }
  0x42   : > { %v1741_v48 = vshll.u32 %v15901_v27, 16  ;;  %v1745_v3 = vshrl.u32 %v15901_v27, 16  ;;  %v15924_v9 = vld [vmem:[#allocation2 + $0x1c] sm:$0xf]  ;;  %v12071_v13 = vcombine.low %v15898_v22, %v15901_v27  ;;  %v12047_v21 = vcombine.low %v1285_v10, %v1295_v15 }
  0x43   : > { %14259 = vmatpush3.bf16.msra.mxu1 %v15107_v37  ;;  %v1735_v37 = vshll.u32 %v15898_v22, 16  ;;  %v1730_v44 = vsel %vm15716_vm2, %v1725_v29, %v1729_v14  ;;  %v1239_v14 = vld [vmem:[#allocation2 + $0x20] sm:$0x1]  ;;  %v1306_v25 = vshll.u32 %v15924_v9, 16  ;;  %v1299_v29 = vrot.slane %v1297_v18, 4 }
  0x44   : > { %v12078_v53 = vcombine.low %v1720_v40, %v1730_v44  ;;  %v1743_v2 = vrot.slane %v1741_v48, 5  ;;  %14260 = vmatprep.subr.bf16.mxu1 %v15111_v0  ;;  %v1747_v16 = vrot.slane %v1745_v3, 4  ;;  %v1310_v30 = vshrl.u32 %v15924_v9, 16  ;;  %2662 = vmatprep.mubr.bf16.mxu1 %v12047_v21 }
  0x45   : > { %v1737_v62 = vrot.slane %v1735_v37, 5  ;;  %v1316_v31 = vshll.u32 %v1239_v14, 16  ;;  %v1302_v37 = vrot.slane %v1300_v24, 5  ;;  %v1308_v40 = vrot.slane %v1306_v25, 5  ;;  %2663 = vmatmul.mubr.bf16.gmra.mrb[4].mxu1 %v12039_v34  ;;  %v15116_v34 = vld [vmem:[%s21152_s3 + $0xb8] sm:$0xff]  }
  0x46   : > { %2316 = vmatprep.mubr.bf16.mxu0 %v12078_v53  ;;  %v12040_v44 = vcombine.low %v15917_v63, %v15924_v9  ;;  %v1312_v45 = vrot.slane %v1310_v30, 4  ;;  %v733_v53 = vrot.slane %v15851_v43, 4  ;;  %v15112_v9 = vld [vmem:[%s21152_s3 + $0x158] sm:$0xff]   ;;  %v12072_v18 = vcombine.low %v15934_v19, %v15936_v20 }
  0x47   : > { %v1738_v11 = vor.u32 %v1737_v62, %v1734_v57  ;;  %2317 = vmatmul.mubr.bf16.vlgmr.msra.gmra.mrb[0].mxu0 %v12070_v6  ;;  %14261 = vmatpush3.bf16.msra.mxu1 %v15111_v0  ;;  %v1748_v6 = vor.u32 %v1747_v16, %v1743_v2  ;;  %v1318_v48 = vrot.slane %v1316_v31, 5  ;;  %v1303_v57 = vor.u32 %v1302_v37, %v1299_v29  ;;  %v15114_v31 = vld [vmem:[%s21152_s3 + $0x160] sm:$0xff]  }
  0x48   : > { %14217 = vmatpush3.bf16.msra.mxu0 %v15799_v38  ;;  %v1756_v62 = vshrl.u32 %v15934_v19, 16  ;;  %v1759_v0 = vshll.u32 %v15934_v19, 16  ;;  %v1313_v43 = vor.u32 %v1312_v45, %v1308_v40  ;;  %v1024_v3 = vsel %vm15755_vm6, %v733_v53, %v1023_v28  ;;  %14262 = vmatprep.subr.bf16.mxu1 %v15116_v34  ;;  %v15992_v45 = vld [vmem:[%s21152_s3 + $0x200] sm:$0xff]  }
  0x49   : > { %v1739_v23 = vrot.slane %v1738_v11, 4  ;;  %14218 = vmatprep.subr.bf16.mxu0 %v15104_v52  ;;  %v1749_v38 = vrot.slane %v1748_v6, 4  ;;  %1025 = vst [vmem:[#allocation2 + $0x2c] sm:$0x1] %v1024_v3  ;;  %v15968_v16 = vrot.slane %v1765_v1, 5  ;;  %v1321_v24 = vshrl.u32 %v15950_v56, 16 }
  0x4a   : > { %v1758_v11 = vrot.slane %v1756_v62, 4  ;;  %v1761_v14 = vrot.slane %v1759_v0, 5  ;;  %v1314_v15 = vrot.slane %v1313_v43, 4  ;;  %v1324_v25 = vshll.u32 %v15950_v56, 16  ;;  %v499_v0 = vld [vmem:[#allocation2 + $0x3c] sm:$0x1] }
  0x4b   : > { %v1744_v39 = vsel %vm15716_vm2, %v1739_v23, %v1743_v2  ;;  %v15955_v2 = vld [vmem:[#allocation2 + $0x28] sm:$0xf]  ;;  %v1754_v63 = vsel %vm15716_vm2, %v1749_v38, %v1753_v17  ;;  %v1771_v17 = vrot.slane %v1769_v7, 4  ;;  %14263 = vmatpush3.bf16.msra.mxu1 %v15116_v34  ;;  %v1323_v37 = vrot.slane %v1321_v24, 4  ;;  %v1026_v3 = vld [vmem:[#allocation2 + $0x30] sm:$0xf] }
  0x4c   : > { %14219 = vmatpush3.bf16.msra.mxu0 %v15104_v52  ;;  %v12079_v10 = vcombine.low %v1744_v39, %v1754_v63  ;;  %v1304_v52 = vrot.slane %v1303_v57, 4  ;;  %v1762_v23 = vor.u32 %v1761_v14, %v1758_v11  ;;  %v1319_v28 = vsel %vm15716_vm2, %v1314_v15, %v1318_v48  ;;  %14280 = vmatprep.subr.bf16.mxu1 %v15992_v45  ;;  %v1030_v24 = vld [vmem:[#allocation2 + $0x38] sm:$0x1] }
  0x4d   : > { %14220 = vmatprep.subr.bf16.mxu0 %v15108_v33  ;;  %v1772_v6 = vor.u32 %v1771_v17, %v15968_v16  ;;  %v1330_v29 = vshll.u32 %v15955_v2, 16  ;;  %v1334_v30 = vshrl.u32 %v15955_v2, 16  ;;  %v12041_v38 = vcombine.low %v15950_v56, %v15955_v2 }
  0x4e   : > { %2324 = vmatprep.mubr.bf16.mxu0 %v12079_v10  ;;  %v1309_v21 = vsel %vm15716_vm2, %v1304_v52, %v1308_v40  ;;  %v1326_v40 = vrot.slane %v1324_v25, 5  ;;  %v13167_v57 = vpack.c.bf16 %v451_v47, %v451_v47  ;;  %v735_v62 = vshrl.u32 %v15872_v59, 16  ;;  %v549_v47 = vld [vmem:[#allocation2 + $0x44] sm:$0x1]  ;;  %v502_v25 = vld [vmem:[#allocation2 + $0x48] sm:$0x1] }
  0x4f   : > { %2325 = vmatmul.mubr.bf16.gmra.mrb[4].mxu0 %v12071_v13  ;;  %v12048_v39 = vcombine.low %v1309_v21, %v1319_v28  ;;  %v1773_v22 = vrot.slane %v1772_v6, 4  ;;  %v1332_v27 = vrot.slane %v1330_v29, 5  ;;  %v1336_v13 = vrot.slane %v1334_v30, 4  ;;  %v552_v28 = vld [vmem:[#allocation2 + $0x50] sm:$0x1] }
  0x50   : > { %14221 = vmatpush3.bf16.msra.mxu0 %v15108_v33  ;;  %v1763_v33 = vrot.slane %v1762_v23, 4  ;;  %v1327_v53 = vor.u32 %v1326_v40, %v1323_v37  ;;  %v16001_v1 = vld [vmem:[#allocation2 + $0x2c] sm:$0x1]  ;;  %v738_v43 = vshll.u32 %v15872_v59, 16  ;;  %v420_v7 = vadd.f32 %v15747_v58, %v15858_v49 }
  0x51   : > { %14222 = vmatprep.subr.bf16.mxu0 %v15112_v9  ;;  %2670 = vmatprep.mubr.bf16.mxu1 %v12048_v39  ;;  %v16003_v34 = vld [vmem:[#allocation2 + $0x2c] sm:$0x1]  ;;  %v1337_v63 = vor.u32 %v1336_v13, %v1332_v27  ;;  %v737_v59 = vrot.slane %v735_v62, 7  ;;  %v743_v14 = vshrl.u32 %v13167_v57, 16  ;;  %v746_v49 = vshll.u32 %v13167_v57, 16 }
  0x52   : > { %v1768_v48 = vsel %vm15716_vm2, %v1763_v33, %v15968_v16  ;;  %2671 = vmatmul.mubr.bf16.gmra.mrb[8].mxu1 %v12040_v44  ;;  %v15117_v44 = vld [vmem:[%s21152_s3 + $0x168] sm:$0xff]   ;;  %v1328_v10 = vrot.slane %v1327_v53, 4  ;;  %v1340_v52 = vshll.u32 %v16003_v34, 16  ;;  %v452_v15 = vmax.f32 %v420_v7, 0.0  ;;  %v345_v16 = vld [vmem:[%s15728_s21 + $0x58] sm:$0xff] }
  0x53   : > { %v1338_v11 = vrot.slane %v1337_v63, 4  ;;  %v740_v23 = vor.u32 %v738_v43, %v737_v59  ;;  %v741_v6 = vrot.slane %v737_v59, 4  ;;  %v745_v29 = vrot.slane %v743_v14, 7  ;;  %v347_v13 = vld [vmem:[%s15728_s21 + $0x68] sm:$0xff]  ;;  %v505_v63 = vld [vmem:[#allocation2 + $0x54] sm:$0x1] }
  0x54   : > { %14223 = vmatpush3.bf16.msra.mxu0 %v15112_v9  ;;  %v1775_v9 = vshll.u32 %v16001_v1, 16  ;;  %v1333_v17 = vsel %vm15716_vm2, %v1328_v10, %v1332_v27  ;;  %v1342_v21 = vrot.slane %v1340_v52, 5  ;;  %v453_v30 = vmax.f32 %v421_v36, 0.0  ;;  %v346_v27 = vld [vmem:[%s15728_s21 + $0x60] sm:$0xff]  ;;  %v15119_v43 = vld [vmem:[%s21152_s3 + $0x170] sm:$0xff]  }
  0x55   : > { %14224 = vmatprep.subr.bf16.mxu0 %v15114_v31  ;;  %v500_v39 = vsel %vm15755_vm6, 0, %v499_v0  ;;  %v1027_v40 = vsel %vm15803_vm10, %v740_v23, %v1026_v3  ;;  %v748_v62 = vor.u32 %v746_v49, %v745_v29  ;;  %v750_v0 = vrot.slane %v745_v29, 4 }
  0x56   : > { %v1777_v50 = vrot.slane %v1775_v9, 5  ;;  %v1343_v37 = vsel %vm15716_vm2, %v1338_v11, %v1342_v21  ;;  %501 = vst [vmem:[#allocation2 + $0x3c] sm:$0x1] %v500_v39  ;;  %1028 = vst [vmem:[#allocation2 + $0x30] sm:$0xf] %v1027_v40  ;;  %v13168_v7 = vpack.c.bf16 %v452_v15, %v452_v15  ;;  %v13169_v3 = vpack.c.bf16 %v453_v30, %v453_v30 }
  0x57   : > { %v12049_v57 = vcombine.low %v1333_v17, %v1343_v37  ;;  %v384_v36 = vmul.f32 %v15740_v54, %v345_v16  ;;  %v749_v9 = vsel %vm15813_vm11, %v741_v6, %v748_v62  ;;  %v1031_v10 = vsel %vm15755_vm6, %v750_v0, %v1030_v24  ;;  %v348_v16 = vld [vmem:[%s15728_s21 + $0x70] sm:$0xff] }
  0x58   : > { %14225 = vmatpush3.bf16.msra.mxu0 %v15114_v31  ;;  %v1778_v33 = vsel %vm15716_vm2, %v1773_v22, %v1777_v50  ;;  %v550_v31 = vsel %vm15767_vm8, 0, %v549_v47  ;;  %v555_v22 = vld [vmem:[#allocation2 + $0x5c] sm:$0x1]  ;;  %v422_v47 = vadd.f32 %v15747_v58, %v15875_v60  ;;  %v503_v52 = vsel %vm15755_vm6, 0, %v502_v25  ;;  %1029 = vst [vmem:[#allocation2 + $0x34] sm:$0xf] %v749_v9 }
  0x59   : > { %14226 = vmatprep.subr.bf16.mxu0 %v15117_v44  ;;  %v12080_v53 = vcombine.low %v1768_v48, %v1778_v33  ;;  %551 = vst [vmem:[#allocation2 + $0x44] sm:$0x1] %v550_v31  ;;  %v15121_v48 = vld [vmem:[%s21152_s3 + $0x178] sm:$0xff]   ;;  %2678 = vmatprep.mubr.bf16.mxu1 %v12049_v57  ;;  %v553_v59 = vsel %vm15767_vm8, 0, %v552_v28  ;;  %1032 = vst [vmem:[#allocation2 + $0x38] sm:$0x1] %v1031_v10  ;;  %v423_v49 = vadd.f32 %v15747_v58, %v384_v36 }
  0x5a   : > { %2679 = vmatmul.mubr.bf16.gmra.mrb[12].mxu1 %v12041_v38  ;;  %v752_v60 = vshrl.u32 %v13168_v7, 16  ;;  %v760_v11 = vshrl.u32 %v13169_v3, 16  ;;  %v763_v14 = vshll.u32 %v13169_v3, 16  ;;  %504 = vst [vmem:[#allocation2 + $0x48] sm:$0x1] %v503_v52  ;;  %v454_v15 = vmax.f32 %v422_v47, 0.0 }
  0x5b   : > { %2332 = vmatprep.mubr.bf16.mxu0 %v12080_v53  ;;  %554 = vst [vmem:[#allocation2 + $0x50] sm:$0x1] %v553_v59  ;;  %v385_v19 = vmul.f32 %v15740_v54, %v346_v27  ;;  %v386_v20 = vmul.f32 %v15740_v54, %v347_v13  ;;  %v556_v38 = vsel %vm15767_vm8, 0, %v555_v22  ;;  %v349_v50 = vld [vmem:[%s15728_s21 + $0x78] sm:$0xff]  ;;  %v455_v21 = vmax.f32 %v423_v49, 0.0  ;;  %v15123_v28 = vld [vmem:[%s21152_s3 + $0x1c0] sm:$0xff]  }
  0x5c   : > { %14227 = vmatpush3.bf16.msra.mxu0 %v15117_v44  ;;  %v755_v44 = vshll.u32 %v13168_v7, 16  ;;  %v754_v56 = vrot.slane %v752_v60, 7  ;;  %v762_v2 = vrot.slane %v760_v11, 7  ;;  %v16063_v23 = vpack.c.bf16 %v454_v15, %v454_v15  ;;  %557 = vst [vmem:[#allocation2 + $0x5c] sm:$0x1] %v556_v38 }
  0x5d   : > { %2333 = vmatmul.mubr.bf16.gmra.mrb[8].mxu0 %v12072_v18  ;;  %14228 = vmatprep.subr.bf16.mxu0 %v15119_v43  ;;  %v506_v18 = vsel %vm15755_vm6, 0, %v505_v63  ;;  %v1033_v17 = vld [vmem:[#allocation2 + $0x3c] sm:$0xf]  ;;  %v16066_v24 = vadd.f32 %v15747_v58, %v385_v19  ;;  %v16069_v25 = vadd.f32 %v15747_v58, %v386_v20  ;;  %v16074_v6 = vld [vmem:[#allocation2 + $0x30] sm:$0xf]  ;;  %v16088_v63 = vpack.c.bf16 %v455_v21, %v455_v21 }
  0x5e   : > { %507 = vst [vmem:[#allocation2 + $0x54] sm:$0x1] %v506_v18  ;;  %v16076_v29 = vld [vmem:[#allocation2 + $0x30] sm:$0xf]  ;;  %v757_v30 = vor.u32 %v755_v44, %v754_v56  ;;  %v758_v39 = vrot.slane %v754_v56, 4  ;;  %v765_v33 = vor.u32 %v763_v14, %v762_v2  ;;  %v767_v37 = vrot.slane %v762_v2, 4 }
  0x5f   : > { %v1780_v40 = vshrl.u32 %v16074_v6, 16  ;;  %v1783_v31 = vshll.u32 %v16074_v6, 16  ;;  %v1345_v27 = vshrl.u32 %v16076_v29, 16  ;;  %v1348_v13 = vshll.u32 %v16076_v29, 16  ;;  %v16090_v22 = vld [vmem:[#allocation2 + $0x34] sm:$0xf] }
  0x60   : > { %14229 = vmatpush3.bf16.msra.mxu0 %v15119_v43  ;;  %v1037_v53 = vld [vmem:[#allocation2 + $0x44] sm:$0x1]  ;;  %v766_v57 = vsel %vm15813_vm11, %v758_v39, %v765_v33  ;;  %v1034_v62 = vsel %vm15803_vm10, %v757_v30, %v1033_v17  ;;  %v16092_v43 = vld [vmem:[#allocation2 + $0x38] sm:$0x1]  ;;  %v387_v36 = vmul.f32 %v15740_v54, %v348_v16  ;;  %v16096_v47 = vmul.f32 %v15740_v54, %v349_v50  ;;  %v16103_v59 = vld [vmem:[#allocation2 + $0x34] sm:$0xf] }
  0x61   : > { %14230 = vmatprep.subr.bf16.mxu0 %v15121_v48  ;;  %v1038_v0 = vsel %vm15755_vm6, %v767_v37, %v1037_v53  ;;  %v1782_v7 = vrot.slane %v1780_v40, 4  ;;  %v1785_v3 = vrot.slane %v1783_v31, 5  ;;  %1035 = vst [vmem:[#allocation2 + $0x3c] sm:$0xf] %v1034_v62  ;;  %1036 = vst [vmem:[#allocation2 + $0x40] sm:$0xf] %v766_v57  ;;  %v12073_v52 = vcombine.low %v16074_v6, %v16090_v22 }
  0x62   : > { %1039 = vst [vmem:[#allocation2 + $0x44] sm:$0x1] %v1038_v0  ;;  %v1789_v9 = vshll.u32 %v16090_v22, 16  ;;  %v1793_v10 = vshrl.u32 %v16090_v22, 16  ;;  %v16105_v44 = vld [vmem:[#allocation2 + $0x38] sm:$0x1]  ;;  %v12042_v17 = vcombine.low %v16076_v29, %v16103_v59 }
  0x63   : > { %v1786_v60 = vor.u32 %v1785_v3, %v1782_v7  ;;  %v1347_v11 = vrot.slane %v1345_v27, 4  ;;  %v1350_v14 = vrot.slane %v1348_v13, 5  ;;  %v1354_v54 = vshll.u32 %v16103_v59, 16 }
  0x64   : > { %14231 = vmatpush3.bf16.msra.mxu0 %v15121_v48  ;;  %v1799_v48 = vshll.u32 %v16092_v43, 16  ;;  %v1791_v49 = vrot.slane %v1789_v9, 5  ;;  %v1795_v15 = vrot.slane %v1793_v10, 4  ;;  %v1358_v20 = vshrl.u32 %v16103_v59, 16 }
  0x65   : > { %13384 = vmatprep.subr.bf16.mxu0 %v15123_v28  ;;  %v1787_v56 = vrot.slane %v1786_v60, 4  ;;  %v1351_v2 = vor.u32 %v1350_v14, %v1347_v11  ;;  %v1356_v18 = vrot.slane %v1354_v54, 5  ;;  %v1364_v38 = vshll.u32 %v16105_v44, 16 }
  0x66   : > { %v1801_v19 = vrot.slane %v1799_v48, 5  ;;  %v1796_v16 = vor.u32 %v1795_v15, %v1791_v49  ;;  %v1360_v50 = vrot.slane %v1358_v20, 4  ;;  %v769_v21 = vshrl.u32 %v16063_v23, 16 }
  0x67   : > { %v1792_v28 = vsel %vm15716_vm2, %v1787_v56, %v1791_v49  ;;  %v1352_v6 = vrot.slane %v1351_v2, 4  ;;  %v1366_v30 = vrot.slane %v1364_v38, 5  ;;  %v772_v39 = vshll.u32 %v16063_v23, 16 }
  0x68   : > { %v1797_v33 = vrot.slane %v1796_v16, 4  ;;  %v1361_v37 = vor.u32 %v1360_v50, %v1356_v18  ;;  %v16116_v40 = vld [vmem:[#allocation2 + $0x3c] sm:$0xf]  ;;  %v16118_v31 = vld [vmem:[#allocation2 + $0x40] sm:$0xf]  ;;  %v16120_v27 = vrot.slane %v769_v21, 7  ;;  %v16123_v13 = vadd.f32 %v15747_v58, %v387_v36 }
  0x69   : > { %v1357_v29 = vsel %vm15716_vm2, %v1352_v6, %v1356_v18  ;;  %v16127_v53 = vld [vmem:[#allocation2 + $0x44] sm:$0x1]  ;;  %v1804_v57 = vshrl.u32 %v16116_v40, 16  ;;  %v1807_v23 = vshll.u32 %v16116_v40, 16  ;;  %v1813_v62 = vshll.u32 %v16118_v31, 16 }
  0x6a   : > { %v1802_v0 = vsel %vm15716_vm2, %v1797_v33, %v1801_v19  ;;  %v1362_v7 = vrot.slane %v1361_v37, 4  ;;  %v1817_v3 = vshrl.u32 %v16118_v31, 16  ;;  %v1823_v58 = vshll.u32 %v16127_v53, 16  ;;  %v16136_v36 = vld [vmem:[#allocation2 + $0x3c] sm:$0xf] }
  0x6b   : > { %v12081_v9 = vcombine.low %v1792_v28, %v1802_v0  ;;  %v1806_v10 = vrot.slane %v1804_v57, 4  ;;  %v1809_v48 = vrot.slane %v1807_v23, 5  ;;  %v1815_v60 = vrot.slane %v1813_v62, 5  ;;  %v16138_v11 = vld [vmem:[#allocation2 + $0x40] sm:$0xf] }
  0x6c   : > { %v1367_v14 = vsel %vm15716_vm2, %v1362_v7, %v1366_v30  ;;  %v1819_v54 = vrot.slane %v1817_v3, 4  ;;  %v1825_v49 = vrot.slane %v1823_v58, 5  ;;  %v12074_v15 = vcombine.low %v16116_v40, %v16118_v31  ;;  %v16144_v19 = vld [vmem:[#allocation2 + $0x44] sm:$0x1]  ;;  %v508_v23 = vld [vmem:[#allocation2 + $0x60] sm:$0x1] }
  0x6d   : > { %2340 = vmatprep.mubr.bf16.mxu0 %v12081_v9  ;;  %v12050_v20 = vcombine.low %v1357_v29, %v1367_v14  ;;  %v1810_v56 = vor.u32 %v1809_v48, %v1806_v10  ;;  %v1369_v2 = vshrl.u32 %v16136_v36, 16  ;;  %v1372_v18 = vshll.u32 %v16136_v36, 16 }
  0x6e   : > { %2341 = vmatmul.mubr.bf16.gmra.mrb[12].mxu0 %v12073_v52  ;;  %v1820_v38 = vor.u32 %v1819_v54, %v1815_v60  ;;  %v1378_v16 = vshll.u32 %v16138_v11, 16  ;;  %v1382_v50 = vshrl.u32 %v16138_v11, 16  ;;  %v1388_v21 = vshll.u32 %v16144_v19, 16  ;;  %v1040_v52 = vld [vmem:[#allocation2 + $0x48] sm:$0xf] }
  0x6f   : > { %2686 = vmatprep.mubr.bf16.mxu1 %v12050_v20  ;;  %v1811_v28 = vrot.slane %v1810_v56, 4  ;;  %v1371_v6 = vrot.slane %v1369_v2, 4  ;;  %v1374_v30 = vrot.slane %v1372_v18, 5  ;;  %v12043_v33 = vcombine.low %v16136_v36, %v16138_v11  ;;  %v1044_v54 = vld [vmem:[#allocation2 + $0x50] sm:$0x1] }
  0x70   : > { %2687 = vmatmul.mubr.bf16.gmra.mrb[16].mxu1 %v12042_v17  ;;  %v1821_v37 = vrot.slane %v1820_v38, 4  ;;  %v1380_v40 = vrot.slane %v1378_v16, 5  ;;  %v1384_v29 = vrot.slane %v1382_v50, 4  ;;  %v1390_v57 = vrot.slane %v1388_v21, 5  ;;  %v558_v56 = vld [vmem:[#allocation2 + $0x68] sm:$0x1] }
  0x71   : > { %v1816_v62 = vsel %vm15716_vm2, %v1811_v28, %v1815_v60  ;;  %v1375_v0 = vor.u32 %v1374_v30, %v1371_v6  ;;  %v774_v7 = vor.u32 %v772_v39, %v16120_v27  ;;  %v775_v3 = vrot.slane %v16120_v27, 4 }
  0x72   : > { %v1826_v58 = vsel %vm15716_vm2, %v1821_v37, %v1825_v49  ;;  %v1385_v9 = vor.u32 %v1384_v29, %v1380_v40  ;;  %v777_v17 = vshrl.u32 %v16088_v63, 16  ;;  %v780_v36 = vshll.u32 %v16088_v63, 16  ;;  %v15457_v49 = vld [vmem:[%s21151_s2] ss:$0 sm:$0xff] }
  0x73   : > { %v12082_v10 = vcombine.low %v1816_v62, %v1826_v58  ;;  %v1376_v48 = vrot.slane %v1375_v0, 4  ;;  %v1041_v14 = vsel %vm15803_vm10, %v774_v7, %v1040_v52  ;;  %v456_v60 = vmax.f32 %v16066_v24, 0.0  ;;  %v1047_v52 = vld [vmem:[#allocation2 + $0x54] sm:$0xf] }
  0x74   : > { %v1386_v39 = vrot.slane %v1385_v9, 4  ;;  %v779_v20 = vrot.slane %v777_v17, 7  ;;  %1042 = vst [vmem:[#allocation2 + $0x48] sm:$0xf] %v1041_v14  ;;  %v457_v27 = vmax.f32 %v16069_v25, 0.0  ;;  %v16169_v63 = vadd.f32 %v15457_v49, %v16096_v47 }
  0x75   : > { %2348 = vmatprep.mubr.bf16.mxu0 %v12082_v10  ;;  %v1381_v2 = vsel %vm15716_vm2, %v1376_v48, %v1380_v40  ;;  %v13172_v18 = vpack.c.bf16 %v456_v60, %v456_v60  ;;  %v458_v24 = vmax.f32 %v16123_v13, 0.0  ;;  %v509_v38 = vsel %vm15755_vm6, 0, %v508_v23  ;;  %v1440_v47 = vld [vmem:[#allocation2] sm:$0xe] }
  0x76   : > { %2349 = vmatmul.mubr.bf16.gmra.mrb[16].mxu0 %v12074_v15  ;;  %v1391_v25 = vsel %vm15716_vm2, %v1386_v39, %v1390_v57  ;;  %v782_v16 = vor.u32 %v780_v36, %v779_v20  ;;  %v784_v50 = vrot.slane %v779_v20, 4  ;;  %v13173_v21 = vpack.c.bf16 %v457_v27, %v457_v27  ;;  %510 = vst [vmem:[#allocation2 + $0x60] sm:$0x1] %v509_v38  ;;  %v1051_v39 = vld [vmem:[#allocation2 + $0x5c] sm:$0x1] }
  0x77   : > { %v12051_v28 = vcombine.low %v1381_v2, %v1391_v25  ;;  %v786_v6 = vshrl.u32 %v13172_v18, 16  ;;  %v789_v30 = vshll.u32 %v13172_v18, 16  ;;  %v459_v37 = vmax.f32 %v16169_v63, 0.0 }
  0x78   : > { %v783_v13 = vsel %vm15813_vm11, %v775_v3, %v782_v16  ;;  %v1045_v40 = vsel %vm15755_vm6, %v784_v50, %v1044_v54  ;;  %v794_v15 = vshrl.u32 %v13173_v21, 16  ;;  %v797_v29 = vshll.u32 %v13173_v21, 16  ;;  %v16185_v3 = vld [vmem:[#allocation2 + $0x4] sm:$0xf] }
  0x79   : > { %2694 = vmatprep.mubr.bf16.mxu1 %v12051_v28  ;;  %1043 = vst [vmem:[#allocation2 + $0x4c] sm:$0xf] %v783_v13  ;;  %1046 = vst [vmem:[#allocation2 + $0x50] sm:$0x1] %v1045_v40  ;;  %v788_v57 = vrot.slane %v786_v6, 7  ;;  %v559_v23 = vsel %vm15767_vm8, 0, %v558_v56  ;;  %v13174_v62 = vpack.c.bf16 %v458_v24, %v458_v24  ;;  %v16217_v40 = vpack.c.bf16 %v459_v37, %v459_v37 }
  0x7a   : > { %2695 = vmatmul.mubr.bf16.gmra.mrb[20].mxu1 %v12043_v33  ;;  %v796_v0 = vrot.slane %v794_v15, 7  ;;  %560 = vst [vmem:[#allocation2 + $0x68] sm:$0x1] %v559_v23  ;;  %v12030_v7 = vrot.slane %v1440_v47, 9  ;;  %v1477_v58 = vrot.slane %v16185_v3, 5  ;;  %v21210_v38 = vmov 0 }
  0x7b   : > { %v16188_v9 = vld [vmem:[#allocation2 + $0x48] sm:$0xf]  ;;  %v791_v36 = vor.u32 %v789_v30, %v788_v57  ;;  %v792_v10 = vrot.slane %v788_v57, 4  ;;  %v803_v48 = vshrl.u32 %v13174_v62, 16  ;;  %v21211_v38 = vsel %vm16202_vm14, 4294967295, %v21210_v38 }
  0x7c   : > { %v16190_v17 = vld [vmem:[#allocation2 + $0x48] sm:$0xf]  ;;  %v1828_v14 = vshrl.u32 %v16188_v9, 16  ;;  %v1831_v54 = vshll.u32 %v16188_v9, 16  ;;  %v799_v20 = vor.u32 %v797_v29, %v796_v0  ;;  %v801_v27 = vrot.slane %v796_v0, 4  ;;  %21212 = vst [vmem:[#allocation8_spill] sm:$0xff] %v21211_v38 }
  0x7d   : > { %v1393_v33 = vshrl.u32 %v16190_v17, 16  ;;  %v1396_v60 = vshll.u32 %v16190_v17, 16  ;;  %v1048_v49 = vsel %vm15803_vm10, %v791_v36, %v1047_v52  ;;  %v16198_v63 = vrot.slane %v803_v48, 7 }
  0x7e   : > { %v1830_v56 = vrot.slane %v1828_v14, 4  ;;  %v1833_v2 = vrot.slane %v1831_v54, 5  ;;  %1049 = vst [vmem:[#allocation2 + $0x54] sm:$0xf] %v1048_v49  ;;  %v800_v25 = vsel %vm15813_vm11, %v792_v10, %v799_v20  ;;  %v1052_v16 = vsel %vm15755_vm6, %v801_v27, %v1051_v39  ;;  %v1054_v10 = vld [vmem:[#allocation2 + $0x60] sm:$0xf] }
  0x7f   : > { %v1395_v18 = vrot.slane %v1393_v33, 4  ;;  %v1398_v24 = vrot.slane %v1396_v60, 5  ;;  %v806_v50 = vshll.u32 %v13174_v62, 16  ;;  %v809_v21 = vrot.slane %v16198_v63, 4  ;;  %1050 = vst [vmem:[#allocation2 + $0x58] sm:$0xf] %v800_v25 }
  0x80   : > { %v16211_v47 = vld [vmem:[#allocation2 + $0x4c] sm:$0xf]  ;;  %v16213_v28 = vld [vmem:[#allocation2 + $0x50] sm:$0x1]  ;;  %v1834_v6 = vor.u32 %v1833_v2, %v1830_v56  ;;  %1053 = vst [vmem:[#allocation2 + $0x5c] sm:$0x1] %v1052_v16  ;;  %v16228_v23 = vsel %vm16202_vm14, %v12030_v7, %v1477_v58 }
  0x81   : > { %v16215_v30 = vld [vmem:[#allocation2 + $0x4c] sm:$0xf]  ;;  %v1399_v13 = vor.u32 %v1398_v24, %v1395_v18  ;;  %v1837_v15 = vshll.u32 %v16211_v47, 16  ;;  %v1841_v29 = vshrl.u32 %v16211_v47, 16  ;;  %v1847_v52 = vshll.u32 %v16213_v28, 16 }
  0x82   : > { %v16222_v57 = vld [vmem:[#allocation2 + $0x50] sm:$0x1]  ;;  %v1835_v62 = vrot.slane %v1834_v6, 4  ;;  %v1402_v36 = vshll.u32 %v16215_v30, 16  ;;  %v1406_v37 = vshrl.u32 %v16215_v30, 16  ;;  %v12075_v60 = vcombine.low %v16188_v9, %v16211_v47 }
  0x83   : > { %v1400_v0 = vrot.slane %v1399_v13, 4  ;;  %v1839_v48 = vrot.slane %v1837_v15, 5  ;;  %v1843_v14 = vrot.slane %v1841_v29, 4  ;;  %v1849_v54 = vrot.slane %v1847_v52, 5 }
  0x84   : > { %v1412_v33 = vshll.u32 %v16222_v57, 16  ;;  %v1404_v39 = vrot.slane %v1402_v36, 5  ;;  %v1408_v20 = vrot.slane %v1406_v37, 4  ;;  %v808_v7 = vor.u32 %v806_v50, %v16198_v63 }
  0x85   : > { %v1840_v27 = vsel %vm15716_vm2, %v1835_v62, %v1839_v48  ;;  %v1844_v49 = vor.u32 %v1843_v14, %v1839_v48  ;;  %v12044_v2 = vcombine.low %v16190_v17, %v16215_v30  ;;  %v16240_v18 = vld [vmem:[#allocation2 + $0x54] sm:$0xf]  ;;  %v811_v6 = vshrl.u32 %v16217_v40, 16 }
  0x86   : > { %v1414_v56 = vrot.slane %v1412_v33, 5  ;;  %v16242_v24 = vld [vmem:[#allocation2 + $0x54] sm:$0xf]  ;;  %v1409_v25 = vor.u32 %v1408_v20, %v1404_v39  ;;  %v1852_v16 = vshrl.u32 %v16240_v18, 16  ;;  %v1855_v9 = vshll.u32 %v16240_v18, 16 }
  0x87   : > { %v1845_v50 = vrot.slane %v1844_v49, 4  ;;  %v1405_v13 = vsel %vm15716_vm2, %v1400_v0, %v1404_v39  ;;  %v16249_v15 = vld [vmem:[#allocation2 + $0x58] sm:$0xf]  ;;  %v16251_v29 = vld [vmem:[#allocation2 + $0x5c] sm:$0x1]  ;;  %v1417_v17 = vshrl.u32 %v16242_v24, 16  ;;  %v1055_v52 = vsel %vm15803_vm10, %v808_v7, %v1054_v10 }
  0x88   : > { %v1410_v62 = vrot.slane %v1409_v25, 4  ;;  %v1854_v36 = vrot.slane %v1852_v16, 4  ;;  %v1857_v37 = vrot.slane %v1855_v9, 5  ;;  %v1861_v48 = vshll.u32 %v16249_v15, 16  ;;  %1056 = vst [vmem:[#allocation2 + $0x60] sm:$0xf] %v1055_v52 }
  0x89   : > { %v1850_v14 = vsel %vm15716_vm2, %v1845_v50, %v1849_v54  ;;  %v1865_v0 = vshrl.u32 %v16249_v15, 16  ;;  %v1871_v33 = vshll.u32 %v16251_v29, 16  ;;  %v12076_v39 = vcombine.low %v16240_v18, %v16249_v15  ;;  %v16263_v20 = vld [vmem:[#allocation2 + $0x58] sm:$0xf]  ;;  %v16267_v16 = vld [vmem:[#allocation2 + $0x5c] sm:$0x1] }
  0x8a   : > { %v12083_v49 = vcombine.low %v1840_v27, %v1850_v14  ;;  %v1415_v10 = vsel %vm15716_vm2, %v1410_v62, %v1414_v56  ;;  %v1858_v7 = vor.u32 %v1857_v37, %v1854_v36  ;;  %v1863_v25 = vrot.slane %v1861_v48, 5  ;;  %v1058_v14 = vld [vmem:[#allocation2 + $0x68] sm:$0x1] }
  0x8b   : > { %v12052_v9 = vcombine.low %v1405_v13, %v1415_v10  ;;  %v1867_v52 = vrot.slane %v1865_v0, 4  ;;  %v1873_v54 = vrot.slane %v1871_v33, 5  ;;  %v1419_v50 = vrot.slane %v1417_v17, 4 }
  0x8c   : > { %2356 = vmatprep.mubr.bf16.mxu0 %v12083_v49  ;;  %v1859_v12 = vrot.slane %v1858_v7, 4  ;;  %v1420_v5 = vshll.u32 %v16242_v24, 16  ;;  %v1426_v18 = vshll.u32 %v16263_v20, 16  ;;  %v1430_v26 = vshrl.u32 %v16263_v20, 16 }
  0x8d   : > { %2357 = vmatmul.mubr.bf16.gmra.mrb[20].mxu0 %v12075_v60  ;;  %2702 = vmatprep.mubr.bf16.mxu1 %v12052_v9  ;;  %v1868_v27 = vor.u32 %v1867_v52, %v1863_v25  ;;  %v1436_v56 = vshll.u32 %v16267_v16, 16  ;;  %v12045_v62 = vcombine.low %v16242_v24, %v16263_v20  ;;  %v813_v13 = vrot.slane %v811_v6, 7  ;;  %v1441_v6 = vld [vmem:[#allocation2 + $0xc] sm:$0xe] }
  0x8e   : > { %2703 = vmatmul.mubr.bf16.gmra.mrb[24].mxu1 %v12044_v2  ;;  %v1864_v17 = vsel %vm15716_vm2, %v1859_v12, %v1863_v25  ;;  %v1422_v36 = vrot.slane %v1420_v5, 5  ;;  %v1428_v37 = vrot.slane %v1426_v18, 5  ;;  %v1432_v48 = vrot.slane %v1430_v26, 4  ;;  %v1899_v52 = vld [vmem:[#allocation2 + $0xc] sm:$0xe] }
  0x8f   : > { %v1869_v0 = vrot.slane %v1868_v27, 4  ;;  %v1438_v33 = vrot.slane %v1436_v56, 5  ;;  %v814_v60 = vshll.u32 %v16217_v40, 16  ;;  %v818_v49 = vrot.slane %v813_v13, 4  ;;  %v16278_v10 = vld [vmem:[#allocation2 + $0x60] sm:$0xf] }
  0x90   : > { %v1423_v7 = vor.u32 %v1422_v36, %v1419_v50  ;;  %v1433_v9 = vor.u32 %v1432_v48, %v1428_v37  ;;  %v1876_v24 = vshrl.u32 %v16278_v10, 16  ;;  %v1879_v2 = vshll.u32 %v16278_v10, 16  ;;  %v1900_v25 = vld [vmem:[#allocation2 + $0x18] sm:$0xe] }
  0x91   : > { %v1874_v5 = vsel %vm15716_vm2, %v1869_v0, %v1873_v54  ;;  %v816_v26 = vor.u32 %v814_v60, %v813_v13  ;;  %v1059_v12 = vsel %vm15755_vm6, %v818_v49, %v1058_v14  ;;  %v1479_v40 = vrot.slane %v1477_v58, 4  ;;  %v1442_v36 = vld [vmem:[#allocation2 + $0x18] sm:$0xe]  ;;  %v15459_v14 = vld [vmem:[#allocation2 + $0x10] sm:$0xf] }
  0x92   : > { %v12084_v18 = vcombine.low %v1864_v17, %v1874_v5  ;;  %v1424_v50 = vrot.slane %v1423_v7, 4  ;;  %v1434_v27 = vrot.slane %v1433_v9, 4  ;;  %1060 = vst [vmem:[#allocation2 + $0x68] sm:$0x1] %v1059_v12  ;;  %v1878_v56 = vrot.slane %v1876_v24, 4 }
  0x93   : > { %v817_v48 = vsel %vm15813_vm11, %v809_v21, %v816_v26  ;;  %v1881_v54 = vrot.slane %v1879_v2, 5  ;;  %v1481_v13 = vsel %vm16202_vm14, %v1479_v40, %v1480_v51  ;;  %v12031_v3 = vrot.slane %v1441_v6, 9  ;;  %v15460_v49 = vld [vmem:[#allocation2 + $0x10] sm:$0xf]  ;;  %v1443_v6 = vld [vmem:[#allocation2 + $0x24] sm:$0xe] }
  0x94   : > { %2364 = vmatprep.mubr.bf16.mxu0 %v12084_v18  ;;  %v1429_v58 = vsel %vm15716_vm2, %v1424_v50, %v1428_v37  ;;  %v1439_v17 = vsel %vm15716_vm2, %v1434_v27, %v1438_v33  ;;  %1057 = vst [vmem:[#allocation2 + $0x64] sm:$0xf] %v817_v48  ;;  %v12054_v63 = vcombine.low %v16228_v23, %v1481_v13  ;;  %v1484_v0 = vrot.slane %v15459_v14, 5  ;;  %v15461_v37 = vld [vmem:[#allocation2 + $0x1c] sm:$0xf] }
  0x95   : > { %2365 = vmatmul.mubr.bf16.gmra.mrb[24].mxu0 %v12076_v39  ;;  %v12053_v21 = vcombine.low %v1429_v58, %v1439_v17  ;;  %v1882_v60 = vor.u32 %v1881_v54, %v1878_v56  ;;  %v12062_v32 = vrot.slane %v1899_v52, 9  ;;  %v1933_v7 = vrot.slane %v15460_v49, 5  ;;  %v1901_v17 = vld [vmem:[#allocation2 + $0x24] sm:$0xe] }
  0x96   : > { %v1485_v51 = vsel %vm16202_vm14, %v12031_v3, %v1484_v0  ;;  %v1486_v9 = vrot.slane %v1484_v0, 4  ;;  %v12063_v24 = vrot.slane %v1900_v25, 9  ;;  %v1940_v2 = vrot.slane %v15461_v37, 5  ;;  %v15462_v25 = vld [vmem:[#allocation2 + $0x1c] sm:$0xf] }
  0x97   : > { %2710 = vmatprep.mubr.bf16.mxu1 %v12053_v21  ;;  %v16303_v33 = vrot.slane %v1882_v60, 4  ;;  %v16307_v23 = vsel %vm16202_vm14, %v12062_v32, %v1933_v7  ;;  %v1935_v39 = vrot.slane %v1933_v7, 4  ;;  %v12032_v5 = vrot.slane %v1442_v36, 9  ;;  %v15464_v60 = vld [vmem:[#allocation2 + $0x28] sm:$0xf] }
  0x98   : > { %2711 = vmatmul.mubr.bf16.gmra.mrb[28].mxu1 %v12045_v62  ;;  %v21213_v52 = vrot.slane %v15889_v8, 5  ;;  %v16315_v12 = vsel %vm16202_vm14, %v12063_v24, %v1940_v2  ;;  %v1942_v40 = vrot.slane %v1940_v2, 4  ;;  %v1491_v18 = vrot.slane %v15462_v25, 5  ;;  %v15463_v8 = vld [vmem:[#allocation2 + $0x20] sm:$0x1] }
  0x99   : > { %v16317_v50 = vld [vmem:[#allocation2 + $0x68] sm:$0x1]  ;;  %14264 = vmatprep.mubr.bf16.mxu1 %v12054_v63  ;;  %v21214_v56 = vrot.slane %v15867_v55, 5  ;;  %v1494_v36 = vrot.slane %v15463_v8, 5  ;;  %v12033_v48 = vrot.slane %v1443_v6, 9  ;;  %v21215_v3 = vrot.slane %v15905_v35, 5 }
  0x9a   : > { %v1488_v26 = vsel %vm16202_vm14, %v1486_v9, %v21213_v52  ;;  %v1895_v54 = vshll.u32 %v16317_v50, 16  ;;  %v1492_v55 = vsel %vm16202_vm14, %v12032_v5, %v1491_v18  ;;  %v1902_v63 = vld [vmem:[#allocation2 + $0x30] sm:$0xe]  ;;  %v1493_v21 = vrot.slane %v1491_v18, 4 }
  0x9b   : > { %v12055_v27 = vcombine.low %v1485_v51, %v1488_v26  ;;  %v16323_v62 = vsel %vm16202_vm14, %v1935_v39, %v21214_v56  ;;  %v16332_v58 = vsel %vm16202_vm14, %v1942_v40, %v21215_v3  ;;  %v16336_v14 = vld [vmem:[#allocation2 + $0x64] sm:$0xf]  ;;  %v1498_v32 = vrot.slane %v15464_v60, 5  ;;  %v15465_v26 = vld [vmem:[#allocation2 + $0x28] sm:$0xf] }
  0x9c   : > { %v12086_v13 = vcombine.low %v16307_v23, %v16323_v62  ;;  %v12087_v0 = vcombine.low %v16315_v12, %v16332_v58  ;;  %v1501_v49 = vrot.slane %v16003_v34, 5  ;;  %v1885_v35 = vshll.u32 %v16336_v14, 16  ;;  %v15122_v34 = vld [vmem:[%s21152_s3 + $0x208] sm:$0xff]   ;;  %v1444_v8 = vld [vmem:[#allocation2 + $0x30] sm:$0xe] }
  0x9d   : > { %v1889_v7 = vshrl.u32 %v16336_v14, 16  ;;  %v1897_v51 = vrot.slane %v1895_v54, 5  ;;  %v12077_v9 = vcombine.low %v16278_v10, %v16336_v14  ;;  %v1495_v24 = vsel %vm16202_vm14, %v1493_v21, %v1494_v36  ;;  %v15137_v12 = vld [vmem:[%s21152_s3 + $0x230] sm:$0xff]  }
  0x9e   : > { %v1499_v37 = vsel %vm16202_vm14, %v12033_v48, %v1498_v32  ;;  %v1500_v2 = vrot.slane %v1498_v32, 4  ;;  %v12064_v6 = vrot.slane %v1901_v17, 9  ;;  %v1887_v39 = vrot.slane %v1885_v35, 5  ;;  %v1903_v32 = vld [vmem:[#allocation2 + $0x3c] sm:$0xe] }
  0x9f   : > { %v1891_v5 = vrot.slane %v1889_v7, 4  ;;  %v12056_v52 = vcombine.low %v1492_v55, %v1495_v24  ;;  %v1947_v40 = vrot.slane %v15465_v26, 5  ;;  %v1950_v25 = vrot.slane %v16001_v1, 5  ;;  %v1445_v55 = vld [vmem:[#allocation2 + $0x3c] sm:$0xe]  ;;  %v15125_v1 = vld [vmem:[%s21152_s3 + $0x210] sm:$0xff]  }
  0xa0   : > { %v1502_v10 = vsel %vm16202_vm14, %v1500_v2, %v1501_v49  ;;  %v12065_v18 = vrot.slane %v1902_v63, 9  ;;  %v1954_v56 = vrot.slane %v16090_v22, 5  ;;  %v1888_v36 = vsel %vm15716_vm2, %v16303_v33, %v1887_v39  ;;  %14265 = vmatmul.mubr.bf16.vlgmr.msra.gmra.mrb[32].mxu1 %v12055_v27 }
  0xa1   : > { %v1892_v48 = vor.u32 %v1891_v5, %v1887_v39  ;;  %v12057_v54 = vcombine.low %v1499_v37, %v1502_v10  ;;  %v16361_v3 = vsel %vm16202_vm14, %v12064_v6, %v1947_v40  ;;  %14281 = vmatpush3.bf16.msra.mxu1 %v15992_v45  ;;  %14268 = vmatprep.mubr.bf16.mxu1 %v12056_v52  ;;  %v1949_v22 = vrot.slane %v1947_v40, 4  ;;  %v15128_v39 = vld [vmem:[%s21152_s3 + $0x218] sm:$0xff]  }
  0xa2   : > { %v16369_v17 = vsel %vm16202_vm14, %v12065_v18, %v1954_v56  ;;  %v1956_v33 = vrot.slane %v1954_v56, 4  ;;  %v1957_v27 = vrot.slane %v16092_v43, 5  ;;  %14282 = vmatprep.subr.bf16.mxu1 %v15122_v34  ;;  %v12034_v21 = vrot.slane %v1444_v8, 9  ;;  %v1904_v43 = vld [vmem:[#allocation2 + $0x48] sm:$0xe] }
  0xa3   : > { %v1893_v63 = vrot.slane %v1892_v48, 4  ;;  %v1505_v60 = vrot.slane %v16103_v59, 5  ;;  %v1508_v45 = vrot.slane %v16105_v44, 5  ;;  %v16376_v49 = vsel %vm16202_vm14, %v1949_v22, %v1950_v25  ;;  %v1446_v25 = vld [vmem:[#allocation2 + $0x48] sm:$0xe] }
  0xa4   : > { %v16380_v35 = vsel %vm16202_vm14, %v1956_v33, %v1957_v27  ;;  %v12035_v7 = vrot.slane %v1445_v55, 9  ;;  %v1512_v24 = vrot.slane %v16138_v11, 5  ;;  %v12088_v59 = vcombine.low %v16361_v3, %v16376_v49  ;;  %v1905_v55 = vld [vmem:[#allocation2 + $0x54] sm:$0xe]  ;;  %v1906_v22 = vld [vmem:[#allocation2 + $0x60] sm:$0xe] }
  0xa5   : > { %v1898_v37 = vsel %vm15716_vm2, %v1893_v63, %v1897_v51  ;;  %v12089_v44 = vcombine.low %v16369_v17, %v16380_v35  ;;  %v1506_v2 = vsel %vm16202_vm14, %v12034_v21, %v1505_v60  ;;  %14283 = vmatpush3.bf16.msra.mxu1 %v15122_v34  ;;  %v1507_v11 = vrot.slane %v1505_v60, 4  ;;  %v15131_v33 = vld [vmem:[%s21152_s3 + $0x220] sm:$0xff]  }
  0xa6   : > { %v12085_v6 = vcombine.low %v1888_v36, %v1898_v37  ;;  %v16396_v5 = vsel %vm16202_vm14, %v12035_v7, %v1512_v24  ;;  %v1514_v51 = vrot.slane %v1512_v24, 4  ;;  %14284 = vmatprep.subr.bf16.mxu1 %v15125_v1  ;;  %v1515_v52 = vrot.slane %v16144_v19, 5  ;;  %v1447_v36 = vld [vmem:[#allocation2 + $0x54] sm:$0xe]  ;;  %v16440_v24 = vld [vmem:[#allocation2 + $0x1c] sm:$0xf] }
  0xa7   : > { %v12066_v26 = vrot.slane %v1903_v32, 9  ;;  %v1961_v40 = vrot.slane %v16118_v31, 5  ;;  %v1964_v10 = vrot.slane %v16127_v53, 5  ;;  %v1509_v34 = vsel %vm16202_vm14, %v1507_v11, %v1508_v45  ;;  %v3033_v45 = vld [vmem:[#allocation2 + $0x18] sm:$0xe]  ;;  %v15124_v37 = vld [vmem:[%s21152_s3 + $0x180] sm:$0xff]  }
  0xa8   : > { %2372 = vmatprep.mubr.bf16.mxu0 %v12085_v6  ;;  %v12067_v18 = vrot.slane %v1904_v43, 9  ;;  %v1968_v56 = vrot.slane %v16211_v47, 5  ;;  %v1971_v8 = vrot.slane %v16213_v28, 5  ;;  %14269 = vmatmul.mubr.bf16.gmra.mrb[36].mxu1 %v12057_v54  ;;  %v12058_v48 = vcombine.low %v1506_v2, %v1509_v34  ;;  %v16442_v43 = vld [vmem:[#allocation2 + $0x20] sm:$0x1] }
  0xa9   : > { %2373 = vmatmul.mubr.bf16.gmra.mrb[28].mxu0 %v12077_v9  ;;  %v1516_v19 = vsel %vm16202_vm14, %v1514_v51, %v1515_v52  ;;  %v16409_v31 = vsel %vm16202_vm14, %v12066_v26, %v1961_v40  ;;  %v1963_v53 = vrot.slane %v1961_v40, 4  ;;  %14285 = vmatpush3.bf16.msra.mxu1 %v15125_v1  ;;  %v12036_v54 = vrot.slane %v1446_v25, 9  ;;  %v16453_v11 = vld [vmem:[#allocation2 + $0x28] sm:$0xf]  ;;  %v3034_v40 = vld [vmem:[#allocation2 + $0x24] sm:$0xe] }
  0xaa   : > { %14232 = vmatprep.mubr.bf16.mxu0 %v12086_v13  ;;  %v12059_v47 = vcombine.low %v16396_v5, %v1516_v19  ;;  %v16417_v28 = vsel %vm16202_vm14, %v12067_v18, %v1968_v56  ;;  %v1970_v9 = vrot.slane %v1968_v56, 4  ;;  %14286 = vmatprep.subr.bf16.mxu1 %v15128_v39  ;;  %v1519_v62 = vrot.slane %v16215_v30, 5  ;;  %v15126_v5 = vld [vmem:[%s21152_s3 + $0x1c8] sm:$0xff]   ;;  %v15129_v56 = vld [vmem:[%s21152_s3 + $0x1d0] sm:$0xff]  }
  0xab   : > { %14272 = vmatprep.mubr.bf16.mxu1 %v12058_v48  ;;  %v16424_v23 = vsel %vm16202_vm14, %v1963_v53, %v1964_v10  ;;  %v1522_v13 = vrot.slane %v16222_v57, 5  ;;  %v12037_v1 = vrot.slane %v1447_v36, 9  ;;  %v1526_v21 = vrot.slane %v16263_v20, 5  ;;  %v16474_v18 = vld [vmem:[#allocation2 + $0x2c] sm:$0x1] }
  0xac   : > { %v12090_v27 = vcombine.low %v16409_v31, %v16424_v23  ;;  %v16432_v63 = vsel %vm16202_vm14, %v1970_v9, %v1971_v8  ;;  %v1529_v60 = vrot.slane %v16267_v16, 5  ;;  %v1520_v30 = vsel %vm16202_vm14, %v12036_v54, %v1519_v62  ;;  %v3037_v23 = vld [vmem:[#allocation2 + $0x48] sm:$0xe] }
  0xad   : > { %v12091_v32 = vcombine.low %v16417_v28, %v16432_v63  ;;  %v1521_v57 = vrot.slane %v1519_v62, 4  ;;  %v12068_v7 = vrot.slane %v1905_v55, 9  ;;  %14287 = vmatpush3.bf16.msra.mxu1 %v15128_v39  ;;  %v16449_v20 = vsel %vm16202_vm14, %v12037_v1, %v1526_v21  ;;  %v16514_v62 = vld [vmem:[#allocation2 + $0x34] sm:$0xf]  ;;  %v3035_v1 = vld [vmem:[#allocation2 + $0x30] sm:$0xe] }
  0xae   : > { %v1528_v16 = vrot.slane %v1526_v21, 4  ;;  %v1975_v2 = vrot.slane %v16249_v15, 5  ;;  %v1978_v6 = vrot.slane %v16251_v29, 5  ;;  %14288 = vmatprep.subr.bf16.mxu1 %v15131_v33  ;;  %v12069_v39 = vrot.slane %v1906_v22, 9  ;;  %v15127_v15 = vld [vmem:[%s21152_s3 + $0x188] sm:$0xff]   ;;  %v15130_v21 = vld [vmem:[%s21152_s3 + $0x190] sm:$0xff]  }
  0xaf   : > { %v1523_v51 = vsel %vm16202_vm14, %v1521_v57, %v1522_v13  ;;  %v1982_v52 = vrot.slane %v16336_v14, 5  ;;  %v1985_v26 = vrot.slane %v16317_v50, 5  ;;  %v15134_v29 = vld [vmem:[%s21152_s3 + $0x228] sm:$0xff]   ;;  %v16476_v50 = vld [vmem:[#allocation2 + $0x18] sm:$0xf]  ;;  %v12190_v19 = vrot.slane %v3033_v45, 9 }
  0xb0   : > { %v12060_v10 = vcombine.low %v1520_v30, %v1523_v51  ;;  %v1530_v25 = vsel %vm16202_vm14, %v1528_v16, %v1529_v60  ;;  %v16472_v34 = vsel %vm16202_vm14, %v12068_v7, %v1975_v2  ;;  %v1977_v14 = vrot.slane %v1975_v2, 4  ;;  %14273 = vmatmul.mubr.bf16.gmra.mrb[40].mxu1 %v12059_v47  ;;  %v16516_v13 = vld [vmem:[#allocation2 + $0x38] sm:$0x1] }
  0xb1   : > { %14233 = vmatmul.mubr.bf16.vlgmr.msra.gmra.mrb[32].mxu0 %v12087_v0  ;;  %v12061_v8 = vcombine.low %v16449_v20, %v1530_v25  ;;  %v16487_v36 = vsel %vm16202_vm14, %v12069_v39, %v1982_v52  ;;  %v1984_v48 = vrot.slane %v1982_v52, 4  ;;  %v3067_v0 = vrot.slane %v16440_v24, 5  ;;  %14289 = vmatpush3.bf16.msra.mxu1 %v15131_v33  ;;  %v15132_v7 = vld [vmem:[%s21152_s3 + $0x1d8] sm:$0xff]  }
  0xb2   : > { %13385 = vmatpush3.bf16.msra.mxu0 %v15124_v37  ;;  %14236 = vmatprep.mubr.bf16.mxu0 %v12088_v59  ;;  %v16497_v58 = vsel %vm16202_vm14, %v1977_v14, %v1978_v6  ;;  %v3070_v53 = vrot.slane %v16442_v43, 5  ;;  %v12191_v55 = vrot.slane %v3034_v40, 9  ;;  %v3074_v49 = vrot.slane %v16453_v11, 5  ;;  %v16534_v6 = vld [vmem:[#allocation2 + $0x40] sm:$0xf] }
  0xb3   : > { %13386 = vmatprep.subr.bf16.mxu0 %v15126_v5  ;;  %v12092_v47 = vcombine.low %v16472_v34, %v16497_v58  ;;  %v16505_v3 = vsel %vm16202_vm14, %v1984_v48, %v1985_v26  ;;  %v3077_v59 = vrot.slane %v16474_v18, 5  ;;  %14290 = vmatprep.subr.bf16.mxu1 %v15134_v29  ;;  %v3068_v54 = vsel %vm16202_vm14, %v12190_v19, %v3067_v0  ;;  %v16540_v26 = vld [vmem:[#allocation2 + $0x44] sm:$0x1]  ;;  %v3036_v40 = vld [vmem:[#allocation2 + $0x3c] sm:$0xe]  ;;  %v15148_v34 = vld [vmem:[%s21152_s3 + $0x150] sm:$0xff]  }
  0xb4   : > { %14276 = vmatprep.mubr.bf16.mxu1 %v12060_v10  ;;  %v12093_v9 = vcombine.low %v16487_v36, %v16505_v3  ;;  %v3069_v22 = vrot.slane %v3067_v0, 4  ;;  %v2842_v33 = vshrl.u32 %v16476_v50, 16  ;;  %v16523_v60 = vsel %vm16202_vm14, %v12191_v55, %v3074_v49  ;;  %v16549_v14 = vld [vmem:[#allocation2 + $0x24] sm:$0xf]  ;;  %v16698_v36 = vld [vmem:[%s21150_s1] ss:$0 sm:$0xff] }
  0xb5   : > { %v3076_v45 = vrot.slane %v3074_v49, 4  ;;  %v2845_v30 = vshll.u32 %v16476_v50, 16  ;;  %v2851_v57 = vshll.u32 %v16440_v24, 16  ;;  %v2855_v16 = vshrl.u32 %v16440_v24, 16  ;;  %14291 = vmatpush3.bf16.msra.mxu1 %v15134_v29 }
  0xb6   : > { %13387 = vmatpush3.bf16.msra.mxu0 %v15127_v15  ;;  %v3071_v37 = vsel %vm16202_vm14, %v3069_v22, %v3070_v53  ;;  %v2844_v20 = vrot.slane %v2842_v33, 4  ;;  %v2861_v2 = vshll.u32 %v16442_v43, 16  ;;  %14292 = vmatprep.subr.bf16.mxu1 %v15137_v12  ;;  %v15140_v15 = vld [vmem:[%s21152_s3 + $0x238] sm:$0xff]   ;;  %v12198_v25 = vcombine.low %v16476_v50, %v16440_v24  ;;  %v15143_v22 = vld [vmem:[%s21152_s3 + $0x140] sm:$0xff]  }
  0xb7   : > { %13388 = vmatprep.subr.bf16.mxu0 %v15129_v56  ;;  %v12214_v5 = vcombine.low %v3068_v54, %v3071_v37  ;;  %v16538_v51 = vsel %vm16202_vm14, %v3076_v45, %v3077_v59  ;;  %v2847_v39 = vrot.slane %v2845_v30, 5  ;;  %v2853_v52 = vrot.slane %v2851_v57, 5  ;;  %v15133_v53 = vld [vmem:[%s21152_s3 + $0x198] sm:$0xff]   ;;  %v16581_v45 = vld [vmem:[#allocation2 + $0x4c] sm:$0xf] }
  0xb8   : > { %v12215_v43 = vcombine.low %v16523_v60, %v16538_v51  ;;  %v2857_v10 = vrot.slane %v2855_v16, 4  ;;  %v2863_v29 = vrot.slane %v2861_v2, 5  ;;  %14277 = vmatmul.mubr.bf16.gmra.mrb[44].mxu1 %v12061_v8  ;;  %v12192_v48 = vrot.slane %v3035_v1, 9  ;;  %v16583_v30 = vld [vmem:[#allocation2 + $0x50] sm:$0x1] }
  0xb9   : > { %14237 = vmatmul.mubr.bf16.gmra.mrb[36].mxu0 %v12089_v44  ;;  %v2848_v56 = vor.u32 %v2847_v39, %v2844_v20  ;;  %v3081_v19 = vrot.slane %v16514_v62, 5  ;;  %v3084_v0 = vrot.slane %v16516_v13, 5  ;;  %v12193_v49 = vrot.slane %v3036_v40, 9  ;;  %v15135_v44 = vld [vmem:[%s21152_s3 + $0x1e0] sm:$0xff]   ;;  %14293 = vmatpush3.bf16.msra.mxu1 %v15137_v12  ;;  %v3038_v57 = vld [vmem:[#allocation2 + $0x54] sm:$0xe] }
  0xba   : > { %13389 = vmatpush3.bf16.msra.mxu0 %v15130_v21  ;;  %14240 = vmatprep.mubr.bf16.mxu0 %v12090_v27  ;;  %v2858_v55 = vor.u32 %v2857_v10, %v2853_v52  ;;  %v3088_v17 = vrot.slane %v16534_v6, 5  ;;  %v3091_v35 = vrot.slane %v16540_v26, 5  ;;  %v2866_v31 = vshrl.u32 %v16549_v14, 16  ;;  %v15136_v27 = vld [vmem:[%s21152_s3 + $0x1a0] sm:$0xff]   ;;  %v16590_v2 = vld [vmem:[#allocation2 + $0x58] sm:$0xf] }
  0xbb   : > { %13390 = vmatprep.subr.bf16.mxu0 %v15132_v7  ;;  %v2849_v8 = vrot.slane %v2848_v56, 4  ;;  %v3082_v59 = vsel %vm16202_vm14, %v12192_v48, %v3081_v19  ;;  %v3083_v54 = vrot.slane %v3081_v19, 4  ;;  %14294 = vmatprep.subr.bf16.mxu1 %v15140_v15  ;;  %v2869_v21 = vshll.u32 %v16549_v14, 16 }
  0xbc   : > { %14296 = vmatprep.mubr.bf16.mxu1 %v12214_v5  ;;  %v2859_v33 = vrot.slane %v2858_v55, 4  ;;  %v16578_v12 = vsel %vm16202_vm14, %v12193_v49, %v3088_v17  ;;  %v3090_v1 = vrot.slane %v3088_v17, 4  ;;  %v2868_v20 = vrot.slane %v2866_v31, 4  ;;  %v15138_v5 = vld [vmem:[%s21152_s3 + $0x1e8] sm:$0xff]  }
  0xbd   : > { %v2854_v7 = vsel %vm15716_vm2, %v2849_v8, %v2853_v52  ;;  %v3085_v37 = vsel %vm16202_vm14, %v3083_v54, %v3084_v0  ;;  %v2875_v16 = vshll.u32 %v16453_v11, 16  ;;  %v2871_v10 = vrot.slane %v2869_v21, 5  ;;  %14295 = vmatpush3.bf16.msra.mxu1 %v15140_v15  ;;  %v16613_v15 = vld [vmem:[#allocation2 + $0x30] sm:$0xf]  ;;  %v15139_v54 = vld [vmem:[%s21152_s3 + $0x1a8] sm:$0xff]  }
  0xbe   : > { %13391 = vmatpush3.bf16.msra.mxu0 %v15133_v53  ;;  %v2864_v39 = vsel %vm15716_vm2, %v2859_v33, %v2863_v29  ;;  %v12216_v40 = vcombine.low %v3082_v59, %v3085_v37  ;;  %v16599_v52 = vsel %vm16202_vm14, %v3090_v1, %v3091_v35  ;;  %v2879_v0 = vshrl.u32 %v16453_v11, 16  ;;  %v16608_v53 = vld [vmem:[#allocation2 + $0x5c] sm:$0x1]  ;;  %14312 = vmatprep.subr.bf16.mxu1 %v15143_v22  ;;  %v15146_v35 = vld [vmem:[%s21152_s3 + $0x148] sm:$0xff]   ;;  %v15142_v1 = vld [vmem:[%s21152_s3 + $0x1b0] sm:$0xff]  }
  0xbf   : > { %13392 = vmatprep.subr.bf16.mxu0 %v15135_v44  ;;  %v16601_v56 = vcombine.low %v2854_v7, %v2864_v39  ;;  %v12217_v48 = vcombine.low %v16578_v12, %v16599_v52  ;;  %v16605_v19 = vrot.slane %v2875_v16, 5  ;;  %v2872_v29 = vor.u32 %v2871_v10, %v2868_v20  ;;  %v16657_v7 = vld [vmem:[#allocation2 + $0x68] sm:$0x1]  ;;  %v3039_v37 = vld [vmem:[#allocation2 + $0x60] sm:$0xe] }
  0xc0   : > { %v2885_v55 = vshll.u32 %v16474_v18, 16  ;;  %v12199_v49 = vcombine.low %v16549_v14, %v16453_v11  ;;  %v12194_v17 = vrot.slane %v3037_v23, 9  ;;  %v2881_v44 = vrot.slane %v2879_v0, 4  ;;  %v15141_v23 = vld [vmem:[%s21152_s3 + $0x1f0] sm:$0xff]   ;;  %14297 = vmatmul.mubr.bf16.vlgmr.msra.gmra.mrb[32].mxu1 %v12215_v43  ;;  %v351_v10 = vld [vmem:[%s15728_s21 + $0x88] sm:$0xff]  ;;  %v15151_v12 = vld [vmem:[%s21152_s3 + $0x160] sm:$0xff]  }
  0xc1   : > { %14241 = vmatmul.mubr.bf16.gmra.mrb[40].mxu0 %v12091_v32  ;;  %v3095_v8 = vrot.slane %v16581_v45, 5  ;;  %v3098_v59 = vrot.slane %v16583_v30, 5  ;;  %v12195_v18 = vrot.slane %v3038_v57, 9  ;;  %v2873_v28 = vrot.slane %v2872_v29, 4  ;;  %14313 = vmatpush3.bf16.msra.mxu1 %v15143_v22  ;;  %v16655_v57 = vld [vmem:[#allocation2 + $0x64] sm:$0xf] }
  0xc2   : > { %13393 = vmatpush3.bf16.msra.mxu0 %v15136_v27  ;;  %14244 = vmatprep.mubr.bf16.mxu0 %v12092_v47  ;;  %v2887_v63 = vrot.slane %v2885_v55, 5  ;;  %v3102_v32 = vrot.slane %v16590_v2, 5  ;;  %v3105_v31 = vrot.slane %v16608_v53, 5  ;;  %v2882_v58 = vor.u32 %v2881_v44, %v16605_v19  ;;  %v15144_v22 = vld [vmem:[%s21152_s3 + $0x1f8] sm:$0xff]  }
  0xc3   : > { %13394 = vmatprep.subr.bf16.mxu0 %v15138_v5  ;;  %v3096_v47 = vsel %vm16202_vm14, %v12194_v17, %v3095_v8  ;;  %v3097_v27 = vrot.slane %v3095_v8, 4  ;;  %v2890_v33 = vshrl.u32 %v16613_v15, 16  ;;  %14300 = vmatprep.mubr.bf16.mxu1 %v12216_v40  ;;  %v2878_v60 = vsel %vm15716_vm2, %v2873_v28, %v16605_v19  ;;  %v350_v40 = vld [vmem:[%s15728_s21 + $0x80] sm:$0xff]  ;;  %v511_v17 = vld [vmem:[#allocation2 + $0x6c] sm:$0x1]  ;;  %v15149_v28 = vld [vmem:[%s21152_s3 + $0x158] sm:$0xff]  }
  0xc4   : > { %v16652_v51 = vsel %vm16202_vm14, %v12195_v18, %v3102_v32  ;;  %v3104_v43 = vrot.slane %v3102_v32, 4  ;;  %v2893_v21 = vshll.u32 %v16613_v15, 16  ;;  %14314 = vmatprep.subr.bf16.mxu1 %v15146_v35  ;;  %v2883_v20 = vrot.slane %v2882_v58, 4 }
  0xc5   : > { %v3099_v16 = vsel %vm16202_vm14, %v3097_v27, %v3098_v59  ;;  %v2892_v5 = vrot.slane %v2890_v33, 4  ;;  %v2899_v39 = vshll.u32 %v16514_v62, 16  ;;  %v2903_v55 = vshrl.u32 %v16514_v62, 16  ;;  %14315 = vmatpush3.bf16.msra.mxu1 %v15146_v35  ;;  %v16689_v27 = vld [vmem:[#allocation2 + $0x3c] sm:$0xf] }
  0xc6   : > { %13395 = vmatpush3.bf16.msra.mxu0 %v15139_v54  ;;  %v12218_v19 = vcombine.low %v3096_v47, %v3099_v16  ;;  %v16669_v0 = vsel %vm16202_vm14, %v3104_v43, %v3105_v31  ;;  %v2895_v29 = vrot.slane %v2893_v21, 5  ;;  %v2888_v44 = vsel %vm15716_vm2, %v2883_v20, %v2887_v63  ;;  %v561_v54 = vld [vmem:[#allocation2 + $0x74] sm:$0x1]  ;;  %14316 = vmatprep.subr.bf16.mxu1 %v15148_v34  ;;  %v15145_v33 = vld [vmem:[%s21152_s3 + $0x1b8] sm:$0xff]   ;;  %v15155_v20 = vld [vmem:[%s21152_s3 + $0x100] sm:$0xff]  }
  0xc7   : > { %13396 = vmatprep.subr.bf16.mxu0 %v15141_v23  ;;  %v12219_v8 = vcombine.low %v16652_v51, %v16669_v0  ;;  %v2901_v59 = vrot.slane %v2899_v39, 5  ;;  %v2909_v18 = vshll.u32 %v16516_v13, 16  ;;  %v16680_v32 = vcombine.low %v2878_v60, %v2888_v44  ;;  %v15156_v39 = vld [vmem:[%s21152_s3 + $0xc0] sm:$0xff]  }
  0xc8   : > { %v2896_v31 = vor.u32 %v2895_v29, %v2892_v5  ;;  %v2905_v58 = vrot.slane %v2903_v55, 4  ;;  %v12200_v23 = vcombine.low %v16613_v15, %v16514_v62  ;;  %v12196_v13 = vrot.slane %v3039_v37, 9  ;;  %14301 = vmatmul.mubr.bf16.gmra.mrb[36].mxu1 %v12217_v48 }
  0xc9   : > { %14245 = vmatmul.mubr.bf16.gmra.mrb[44].mxu0 %v12093_v9  ;;  %v2911_v63 = vrot.slane %v2909_v18, 5  ;;  %v3109_v35 = vrot.slane %v16655_v57, 5  ;;  %v3112_v47 = vrot.slane %v16657_v7, 5  ;;  %v389_v3 = vmul.f32 %v16698_v36, %v350_v40  ;;  %14317 = vmatpush3.bf16.msra.mxu1 %v15148_v34  ;;  %v353_v18 = vld [vmem:[%s15728_s21 + $0x98] sm:$0xff] }
  0xca   : > { %13397 = vmatpush3.bf16.msra.mxu0 %v15142_v1  ;;  %3450 = vmatprep.mubr.bf16.mxu0 %v16601_v56  ;;  %v2897_v60 = vrot.slane %v2896_v31, 4  ;;  %v2906_v43 = vor.u32 %v2905_v58, %v2901_v59  ;;  %v390_v9 = vmul.f32 %v16698_v36, %v351_v10  ;;  %v512_v21 = vsel %vm15755_vm6, 0, %v511_v17  ;;  %v15152_v31 = vld [vmem:[%s21152_s3 + $0x168] sm:$0xff]  }
  0xcb   : > { %13398 = vmatprep.subr.bf16.mxu0 %v15144_v22  ;;  %v16707_v1 = vsel %vm16202_vm14, %v12196_v13, %v3109_v35  ;;  %v3111_v56 = vrot.slane %v3109_v35, 4  ;;  %v562_v37 = vsel %vm15767_vm8, 0, %v561_v54  ;;  %14304 = vmatprep.mubr.bf16.mxu1 %v12218_v19  ;;  %v16724_v22 = vld [vmem:[%s21151_s2] ss:$0 sm:$0xff]  ;;  %513 = vst [vmem:[#allocation2 + $0x6c] sm:$0x1] %v512_v21  ;;  %v12201_v21 = vcombine.low %v16689_v27, %v16534_v6 }
  0xcc   : > { %v2902_v52 = vsel %vm15716_vm2, %v2897_v60, %v2901_v59  ;;  %v2907_v48 = vrot.slane %v2906_v43, 4  ;;  %v428_v16 = vadd.f32 %v16724_v22, %v389_v3  ;;  %v429_v34 = vadd.f32 %v16724_v22, %v390_v9  ;;  %563 = vst [vmem:[#allocation2 + $0x74] sm:$0x1] %v562_v37  ;;  %14318 = vmatprep.subr.bf16.mxu1 %v15149_v28  ;;  %v352_v59 = vld [vmem:[%s15728_s21 + $0x90] sm:$0xff]  ;;  %v514_v54 = vld [vmem:[#allocation2 + $0x78] sm:$0x1] }
  0xcd   : > { %v3113_v5 = vsel %vm16202_vm14, %v3111_v56, %v3112_v47  ;;  %v2914_v40 = vshrl.u32 %v16689_v27, 16  ;;  %v2917_v10 = vshll.u32 %v16689_v27, 16  ;;  %v2923_v19 = vshll.u32 %v16534_v6, 16  ;;  %14319 = vmatpush3.bf16.msra.mxu1 %v15149_v28 }
  0xce   : > { %13399 = vmatpush3.bf16.msra.mxu0 %v15145_v33  ;;  %v2912_v29 = vsel %vm15716_vm2, %v2907_v48, %v2911_v63  ;;  %v12220_v55 = vcombine.low %v16707_v1, %v3113_v5  ;;  %v460_v17 = vmax.f32 %v428_v16, 0.0  ;;  %v461_v44 = vmax.f32 %v429_v34, 0.0  ;;  %v564_v33 = vld [vmem:[#allocation2 + $0x80] sm:$0x1]  ;;  %v15160_v63 = vld [vmem:[%s21152_s3 + $0x108] sm:$0xff]   ;;  %14320 = vmatprep.subr.bf16.mxu1 %v15151_v12  ;;  %v15154_v34 = vld [vmem:[%s21152_s3 + $0x170] sm:$0xff]  }
  0xcf   : > { %v16744_v58 = vcombine.low %v2902_v52, %v2912_v29  ;;  %13464 = vmatprep.subr.bf16.mxu0 %v15155_v20  ;;  %v2916_v13 = vrot.slane %v2914_v40, 4  ;;  %v2919_v35 = vrot.slane %v2917_v10, 5  ;;  %v16746_v47 = vrot.slane %v2923_v19, 5  ;;  %v15161_v1 = vld [vmem:[%s21152_s3 + $0xc8] sm:$0xff]  }
  0xd0   : > { %v13176_v60 = vpack.c.bf16 %v460_v17, %v460_v17  ;;  %v13177_v43 = vpack.c.bf16 %v461_v44, %v461_v44  ;;  %v2927_v3 = vshrl.u32 %v16534_v6, 16  ;;  %v2933_v9 = vshll.u32 %v16540_v26, 16  ;;  %v15165_v26 = vld [vmem:[%s21152_s3 + $0x110] sm:$0xff]   ;;  %14305 = vmatmul.mubr.bf16.gmra.mrb[40].mxu1 %v12219_v8 }
  0xd1   : > { %3451 = vmatmul.mubr.bf16.vlgmr.msra.gmra.mrb[48].mxu0 %v12198_v25  ;;  %v2920_v56 = vor.u32 %v2919_v35, %v2916_v13  ;;  %v391_v28 = vmul.f32 %v16698_v36, %v352_v59  ;;  %v515_v37 = vsel %vm15755_vm6, 0, %v514_v54  ;;  %v16768_v25 = vld [vmem:[#allocation2 + $0x48] sm:$0xf]  ;;  %v392_v40 = vmul.f32 %v16698_v36, %v353_v18  ;;  %14321 = vmatpush3.bf16.msra.mxu1 %v15151_v12  ;;  %v15166_v12 = vld [vmem:[%s21152_s3 + $0xd0] sm:$0xff]  }
  0xd2   : > { %3458 = vmatprep.mubr.bf16.mxu0 %v16680_v32  ;;  %v820_v20 = vshrl.u32 %v13176_v60, 16  ;;  %v823_v52 = vshll.u32 %v13176_v60, 16  ;;  %v828_v24 = vshrl.u32 %v13177_v43, 16  ;;  %v831_v50 = vshll.u32 %v13177_v43, 16  ;;  %13465 = vmatpush3.bf16.msra.mxu0 %v15156_v39  ;;  %516 = vst [vmem:[#allocation2 + $0x78] sm:$0x1] %v515_v37 }
  0xd3   : > { %v1061_v48 = vld [vmem:[#allocation2 + $0x6c] sm:$0xf]  ;;  %v1065_v16 = vld [vmem:[#allocation2 + $0x74] sm:$0x1]  ;;  %v2921_v5 = vrot.slane %v2920_v56, 4  ;;  %v2929_v32 = vrot.slane %v2927_v3, 4  ;;  %v430_v10 = vadd.f32 %v16724_v22, %v391_v28  ;;  %13466 = vmatprep.subr.bf16.mxu0 %v15160_v63  ;;  %14308 = vmatprep.mubr.bf16.mxu1 %v12220_v55  ;;  %v431_v17 = vadd.f32 %v16724_v22, %v392_v40 }
  0xd4   : > { %v822_v39 = vrot.slane %v820_v20, 7  ;;  %v830_v19 = vrot.slane %v828_v24, 7  ;;  %v2935_v29 = vrot.slane %v2933_v9, 5  ;;  %v565_v51 = vsel %vm15767_vm8, 0, %v564_v33  ;;  %14322 = vmatprep.subr.bf16.mxu1 %v15152_v31  ;;  %v15157_v9 = vld [vmem:[%s21152_s3 + $0x178] sm:$0xff]   ;;  %v355_v20 = vld [vmem:[%s15728_s21 + $0xa8] sm:$0xff] }
  0xd5   : > { %v2926_v0 = vsel %vm15716_vm2, %v2921_v5, %v16746_v47  ;;  %v2930_v8 = vor.u32 %v2929_v32, %v16746_v47  ;;  %v462_v44 = vmax.f32 %v430_v10, 0.0  ;;  %566 = vst [vmem:[#allocation2 + $0x80] sm:$0x1] %v565_v51  ;;  %v463_v35 = vmax.f32 %v431_v17, 0.0  ;;  %v15170_v47 = vld [vmem:[%s21152_s3 + $0x118] sm:$0xff]   ;;  %14323 = vmatpush3.bf16.msra.mxu1 %v15152_v31  ;;  %v16820_v32 = vld [vmem:[%s21152_s3 + $0x80] sm:$0xff]  }
  0xd6   : > { %v825_v55 = vor.u32 %v823_v52, %v822_v39  ;;  %v826_v59 = vrot.slane %v822_v39, 4  ;;  %v833_v18 = vor.u32 %v831_v50, %v830_v19  ;;  %v835_v54 = vrot.slane %v830_v19, 4  ;;  %13467 = vmatpush3.bf16.msra.mxu0 %v15161_v1  ;;  %14324 = vmatprep.subr.bf16.mxu1 %v15154_v34  ;;  %v15171_v52 = vld [vmem:[%s21152_s3 + $0xd8] sm:$0xff]   ;;  %v15174_v50 = vld [vmem:[%s21152_s3 + $0x120] sm:$0xff]   ;;  %v356_v40 = vld [vmem:[%s15728_s21 + $0xb0] sm:$0xff] }
  0xd7   : > { %v2931_v13 = vrot.slane %v2930_v8, 4  ;;  %v13178_v33 = vpack.c.bf16 %v462_v44, %v462_v44  ;;  %v2938_v63 = vshrl.u32 %v16768_v25, 16  ;;  %13468 = vmatprep.subr.bf16.mxu0 %v15165_v26  ;;  %v2941_v1 = vshll.u32 %v16768_v25, 16  ;;  %v354_v26 = vld [vmem:[%s15728_s21 + $0xa0] sm:$0xff] }
  0xd8   : > { %v834_v60 = vsel %vm15813_vm11, %v826_v59, %v833_v18  ;;  %v1062_v43 = vsel %vm15803_vm10, %v825_v55, %v1061_v48  ;;  %v1066_v3 = vsel %vm15755_vm6, %v835_v54, %v1065_v16  ;;  %v13179_v56 = vpack.c.bf16 %v463_v35, %v463_v35  ;;  %v357_v55 = vld [vmem:[%s15728_s21 + $0xb8] sm:$0xff] }
  0xd9   : > { %3459 = vmatmul.mubr.bf16.gmra.mrb[52].mxu0 %v12199_v49  ;;  %1063 = vst [vmem:[#allocation2 + $0x6c] sm:$0xf] %v1062_v43  ;;  %1064 = vst [vmem:[#allocation2 + $0x70] sm:$0xf] %v834_v60  ;;  %v2936_v31 = vsel %vm15716_vm2, %v2931_v13, %v2935_v29  ;;  %v837_v28 = vshrl.u32 %v13178_v33, 16  ;;  %v840_v37 = vshll.u32 %v13178_v33, 16  ;;  %14325 = vmatpush3.bf16.msra.mxu1 %v15154_v34 }
  0xda   : > { %1067 = vst [vmem:[#allocation2 + $0x74] sm:$0x1] %v1066_v3  ;;  %3466 = vmatprep.mubr.bf16.mxu0 %v16744_v58  ;;  %v12209_v11 = vcombine.low %v2926_v0, %v2936_v31  ;;  %v2940_v14 = vrot.slane %v2938_v63, 4  ;;  %v2943_v49 = vrot.slane %v2941_v1, 5  ;;  %v2947_v24 = vshll.u32 %v16581_v45, 16  ;;  %13469 = vmatpush3.bf16.msra.mxu0 %v15166_v12  ;;  %v15175_v34 = vld [vmem:[%s21152_s3 + $0xe0] sm:$0xff]  }
  0xdb   : > { %v839_v48 = vrot.slane %v837_v28, 7  ;;  %v845_v16 = vshrl.u32 %v13179_v56, 16  ;;  %v848_v5 = vshll.u32 %v13179_v56, 16  ;;  %v2951_v58 = vshrl.u32 %v16581_v45, 16  ;;  %13470 = vmatprep.subr.bf16.mxu0 %v15170_v47  ;;  %v1068_v10 = vld [vmem:[#allocation2 + $0x78] sm:$0xf]  ;;  %14326 = vmatprep.subr.bf16.mxu1 %v15157_v9 }
  0xdc   : > { %v2944_v39 = vor.u32 %v2943_v49, %v2940_v14  ;;  %v16824_v19 = vrot.slane %v2947_v24, 5  ;;  %v2957_v29 = vshll.u32 %v16583_v30, 16  ;;  %v12202_v51 = vcombine.low %v16768_v25, %v16581_v45  ;;  %v1072_v44 = vld [vmem:[#allocation2 + $0x80] sm:$0x1]  ;;  %v15177_v47 = vld [vmem:[%s21152_s3 + $0x128] sm:$0xff]   ;;  %v361_v45 = vld [vmem:[%s15728_s21 + $0xd8] sm:$0xff] }
  0xdd   : > { %v842_v0 = vor.u32 %v840_v37, %v839_v48  ;;  %v843_v8 = vrot.slane %v839_v48, 4  ;;  %v847_v17 = vrot.slane %v845_v16, 7  ;;  %v2953_v12 = vrot.slane %v2951_v58, 4  ;;  %14327 = vmatpush3.bf16.msra.mxu1 %v15157_v9  ;;  %v517_v28 = vld [vmem:[#allocation2 + $0x84] sm:$0x1]  ;;  %v15178_v49 = vld [vmem:[%s21152_s3 + $0xe8] sm:$0xff]  }
  0xde   : > { %v2945_v59 = vrot.slane %v2944_v39, 4  ;;  %v2959_v18 = vrot.slane %v2957_v29, 5  ;;  %v393_v54 = vmul.f32 %v16698_v36, %v354_v26  ;;  %v394_v30 = vmul.f32 %v16698_v36, %v355_v20  ;;  %13471 = vmatpush3.bf16.msra.mxu0 %v15171_v52  ;;  %14344 = vmatprep.subr.bf16.mxu1 %v16820_v32 }
  0xdf   : > { %v850_v13 = vor.u32 %v848_v5, %v847_v17  ;;  %v852_v35 = vrot.slane %v847_v17, 4  ;;  %v1069_v33 = vsel %vm15803_vm10, %v842_v0, %v1068_v10  ;;  %v2954_v63 = vor.u32 %v2953_v12, %v16824_v19  ;;  %13472 = vmatprep.subr.bf16.mxu0 %v15174_v50  ;;  %v15181_v10 = vld [vmem:[%s21152_s3 + $0x130] sm:$0xff]  }
  0xe0   : > { %v16841_v60 = vld [vmem:[#allocation2 + $0x70] sm:$0xf]  ;;  %v3040_v3 = vld [vmem:[#allocation2 + $0x6c] sm:$0xe]  ;;  %1070 = vst [vmem:[#allocation2 + $0x78] sm:$0xf] %v1069_v33  ;;  %v2950_v1 = vsel %vm15716_vm2, %v2945_v59, %v16824_v19  ;;  %v432_v31 = vadd.f32 %v16724_v22, %v393_v54  ;;  %v433_v56 = vadd.f32 %v16724_v22, %v394_v30  ;;  %v395_v37 = vmul.f32 %v16698_v36, %v356_v40 }
  0xe1   : > { %v16843_v43 = vld [vmem:[#allocation2 + $0x74] sm:$0x1]  ;;  %3467 = vmatmul.mubr.bf16.gmra.mrb[56].mxu0 %v12200_v23  ;;  %v12197_v26 = vrot.slane %v3040_v3, 9  ;;  %v3116_v20 = vrot.slane %v16841_v60, 5  ;;  %v16856_v52 = vld [vmem:[#allocation2 + $0x70] sm:$0xf]  ;;  %v851_v14 = vsel %vm15813_vm11, %v843_v8, %v850_v13  ;;  %v1073_v23 = vsel %vm15755_vm6, %v852_v35, %v1072_v44 }
  0xe2   : > { %v3119_v9 = vrot.slane %v16843_v43, 5  ;;  %3474 = vmatprep.mubr.bf16.mxu0 %v12209_v11  ;;  %v16864_v24 = vld [vmem:[#allocation2 + $0x74] sm:$0x1]  ;;  %v4628_v62 = vld [vmem:[#allocation2 + $0x6c] sm:$0xe]  ;;  %v4662_v15 = vrot.slane %v16856_v52, 5  ;;  %v396_v48 = vmul.f32 %v16698_v36, %v357_v55  ;;  %13473 = vmatpush3.bf16.msra.mxu0 %v15175_v34 }
  0xe3   : > { %1071 = vst [vmem:[#allocation2 + $0x7c] sm:$0xf] %v851_v14  ;;  %v2955_v50 = vrot.slane %v2954_v63, 4  ;;  %v3117_v16 = vsel %vm16202_vm14, %v12197_v26, %v3116_v20  ;;  %v3118_v5 = vrot.slane %v3116_v20, 4  ;;  %v12344_v58 = vrot.slane %v4628_v62, 9  ;;  %13474 = vmatprep.subr.bf16.mxu0 %v15177_v47  ;;  %v15185_v33 = vld [vmem:[%s21152_s3 + $0x138] sm:$0xff]  }
  0xe4   : > { %v4665_v11 = vrot.slane %v16864_v24, 5  ;;  %1074 = vst [vmem:[#allocation2 + $0x80] sm:$0x1] %v1073_v23  ;;  %v567_v40 = vld [vmem:[#allocation2 + $0x8c] sm:$0x1]  ;;  %v4664_v39 = vrot.slane %v4662_v15, 4 }
  0xe5   : > { %v2960_v19 = vsel %vm15716_vm2, %v2955_v50, %v2959_v18  ;;  %v464_v29 = vmax.f32 %v432_v31, 0.0  ;;  %v465_v0 = vmax.f32 %v433_v56, 0.0  ;;  %v520_v8 = vld [vmem:[#allocation2 + $0x90] sm:$0x1]  ;;  %v3120_v17 = vsel %vm16202_vm14, %v3118_v5, %v3119_v9  ;;  %v570_v34 = vld [vmem:[#allocation2 + $0x98] sm:$0x1] }
  0xe6   : > { %v4663_v44 = vsel %vm16202_vm14, %v12344_v58, %v4662_v15  ;;  %v12210_v12 = vcombine.low %v2950_v1, %v2960_v19  ;;  %v518_v55 = vsel %vm15755_vm6, 0, %v517_v28  ;;  %v16884_v59 = vld [vmem:[#allocation2 + $0x54] sm:$0xf]  ;;  %v12221_v54 = vcombine.low %v3117_v16, %v3120_v17  ;;  %13475 = vmatpush3.bf16.msra.mxu0 %v15178_v49  ;;  %v15186_v9 = vld [vmem:[%s21152_s3 + $0xf8] sm:$0xff]   ;;  %v15162_v19 = vld [vmem:[%s21152_s3 + $0x88] sm:$0xff]  }
  0xe7   : > { %v15182_v18 = vld [vmem:[%s21152_s3 + $0xf0] sm:$0xff]   ;;  %v4666_v30 = vsel %vm16202_vm14, %v4664_v39, %v4665_v11  ;;  %519 = vst [vmem:[#allocation2 + $0x84] sm:$0x1] %v518_v55  ;;  %v568_v13 = vsel %vm15767_vm8, 0, %v567_v40  ;;  %v13180_v35 = vpack.c.bf16 %v464_v29, %v464_v29  ;;  %v4629_v47 = vld [vmem:[#allocation2 + $0x78] sm:$0xe]  ;;  %v13181_v3 = vpack.c.bf16 %v465_v0, %v465_v0  ;;  %13476 = vmatprep.subr.bf16.mxu0 %v15181_v10 }
  0xe8   : > { %v12368_v63 = vcombine.low %v4663_v44, %v4666_v30  ;;  %569 = vst [vmem:[#allocation2 + $0x8c] sm:$0x1] %v568_v13  ;;  %v434_v1 = vadd.f32 %v16724_v22, %v395_v37  ;;  %v435_v31 = vadd.f32 %v16724_v22, %v396_v48  ;;  %14309 = vmatmul.mubr.bf16.gmra.mrb[44].mxu1 %v12221_v54  ;;  %v12345_v56 = vrot.slane %v4629_v47, 9 }
  0xe9   : > { %v854_v28 = vshrl.u32 %v13180_v35, 16  ;;  %v857_v26 = vshll.u32 %v13180_v35, 16  ;;  %v521_v20 = vsel %vm15755_vm6, 0, %v520_v8  ;;  %3475 = vmatmul.mubr.bf16.gmra.mrb[60].mxu0 %v12201_v21  ;;  %v862_v14 = vshrl.u32 %v13181_v3, 16 }
  0xea   : > { %14328 = vmatprep.mubr.bf16.mxu1 %v12368_v63  ;;  %v16906_v37 = vld [vmem:[#allocation2 + $0x7c] sm:$0xf]  ;;  %v865_v49 = vshll.u32 %v13181_v3, 16  ;;  %v466_v62 = vmax.f32 %v434_v1, 0.0  ;;  %v467_v15 = vmax.f32 %v435_v31, 0.0  ;;  %3482 = vmatprep.mubr.bf16.mxu0 %v12210_v12  ;;  %v571_v16 = vsel %vm15767_vm8, 0, %v570_v34 }
  0xeb   : > { %522 = vst [vmem:[#allocation2 + $0x90] sm:$0x1] %v521_v20  ;;  %v16908_v23 = vld [vmem:[#allocation2 + $0x80] sm:$0x1]  ;;  %v4669_v50 = vrot.slane %v16906_v37, 5  ;;  %v856_v48 = vrot.slane %v854_v28, 7  ;;  %13477 = vmatpush3.bf16.msra.mxu0 %v15182_v18 }
  0xec   : > { %v2962_v6 = vshrl.u32 %v16884_v59, 16  ;;  %v4672_v27 = vrot.slane %v16908_v23, 5  ;;  %v864_v21 = vrot.slane %v862_v14, 7  ;;  %572 = vst [vmem:[#allocation2 + $0x98] sm:$0x1] %v571_v16  ;;  %v13182_v5 = vpack.c.bf16 %v466_v62, %v466_v62  ;;  %13478 = vmatprep.subr.bf16.mxu0 %v15185_v33  ;;  %v358_v63 = vld [vmem:[%s15728_s21 + $0xc0] sm:$0xff] }
  0xed   : > { %v13183_v58 = vpack.c.bf16 %v467_v15, %v467_v15  ;;  %v4670_v11 = vsel %vm16202_vm14, %v12345_v56, %v4669_v50  ;;  %v4671_v40 = vrot.slane %v4669_v50, 4  ;;  %v859_v10 = vor.u32 %v857_v26, %v856_v48  ;;  %v359_v28 = vld [vmem:[%s15728_s21 + $0xc8] sm:$0xff]  ;;  %v523_v26 = vld [vmem:[#allocation2 + $0x9c] sm:$0x1]  ;;  %v573_v20 = vld [vmem:[#allocation2 + $0xa4] sm:$0x1] }
  0xee   : > { %v860_v39 = vrot.slane %v856_v48, 4  ;;  %v867_v29 = vor.u32 %v865_v49, %v864_v21  ;;  %v869_v0 = vrot.slane %v864_v21, 4  ;;  %v1075_v8 = vld [vmem:[#allocation2 + $0x84] sm:$0xf]  ;;  %v871_v17 = vshrl.u32 %v13182_v5, 16  ;;  %v15164_v49 = vld [vmem:[%s21152_s3 + $0x90] sm:$0xff]  }
  0xef   : > { %v874_v44 = vshll.u32 %v13182_v5, 16  ;;  %v4673_v12 = vsel %vm16202_vm14, %v4671_v40, %v4672_v27  ;;  %v1076_v55 = vsel %vm15803_vm10, %v859_v10, %v1075_v8  ;;  %v1079_v34 = vld [vmem:[#allocation2 + $0x8c] sm:$0x1]  ;;  %v879_v18 = vshrl.u32 %v13183_v58, 16  ;;  %13479 = vmatpush3.bf16.msra.mxu0 %v15186_v9  ;;  %v360_v50 = vld [vmem:[%s15728_s21 + $0xd0] sm:$0xff] }
  0xf0   : > { %v882_v54 = vshll.u32 %v13183_v58, 16  ;;  %v12369_v30 = vcombine.low %v4670_v11, %v4673_v12  ;;  %v868_v13 = vsel %vm15813_vm11, %v860_v39, %v867_v29  ;;  %1077 = vst [vmem:[#allocation2 + $0x84] sm:$0xf] %v1076_v55  ;;  %v1080_v35 = vsel %vm15755_vm6, %v869_v0, %v1079_v34 }
  0xf1   : > { %v873_v33 = vrot.slane %v871_v17, 7  ;;  %1078 = vst [vmem:[#allocation2 + $0x88] sm:$0xf] %v868_v13  ;;  %1081 = vst [vmem:[#allocation2 + $0x8c] sm:$0x1] %v1080_v35  ;;  %v881_v47 = vrot.slane %v879_v18, 7  ;;  %3483 = vmatmul.mubr.bf16.gmra.mrb[64].mxu0 %v12202_v51  ;;  %v12203_v58 = vcombine.low %v16884_v59, %v16590_v2  ;;  %v397_v40 = vmul.f32 %v16698_v36, %v358_v63 }
  0xf2   : > { %v1082_v3 = vld [vmem:[#allocation2 + $0x90] sm:$0xf]  ;;  %v2964_v1 = vrot.slane %v2962_v6, 4  ;;  %v2965_v31 = vshll.u32 %v16884_v59, 16  ;;  %v2971_v56 = vshll.u32 %v16590_v2, 16  ;;  %14329 = vmatmul.mubr.bf16.vlgmr.msra.gmra.mrb[48].mxu1 %v12369_v30  ;;  %v2975_v62 = vshrl.u32 %v16590_v2, 16 }
  0xf3   : > { %v876_v9 = vor.u32 %v874_v44, %v873_v33  ;;  %v877_v14 = vrot.slane %v873_v33, 4  ;;  %v2981_v15 = vshll.u32 %v16608_v53, 16  ;;  %14345 = vmatpush3.bf16.msra.mxu1 %v16820_v32  ;;  %v884_v48 = vor.u32 %v882_v54, %v881_v47  ;;  %v1086_v6 = vld [vmem:[#allocation2 + $0x98] sm:$0x1]  ;;  %v16963_v18 = vld [vmem:[#allocation2 + $0x60] sm:$0xf] }
  0xf4   : > { %v886_v16 = vrot.slane %v881_v47, 4  ;;  %v2967_v27 = vrot.slane %v2965_v31, 5  ;;  %v2973_v21 = vrot.slane %v2971_v56, 5  ;;  %14346 = vmatprep.subr.bf16.mxu1 %v15162_v19  ;;  %v2977_v51 = vrot.slane %v2975_v62, 4  ;;  %v15167_v17 = vld [vmem:[%s21152_s3 + $0x98] sm:$0xff]   ;;  %v15172_v2 = vld [vmem:[%s21152_s3 + $0xa8] sm:$0xff]  }
  0xf5   : > { %v1083_v25 = vsel %vm15803_vm10, %v876_v9, %v1082_v3  ;;  %v2983_v5 = vrot.slane %v2981_v15, 5  ;;  %v885_v53 = vsel %vm15813_vm11, %v877_v14, %v884_v48  ;;  %v398_v39 = vmul.f32 %v16698_v36, %v359_v28  ;;  %v526_v31 = vld [vmem:[#allocation2 + $0xa8] sm:$0x1]  ;;  %v576_v9 = vld [vmem:[#allocation2 + $0xb0] sm:$0x1]  ;;  %v362_v14 = vld [vmem:[%s15728_s21 + $0xe0] sm:$0xff] }
  0xf6   : > { %1084 = vst [vmem:[#allocation2 + $0x90] sm:$0xf] %v1083_v25  ;;  %v1087_v32 = vsel %vm15755_vm6, %v886_v16, %v1086_v6  ;;  %v2968_v11 = vor.u32 %v2967_v27, %v2964_v1  ;;  %1085 = vst [vmem:[#allocation2 + $0x94] sm:$0xf] %v885_v53  ;;  %v2978_v10 = vor.u32 %v2977_v51, %v2973_v21  ;;  %v524_v29 = vsel %vm15755_vm6, 0, %v523_v26  ;;  %v15169_v16 = vld [vmem:[%s21152_s3 + $0xa0] sm:$0xff]  }
  0xf7   : > { %1088 = vst [vmem:[#allocation2 + $0x98] sm:$0x1] %v1087_v32  ;;  %v574_v0 = vsel %vm15767_vm8, 0, %v573_v20  ;;  %14347 = vmatpush3.bf16.msra.mxu1 %v15162_v19  ;;  %v4630_v8 = vld [vmem:[#allocation2 + $0x84] sm:$0xe]  ;;  %v436_v12 = vadd.f32 %v16724_v22, %v397_v40  ;;  %v399_v55 = vmul.f32 %v16698_v36, %v360_v50  ;;  %v400_v34 = vmul.f32 %v16698_v36, %v361_v45 }
  0xf8   : > { %v2969_v44 = vrot.slane %v2968_v11, 4  ;;  %525 = vst [vmem:[#allocation2 + $0x9c] sm:$0x1] %v524_v29  ;;  %575 = vst [vmem:[#allocation2 + $0xa4] sm:$0x1] %v574_v0  ;;  %v12346_v19 = vrot.slane %v4630_v8, 9  ;;  %14348 = vmatprep.subr.bf16.mxu1 %v15164_v49  ;;  %v437_v35 = vadd.f32 %v16724_v22, %v398_v39  ;;  %v12204_v33 = vcombine.low %v16963_v18, %v16655_v57 }
  0xf9   : > { %v16965_v54 = vld [vmem:[#allocation2 + $0x88] sm:$0xf]  ;;  %v16967_v30 = vld [vmem:[#allocation2 + $0x8c] sm:$0x1]  ;;  %v2979_v13 = vrot.slane %v2978_v10, 4  ;;  %v468_v1 = vmax.f32 %v436_v12, 0.0  ;;  %v438_v26 = vadd.f32 %v16724_v22, %v399_v55  ;;  %v439_v20 = vadd.f32 %v16724_v22, %v400_v34 }
  0xfa   : > { %v4676_v63 = vrot.slane %v16965_v54, 5  ;;  %v4679_v47 = vrot.slane %v16967_v30, 5  ;;  %v2974_v3 = vsel %vm15716_vm2, %v2969_v44, %v2973_v21  ;;  %v469_v28 = vmax.f32 %v437_v35, 0.0  ;;  %v15202_v51 = vld [vmem:[%s21152_s3 + $0x40] sm:$0xff]  }
  0xfb   : > { %v2984_v56 = vsel %vm15716_vm2, %v2979_v13, %v2983_v5  ;;  %14349 = vmatpush3.bf16.msra.mxu1 %v15164_v49  ;;  %v13184_v48 = vpack.c.bf16 %v468_v1, %v468_v1  ;;  %v470_v21 = vmax.f32 %v438_v26, 0.0  ;;  %v471_v45 = vmax.f32 %v439_v20, 0.0  ;;  %13544 = vmatprep.subr.bf16.mxu0 %v15202_v51 }
  0xfc   : > { %v4677_v62 = vsel %vm16202_vm14, %v12346_v19, %v4676_v63  ;;  %v4678_v15 = vrot.slane %v4676_v63, 4  ;;  %v12211_v50 = vcombine.low %v2974_v3, %v2984_v56  ;;  %14350 = vmatprep.subr.bf16.mxu1 %v15167_v17  ;;  %v13185_v27 = vpack.c.bf16 %v469_v28, %v469_v28 }
  0xfd   : > { %v4631_v6 = vld [vmem:[#allocation2 + $0x90] sm:$0xe]  ;;  %v527_v25 = vsel %vm15755_vm6, 0, %v526_v31  ;;  %v16993_v5 = vld [vmem:[#allocation2 + $0x94] sm:$0xf]  ;;  %v888_v11 = vshrl.u32 %v13184_v48, 16  ;;  %v16998_v40 = vmul.f32 %v16698_v36, %v362_v14  ;;  %v13186_v35 = vpack.c.bf16 %v470_v21, %v470_v21 }
  0xfe   : > { %v4680_v49 = vsel %vm16202_vm14, %v4678_v15, %v4679_v47  ;;  %v16995_v53 = vld [vmem:[#allocation2 + $0x98] sm:$0x1]  ;;  %v12347_v32 = vrot.slane %v4631_v6, 9  ;;  %3490 = vmatprep.mubr.bf16.mxu0 %v12211_v50  ;;  %528 = vst [vmem:[#allocation2 + $0xa8] sm:$0x1] %v527_v25  ;;  %v4683_v39 = vrot.slane %v16993_v5, 5  ;;  %v13187_v63 = vpack.c.bf16 %v471_v45, %v471_v45 }
  0xff   : > { %v12370_v10 = vcombine.low %v4677_v62, %v4680_v49  ;;  %v4686_v29 = vrot.slane %v16995_v53, 5  ;;  %3491 = vmatmul.mubr.bf16.gmra.mrb[68].mxu0 %v12203_v58  ;;  %v891_v0 = vshll.u32 %v13184_v48, 16  ;;  %14351 = vmatpush3.bf16.msra.mxu1 %v15167_v17  ;;  %v890_v8 = vrot.slane %v888_v11, 7  ;;  %v1089_v13 = vld [vmem:[#allocation2 + $0x9c] sm:$0xf]  ;;  %v363_v6 = vld [vmem:[%s15728_s21 + $0xe8] sm:$0xff] }
 0x100   : > { %v896_v44 = vshrl.u32 %v13185_v27, 16  ;;  %v899_v12 = vshll.u32 %v13185_v27, 16  ;;  %v577_v55 = vsel %vm15767_vm8, 0, %v576_v9  ;;  %v4684_v34 = vsel %vm16202_vm14, %v12347_v32, %v4683_v39  ;;  %14352 = vmatprep.subr.bf16.mxu1 %v15169_v16  ;;  %v1093_v47 = vld [vmem:[#allocation2 + $0xa4] sm:$0x1]  ;;  %v15176_v27 = vld [vmem:[%s21152_s3 + $0xb0] sm:$0xff]  }
 0x101   : > { %14332 = vmatprep.mubr.bf16.mxu1 %v12370_v10  ;;  %v4685_v19 = vrot.slane %v4683_v39, 4  ;;  %578 = vst [vmem:[#allocation2 + $0xb0] sm:$0x1] %v577_v55  ;;  %v893_v59 = vor.u32 %v891_v0, %v890_v8  ;;  %v894_v58 = vrot.slane %v890_v8, 4  ;;  %v2986_v3 = vshrl.u32 %v16963_v18, 16  ;;  %v364_v11 = vld [vmem:[%s15728_s21 + $0xf0] sm:$0xff] }
 0x102   : > { %v898_v17 = vrot.slane %v896_v44, 7  ;;  %v905_v31 = vshrl.u32 %v13186_v35, 16  ;;  %v908_v56 = vshll.u32 %v13186_v35, 16  ;;  %v913_v28 = vshrl.u32 %v13187_v63, 16  ;;  %v529_v49 = vld [vmem:[#allocation2 + $0xb4] sm:$0x1] }
 0x103   : > { %v4687_v1 = vsel %vm16202_vm14, %v4685_v19, %v4686_v29  ;;  %v1090_v14 = vsel %vm15803_vm10, %v893_v59, %v1089_v13  ;;  %14353 = vmatpush3.bf16.msra.mxu1 %v15169_v16  ;;  %v916_v50 = vshll.u32 %v13187_v63, 16  ;;  %v2988_v48 = vrot.slane %v2986_v3, 4  ;;  %v579_v32 = vld [vmem:[#allocation2 + $0xbc] sm:$0x1]  ;;  %v532_v35 = vld [vmem:[#allocation2 + $0xc0] sm:$0x1] }
 0x104   : > { %v12371_v26 = vcombine.low %v4684_v34, %v4687_v1  ;;  %v901_v20 = vor.u32 %v899_v12, %v898_v17  ;;  %v903_v9 = vrot.slane %v898_v17, 4  ;;  %1091 = vst [vmem:[#allocation2 + $0x9c] sm:$0xf] %v1090_v14  ;;  %v907_v62 = vrot.slane %v905_v31, 7  ;;  %14354 = vmatprep.subr.bf16.mxu1 %v15172_v2  ;;  %v365_v8 = vld [vmem:[%s15728_s21 + $0xf8] sm:$0xff] }
 0x105   : > { %v915_v15 = vrot.slane %v913_v28, 7  ;;  %v1096_v45 = vld [vmem:[#allocation2 + $0xa8] sm:$0xf]  ;;  %v2989_v25 = vshll.u32 %v16963_v18, 16  ;;  %v2995_v51 = vshll.u32 %v16655_v57, 16  ;;  %v15179_v44 = vld [vmem:[%s21152_s3 + $0xb8] sm:$0xff]   ;;  %v402_v17 = vmul.f32 %v16698_v36, %v363_v6 }
 0x106   : > { %14333 = vmatmul.mubr.bf16.gmra.mrb[52].mxu1 %v12371_v26  ;;  %v902_v21 = vsel %vm15813_vm11, %v894_v58, %v901_v20  ;;  %v1094_v16 = vsel %vm15755_vm6, %v903_v9, %v1093_v47  ;;  %v910_v10 = vor.u32 %v908_v56, %v907_v62  ;;  %v911_v39 = vrot.slane %v907_v62, 4  ;;  %v15183_v6 = vld [vmem:[%s21152_s3 + $0x1c0] sm:$0xff]   ;;  %v17502_v61 = vld [vmem:[#allocation2 + $0x98] sm:$0x1] }
 0x107   : > { %1092 = vst [vmem:[#allocation2 + $0xa0] sm:$0xf] %v902_v21  ;;  %1095 = vst [vmem:[#allocation2 + $0xa4] sm:$0x1] %v1094_v16  ;;  %v918_v29 = vor.u32 %v916_v50, %v915_v15  ;;  %v920_v0 = vrot.slane %v915_v15, 4  ;;  %14355 = vmatpush3.bf16.msra.mxu1 %v15172_v2  ;;  %v2991_v55 = vrot.slane %v2989_v25, 5  ;;  %v441_v1 = vadd.f32 %v16724_v22, %v402_v17 }
 0x108   : > { %v1100_v12 = vld [vmem:[#allocation2 + $0xb0] sm:$0x1]  ;;  %v2997_v34 = vrot.slane %v2995_v51, 5  ;;  %v2999_v19 = vshrl.u32 %v16655_v57, 16  ;;  %v3005_v13 = vshll.u32 %v16657_v7, 16  ;;  %v1097_v59 = vsel %vm15803_vm10, %v910_v10, %v1096_v45  ;;  %14356 = vmatprep.subr.bf16.mxu1 %v15176_v27  ;;  %21227 = vst [vmem:[#allocation12_spill] sm:$0xff] %v17502_v61 }
 0x109   : > { %v919_v63 = vsel %vm15813_vm11, %v911_v39, %v918_v29  ;;  %v1101_v58 = vsel %vm15755_vm6, %v920_v0, %v1100_v12  ;;  %1098 = vst [vmem:[#allocation2 + $0xa8] sm:$0xf] %v1097_v59  ;;  %v2992_v2 = vor.u32 %v2991_v55, %v2988_v48  ;;  %v440_v7 = vadd.f32 %v16724_v22, %v16998_v40 }
 0x10a   : > { %1099 = vst [vmem:[#allocation2 + $0xac] sm:$0xf] %v919_v63  ;;  %1102 = vst [vmem:[#allocation2 + $0xb0] sm:$0x1] %v1101_v58  ;;  %v3001_v47 = vrot.slane %v2999_v19, 4  ;;  %v3007_v3 = vrot.slane %v3005_v13, 5  ;;  %v403_v28 = vmul.f32 %v16698_v36, %v364_v11  ;;  %v404_v62 = vmul.f32 %v16698_v36, %v365_v8 }
 0x10b   : > { %v530_v31 = vsel %vm15755_vm6, 0, %v529_v49  ;;  %v580_v56 = vsel %vm15767_vm8, 0, %v579_v32  ;;  %v4632_v26 = vld [vmem:[#allocation2 + $0x9c] sm:$0xe]  ;;  %v2993_v20 = vrot.slane %v2992_v2, 4  ;;  %v472_v14 = vmax.f32 %v440_v7, 0.0  ;;  %14357 = vmatpush3.bf16.msra.mxu1 %v15176_v27 }
 0x10c   : > { %v3002_v9 = vor.u32 %v3001_v47, %v2997_v34  ;;  %531 = vst [vmem:[#allocation2 + $0xb4] sm:$0x1] %v530_v31  ;;  %581 = vst [vmem:[#allocation2 + $0xbc] sm:$0x1] %v580_v56  ;;  %v12348_v40 = vrot.slane %v4632_v26, 9  ;;  %v473_v15 = vmax.f32 %v441_v1, 0.0  ;;  %v442_v50 = vadd.f32 %v16724_v22, %v403_v28  ;;  %14358 = vmatprep.subr.bf16.mxu1 %v15179_v44 }
 0x10d   : > { %v533_v48 = vsel %vm15755_vm6, 0, %v532_v35  ;;  %v2998_v36 = vsel %vm15716_vm2, %v2993_v20, %v2997_v34  ;;  %v13188_v45 = vpack.c.bf16 %v472_v14, %v472_v14  ;;  %v443_v25 = vadd.f32 %v16724_v22, %v404_v62  ;;  %v582_v8 = vld [vmem:[#allocation2 + $0xc8] sm:$0x1] }
 0x10e   : > { %v17056_v21 = vld [vmem:[#allocation2 + $0xa0] sm:$0xf]  ;;  %v17058_v16 = vld [vmem:[#allocation2 + $0xa4] sm:$0x1]  ;;  %v3003_v27 = vrot.slane %v3002_v9, 4  ;;  %v13189_v32 = vpack.c.bf16 %v473_v15, %v473_v15  ;;  %v474_v11 = vmax.f32 %v442_v50, 0.0 }
 0x10f   : > { %534 = vst [vmem:[#allocation2 + $0xc0] sm:$0x1] %v533_v48  ;;  %v4690_v51 = vrot.slane %v17056_v21, 5  ;;  %v4693_v49 = vrot.slane %v17058_v16, 5  ;;  %v922_v39 = vshrl.u32 %v13188_v45, 16  ;;  %v925_v29 = vshll.u32 %v13188_v45, 16  ;;  %14359 = vmatpush3.bf16.msra.mxu1 %v15179_v44 }
 0x110   : > { %v3008_v10 = vsel %vm15716_vm2, %v3003_v27, %v3007_v3  ;;  %v475_v0 = vmax.f32 %v443_v25, 0.0  ;;  %v930_v13 = vshrl.u32 %v13189_v32, 16  ;;  %13624 = vmatprep.subr.bf16.mxu1 %v15183_v6  ;;  %v4633_v35 = vld [vmem:[#allocation2 + $0xa8] sm:$0xe]  ;;  %v933_v17 = vshll.u32 %v13189_v32, 16 }
 0x111   : > { %v4691_v12 = vsel %vm16202_vm14, %v12348_v40, %v4690_v51  ;;  %v4692_v55 = vrot.slane %v4690_v51, 4  ;;  %v17069_v22 = vld [vmem:[#allocation2 + $0xac] sm:$0xf]  ;;  %v17071_v34 = vld [vmem:[#allocation2 + $0xb0] sm:$0x1]  ;;  %v12212_v19 = vcombine.low %v2998_v36, %v3008_v10  ;;  %v924_v58 = vrot.slane %v922_v39, 7 }
 0x112   : > { %v4697_v63 = vrot.slane %v17069_v22, 5  ;;  %v4700_v59 = vrot.slane %v17071_v34, 5  ;;  %v12349_v2 = vrot.slane %v4633_v35, 9  ;;  %v932_v47 = vrot.slane %v930_v13, 7  ;;  %v17084_v40 = vld [vmem:[#allocation2 + $0x6c] sm:$0xf] }
 0x113   : > { %v4694_v44 = vsel %vm16202_vm14, %v4692_v55, %v4693_v49  ;;  %3498 = vmatprep.mubr.bf16.mxu0 %v12212_v19  ;;  %v1103_v3 = vld [vmem:[#allocation2 + $0xb4] sm:$0xf]  ;;  %v13190_v7 = vpack.c.bf16 %v474_v11, %v474_v11  ;;  %v927_v56 = vor.u32 %v925_v29, %v924_v58  ;;  %v928_v28 = vrot.slane %v924_v58, 4  ;;  %v1107_v26 = vld [vmem:[#allocation2 + $0xbc] sm:$0x1] }
 0x114   : > { %v12372_v1 = vcombine.low %v4691_v12, %v4694_v44  ;;  %v4699_v31 = vrot.slane %v4697_v63, 4  ;;  %3499 = vmatmul.mubr.bf16.gmra.mrb[72].mxu0 %v12204_v33  ;;  %v4698_v20 = vsel %vm16202_vm14, %v12349_v2, %v4697_v63  ;;  %v935_v9 = vor.u32 %v933_v17, %v932_v47  ;;  %v3956_v32 = vld [vmem:[#allocation2 + $0x64] sm:$0xf]  ;;  %v4171_v11 = vld [vmem:[#allocation2 + $0x60] sm:$0xe]  ;;  %v17099_v63 = vpop.f32.mrb[0].mxu1 }
 0x115   : > { %v937_v14 = vrot.slane %v932_v47, 4  ;;  %v583_v62 = vsel %vm15767_vm8, 0, %v582_v8  ;;  %v1104_v57 = vsel %vm15803_vm10, %v927_v56, %v1103_v3  ;;  %v13191_v18 = vpack.c.bf16 %v475_v0, %v475_v0  ;;  %v3971_v8 = vld [vmem:[#allocation2 + $0x68] sm:$0x1]  ;;  %v4172_v12 = vld [vmem:[#allocation2 + $0x6c] sm:$0xe] }
 0x116   : > { %14336 = vmatprep.mubr.bf16.mxu1 %v12372_v1  ;;  %v4701_v15 = vsel %vm16202_vm14, %v4699_v31, %v4700_v59  ;;  %584 = vst [vmem:[#allocation2 + $0xc8] sm:$0x1] %v583_v62  ;;  %v939_v33 = vshrl.u32 %v13190_v7, 16  ;;  %v936_v48 = vsel %vm15813_vm11, %v928_v28, %v935_v9  ;;  %1105 = vst [vmem:[#allocation2 + $0xb4] sm:$0xf] %v1104_v57  ;;  %v942_v36 = vshll.u32 %v13190_v7, 16 }
 0x117   : > { %v12373_v50 = vcombine.low %v4698_v20, %v4701_v15  ;;  %v1108_v6 = vsel %vm15755_vm6, %v937_v14, %v1107_v26  ;;  %1106 = vst [vmem:[#allocation2 + $0xb8] sm:$0xf] %v936_v48  ;;  %v947_v45 = vshrl.u32 %v13191_v18, 16  ;;  %v950_v25 = vshll.u32 %v13191_v18, 16  ;;  %v1110_v51 = vld [vmem:[#allocation2 + $0xc0] sm:$0xf] }
 0x118   : > { %1109 = vst [vmem:[#allocation2 + $0xbc] sm:$0x1] %v1108_v6  ;;  %v941_v27 = vrot.slane %v939_v33, 7  ;;  %v3010_v49 = vshrl.u32 %v17084_v40, 16  ;;  %v3013_v10 = vshll.u32 %v17084_v40, 16  ;;  %v3019_v39 = vshll.u32 %v16841_v60, 16 }
 0x119   : > { %14337 = vmatmul.mubr.bf16.gmra.mrb[56].mxu1 %v12373_v50  ;;  %v3023_v29 = vshrl.u32 %v16841_v60, 16  ;;  %v3029_v0 = vshll.u32 %v16843_v43, 16  ;;  %v949_v13 = vrot.slane %v947_v45, 7  ;;  %v12205_v43 = vcombine.low %v17084_v40, %v16841_v60  ;;  %v3958_v7 = vld [vmem:[#allocation2 + $0x70] sm:$0xf] }
 0x11a   : > { %v944_v55 = vor.u32 %v942_v36, %v941_v27  ;;  %v945_v19 = vrot.slane %v941_v27, 4  ;;  %v3012_v35 = vrot.slane %v3010_v49, 4  ;;  %v3015_v59 = vrot.slane %v3013_v10, 5  ;;  %v3972_v1 = vld [vmem:[#allocation2 + $0x74] sm:$0x1]  ;;  %v17126_v10 = vpop.f32.mrb[1].mxu1 }
 0x11b   : > { %v3021_v58 = vrot.slane %v3019_v39, 5  ;;  %v3025_v17 = vrot.slane %v3023_v29, 4  ;;  %v3031_v44 = vrot.slane %v3029_v0, 5  ;;  %v952_v2 = vor.u32 %v950_v25, %v949_v13  ;;  %v17109_v18 = vld [vmem:[#allocation2 + $0x6c] sm:$0xf] }
 0x11c   : > { %v954_v47 = vrot.slane %v949_v13, 4  ;;  %v1111_v3 = vsel %vm15803_vm10, %v944_v55, %v1110_v51  ;;  %v3016_v56 = vor.u32 %v3015_v59, %v3012_v35  ;;  %v12312_v26 = vrot.slane %v4171_v11, 9  ;;  %v3960_v59 = vld [vmem:[#allocation2 + $0x7c] sm:$0xf] }
 0x11d   : > { %1112 = vst [vmem:[#allocation2 + $0xc0] sm:$0xf] %v1111_v3  ;;  %v1114_v31 = vld [vmem:[#allocation2 + $0xc8] sm:$0x1]  ;;  %v3026_v28 = vor.u32 %v3025_v17, %v3021_v58  ;;  %v4205_v20 = vrot.slane %v3956_v32, 5  ;;  %v953_v14 = vsel %vm15813_vm11, %v945_v19, %v952_v2  ;;  %v4208_v15 = vrot.slane %v3971_v8, 5 }
 0x11e   : > { %v4634_v9 = vld [vmem:[#allocation2 + $0xb4] sm:$0xe]  ;;  %v1115_v62 = vsel %vm15755_vm6, %v954_v47, %v1114_v31  ;;  %v12313_v57 = vrot.slane %v4172_v12, 9  ;;  %v17111_v60 = vld [vmem:[#allocation2 + $0xb8] sm:$0xf]  ;;  %v3017_v50 = vrot.slane %v3016_v56, 4  ;;  %v12352_v6 = vcombine.low %v17109_v18, %v16856_v52 }
 0x11f   : > { %v17113_v40 = vld [vmem:[#allocation2 + $0xbc] sm:$0x1]  ;;  %v12350_v33 = vrot.slane %v4634_v9, 9  ;;  %1113 = vst [vmem:[#allocation2 + $0xc4] sm:$0xf] %v953_v14  ;;  %v17117_v48 = vsel %vm16202_vm14, %v12312_v26, %v4205_v20  ;;  %v4704_v36 = vrot.slane %v17111_v60, 5 }
 0x120   : > { %1116 = vst [vmem:[#allocation2 + $0xc8] sm:$0x1] %v1115_v62  ;;  %v4707_v27 = vrot.slane %v17113_v40, 5  ;;  %v3027_v45 = vrot.slane %v3026_v28, 4  ;;  %v4207_v25 = vrot.slane %v4205_v20, 4  ;;  %v3022_v51 = vsel %vm15716_vm2, %v3017_v50, %v3021_v58  ;;  %v17136_v12 = vpop.f32.mrb[2].mxu1 }
 0x121   : > { %v4212_v49 = vrot.slane %v3958_v7, 5  ;;  %v4215_v32 = vrot.slane %v3972_v1, 5  ;;  %v4437_v11 = vshrl.u32 %v17109_v18, 16  ;;  %v4705_v39 = vsel %vm16202_vm14, %v12350_v33, %v4704_v36  ;;  %v3973_v58 = vld [vmem:[#allocation2 + $0x80] sm:$0x1] }
 0x122   : > { %v4706_v29 = vrot.slane %v4704_v36, 4  ;;  %v3032_v0 = vsel %vm15716_vm2, %v3027_v45, %v3031_v44  ;;  %v17134_v8 = vsel %vm16202_vm14, %v4207_v25, %v4208_v15  ;;  %v4173_v17 = vld [vmem:[#allocation2 + $0x78] sm:$0xe]  ;;  %v17146_v44 = vpop.f32.mrb[3].mxu1  ;;  %v4440_v1 = vshll.u32 %v17109_v18, 16 }
 0x123   : > { %v12213_v55 = vcombine.low %v3022_v51, %v3032_v0  ;;  %v12336_v19 = vcombine.low %v17117_v48, %v17134_v8  ;;  %v17142_v13 = vsel %vm16202_vm14, %v12313_v57, %v4212_v49  ;;  %v4214_v35 = vrot.slane %v4212_v49, 4  ;;  %v17144_v2 = vld [vmem:[#allocation2 + $0x78] sm:$0xf]  ;;  %v4174_v9 = vld [vmem:[#allocation2 + $0x84] sm:$0xe] }
 0x124   : > { %v4708_v47 = vsel %vm16202_vm14, %v4706_v29, %v4707_v27  ;;  %v4635_v3 = vld [vmem:[#allocation2 + $0xc0] sm:$0xe]  ;;  %v4439_v7 = vrot.slane %v4437_v11, 4  ;;  %v4446_v31 = vshll.u32 %v16856_v52, 16  ;;  %v4450_v20 = vshrl.u32 %v16856_v52, 16  ;;  %v15210_v52 = vld [vmem:[%s21152_s3 + $0x8] sm:$0xff]  }
 0x125   : > { %v12374_v56 = vcombine.low %v4705_v39, %v4708_v47  ;;  %v12351_v28 = vrot.slane %v4635_v3, 9  ;;  %3506 = vmatprep.mubr.bf16.mxu0 %v12213_v55  ;;  %v17154_v26 = vsel %vm16202_vm14, %v4214_v35, %v4215_v32  ;;  %v4442_v57 = vrot.slane %v4440_v1, 5  ;;  %v3962_v50 = vld [vmem:[#allocation2 + $0x88] sm:$0xf]  ;;  %v3974_v36 = vld [vmem:[#allocation2 + $0x8c] sm:$0x1] }
 0x126   : > { %v17157_v14 = vld [vmem:[#allocation2 + $0xc4] sm:$0xf]  ;;  %3507 = vmatmul.mubr.bf16.gmra.mrb[76].mxu0 %v12205_v43  ;;  %v12337_v15 = vcombine.low %v17142_v13, %v17154_v26  ;;  %v4448_v33 = vrot.slane %v4446_v31, 5  ;;  %v4452_v51 = vrot.slane %v4450_v20, 4  ;;  %v4456_v49 = vshll.u32 %v16864_v24, 16 }
 0x127   : > { %v17159_v62 = vld [vmem:[#allocation2 + $0xc8] sm:$0x1]  ;;  %14340 = vmatprep.mubr.bf16.mxu1 %v12374_v56  ;;  %v4711_v45 = vrot.slane %v17157_v14, 5  ;;  %v4443_v32 = vor.u32 %v4442_v57, %v4439_v7  ;;  %v12314_v43 = vrot.slane %v4173_v17, 9  ;;  %v4219_v11 = vrot.slane %v3960_v59, 5  ;;  %v17176_v56 = vpop.f32.mrb[4].mxu1 }
 0x128   : > { %v4714_v25 = vrot.slane %v17159_v62, 5  ;;  %v4222_v39 = vrot.slane %v3973_v58, 5  ;;  %v4453_v55 = vor.u32 %v4452_v51, %v4448_v33  ;;  %v4458_v35 = vrot.slane %v4456_v49, 5  ;;  %v3964_v58 = vld [vmem:[#allocation2 + $0x94] sm:$0xf]  ;;  %v15184_v8 = vld [vmem:[%s21152_s3 + $0x180] sm:$0xff]  }
 0x129   : > { %v4712_v29 = vsel %vm16202_vm14, %v12351_v28, %v4711_v45  ;;  %v4713_v0 = vrot.slane %v4711_v45, 4  ;;  %v4444_v47 = vrot.slane %v4443_v32, 4  ;;  %v17172_v3 = vsel %vm16202_vm14, %v12314_v43, %v4219_v11  ;;  %v4175_v51 = vld [vmem:[#allocation2 + $0x90] sm:$0xe]  ;;  %v4176_v49 = vld [vmem:[#allocation2 + $0x9c] sm:$0xe] }
 0x12a   : > { %v4221_v1 = vrot.slane %v4219_v11, 4  ;;  %v12315_v31 = vrot.slane %v4174_v9, 9  ;;  %v4454_v7 = vrot.slane %v4453_v55, 4  ;;  %v4226_v17 = vrot.slane %v3962_v50, 5  ;;  %v3975_v9 = vld [vmem:[#allocation2 + $0x98] sm:$0x1] }
 0x12b   : > { %v4715_v24 = vsel %vm16202_vm14, %v4713_v0, %v4714_v25  ;;  %v4229_v59 = vrot.slane %v3974_v36, 5  ;;  %v4449_v20 = vsel %vm15716_vm2, %v4444_v47, %v4448_v33  ;;  %v4461_v45 = vshrl.u32 %v17144_v2, 16  ;;  %v15203_v50 = vld [vmem:[%s21152_s3] sm:$0xff]   ;;  %v17196_v11 = vpop.f32.mrb[5].mxu1  ;;  %v3978_v25 = vld [vmem:[#allocation2 + $0xbc] sm:$0x1] }
 0x12c   : > { %v12375_v28 = vcombine.low %v4712_v29, %v4715_v24  ;;  %v17182_v57 = vsel %vm16202_vm14, %v4221_v1, %v4222_v39  ;;  %v4459_v36 = vsel %vm15716_vm2, %v4454_v7, %v4458_v35  ;;  %v17194_v33 = vsel %vm16202_vm14, %v12315_v31, %v4226_v17  ;;  %v3966_v43 = vld [vmem:[#allocation2 + $0xa0] sm:$0xf]  ;;  %v3976_v47 = vld [vmem:[#allocation2 + $0xa4] sm:$0x1]  ;;  %v15209_v1 = vld [vmem:[%s21152_s3 + $0x48] sm:$0xff]  }
 0x12d   : > { %v4228_v32 = vrot.slane %v4226_v17, 4  ;;  %v12360_v39 = vcombine.low %v4449_v20, %v4459_v36  ;;  %v4463_v29 = vrot.slane %v4461_v45, 4  ;;  %v4464_v0 = vshll.u32 %v17144_v2, 16  ;;  %v17200_v35 = vld [vmem:[#allocation2 + $0x84] sm:$0xf] }
 0x12e   : > { %14341 = vmatmul.mubr.bf16.gmra.mrb[60].mxu1 %v12375_v28  ;;  %v4470_v55 = vshll.u32 %v16906_v37, 16  ;;  %v4474_v24 = vshrl.u32 %v16906_v37, 16  ;;  %v4480_v7 = vshll.u32 %v16908_v23, 16  ;;  %v12316_v17 = vrot.slane %v4175_v51, 9  ;;  %v17214_v28 = vpop.f32.mrb[6].mxu1 }
 0x12f   : > { %14360 = vmatprep.mubr.bf16.mxu1 %v12336_v19  ;;  %v17210_v31 = vsel %vm16202_vm14, %v4228_v32, %v4229_v59  ;;  %5044 = vmatprep.mubr.bf16.mxu0 %v12360_v39  ;;  %v4466_v45 = vrot.slane %v4464_v0, 5  ;;  %v4233_v27 = vrot.slane %v3964_v58, 5  ;;  %v17218_v48 = vpop.f32.mrb[7].mxu1  ;;  %v4236_v59 = vrot.slane %v3975_v9, 5  ;;  %v15187_v32 = vld [vmem:[%s21152_s3 + $0x1c8] sm:$0xff]  }
 0x130   : > { %v4472_v36 = vrot.slane %v4470_v55, 5  ;;  %5045 = vmatmul.mubr.bf16.vlgmr.msra.gmra.mrb[80].mxu0 %v12352_v6  ;;  %v4476_v23 = vrot.slane %v4474_v24, 4  ;;  %v4482_v19 = vrot.slane %v4480_v7, 5  ;;  %v12317_v51 = vrot.slane %v4176_v49, 9  ;;  %v4177_v7 = vld [vmem:[#allocation2 + $0xa8] sm:$0xe] }
 0x131   : > { %v4467_v39 = vor.u32 %v4466_v45, %v4463_v29  ;;  %v17231_v58 = vsel %vm16202_vm14, %v12316_v17, %v4233_v27  ;;  %v4235_v0 = vrot.slane %v4233_v27, 4  ;;  %v4240_v55 = vrot.slane %v3966_v43, 5  ;;  %13545 = vmatpush3.bf16.msra.mxu0 %v15203_v50  ;;  %v15214_v29 = vld [vmem:[%s21152_s3 + $0x50] sm:$0xff]  }
 0x132   : > { %v4477_v18 = vor.u32 %v4476_v23, %v4472_v36  ;;  %v4243_v6 = vrot.slane %v3976_v47, 5  ;;  %v4485_v9 = vshrl.u32 %v17200_v35, 16  ;;  %v4488_v49 = vshll.u32 %v17200_v35, 16  ;;  %13546 = vmatprep.subr.bf16.mxu0 %v15209_v1  ;;  %v3968_v47 = vld [vmem:[#allocation2 + $0xac] sm:$0xf] }
 0x133   : > { %v4468_v24 = vrot.slane %v4467_v39, 4  ;;  %v17243_v27 = vsel %vm16202_vm14, %v4235_v0, %v4236_v59  ;;  %v17247_v50 = vsel %vm16202_vm14, %v12317_v51, %v4240_v55  ;;  %v4242_v43 = vrot.slane %v4240_v55, 4  ;;  %v15188_v1 = vld [vmem:[%s21152_s3 + $0x188] sm:$0xff]   ;;  %v3977_v20 = vld [vmem:[#allocation2 + $0xb0] sm:$0x1] }
 0x134   : > { %v4478_v17 = vrot.slane %v4477_v18, 4  ;;  %v4487_v23 = vrot.slane %v4485_v9, 4  ;;  %v4490_v39 = vrot.slane %v4488_v49, 5  ;;  %v3970_v59 = vld [vmem:[#allocation2 + $0xb8] sm:$0xf]  ;;  %v15215_v51 = vld [vmem:[%s21152_s3 + $0x10] sm:$0xff]   ;;  %v21216_v13 = vcombine.low %v17172_v3, %v17182_v57 }
 0x135   : > { %v4178_v0 = vld [vmem:[#allocation2 + $0xb4] sm:$0xe]  ;;  %v4473_v18 = vsel %vm15716_vm2, %v4468_v24, %v4472_v36  ;;  %v17267_v9 = vsel %vm16202_vm14, %v4242_v43, %v4243_v6  ;;  %v4494_v49 = vshll.u32 %v16965_v54, 16  ;;  %v4498_v45 = vshrl.u32 %v16965_v54, 16  ;;  %13547 = vmatpush3.bf16.msra.mxu0 %v15210_v52  ;;  %v17279_v24 = vld [vmem:[#allocation2 + $0x90] sm:$0xf] }
 0x136   : > { %14361 = vmatmul.mubr.bf16.vlgmr.msra.gmra.mrb[48].mxu1 %v12337_v15  ;;  %v15190_v55 = vld [vmem:[%s21152_s3 + $0x1d0] sm:$0xff]   ;;  %v4483_v26 = vsel %vm15716_vm2, %v4478_v17, %v4482_v19  ;;  %v4491_v36 = vor.u32 %v4490_v39, %v4487_v23  ;;  %v4504_v6 = vshll.u32 %v16967_v30, 16  ;;  %v15219_v52 = vld [vmem:[%s21152_s3 + $0x58] sm:$0xff]   ;;  %v12354_v57 = vcombine.low %v17200_v35, %v16965_v54  ;;  %13548 = vmatprep.subr.bf16.mxu0 %v15214_v29 }
 0x137   : > { %13625 = vmatpush3.bf16.msra.mxu1 %v15184_v8  ;;  %14364 = vmatprep.mubr.bf16.mxu1 %v21216_v13  ;;  %v12361_v8 = vcombine.low %v4473_v18, %v4483_v26  ;;  %v4496_v43 = vrot.slane %v4494_v49, 5  ;;  %v4500_v3 = vrot.slane %v4498_v45, 4  ;;  %v15220_v19 = vld [vmem:[%s21152_s3 + $0x18] sm:$0xff]   ;;  %v15191_v30 = vld [vmem:[%s21152_s3 + $0x190] sm:$0xff]   ;;  %v12318_v39 = vrot.slane %v4177_v7, 9  ;;  %v17295_v26 = vpop.f32.mrb[8].mxu1 }
 0x138   : > { %13626 = vmatprep.subr.bf16.mxu1 %v15187_v32  ;;  %v4492_v17 = vrot.slane %v4491_v36, 4  ;;  %v4506_v23 = vrot.slane %v4504_v6, 5  ;;  %v4247_v13 = vrot.slane %v3968_v47, 5  ;;  %v15192_v32 = vld [vmem:[%s21152_s3 + $0x1d8] sm:$0xff]   ;;  %v4250_v18 = vrot.slane %v3977_v20, 5 }
 0x139   : > { %5052 = vmatprep.mubr.bf16.mxu0 %v12361_v8  ;;  %v4501_v45 = vor.u32 %v4500_v3, %v4496_v43  ;;  %v12319_v29 = vrot.slane %v4178_v0, 9  ;;  %v4254_v49 = vrot.slane %v3970_v59, 5  ;;  %13549 = vmatpush3.bf16.msra.mxu0 %v15215_v51  ;;  %v21217_v15 = vcombine.low %v17144_v2, %v16906_v37  ;;  %v17306_v20 = vld [vmem:[#allocation2 + $0x78] sm:$0xf]  ;;  %v15222_v2 = vld [vmem:[%s21152_s3 + $0x60] sm:$0xff]  }
 0x13a   : > { %v4497_v47 = vsel %vm15716_vm2, %v4492_v17, %v4496_v43  ;;  %v17304_v7 = vsel %vm16202_vm14, %v12318_v39, %v4247_v13  ;;  %v4249_v36 = vrot.slane %v4247_v13, 4  ;;  %v4257_v6 = vrot.slane %v3978_v25, 5  ;;  %13550 = vmatprep.subr.bf16.mxu0 %v15219_v52  ;;  %v15193_v25 = vld [vmem:[%s21152_s3 + $0x198] sm:$0xff]   ;;  %v17328_v52 = vpop.f32.mrb[9].mxu1  ;;  %v15195_v17 = vld [vmem:[%s21152_s3 + $0x1e0] sm:$0xff]  }
 0x13b   : > { %13627 = vmatpush3.bf16.msra.mxu1 %v15188_v1  ;;  %5053 = vmatmul.mubr.bf16.gmra.mrb[84].mxu0 %v21217_v15  ;;  %v4502_v59 = vrot.slane %v4501_v45, 4  ;;  %v17310_v1 = vsel %vm16202_vm14, %v12319_v29, %v4254_v49  ;;  %v4256_v0 = vrot.slane %v4254_v49, 4  ;;  %v4509_v37 = vshrl.u32 %v17279_v24, 16  ;;  %v17326_v43 = vld [vmem:[#allocation2 + $0x7c] sm:$0xf] }
 0x13c   : > { %13628 = vmatprep.subr.bf16.mxu1 %v15190_v55  ;;  %v17321_v51 = vsel %vm16202_vm14, %v4249_v36, %v4250_v18  ;;  %v4512_v55 = vshll.u32 %v17279_v24, 16  ;;  %v4518_v15 = vshll.u32 %v16993_v5, 16  ;;  %v4522_v8 = vshrl.u32 %v16993_v5, 16  ;;  %v5561_v29 = vld [vmem:[#allocation2 + $0x80] sm:$0x1] }
 0x13d   : > { %v21218_v3 = vcombine.low %v17194_v33, %v17210_v31  ;;  %v4507_v39 = vsel %vm15716_vm2, %v4502_v59, %v4506_v23  ;;  %v17342_v45 = vsel %vm16202_vm14, %v4256_v0, %v4257_v6  ;;  %v4511_v18 = vrot.slane %v4509_v37, 4  ;;  %13551 = vmatpush3.bf16.msra.mxu0 %v15220_v19  ;;  %v15223_v33 = vld [vmem:[%s21152_s3 + $0x20] sm:$0xff]   ;;  %v15226_v31 = vld [vmem:[%s21152_s3 + $0x68] sm:$0xff]   ;;  %v17355_v19 = vld [vmem:[#allocation2 + $0x9c] sm:$0xf] }
 0x13e   : > { %v21219_v23 = vcombine.low %v17231_v58, %v17243_v27  ;;  %v12362_v49 = vcombine.low %v4497_v47, %v4507_v39  ;;  %v4514_v6 = vrot.slane %v4512_v55, 5  ;;  %v4520_v59 = vrot.slane %v4518_v15, 5  ;;  %13552 = vmatprep.subr.bf16.mxu0 %v15222_v2  ;;  %v15227_v58 = vld [vmem:[%s21152_s3 + $0x28] sm:$0xff]   ;;  %v17364_v27 = vpop.f32.mrb[10].mxu1  ;;  %v15196_v47 = vld [vmem:[%s21152_s3 + $0x1a0] sm:$0xff]  }
 0x13f   : > { %14365 = vmatmul.mubr.bf16.gmra.mrb[52].mxu1 %v21218_v3  ;;  %v4524_v0 = vrot.slane %v4522_v8, 4  ;;  %v4528_v37 = vshll.u32 %v16995_v53, 16  ;;  %v5573_v53 = vshll.u32 %v17306_v20, 16  ;;  %v5579_v55 = vshll.u32 %v17326_v43, 16  ;;  %v17372_v8 = vpop.f32.mrb[11].mxu1  ;;  %v15197_v2 = vld [vmem:[%s21152_s3 + $0x1e8] sm:$0xff]  }
 0x140   : > { %13629 = vmatpush3.bf16.msra.mxu1 %v15191_v30  ;;  %14368 = vmatprep.mubr.bf16.mxu1 %v21219_v23  ;;  %v5570_v30 = vshrl.u32 %v17306_v20, 16  ;;  %v5583_v15 = vshrl.u32 %v17326_v43, 16  ;;  %v5589_v3 = vshll.u32 %v5561_v29, 16  ;;  %v17467_v29 = vld [vmem:[#allocation2 + $0x90] sm:$0xf] }
 0x141   : > { %13630 = vmatprep.subr.bf16.mxu1 %v15192_v32  ;;  %5060 = vmatprep.mubr.bf16.mxu0 %v12362_v49  ;;  %v4515_v32 = vor.u32 %v4514_v6, %v4511_v18  ;;  %v4525_v39 = vor.u32 %v4524_v0, %v4520_v59  ;;  %v4530_v23 = vrot.slane %v4528_v37, 5  ;;  %v15229_v18 = vld [vmem:[%s21152_s3 + $0x70] sm:$0xff]   ;;  %v5575_v6 = vrot.slane %v5573_v53, 5  ;;  %v17386_v37 = vpop.f32.mrb[0].mxu0  ;;  %v17405_v53 = vld [vmem:[#allocation2 + $0x88] sm:$0xf] }
 0x142   : > { %v5572_v36 = vrot.slane %v5570_v30, 4  ;;  %13553 = vmatpush3.bf16.msra.mxu0 %v15223_v33  ;;  %v5581_v13 = vrot.slane %v5579_v55, 5  ;;  %v5585_v46 = vrot.slane %v5583_v15, 4  ;;  %v5591_v0 = vrot.slane %v5589_v3, 5  ;;  %v17391_v30 = vld [vmem:[#allocation2 + $0x84] sm:$0xf] }
 0x143   : > { %5061 = vmatmul.mubr.bf16.gmra.mrb[88].mxu0 %v12354_v57  ;;  %v4516_v49 = vrot.slane %v4515_v32, 4  ;;  %v4526_v41 = vrot.slane %v4525_v39, 4  ;;  %v4533_v33 = vshrl.u32 %v17355_v19, 16  ;;  %13554 = vmatprep.subr.bf16.mxu0 %v15226_v31  ;;  %v4536_v57 = vshll.u32 %v17355_v19, 16  ;;  %v15198_v31 = vld [vmem:[%s21152_s3 + $0x1a8] sm:$0xff]  }
 0x144   : > { %13631 = vmatpush3.bf16.msra.mxu1 %v15193_v25  ;;  %v5576_v54 = vor.u32 %v5575_v6, %v5572_v36  ;;  %v5586_v35 = vor.u32 %v5585_v46, %v5581_v13  ;;  %v21220_v3 = vcombine.low %v17247_v50, %v17267_v9  ;;  %v4542_v46 = vshll.u32 %v17056_v21, 16  ;;  %v15230_v50 = vld [vmem:[%s21152_s3 + $0x30] sm:$0xff]   ;;  %v17410_v9 = vpop.f32.mrb[1].mxu0 }
 0x145   : > { %13632 = vmatprep.subr.bf16.mxu1 %v15195_v17  ;;  %v4521_v25 = vsel %vm15716_vm2, %v4516_v49, %v4520_v59  ;;  %v17393_v17 = vpop.f32.mrb[12].mxu1  ;;  %v4531_v32 = vsel %vm15716_vm2, %v4526_v41, %v4530_v23  ;;  %v4535_v59 = vrot.slane %v4533_v33, 4  ;;  %v4546_v36 = vshrl.u32 %v17056_v21, 16  ;;  %v17415_v49 = vld [vmem:[#allocation2 + $0x8c] sm:$0x1] }
 0x146   : > { %13555 = vmatpush3.bf16.msra.mxu0 %v15227_v58  ;;  %v21221_v55 = vcombine.low %v17304_v7, %v17321_v51  ;;  %v12363_v41 = vcombine.low %v4521_v25, %v4531_v32  ;;  %v5577_v15 = vrot.slane %v5576_v54, 4  ;;  %v5587_v39 = vrot.slane %v5586_v35, 4  ;;  %21222 = vst [vmem:[#allocation9_spill] sm:$0xff] %v17415_v49  ;;  %v17417_v6 = vpop.f32.mrb[13].mxu1  ;;  %v15200_v58 = vld [vmem:[%s21152_s3 + $0x1f0] sm:$0xff]   ;;  %v15233_v51 = vld [vmem:[%s21152_s3 + $0x78] sm:$0xff]  }
 0x147   : > { %14369 = vmatmul.mubr.bf16.gmra.mrb[56].mxu1 %v21220_v3  ;;  %v4538_v23 = vrot.slane %v4536_v57, 5  ;;  %v4544_v33 = vrot.slane %v4542_v46, 5  ;;  %v4548_v3 = vrot.slane %v4546_v36, 4  ;;  %13556 = vmatprep.subr.bf16.mxu0 %v15229_v18  ;;  %v17428_v25 = vpop.f32.mrb[2].mxu0  ;;  %v17435_v57 = vpop.f32.mrb[14].mxu1  ;;  %v15201_v18 = vld [vmem:[%s21152_s3 + $0x1b0] sm:$0xff]  }
 0x148   : > { %13633 = vmatpush3.bf16.msra.mxu1 %v15196_v47  ;;  %14372 = vmatprep.mubr.bf16.mxu1 %v21221_v55  ;;  %v4552_v47 = vshll.u32 %v17058_v16, 16  ;;  %v5592_v54 = vsel %vm15716_vm2, %v5587_v39, %v5591_v0  ;;  %v5594_v16 = vshrl.u32 %v17391_v30, 16  ;;  %v5597_v55 = vshll.u32 %v17391_v30, 16  ;;  %v17444_v0 = vpop.f32.mrb[3].mxu0 }
 0x149   : > { %13634 = vmatprep.subr.bf16.mxu1 %v15197_v2  ;;  %5068 = vmatprep.mubr.bf16.mxu0 %v12363_v41  ;;  %v5582_v2 = vsel %vm15716_vm2, %v5577_v15, %v5581_v13  ;;  %v4539_v35 = vor.u32 %v4538_v23, %v4535_v59  ;;  %v4549_v46 = vor.u32 %v4548_v3, %v4544_v33  ;;  %v15234_v13 = vld [vmem:[%s21152_s3 + $0x38] sm:$0xff]   ;;  %v17446_v59 = vpop.f32.mrb[15].mxu1  ;;  %v5603_v23 = vshll.u32 %v17405_v53, 16 }
 0x14a   : > { %v12488_v32 = vcombine.low %v5582_v2, %v5592_v54  ;;  %v4554_v36 = vrot.slane %v4552_v47, 5  ;;  %13557 = vmatpush3.bf16.msra.mxu0 %v15230_v50  ;;  %v21223_v41 = vcombine.low %v17279_v24, %v16993_v5  ;;  %v5596_v39 = vrot.slane %v5594_v16, 4  ;;  %v17453_v50 = vld [vmem:[#allocation2 + $0xa8] sm:$0xf]  ;;  %v15204_v47 = vld [vmem:[%s21152_s3 + $0x1f8] sm:$0xff]   ;;  %v17484_v7 = vpop.f32.mrb[16].mxu1 }
 0x14b   : > { %v4540_v15 = vrot.slane %v4539_v35, 4  ;;  %v5607_v3 = vshrl.u32 %v17405_v53, 16  ;;  %v4550_v2 = vrot.slane %v4549_v46, 4  ;;  %v5599_v54 = vrot.slane %v5597_v55, 5  ;;  %13558 = vmatprep.subr.bf16.mxu0 %v15233_v51  ;;  %v15205_v24 = vld [vmem:[%s21152_s3 + $0x1b8] sm:$0xff]   ;;  %v15208_v51 = vld [vmem:[%s21152_s3 + $0x200] sm:$0xff]  }
 0x14c   : > { %13635 = vmatpush3.bf16.msra.mxu1 %v15198_v31  ;;  %5069 = vmatmul.mubr.bf16.gmra.mrb[92].mxu0 %v21223_v41  ;;  %v5613_v31 = vshll.u32 %v17415_v49, 16  ;;  %v5605_v16 = vrot.slane %v5603_v23, 5  ;;  %v21224_v46 = vcombine.low %v17310_v1, %v17342_v45  ;;  %v17478_v23 = vpop.f32.mrb[4].mxu0  ;;  %v4560_v1 = vshll.u32 %v17453_v50, 16 }
 0x14d   : > { %13636 = vmatprep.subr.bf16.mxu1 %v15200_v58  ;;  %v4545_v35 = vsel %vm15716_vm2, %v4540_v15, %v4544_v33  ;;  %v5609_v58 = vrot.slane %v5607_v3, 4  ;;  %v4555_v55 = vsel %vm15716_vm2, %v4550_v2, %v4554_v36  ;;  %v5600_v5 = vor.u32 %v5599_v54, %v5596_v39  ;;  %v17486_v36 = vpop.f32.mrb[5].mxu0 }
 0x14e   : > { %v5615_v33 = vrot.slane %v5613_v31, 5  ;;  %v4557_v15 = vshrl.u32 %v17453_v50, 16  ;;  %13559 = vmatpush3.bf16.msra.mxu0 %v15234_v13  ;;  %v12364_v3 = vcombine.low %v4545_v35, %v4555_v55  ;;  %v4566_v45 = vshll.u32 %v17069_v22, 16  ;;  %v17492_v54 = vpop.f32.mrb[6].mxu0 }
 0x14f   : > { %14373 = vmatmul.mubr.bf16.gmra.mrb[60].mxu1 %v21224_v46  ;;  %v5610_v41 = vor.u32 %v5609_v58, %v5605_v16  ;;  %v17482_v46 = vld [vmem:[#allocation2 + $0x94] sm:$0xf]  ;;  %v5601_v39 = vrot.slane %v5600_v5, 4  ;;  %v4570_v13 = vshrl.u32 %v17069_v22, 16  ;;  %v4562_v35 = vrot.slane %v4560_v1, 5 }
 0x150   : > { %13637 = vmatpush3.bf16.msra.mxu1 %v15201_v18  ;;  %6177 = vmatprep.mubr.bf16.mxu1 %v12488_v32  ;;  %v4559_v2 = vrot.slane %v4557_v15, 4  ;;  %v4576_v18 = vshll.u32 %v17071_v34, 16  ;;  %v17490_v32 = vpop.f32.mrb[17].mxu1  ;;  %v4568_v58 = vrot.slane %v4566_v45, 5  ;;  %v5618_v49 = vshrl.u32 %v17467_v29, 16 }
 0x151   : > { %13638 = vmatprep.subr.bf16.mxu1 %v15204_v47  ;;  %5076 = vmatprep.mubr.bf16.mxu0 %v12364_v3  ;;  %v5611_v31 = vrot.slane %v5610_v41, 4  ;;  %v17496_v4 = vpop.f32.mrb[18].mxu1  ;;  %v17498_v47 = vpop.f32.mrb[7].mxu0  ;;  %v5606_v5 = vsel %vm15716_vm2, %v5601_v39, %v5605_v16  ;;  %v4572_v15 = vrot.slane %v4570_v13, 4  ;;  %v21229_v41 = vcombine.low %v17355_v19, %v17056_v21  ;;  %v15213_v16 = vld [vmem:[%s21152_s3 + $0x208] sm:$0xff]  }
 0x152   : > { %21225 = vst [vmem:[#allocation10_spill] sm:$0xff] %v17496_v4  ;;  %21226 = vst [vmem:[#allocation11_spill] sm:$0xff] %v17498_v47  ;;  %v4578_v34 = vrot.slane %v4576_v18, 5  ;;  %v17505_v3 = vpop.f32.mrb[19].mxu1  ;;  %v4563_v45 = vor.u32 %v4562_v35, %v4559_v2  ;;  %v5621_v39 = vshll.u32 %v17467_v29, 16  ;;  %v5627_v13 = vshll.u32 %v17482_v46, 16 }
 0x153   : > { %21228 = vst [vmem:[#allocation13_spill] sm:$0xff] %v17505_v3  ;;  %v5616_v1 = vsel %vm15716_vm2, %v5611_v31, %v5615_v33  ;;  %v17517_v18 = vld [vmem:[#allocation2 + $0xb4] sm:$0xf]  ;;  %v4573_v55 = vor.u32 %v4572_v15, %v4568_v58  ;;  %v5620_v38 = vrot.slane %v5618_v49, 4  ;;  %v5631_v21 = vshrl.u32 %v17482_v46, 16  ;;  %v17521_v3 = vpop.f32.mrb[8].mxu0 }
 0x154   : > { %13639 = vmatpush3.bf16.msra.mxu1 %v15205_v24  ;;  %5077 = vmatmul.mubr.bf16.gmra.mrb[96].mxu0 %v21229_v41  ;;  %v12489_v24 = vcombine.low %v5606_v5, %v5616_v1  ;;  %v4564_v19 = vrot.slane %v4563_v45, 4  ;;  %v5623_v41 = vrot.slane %v5621_v39, 5  ;;  %v5629_v33 = vrot.slane %v5627_v13, 5  ;;  %v17523_v2 = vpop.f32.mrb[20].mxu1  ;;  %v17534_v15 = vpop.f32.mrb[9].mxu0 }
 0x155   : > { %14376 = vmatprep.subr.bf16.mxu1 %v15208_v51  ;;  %v5637_v31 = vshll.u32 %v17502_v61, 16  ;;  %v21230_v35 = vcombine.low %v17306_v20, %v17326_v43  ;;  %v4574_v4 = vrot.slane %v4573_v55, 4  ;;  %v5633_v47 = vrot.slane %v5631_v21, 4  ;;  %v17536_v1 = vpop.f32.mrb[21].mxu1  ;;  %v15218_v55 = vld [vmem:[%s21152_s3 + $0x210] sm:$0xff]  }
 0x156   : > { %v17532_v5 = vadd.f32 %v17126_v10, %v17099_v63  ;;  %v4569_v45 = vsel %vm15716_vm2, %v4564_v19, %v4568_v58  ;;  %v5624_v20 = vor.u32 %v5623_v41, %v5620_v38  ;;  %v17545_v39 = vadd.f32 %v17146_v44, %v17136_v12  ;;  %v17547_v63 = vpop.f32.mrb[10].mxu0  ;;  %v17549_v10 = vpop.f32.mrb[22].mxu1 }
 0x157   : > { %6178 = vmatmul.mubr.bf16.vlgmr.msra.gmra.mrb[64].mxu1 %v21230_v35  ;;  %v5639_v43 = vrot.slane %v5637_v31, 5  ;;  %v5634_v13 = vor.u32 %v5633_v47, %v5629_v33  ;;  %v4581_v38 = vshrl.u32 %v17517_v18, 16  ;;  %v4584_v58 = vshll.u32 %v17517_v18, 16  ;;  %v17557_v21 = vpop.f32.mrb[11].mxu0  ;;  %v17559_v19 = vpop.f32.mrb[23].mxu1 }
 0x158   : > { %21231 = vst [vmem:[#allocation14_spill] sm:$0xff] %v17532_v5  ;;  %14377 = vmatpush3.bf16.msra.mxu1 %v15208_v51  ;;  %6185 = vmatprep.mubr.bf16.mxu1 %v12489_v24  ;;  %21232 = vst [vmem:[#allocation15_spill] sm:$0xff] %v17545_v39  ;;  %v4579_v51 = vsel %vm15716_vm2, %v4574_v4, %v4578_v34  ;;  %v17555_v24 = vld [vmem:[#allocation2 + $0x9c] sm:$0xf]  ;;  %v5625_v44 = vrot.slane %v5624_v20, 4  ;;  %v4590_v41 = vshll.u32 %v17111_v60, 16 }
 0x159   : > { %14378 = vmatprep.subr.bf16.mxu1 %v15213_v16  ;;  %21233 = vst [vmem:[#allocation16_spill] sm:$0xff] %v17559_v19  ;;  %v12365_v12 = vcombine.low %v4569_v45, %v4579_v51  ;;  %v4594_v31 = vshrl.u32 %v17111_v60, 16  ;;  %v17563_v35 = vld [vmem:[#allocation2 + $0xa0] sm:$0xf]  ;;  %v17565_v4 = vpop.f32.mrb[12].mxu0  ;;  %v5635_v47 = vrot.slane %v5634_v13, 4  ;;  %v21236_v13 = vcombine.low %v17453_v50, %v17069_v22 }
 0x15a   : > { %21234 = vst [vmem:[#allocation17_spill] sm:$0xff] %v17565_v4  ;;  %v4583_v34 = vrot.slane %v4581_v38, 4  ;;  %v4586_v49 = vrot.slane %v4584_v58, 5  ;;  %v4600_v39 = vshll.u32 %v17113_v40, 16  ;;  %v17568_v5 = vpop.f32.mrb[13].mxu0  ;;  %v5630_v45 = vsel %vm15716_vm2, %v5625_v44, %v5629_v33  ;;  %v15225_v58 = vld [vmem:[%s21152_s3 + $0x218] sm:$0xff]  }
 0x15b   : > { %5084 = vmatprep.mubr.bf16.mxu0 %v12365_v12  ;;  %v4592_v20 = vrot.slane %v4590_v41, 5  ;;  %v4596_v51 = vrot.slane %v4594_v31, 4  ;;  %v17574_v19 = vld [vmem:[#allocation2 + $0xa4] sm:$0x1]  ;;  %v17576_v4 = vpop.f32.mrb[14].mxu0  ;;  %v5640_v40 = vsel %vm15716_vm2, %v5635_v47, %v5639_v43  ;;  %v5642_v33 = vshrl.u32 %v17555_v24, 16 }
 0x15c   : > { %14379 = vmatpush3.bf16.msra.mxu1 %v15213_v16  ;;  %21235 = vst [vmem:[#allocation18_spill] sm:$0xff] %v17576_v4  ;;  %5085 = vmatmul.mubr.bf16.gmra.mrb[100].mxu0 %v21236_v13  ;;  %v4587_v16 = vor.u32 %v4586_v49, %v4583_v34  ;;  %v4602_v38 = vrot.slane %v4600_v39, 5  ;;  %v17587_v12 = vpop.f32.mrb[15].mxu0  ;;  %v12490_v44 = vcombine.low %v5630_v45, %v5640_v40  ;;  %v5645_v31 = vshll.u32 %v17555_v24, 16  ;;  %v17591_v50 = vld [vmem:[#allocation2 + $0xc0] sm:$0xf] }
 0x15d   : > { %14380 = vmatprep.subr.bf16.mxu1 %v15218_v55  ;;  %21237 = vst [vmem:[#allocation19_spill] sm:$0xff] %v17587_v12  ;;  %v4597_v41 = vor.u32 %v4596_v51, %v4592_v20  ;;  %v5651_v22 = vshll.u32 %v17563_v35, 16  ;;  %v17593_v43 = vpop.f32.mrb[16].mxu0  ;;  %v15253_v49 = vld [vmem:[%s21155_s6 + $0x100] sm:$0xff]   ;;  %v21239_v39 = vcombine.low %v17391_v30, %v17405_v53  ;;  %v5644_v34 = vrot.slane %v5642_v33, 4 }
 0x15e   : > { %21238 = vst [vmem:[#allocation20_spill] sm:$0xff] %v17593_v43  ;;  %v4588_v47 = vrot.slane %v4587_v16, 4  ;;  %v5655_v45 = vshrl.u32 %v17563_v35, 16  ;;  %v5661_v51 = vshll.u32 %v17574_v19, 16  ;;  %v17603_v13 = vpop.f32.mrb[17].mxu0  ;;  %v5647_v61 = vrot.slane %v5645_v31, 5  ;;  %13704 = vmatprep.subr.bf16.mxu0 %v15253_v49 }
 0x15f   : > { %6186 = vmatmul.mubr.bf16.gmra.mrb[68].mxu1 %v21239_v39  ;;  %v4598_v40 = vrot.slane %v4597_v41, 4  ;;  %v5653_v43 = vrot.slane %v5651_v22, 5  ;;  %v17607_v4 = vpop.f32.mrb[18].mxu0  ;;  %v17613_v33 = vadd.f32 %v17196_v11, %v17176_v56  ;;  %v4605_v22 = vshrl.u32 %v17591_v50, 16 }
 0x160   : > { %6193 = vmatprep.mubr.bf16.mxu1 %v12490_v44  ;;  %14381 = vmatpush3.bf16.msra.mxu1 %v15218_v55  ;;  %v4593_v30 = vsel %vm15716_vm2, %v4588_v47, %v4592_v20  ;;  %v5657_v53 = vrot.slane %v5655_v45, 4  ;;  %v5663_v16 = vrot.slane %v5661_v51, 5  ;;  %v15232_v55 = vld [vmem:[%s21152_s3 + $0x220] sm:$0xff]   ;;  %v17618_v44 = vpop.f32.mrb[19].mxu0  ;;  %v5648_v31 = vor.u32 %v5647_v61, %v5644_v34  ;;  %v17629_v45 = vld [vmem:[#allocation2 + $0xa8] sm:$0xf] }
 0x161   : > { %14382 = vmatprep.subr.bf16.mxu1 %v15225_v58  ;;  %21240 = vst [vmem:[#allocation21_spill] sm:$0xff] %v17613_v33  ;;  %v4603_v41 = vsel %vm15716_vm2, %v4598_v40, %v4602_v38  ;;  %v17624_v20 = vadd.f32 %v17218_v48, %v17214_v28  ;;  %v4608_v11 = vshll.u32 %v17591_v50, 16  ;;  %v4614_v47 = vshll.u32 %v17157_v14, 16  ;;  %v17631_v51 = vld [vmem:[#allocation2 + $0xac] sm:$0xf]  ;;  %v17637_v34 = vpop.f32.mrb[20].mxu0 }
 0x162   : > { %v12366_v39 = vcombine.low %v4593_v30, %v4603_v41  ;;  %v5658_v56 = vor.u32 %v5657_v53, %v5653_v43  ;;  %v5649_v49 = vrot.slane %v5648_v31, 4  ;;  %v4607_v38 = vrot.slane %v4605_v22, 4  ;;  %v17635_v48 = vld [vmem:[#allocation2 + $0xb0] sm:$0x1]  ;;  %21243 = vst [vmem:[#allocation24_spill] sm:$0xff] %v17637_v34  ;;  %v17644_v31 = vpop.f32.mrb[24].mxu1 }
 0x163   : > { %21241 = vst [vmem:[#allocation22_spill] sm:$0xff] %v17624_v20  ;;  %v4618_v61 = vshrl.u32 %v17157_v14, 16  ;;  %v4624_v28 = vshll.u32 %v17159_v62, 16  ;;  %21242 = vst [vmem:[#allocation23_spill] sm:$0xff] %v17635_v48  ;;  %v4610_v30 = vrot.slane %v4608_v11, 5  ;;  %v4616_v53 = vrot.slane %v4614_v47, 5 }
 0x164   : > { %14383 = vmatpush3.bf16.msra.mxu1 %v15225_v58  ;;  %5092 = vmatprep.mubr.bf16.mxu0 %v12366_v39  ;;  %v5659_v40 = vrot.slane %v5658_v56, 4  ;;  %v15237_v58 = vld [vmem:[%s21152_s3 + $0x228] sm:$0xff]   ;;  %v17646_v22 = vpop.f32.mrb[21].mxu0  ;;  %v21245_v62 = vcombine.low %v17517_v18, %v17111_v60  ;;  %v5654_v39 = vsel %vm15716_vm2, %v5649_v49, %v5653_v43  ;;  %v5666_v47 = vshrl.u32 %v17629_v45, 16  ;;  %v17654_v41 = vpop.f32.mrb[25].mxu1 }
 0x165   : > { %14384 = vmatprep.subr.bf16.mxu1 %v15232_v55  ;;  %21244 = vst [vmem:[#allocation25_spill] sm:$0xff] %v17646_v22  ;;  %v4620_v56 = vrot.slane %v4618_v61, 4  ;;  %v4626_v11 = vrot.slane %v4624_v28, 5  ;;  %v17656_v12 = vpop.f32.mrb[22].mxu0  ;;  %v21247_v20 = vcombine.low %v17467_v29, %v17482_v46  ;;  %v4611_v60 = vor.u32 %v4610_v30, %v4607_v38  ;;  %v17665_v49 = vpop.f32.mrb[26].mxu1 }
 0x166   : > { %5093 = vmatmul.mubr.bf16.gmra.mrb[104].mxu0 %v21245_v62  ;;  %21246 = vst [vmem:[#allocation26_spill] sm:$0xff] %v17656_v12  ;;  %v5664_v33 = vsel %vm15716_vm2, %v5659_v40, %v5663_v16  ;;  %v5669_v18 = vshll.u32 %v17629_v45, 16  ;;  %v5675_v43 = vshll.u32 %v17631_v51, 16  ;;  %v17667_v61 = vpop.f32.mrb[23].mxu0  ;;  %v5668_v22 = vrot.slane %v5666_v47, 4 }
 0x167   : > { %6194 = vmatmul.mubr.bf16.gmra.mrb[72].mxu1 %v21247_v20  ;;  %21248 = vst [vmem:[#allocation27_spill] sm:$0xff] %v17667_v61  ;;  %v12491_v28 = vcombine.low %v5654_v39, %v5664_v33  ;;  %v4621_v62 = vor.u32 %v4620_v56, %v4616_v53  ;;  %v5679_v12 = vshrl.u32 %v17631_v51, 16  ;;  %v17670_v29 = vld [vmem:[#allocation2 + $0x60] sm:$0xf]  ;;  %v17672_v20 = vpop.f32.mrb[27].mxu1  ;;  %v4612_v16 = vrot.slane %v4611_v60, 4 }
 0x168   : > { %14385 = vmatpush3.bf16.msra.mxu1 %v15232_v55  ;;  %v5671_v38 = vrot.slane %v5669_v18, 5  ;;  %v5677_v40 = vrot.slane %v5675_v43, 5  ;;  %v5685_v30 = vshll.u32 %v17635_v48, 16  ;;  %v15240_v61 = vld [vmem:[%s21152_s3 + $0x230] sm:$0xff]   ;;  %v17682_v56 = vadd.f32 %v17328_v52, %v17295_v26  ;;  %v17696_v52 = vld [vmem:[#allocation2 + $0xb8] sm:$0xf] }
 0x169   : > { %14386 = vmatprep.subr.bf16.mxu1 %v15237_v58  ;;  %6201 = vmatprep.mubr.bf16.mxu1 %v12491_v28  ;;  %v4622_v33 = vrot.slane %v4621_v62, 4  ;;  %v5681_v39 = vrot.slane %v5679_v12, 4  ;;  %v4617_v47 = vsel %vm15716_vm2, %v4612_v16, %v4616_v53  ;;  %v17688_v43 = vadd.f32 %v17372_v8, %v17364_v27  ;;  %v17690_v48 = vld [vmem:[#allocation2 + $0xb4] sm:$0xf]  ;;  %v17698_v53 = vpop.f32.mrb[24].mxu0 }
 0x16a   : > { %21249 = vst [vmem:[#allocation28_spill] sm:$0xff] %v17682_v56  ;;  %v5672_v60 = vor.u32 %v5671_v38, %v5668_v22  ;;  %v5687_v18 = vrot.slane %v5685_v30, 5  ;;  %v3980_v62 = vshrl.u32 %v17670_v29, 16  ;;  %v3983_v26 = vshll.u32 %v17670_v29, 16  ;;  %21251 = vst [vmem:[#allocation30_spill] sm:$0xff] %v17698_v53 }
 0x16b   : > { %21250 = vst [vmem:[#allocation29_spill] sm:$0xff] %v17688_v43  ;;  %v4627_v12 = vsel %vm15716_vm2, %v4622_v33, %v4626_v11  ;;  %v5682_v28 = vor.u32 %v5681_v39, %v5677_v40  ;;  %v17700_v38 = vld [vmem:[#allocation2 + $0x64] sm:$0xf]  ;;  %v17704_v30 = vld [vmem:[#allocation2 + $0xbc] sm:$0x1]  ;;  %v17709_v33 = vpop.f32.mrb[25].mxu0  ;;  %v21254_v43 = vcombine.low %v17555_v24, %v17563_v35 }
 0x16c   : > { %14387 = vmatpush3.bf16.msra.mxu1 %v15237_v58  ;;  %v12367_v22 = vcombine.low %v4617_v47, %v4627_v12  ;;  %v5673_v16 = vrot.slane %v5672_v60, 4  ;;  %v3989_v27 = vshll.u32 %v17700_v38, 16  ;;  %v3993_v8 = vshrl.u32 %v17700_v38, 16  ;;  %v15243_v11 = vld [vmem:[%s21152_s3 + $0x238] sm:$0xff]   ;;  %21252 = vst [vmem:[#allocation31_spill] sm:$0xff] %v17709_v33  ;;  %v17711_v12 = vpop.f32.mrb[26].mxu0 }
 0x16d   : > { %14388 = vmatprep.subr.bf16.mxu1 %v15240_v61  ;;  %v5683_v58 = vrot.slane %v5682_v28, 4  ;;  %v3982_v39 = vrot.slane %v3980_v62, 4  ;;  %v3985_v55 = vrot.slane %v3983_v26, 5  ;;  %v15469_v47 = vld [vmem:[#allocation2 + $0x68] sm:$0x1]  ;;  %21253 = vst [vmem:[#allocation32_spill] sm:$0xff] %v17711_v12  ;;  %v12320_v33 = vcombine.low %v17670_v29, %v17700_v38 }
 0x16e   : > { %v3999_v60 = vshll.u32 %v15469_v47, 16  ;;  %5100 = vmatprep.mubr.bf16.mxu0 %v12367_v22  ;;  %v5678_v56 = vsel %vm15716_vm2, %v5673_v16, %v5677_v40  ;;  %v3991_v53 = vrot.slane %v3989_v27, 5  ;;  %v3995_v34 = vrot.slane %v3993_v8, 4  ;;  %v17720_v28 = vpop.f32.mrb[28].mxu1  ;;  %v17722_v62 = vpop.f32.mrb[27].mxu0 }
 0x16f   : > { %6202 = vmatmul.mubr.bf16.gmra.mrb[76].mxu1 %v21254_v43  ;;  %21255 = vst [vmem:[#allocation33_spill] sm:$0xff] %v17722_v62  ;;  %v21256_v26 = vcombine.low %v17591_v50, %v17157_v14  ;;  %v5688_v24 = vsel %vm15716_vm2, %v5683_v58, %v5687_v18  ;;  %v3986_v43 = vor.u32 %v3985_v55, %v3982_v39  ;;  %v5690_v40 = vshrl.u32 %v17690_v48, 16  ;;  %v17730_v16 = vpop.f32.mrb[29].mxu1  ;;  %v17734_v47 = vld [vmem:[#allocation2 + $0x6c] sm:$0xf]  ;;  %v15249_v50 = vld [vmem:[%s21155_s6 + $0x40] sm:$0xff]  }
 0x170   : > { %v4001_v22 = vrot.slane %v3999_v60, 5  ;;  %14389 = vmatpush3.bf16.msra.mxu1 %v15240_v61  ;;  %v12492_v27 = vcombine.low %v5678_v56, %v5688_v24  ;;  %v3996_v29 = vor.u32 %v3995_v34, %v3991_v53  ;;  %v5693_v38 = vshll.u32 %v17690_v48, 16  ;;  %v17736_v14 = vpop.f32.mrb[30].mxu1 }
 0x171   : > { %5101 = vmatmul.mubr.bf16.gmra.mrb[108].mxu0 %v21256_v26  ;;  %v5699_v8 = vshll.u32 %v17696_v52, 16  ;;  %14390 = vmatprep.subr.bf16.mxu1 %v15243_v11  ;;  %v3987_v55 = vrot.slane %v3986_v43, 4  ;;  %v5692_v18 = vrot.slane %v5690_v40, 4  ;;  %v5703_v61 = vshrl.u32 %v17696_v52, 16  ;;  %v17743_v34 = vpop.f32.mrb[31].mxu1  ;;  %v15255_v40 = vld [vmem:[%s21155_s6 + $0xc0] sm:$0xff]  }
 0x172   : > { %v5709_v56 = vshll.u32 %v17704_v30, 16  ;;  %6209 = vmatprep.mubr.bf16.mxu1 %v12492_v27  ;;  %v3997_v58 = vrot.slane %v3996_v29, 4  ;;  %v5695_v39 = vrot.slane %v5693_v38, 5  ;;  %v12485_v26 = vcombine.low %v17690_v48, %v17696_v52  ;;  %v15265_v48 = vld [vmem:[%s21155_s6 + $0x118] sm:$0xff]  }
 0x173   : > { %v5701_v60 = vrot.slane %v5699_v8, 5  ;;  %v3992_v24 = vsel %vm15716_vm2, %v3987_v55, %v3991_v53  ;;  %v5705_v62 = vrot.slane %v5703_v61, 4  ;;  %v17751_v43 = vadd.f32 %v17410_v9, %v17386_v37  ;;  %v17766_v8 = vld [vmem:[#allocation2 + $0xc0] sm:$0xf]  ;;  %v17773_v55 = vld [vmem:[#allocation2 + $0xc4] sm:$0xf] }
 0x174   : > { %v5711_v12 = vrot.slane %v5709_v56, 5  ;;  %14391 = vmatpush3.bf16.msra.mxu1 %v15243_v11  ;;  %v4002_v27 = vsel %vm15716_vm2, %v3997_v58, %v4001_v22  ;;  %v5696_v29 = vor.u32 %v5695_v39, %v5692_v18  ;;  %v17760_v38 = vadd.f32 %v17417_v6, %v17393_v17  ;;  %v15257_v17 = vld [vmem:[%s21155_s6 + $0x108] sm:$0xff]   ;;  %v15471_v61 = vld [vmem:[#allocation2 + $0x74] sm:$0x1] }
 0x175   : > { %21257 = vst [vmem:[#allocation34_spill] sm:$0xff] %v17751_v43  ;;  %v17764_v53 = vadd.f32 %v17444_v0, %v17428_v25  ;;  %13784 = vmatprep.subr.bf16.mxu1 %v15249_v50  ;;  %v12328_v37 = vcombine.low %v3992_v24, %v4002_v27  ;;  %v5706_v9 = vor.u32 %v5705_v62, %v5701_v60  ;;  %v4004_v22 = vshrl.u32 %v17734_v47, 16  ;;  %v17782_v62 = vld [vmem:[#allocation2 + $0x70] sm:$0xf] }
 0x176   : > { %21258 = vst [vmem:[#allocation35_spill] sm:$0xff] %v17760_v38  ;;  %v17770_v11 = vadd.f32 %v17446_v59, %v17435_v57  ;;  %v21261_v6 = vcombine.low %v17629_v45, %v17631_v51  ;;  %v5697_v25 = vrot.slane %v5696_v29, 4  ;;  %v4007_v0 = vshll.u32 %v17734_v47, 16  ;;  %v17790_v29 = vld [vmem:[#allocation2 + $0xc8] sm:$0x1] }
 0x177   : > { %21259 = vst [vmem:[#allocation36_spill] sm:$0xff] %v17764_v53  ;;  %v4013_v57 = vshll.u32 %v17782_v62, 16  ;;  %v4017_v59 = vshrl.u32 %v17782_v62, 16  ;;  %5382 = vmatprep.mubr.bf16.mxu0 %v12328_v37  ;;  %v5707_v50 = vrot.slane %v5706_v9, 4  ;;  %v4006_v18 = vrot.slane %v4004_v22, 4 }
 0x178   : > { %21260 = vst [vmem:[#allocation37_spill] sm:$0xff] %v17770_v11  ;;  %6210 = vmatmul.mubr.bf16.gmra.mrb[80].mxu1 %v21261_v6  ;;  %v4023_v56 = vshll.u32 %v15471_v61, 16  ;;  %v5702_v45 = vsel %vm15716_vm2, %v5697_v25, %v5701_v60  ;;  %v4009_v39 = vrot.slane %v4007_v0, 5  ;;  %v5714_v9 = vshrl.u32 %v17766_v8, 16 }
 0x179   : > { %5383 = vmatmul.mubr.bf16.vlgmr.msra.gmra.mrb[112].mxu0 %v12320_v33  ;;  %v4015_v24 = vrot.slane %v4013_v57, 5  ;;  %v4019_v27 = vrot.slane %v4017_v59, 4  ;;  %v5712_v6 = vsel %vm15716_vm2, %v5707_v50, %v5711_v12  ;;  %v5717_v22 = vshll.u32 %v17766_v8, 16  ;;  %v15259_v33 = vld [vmem:[%s21155_s6 + $0xc8] sm:$0xff]   ;;  %v15261_v12 = vld [vmem:[%s21155_s6 + $0x110] sm:$0xff]  }
 0x17a   : > { %v4025_v37 = vrot.slane %v4023_v56, 5  ;;  %13705 = vmatpush3.bf16.msra.mxu0 %v15255_v40  ;;  %v12493_v61 = vcombine.low %v5702_v45, %v5712_v6  ;;  %v4010_v60 = vor.u32 %v4009_v39, %v4006_v18  ;;  %v5723_v0 = vshll.u32 %v17773_v55, 16  ;;  %v17805_v56 = vld [vmem:[#allocation2 + $0x78] sm:$0xf] }
 0x17b   : > { %v4020_v25 = vor.u32 %v4019_v27, %v4015_v24  ;;  %13706 = vmatprep.subr.bf16.mxu0 %v15257_v17  ;;  %v5716_v57 = vrot.slane %v5714_v9, 4  ;;  %v5719_v59 = vrot.slane %v5717_v22, 5  ;;  %v5727_v50 = vshrl.u32 %v17773_v55, 16  ;;  %v15263_v17 = vld [vmem:[%s21155_s6 + $0xd0] sm:$0xff]  }
 0x17c   : > { %v5733_v40 = vshll.u32 %v17790_v29, 16  ;;  %6217 = vmatprep.mubr.bf16.mxu1 %v12493_v61  ;;  %v4011_v58 = vrot.slane %v4010_v60, 4  ;;  %v5725_v18 = vrot.slane %v5723_v0, 5  ;;  %v17814_v22 = vadd.f32 %v17486_v36, %v17478_v23  ;;  %v21264_v0 = vld [vmem:[#allocation11_spill] sm:$0xff]  ;;  %v17833_v36 = vpop.f32.mrb[28].mxu0 }
 0x17d   : > { %v4021_v45 = vrot.slane %v4020_v25, 4  ;;  %v5720_v27 = vor.u32 %v5719_v59, %v5716_v57  ;;  %v5729_v6 = vrot.slane %v5727_v50, 4  ;;  %v17825_v25 = vadd.f32 %v17490_v32, %v17484_v7  ;;  %v17831_v23 = vld [vmem:[#allocation2 + $0xcc] sm:$0xf]  ;;  %v17842_v7 = vld [vmem:[#allocation2 + $0xd0] sm:$0xf] }
 0x17e   : > { %v5735_v9 = vrot.slane %v5733_v40, 5  ;;  %21262 = vst [vmem:[#allocation38_spill] sm:$0xff] %v17814_v22  ;;  %13707 = vmatpush3.bf16.msra.mxu0 %v15259_v33  ;;  %v4016_v61 = vsel %vm15716_vm2, %v4011_v58, %v4015_v24  ;;  %v17829_v57 = vadd.f32 %v21264_v0, %v17492_v54  ;;  %v21267_v33 = vld [vmem:[#allocation13_spill] sm:$0xff]  ;;  %v17844_v32 = vpop.f32.mrb[29].mxu0  ;;  %v4028_v54 = vshrl.u32 %v17805_v56, 16 }
 0x17f   : > { %v4026_v60 = vsel %vm15716_vm2, %v4021_v45, %v4025_v37  ;;  %21263 = vst [vmem:[#allocation39_spill] sm:$0xff] %v17825_v25  ;;  %v5721_v58 = vrot.slane %v5720_v27, 4  ;;  %v5730_v24 = vor.u32 %v5729_v6, %v5725_v18  ;;  %v21266_v37 = vld [vmem:[#allocation10_spill] sm:$0xff]  ;;  %13708 = vmatprep.subr.bf16.mxu0 %v15261_v12  ;;  %v4031_v50 = vshll.u32 %v17805_v56, 16  ;;  %v17848_v40 = vld [vmem:[#allocation2 + $0x7c] sm:$0xf] }
 0x180   : > { %6218 = vmatmul.mubr.bf16.gmra.mrb[84].mxu1 %v12485_v26  ;;  %21265 = vst [vmem:[#allocation11_spill] sm:$0xff] %v17829_v57  ;;  %v12329_v26 = vcombine.low %v4016_v61, %v4026_v60  ;;  %v17840_v59 = vadd.f32 %v21267_v33, %v21266_v37  ;;  %v4037_v45 = vshll.u32 %v17848_v40, 16  ;;  %v4041_v27 = vshrl.u32 %v17848_v40, 16  ;;  %v17852_v6 = vld [vmem:[#allocation2 + $0xd4] sm:$0x1]  ;;  %v17854_v61 = vpop.f32.mrb[30].mxu0 }
 0x181   : > { %v15267_v60 = vld [vmem:[%s21155_s6 + $0xd8] sm:$0xff]   ;;  %v5726_v12 = vsel %vm15716_vm2, %v5721_v58, %v5725_v18  ;;  %v5731_v0 = vrot.slane %v5730_v24, 4  ;;  %v15473_v37 = vld [vmem:[#allocation2 + $0x80] sm:$0x1]  ;;  %v21269_v11 = vcombine.low %v17734_v47, %v17782_v62  ;;  %v4033_v38 = vrot.slane %v4031_v50, 5 }
 0x182   : > { %21268 = vst [vmem:[#allocation10_spill] sm:$0xff] %v17840_v59  ;;  %5390 = vmatprep.mubr.bf16.mxu0 %v12329_v26  ;;  %v4047_v33 = vshll.u32 %v15473_v37, 16  ;;  %v17863_v59 = vpop.f32.mrb[31].mxu0  ;;  %13709 = vmatpush3.bf16.msra.mxu0 %v15263_v17  ;;  %v15269_v25 = vld [vmem:[%s21155_s6 + $0x120] sm:$0xff]   ;;  %v4030_v26 = vrot.slane %v4028_v54, 4  ;;  %v4039_v18 = vrot.slane %v4037_v45, 5 }
 0x183   : > { %5391 = vmatmul.mubr.bf16.gmra.mrb[116].mxu0 %v21269_v11  ;;  %v4043_v58 = vrot.slane %v4041_v27, 4  ;;  %13710 = vmatprep.subr.bf16.mxu0 %v15265_v48  ;;  %v5736_v24 = vsel %vm15716_vm2, %v5731_v0, %v5735_v9  ;;  %v5738_v39 = vshrl.u32 %v17831_v23, 16  ;;  %v5741_v17 = vshll.u32 %v17831_v23, 16  ;;  %v15271_v47 = vld [vmem:[%s21155_s6 + $0xe0] sm:$0xff]  }
 0x184   : > { %v4049_v37 = vrot.slane %v4047_v33, 5  ;;  %v12494_v53 = vcombine.low %v5726_v12, %v5736_v24  ;;  %v4034_v57 = vor.u32 %v4033_v38, %v4030_v26  ;;  %v5747_v22 = vshll.u32 %v17842_v7, 16  ;;  %v17881_v54 = vld [vmem:[#allocation2 + $0x84] sm:$0xf]  ;;  %v17885_v12 = vpop.f32.mrb[32].mxu0  ;;  %v15277_v24 = vld [vmem:[%s21155_s6 + $0x130] sm:$0xff]  }
 0x185   : > { %v4044_v43 = vor.u32 %v4043_v58, %v4039_v18  ;;  %v5740_v11 = vrot.slane %v5738_v39, 4  ;;  %v5743_v62 = vrot.slane %v5741_v17, 5  ;;  %v5751_v48 = vshrl.u32 %v17842_v7, 16  ;;  %v15273_v39 = vld [vmem:[%s21155_s6 + $0x128] sm:$0xff]  }
 0x186   : > { %v5757_v9 = vshll.u32 %v17852_v6, 16  ;;  %13711 = vmatpush3.bf16.msra.mxu0 %v15267_v60  ;;  %6225 = vmatprep.mubr.bf16.mxu1 %v12494_v53  ;;  %v4035_v50 = vrot.slane %v4034_v57, 4  ;;  %v5749_v38 = vrot.slane %v5747_v22, 5  ;;  %v21270_v0 = vcombine.low %v17766_v8, %v17773_v55  ;;  %v17897_v22 = vpop.f32.mrb[33].mxu0 }
 0x187   : > { %v4045_v45 = vrot.slane %v4044_v43, 4  ;;  %13712 = vmatprep.subr.bf16.mxu0 %v15269_v25  ;;  %v5744_v33 = vor.u32 %v5743_v62, %v5740_v11  ;;  %v5753_v60 = vrot.slane %v5751_v48, 4  ;;  %v17895_v43 = vadd.f32 %v17534_v15, %v17521_v3  ;;  %v15275_v25 = vld [vmem:[%s21155_s6 + $0xe8] sm:$0xff]   ;;  %v5761_v15 = vld [vmem:[#allocation2 + $0x78] sm:$0xe]  ;;  %v17914_v58 = vpop.f32.mrb[34].mxu0 }
 0x188   : > { %6226 = vmatmul.mubr.bf16.gmra.mrb[88].mxu1 %v21270_v0  ;;  %v5759_v53 = vrot.slane %v5757_v9, 5  ;;  %v4040_v57 = vsel %vm15716_vm2, %v4035_v50, %v4039_v18  ;;  %v17908_v26 = vadd.f32 %v17536_v1, %v17523_v2  ;;  %v17912_v3 = vadd.f32 %v17557_v21, %v17547_v63  ;;  %v17923_v2 = vpop.f32.mrb[35].mxu0  ;;  %v17927_v21 = vld [vmem:[#allocation2 + $0x88] sm:$0xf]  ;;  %v5762_v50 = vld [vmem:[#allocation2 + $0x84] sm:$0xe] }
 0x189   : > { %v4050_v8 = vsel %vm15716_vm2, %v4045_v45, %v4049_v37  ;;  %v5745_v18 = vrot.slane %v5744_v33, 4  ;;  %v5754_v11 = vor.u32 %v5753_v60, %v5749_v38  ;;  %v21271_v37 = vld [vmem:[#allocation16_spill] sm:$0xff]  ;;  %v4052_v1 = vshrl.u32 %v17881_v54, 16  ;;  %v15475_v0 = vld [vmem:[#allocation2 + $0x8c] sm:$0x1] }
 0x18a   : > { %v12330_v17 = vcombine.low %v4040_v57, %v4050_v8  ;;  %v17921_v62 = vadd.f32 %v21271_v37, %v17549_v10  ;;  %13713 = vmatpush3.bf16.msra.mxu0 %v15271_v47  ;;  %v4055_v63 = vshll.u32 %v17881_v54, 16  ;;  %v4061_v48 = vshll.u32 %v17927_v21, 16 }
 0x18b   : > { %v4065_v9 = vshrl.u32 %v17927_v21, 16  ;;  %13714 = vmatprep.subr.bf16.mxu0 %v15273_v39  ;;  %v5750_v10 = vsel %vm15716_vm2, %v5745_v18, %v5749_v38  ;;  %v5755_v45 = vrot.slane %v5754_v11, 4  ;;  %v4071_v33 = vshll.u32 %v15475_v0, 16  ;;  %v15279_v39 = vld [vmem:[%s21155_s6 + $0xf0] sm:$0xff]   ;;  %v15476_v11 = vld [vmem:[#allocation2 + $0x7c] sm:$0xf] }
 0x18c   : > { %21272 = vst [vmem:[#allocation13_spill] sm:$0xff] %v17921_v62  ;;  %5398 = vmatprep.mubr.bf16.mxu0 %v12330_v17  ;;  %v21273_v60 = vcombine.low %v17805_v56, %v17848_v40  ;;  %v4054_v57 = vrot.slane %v4052_v1, 4  ;;  %v4057_v8 = vrot.slane %v4055_v63, 5  ;;  %v4063_v37 = vrot.slane %v4061_v48, 5  ;;  %v15280_v56 = vld [vmem:[%s21155_s6 + $0x138] sm:$0xff]   ;;  %v17948_v47 = vpop.f32.mrb[36].mxu0 }
 0x18d   : > { %v4067_v27 = vrot.slane %v4065_v9, 4  ;;  %v5760_v38 = vsel %vm15716_vm2, %v5755_v45, %v5759_v53  ;;  %v4073_v17 = vrot.slane %v4071_v33, 5  ;;  %v12472_v18 = vrot.slane %v5761_v15, 9  ;;  %v15477_v48 = vld [vmem:[#allocation2 + $0x80] sm:$0x1]  ;;  %v17952_v62 = vpop.f32.mrb[37].mxu0 }
 0x18e   : > { %5399 = vmatmul.mubr.bf16.gmra.mrb[120].mxu0 %v21273_v60  ;;  %v5795_v0 = vrot.slane %v15476_v11, 5  ;;  %v12495_v40 = vcombine.low %v5750_v10, %v5760_v38  ;;  %v4058_v1 = vor.u32 %v4057_v8, %v4054_v57  ;;  %v5798_v9 = vrot.slane %v15477_v48, 5  ;;  %v17946_v60 = vld [vmem:[#allocation2 + $0x90] sm:$0xf]  ;;  %v17962_v48 = vpop.f32.mrb[38].mxu0 }
 0x18f   : > { %13715 = vmatpush3.bf16.msra.mxu0 %v15275_v25  ;;  %v4068_v63 = vor.u32 %v4067_v27, %v4063_v37  ;;  %v12473_v33 = vrot.slane %v5762_v50, 9  ;;  %v15478_v25 = vld [vmem:[#allocation2 + $0x88] sm:$0xf]  ;;  %v21275_v27 = vld [vmem:[#allocation17_spill] sm:$0xff]  ;;  %v17960_v38 = vadd.f32 %v17654_v41, %v17644_v31  ;;  %v21278_v41 = vld [vmem:[#allocation18_spill] sm:$0xff] }
 0x190   : > { %13716 = vmatprep.subr.bf16.mxu0 %v15277_v24  ;;  %v5796_v15 = vsel %vm16202_vm14, %v12472_v18, %v5795_v0  ;;  %v5797_v45 = vrot.slane %v5795_v0, 4  ;;  %v5802_v11 = vrot.slane %v15478_v25, 5  ;;  %6233 = vmatprep.mubr.bf16.mxu1 %v12495_v40  ;;  %v4059_v10 = vrot.slane %v4058_v1, 4  ;;  %v5763_v24 = vld [vmem:[#allocation2 + $0x90] sm:$0xe]  ;;  %v15281_v50 = vld [vmem:[%s21155_s6 + $0xf8] sm:$0xff]  }
 0x191   : > { %v4069_v57 = vrot.slane %v4068_v63, 4  ;;  %v17956_v8 = vadd.f32 %v17568_v5, %v21275_v27  ;;  %21276 = vst [vmem:[#allocation16_spill] sm:$0xff] %v17960_v38  ;;  %v21277_v18 = vcombine.low %v17831_v23, %v17842_v7  ;;  %v21279_v31 = vld [vmem:[#allocation19_spill] sm:$0xff]  ;;  %v17978_v63 = vpop.f32.mrb[39].mxu0 }
 0x192   : > { %v5799_v0 = vsel %vm16202_vm14, %v5797_v45, %v5798_v9  ;;  %v5803_v5 = vsel %vm16202_vm14, %v12473_v33, %v5802_v11  ;;  %v5804_v40 = vrot.slane %v5802_v11, 4  ;;  %v17976_v1 = vadd.f32 %v21279_v31, %v21278_v41  ;;  %v5764_v45 = vld [vmem:[#allocation2 + $0x9c] sm:$0xe] }
 0x193   : > { %6234 = vmatmul.mubr.bf16.gmra.mrb[92].mxu1 %v21277_v18  ;;  %13717 = vmatpush3.bf16.msra.mxu0 %v15279_v39  ;;  %v4064_v25 = vsel %vm15716_vm2, %v4059_v10, %v4063_v37  ;;  %v4074_v23 = vsel %vm15716_vm2, %v4069_v57, %v4073_v17  ;;  %v12496_v27 = vcombine.low %v5796_v15, %v5799_v0  ;;  %v21281_v11 = vld [vmem:[#allocation9_spill] sm:$0xff]  ;;  %v4076_v39 = vshrl.u32 %v17946_v60, 16  ;;  %v17994_v17 = vld [vmem:[#allocation2 + $0x94] sm:$0xf] }
 0x194   : > { %v17986_v9 = vadd.f32 %v17672_v20, %v17665_v49  ;;  %13718 = vmatprep.subr.bf16.mxu0 %v15280_v56  ;;  %v12331_v33 = vcombine.low %v4064_v25, %v4074_v23  ;;  %v21282_v18 = vrot.slane %v21281_v11, 5  ;;  %v4079_v37 = vshll.u32 %v17946_v60, 16  ;;  %v15480_v20 = vld [vmem:[#allocation2 + $0x98] sm:$0x1]  ;;  %v15250_v25 = vld [vmem:[%s21155_s6] sm:$0xff]  }
 0x195   : > { %14392 = vmatprep.mubr.bf16.mxu1 %v12496_v27  ;;  %v4085_v15 = vshll.u32 %v17994_v17, 16  ;;  %v4089_v49 = vshrl.u32 %v17994_v17, 16  ;;  %v4095_v56 = vshll.u32 %v15480_v20, 16  ;;  %v4078_v57 = vrot.slane %v4076_v39, 4  ;;  %v21284_v39 = vld [vmem:[#allocation12_spill] sm:$0xff] }
 0x196   : > { %21280 = vst [vmem:[#allocation17_spill] sm:$0xff] %v17986_v9  ;;  %v5806_v41 = vsel %vm16202_vm14, %v5804_v40, %v21282_v18  ;;  %5406 = vmatprep.mubr.bf16.mxu0 %v12331_v33  ;;  %v4081_v0 = vrot.slane %v4079_v37, 5  ;;  %v12474_v31 = vrot.slane %v5763_v24, 9  ;;  %v5809_v33 = vrot.slane %v17482_v46, 5  ;;  %v18007_v18 = vpop.f32.mrb[40].mxu0  ;;  %v15251_v24 = vld [vmem:[%s21155_s6 + $0x48] sm:$0xff]  }
 0x197   : > { %v12497_v10 = vcombine.low %v5803_v5, %v5806_v41  ;;  %13719 = vmatpush3.bf16.msra.mxu0 %v15281_v50  ;;  %v21283_v5 = vcombine.low %v17881_v54, %v17927_v21  ;;  %v4087_v23 = vrot.slane %v4085_v15, 5  ;;  %v4091_v27 = vrot.slane %v4089_v49, 4  ;;  %v18014_v40 = vld [vmem:[#allocation2 + $0x9c] sm:$0xf]  ;;  %v18016_v54 = vpop.f32.mrb[41].mxu0  ;;  %v21296_v9 = vld [vmem:[#allocation26_spill] sm:$0xff] }
 0x198   : > { %v4097_v11 = vrot.slane %v4095_v56, 5  ;;  %v4082_v41 = vor.u32 %v4081_v0, %v4078_v57  ;;  %v5812_v37 = vrot.slane %v21284_v39, 5  ;;  %v12475_v20 = vrot.slane %v5764_v45, 9  ;;  %v18021_v56 = vpop.f32.mrb[42].mxu0  ;;  %v21286_v0 = vld [vmem:[#allocation20_spill] sm:$0xff] }
 0x199   : > { %5407 = vmatmul.mubr.bf16.gmra.mrb[124].mxu0 %v21283_v5  ;;  %v5816_v50 = vrot.slane %v17563_v35, 5  ;;  %v4092_v21 = vor.u32 %v4091_v27, %v4087_v23  ;;  %v5810_v46 = vsel %vm16202_vm14, %v12474_v31, %v5809_v33  ;;  %v5811_v15 = vrot.slane %v5809_v33, 4  ;;  %v18023_v5 = vpop.f32.mrb[32].mxu1  ;;  %v18031_v27 = vpop.f32.mrb[43].mxu0 }
 0x19a   : > { %v5819_v49 = vrot.slane %v17574_v19, 5  ;;  %21285 = vst [vmem:[#allocation18_spill] sm:$0xff] %v18023_v5  ;;  %v4083_v57 = vrot.slane %v4082_v41, 4  ;;  %v18029_v39 = vadd.f32 %v17603_v13, %v21286_v0  ;;  %v18033_v31 = vpop.f32.mrb[33].mxu1  ;;  %v18043_v41 = vadd.f32 %v17618_v44, %v17607_v4  ;;  %v15252_v13 = vld [vmem:[%s21155_s6 + $0x8] sm:$0xff]   ;;  %v21291_v5 = vld [vmem:[#allocation24_spill] sm:$0xff] }
 0x19b   : > { %14393 = vmatmul.mubr.bf16.vlgmr.msra.gmra.mrb[48].mxu1 %v12497_v10  ;;  %v5817_v35 = vsel %vm16202_vm14, %v12475_v20, %v5816_v50  ;;  %v5818_v45 = vrot.slane %v5816_v50, 4  ;;  %21287 = vst [vmem:[#allocation19_spill] sm:$0xff] %v18033_v31  ;;  %v4093_v33 = vrot.slane %v4092_v21, 4  ;;  %v5813_v19 = vsel %vm16202_vm14, %v5811_v15, %v5812_v37  ;;  %v18045_v20 = vpop.f32.mrb[34].mxu1  ;;  %v5765_v4 = vld [vmem:[#allocation2 + $0xa8] sm:$0xe] }
 0x19c   : > { %v18039_v10 = vadd.f32 %v17730_v16, %v17720_v28  ;;  %21288 = vst [vmem:[#allocation9_spill] sm:$0xff] %v18045_v20  ;;  %13785 = vmatpush3.bf16.msra.mxu1 %v15250_v25  ;;  %v4088_v50 = vsel %vm15716_vm2, %v4083_v57, %v4087_v23  ;;  %v12498_v21 = vcombine.low %v5810_v46, %v5813_v19  ;;  %v5766_v44 = vld [vmem:[#allocation2 + $0xb4] sm:$0xe]  ;;  %v18058_v16 = vpop.f32.mrb[35].mxu1  ;;  %v4100_v15 = vshrl.u32 %v18014_v40, 16 }
 0x19d   : > { %v5820_v37 = vsel %vm16202_vm14, %v5818_v45, %v5819_v49  ;;  %v18056_v28 = vadd.f32 %v17743_v34, %v17736_v14  ;;  %21290 = vst [vmem:[#allocation20_spill] sm:$0xff] %v18058_v16  ;;  %13786 = vmatprep.subr.bf16.mxu1 %v15251_v24  ;;  %v15254_v25 = vld [vmem:[%s21155_s6 + $0x50] sm:$0xff]   ;;  %v4098_v23 = vsel %vm15716_vm2, %v4093_v33, %v4097_v11  ;;  %v4103_v49 = vshll.u32 %v18014_v40, 16  ;;  %v18067_v14 = vld [vmem:[#allocation2 + $0xa0] sm:$0xf]  ;;  %v21292_v16 = vld [vmem:[#allocation25_spill] sm:$0xff] }
 0x19e   : > { %v12499_v46 = vcombine.low %v5817_v35, %v5820_v37  ;;  %v12332_v57 = vcombine.low %v4088_v50, %v4098_v23  ;;  %14396 = vmatprep.mubr.bf16.mxu1 %v12498_v21  ;;  %v4109_v34 = vshll.u32 %v18067_v14, 16  ;;  %v4113_v24 = vshrl.u32 %v18067_v14, 16  ;;  %v15482_v45 = vld [vmem:[#allocation2 + $0xa4] sm:$0x1]  ;;  %v18077_v33 = vpop.f32.mrb[44].mxu0  ;;  %v15256_v50 = vld [vmem:[%s21155_s6 + $0x10] sm:$0xff]  }
 0x19f   : > { %21289 = vst [vmem:[#allocation12_spill] sm:$0xff] %v18056_v28  ;;  %v4119_v0 = vshll.u32 %v15482_v45, 16  ;;  %v4102_v19 = vrot.slane %v4100_v15, 4  ;;  %v4105_v20 = vrot.slane %v4103_v49, 5  ;;  %v18073_v11 = vadd.f32 %v21292_v16, %v21291_v5  ;;  %v18082_v49 = vpop.f32.mrb[45].mxu0  ;;  %v15258_v5 = vld [vmem:[%s21155_s6 + $0x58] sm:$0xff]  }
 0x1a0   : > { %13787 = vmatpush3.bf16.msra.mxu1 %v15252_v13  ;;  %5414 = vmatprep.mubr.bf16.mxu0 %v12332_v57  ;;  %v4111_v21 = vrot.slane %v4109_v34, 5  ;;  %v4115_v37 = vrot.slane %v4113_v24, 4  ;;  %v12476_v15 = vrot.slane %v5765_v4, 9  ;;  %v21293_v16 = vcombine.low %v17946_v60, %v17994_v17  ;;  %v21294_v35 = vld [vmem:[#allocation23_spill] sm:$0xff]  ;;  %v18092_v24 = vpop.f32.mrb[46].mxu0  ;;  %v18094_v4 = vpop.f32.mrb[36].mxu1 }
 0x1a1   : > { %v4121_v23 = vrot.slane %v4119_v0, 5  ;;  %13788 = vmatprep.subr.bf16.mxu1 %v15254_v25  ;;  %v4106_v13 = vor.u32 %v4105_v20, %v4102_v19  ;;  %v5823_v45 = vrot.slane %v17631_v51, 5  ;;  %v5826_v57 = vrot.slane %v21294_v35, 5  ;;  %21295 = vst [vmem:[#allocation24_spill] sm:$0xff] %v18094_v4  ;;  %v21297_v28 = vld [vmem:[#allocation27_spill] sm:$0xff]  ;;  %v18104_v51 = vpop.f32.mrb[47].mxu0 }
 0x1a2   : > { %5415 = vmatmul.mubr.bf16.gmra.mrb[128].mxu0 %v21293_v16  ;;  %v12477_v34 = vrot.slane %v5766_v44, 9  ;;  %v4116_v25 = vor.u32 %v4115_v37, %v4111_v21  ;;  %v5830_v0 = vrot.slane %v17696_v52, 5  ;;  %v5833_v31 = vrot.slane %v17704_v30, 5  ;;  %v18102_v17 = vld [vmem:[#allocation2 + $0xa8] sm:$0xf]  ;;  %v18106_v20 = vpop.f32.mrb[37].mxu1 }
 0x1a3   : > { %14397 = vmatmul.mubr.bf16.gmra.mrb[52].mxu1 %v12499_v46  ;;  %v18100_v60 = vadd.f32 %v21297_v28, %v21296_v9  ;;  %21298 = vst [vmem:[#allocation25_spill] sm:$0xff] %v18106_v20  ;;  %v4107_v44 = vrot.slane %v4106_v13, 4  ;;  %v5824_v19 = vsel %vm16202_vm14, %v12476_v15, %v5823_v45  ;;  %v5825_v46 = vrot.slane %v5823_v45, 4  ;;  %v21299_v35 = vld [vmem:[#allocation30_spill] sm:$0xff]  ;;  %v21300_v37 = vld [vmem:[#allocation31_spill] sm:$0xff]  ;;  %v18114_v30 = vpop.f32.mrb[38].mxu1 }
 0x1a4   : > { %v18112_v52 = vadd.f32 %v21300_v37, %v21299_v35  ;;  %21301 = vst [vmem:[#allocation23_spill] sm:$0xff] %v18114_v30  ;;  %13789 = vmatpush3.bf16.msra.mxu1 %v15256_v50  ;;  %v15260_v9 = vld [vmem:[%s21155_s6 + $0x18] sm:$0xff]   ;;  %v4117_v28 = vrot.slane %v4116_v25, 4  ;;  %v5831_v16 = vsel %vm16202_vm14, %v12477_v34, %v5830_v0  ;;  %v5832_v13 = vrot.slane %v5830_v0, 4  ;;  %v21302_v4 = vld [vmem:[#allocation32_spill] sm:$0xff]  ;;  %v18125_v45 = vpop.f32.mrb[39].mxu1 }
 0x1a5   : > { %v21303_v20 = vld [vmem:[#allocation33_spill] sm:$0xff]  ;;  %21305 = vst [vmem:[#allocation27_spill] sm:$0xff] %v18125_v45  ;;  %13790 = vmatprep.subr.bf16.mxu1 %v15258_v5  ;;  %v15262_v50 = vld [vmem:[%s21155_s6 + $0x60] sm:$0xff]   ;;  %v4112_v35 = vsel %vm15716_vm2, %v4107_v44, %v4111_v21  ;;  %v5827_v25 = vsel %vm16202_vm14, %v5825_v46, %v5826_v57  ;;  %v4124_v34 = vshrl.u32 %v18102_v17, 16  ;;  %v4127_v0 = vshll.u32 %v18102_v17, 16 }
 0x1a6   : > { %v18123_v15 = vadd.f32 %v21303_v20, %v21302_v4  ;;  %v4122_v4 = vsel %vm15716_vm2, %v4117_v28, %v4121_v23  ;;  %v12500_v20 = vcombine.low %v5824_v19, %v5827_v25  ;;  %v5834_v5 = vsel %vm16202_vm14, %v5832_v13, %v5833_v31  ;;  %v18140_v37 = vld [vmem:[#allocation2 + $0xac] sm:$0xf]  ;;  %v5767_v45 = vld [vmem:[#allocation2 + $0xc0] sm:$0xe]  ;;  %v15484_v28 = vld [vmem:[#allocation2 + $0xb0] sm:$0x1] }
 0x1a7   : > { %v4133_v30 = vshll.u32 %v18140_v37, 16  ;;  %v12333_v21 = vcombine.low %v4112_v35, %v4122_v4  ;;  %v12501_v44 = vcombine.low %v5831_v16, %v5834_v5  ;;  %v4126_v38 = vrot.slane %v4124_v34, 4  ;;  %v5768_v46 = vld [vmem:[#allocation2 + $0xcc] sm:$0xe]  ;;  %v15264_v23 = vld [vmem:[%s21155_s6 + $0x20] sm:$0xff]  }
 0x1a8   : > { %21304 = vst [vmem:[#allocation26_spill] sm:$0xff] %v18123_v15  ;;  %v4129_v57 = vrot.slane %v4127_v0, 5  ;;  %v18143_v15 = vpop.f32.mrb[48].mxu0  ;;  %13791 = vmatpush3.bf16.msra.mxu1 %v15260_v9  ;;  %14400 = vmatprep.mubr.bf16.mxu1 %v12500_v20  ;;  %v4137_v31 = vshrl.u32 %v18140_v37, 16  ;;  %v4143_v13 = vshll.u32 %v15484_v28, 16  ;;  %v18153_v16 = vadd.f32 %v17844_v32, %v17833_v36  ;;  %v15266_v9 = vld [vmem:[%s21155_s6 + $0x68] sm:$0xff]  }
 0x1a9   : > { %v18148_v19 = vrot.slane %v4133_v30, 5  ;;  %v18155_v35 = vpop.f32.mrb[49].mxu0  ;;  %13792 = vmatprep.subr.bf16.mxu1 %v15262_v50  ;;  %5422 = vmatprep.mubr.bf16.mxu0 %v12333_v21  ;;  %v12478_v34 = vrot.slane %v5767_v45, 9  ;;  %v5837_v0 = vrot.slane %v17773_v55, 5  ;;  %v18165_v20 = vpop.f32.mrb[40].mxu1  ;;  %v15268_v36 = vld [vmem:[%s21155_s6 + $0x28] sm:$0xff]   ;;  %v21307_v32 = vcombine.low %v18014_v40, %v18067_v14 }
 0x1aa   : > { %v4130_v25 = vor.u32 %v4129_v57, %v4126_v38  ;;  %v18163_v4 = vpop.f32.mrb[50].mxu0  ;;  %21306 = vst [vmem:[#allocation30_spill] sm:$0xff] %v18165_v20  ;;  %v4139_v38 = vrot.slane %v4137_v31, 4  ;;  %v4145_v50 = vrot.slane %v4143_v13, 5  ;;  %v5840_v5 = vrot.slane %v17790_v29, 5  ;;  %v18178_v57 = vpop.f32.mrb[41].mxu1 }
 0x1ab   : > { %5423 = vmatmul.mubr.bf16.gmra.mrb[132].mxu0 %v21307_v32  ;;  %14401 = vmatmul.mubr.bf16.gmra.mrb[56].mxu1 %v12501_v44  ;;  %v12479_v45 = vrot.slane %v5768_v46, 9  ;;  %v18174_v21 = vld [vmem:[#allocation2 + $0xb4] sm:$0xf]  ;;  %v18176_v55 = vpop.f32.mrb[51].mxu0  ;;  %v5838_v40 = vsel %vm16202_vm14, %v12478_v34, %v5837_v0  ;;  %v5839_v14 = vrot.slane %v5837_v0, 4  ;;  %v5844_v44 = vrot.slane %v17842_v7, 5 }
 0x1ac   : > { %v15270_v28 = vld [vmem:[%s21155_s6 + $0x70] sm:$0xff]   ;;  %v4131_v30 = vrot.slane %v4130_v25, 4  ;;  %v18186_v31 = vpop.f32.mrb[42].mxu1  ;;  %13793 = vmatpush3.bf16.msra.mxu1 %v15264_v23  ;;  %v4140_v29 = vor.u32 %v4139_v38, %v18148_v19  ;;  %v5847_v46 = vrot.slane %v17852_v6, 5  ;;  %v18192_v13 = vadd.f32 %v17863_v59, %v17854_v61  ;;  %v21309_v32 = vld [vmem:[#allocation38_spill] sm:$0xff]  ;;  %v21310_v61 = vld [vmem:[#allocation21_spill] sm:$0xff] }
 0x1ad   : > { %21308 = vst [vmem:[#allocation31_spill] sm:$0xff] %v18186_v31  ;;  %v2424_v25 = vadd.f32 %v17885_v12, %v21309_v32  ;;  %v18196_v20 = vpop.f32.mrb[43].mxu1  ;;  %13794 = vmatprep.subr.bf16.mxu1 %v15266_v9  ;;  %v5841_v23 = vsel %vm16202_vm14, %v5839_v14, %v5840_v5  ;;  %v5845_v6 = vsel %vm16202_vm14, %v12479_v45, %v5844_v44  ;;  %v5846_v34 = vrot.slane %v5844_v44, 4  ;;  %v21311_v12 = vld [vmem:[#allocation34_spill] sm:$0xff]  ;;  %v21313_v45 = vld [vmem:[#allocation36_spill] sm:$0xff]  ;;  %v18222_v44 = vpop.f32.mrb[52].mxu0 }
 0x1ae   : > { %v4136_v7 = vsel %vm15716_vm2, %v4131_v30, %v18148_v19  ;;  %v4141_v0 = vrot.slane %v4140_v29, 4  ;;  %v12502_v59 = vcombine.low %v5838_v40, %v5841_v23  ;;  %v2416_v32 = vadd.f32 %v21311_v12, %v17897_v22  ;;  %v18213_v9 = vld [vmem:[%s21155_s6 + $0x140] sm:$0xff]   ;;  %v21312_v30 = vld [vmem:[#allocation11_spill] sm:$0xff]  ;;  %v15272_v22 = vld [vmem:[%s21155_s6 + $0x30] sm:$0xff]  }
 0x1af   : > { %v18206_v38 = vadd.f32 %v21310_v61, %v2424_v25  ;;  %v5848_v19 = vsel %vm16202_vm14, %v5846_v34, %v5847_v46  ;;  %v2427_v5 = vadd.f32 %v17914_v58, %v21312_v30  ;;  %v2419_v40 = vadd.f32 %v21313_v45, %v17923_v2  ;;  %v15274_v29 = vld [vmem:[%s21155_s6 + $0x78] sm:$0xff]   ;;  %v21314_v25 = vld [vmem:[#allocation14_spill] sm:$0xff]  ;;  %v18236_v34 = vpop.f32.mrb[53].mxu0  ;;  %v21316_v30 = vld [vmem:[#allocation15_spill] sm:$0xff]  ;;  %14408 = vmatprep.subr.bf16.mxu0 %v18213_v9 }
 0x1b0   : > { %v4148_v14 = vshrl.u32 %v18174_v21, 16  ;;  %13795 = vmatpush3.bf16.msra.mxu1 %v15268_v36  ;;  %v4146_v46 = vsel %vm15716_vm2, %v4141_v0, %v4145_v50  ;;  %14404 = vmatprep.mubr.bf16.mxu1 %v12502_v59  ;;  %v12503_v58 = vcombine.low %v5845_v6, %v5848_v19  ;;  %v18233_v2 = vadd.f32 %v21314_v25, %v2416_v32  ;;  %v21315_v61 = vld [vmem:[#allocation22_spill] sm:$0xff]  ;;  %v18244_v31 = vpop.f32.mrb[54].mxu0  ;;  %v18247_v6 = vld [vmem:[#allocation2 + $0xb8] sm:$0xf] }
 0x1b1   : > { %v4151_v23 = vshll.u32 %v18174_v21, 16  ;;  %13796 = vmatprep.subr.bf16.mxu1 %v15270_v28  ;;  %v12334_v36 = vcombine.low %v4136_v7, %v4146_v46  ;;  %v18239_v12 = vadd.f32 %v21315_v61, %v2427_v5  ;;  %v18242_v45 = vadd.f32 %v21316_v30, %v2419_v40  ;;  %v15486_v7 = vld [vmem:[#allocation2 + $0xbc] sm:$0x1]  ;;  %v18251_v32 = vpop.f32.mrb[55].mxu0 }
 0x1b2   : > { %v4150_v53 = vrot.slane %v4148_v14, 4  ;;  %v4157_v0 = vshll.u32 %v18247_v6, 16  ;;  %v4161_v28 = vshrl.u32 %v18247_v6, 16  ;;  %v4167_v59 = vshll.u32 %v15486_v7, 16  ;;  %v15276_v61 = vld [vmem:[%s21155_s6 + $0x38] sm:$0xff]  }
 0x1b3   : > { %14405 = vmatmul.mubr.bf16.gmra.mrb[60].mxu1 %v12503_v58  ;;  %v4153_v50 = vrot.slane %v4151_v23, 5  ;;  %5430 = vmatprep.mubr.bf16.mxu0 %v12334_v36  ;;  %v12327_v19 = vcombine.low %v18174_v21, %v18247_v6  ;;  %v2440_v5 = vadd.f32 %v17948_v47, %v17956_v8  ;;  %v2432_v40 = vadd.f32 %v17895_v43, %v17952_v62  ;;  %v21318_v47 = vld [vmem:[#allocation35_spill] sm:$0xff]  ;;  %v21319_v43 = vld [vmem:[#allocation28_spill] sm:$0xff] }
 0x1b4   : > { %v2443_v14 = vadd.f32 %v17962_v48, %v17976_v1  ;;  %v21317_v46 = vcombine.low %v18102_v17, %v18140_v37  ;;  %v4159_v25 = vrot.slane %v4157_v0, 5  ;;  %v4163_v23 = vrot.slane %v4161_v28, 4  ;;  %13797 = vmatpush3.bf16.msra.mxu1 %v15272_v22  ;;  %v21320_v48 = vld [vmem:[#allocation37_spill] sm:$0xff]  ;;  %v1125_v17 = vld [vmem:[#allocation3 + $0xc] sm:$0x1] }
 0x1b5   : > { %v4154_v58 = vor.u32 %v4153_v50, %v4150_v53  ;;  %v4169_v36 = vrot.slane %v4167_v59, 5  ;;  %v18268_v8 = vadd.f32 %v21318_v47, %v2440_v5  ;;  %v18271_v62 = vadd.f32 %v21319_v43, %v2432_v40  ;;  %13798 = vmatprep.subr.bf16.mxu1 %v15274_v29  ;;  %v1173_v0 = vld [vmem:[#allocation3 + $0x14] sm:$0x1]  ;;  %v21321_v28 = vld [vmem:[#allocation29_spill] sm:$0xff]  ;;  %v1128_v29 = vld [vmem:[#allocation3 + $0x18] sm:$0x1] }
 0x1b6   : > { %5431 = vmatmul.mubr.bf16.gmra.mrb[136].mxu0 %v21317_v46  ;;  %v18274_v1 = vadd.f32 %v21320_v48, %v2443_v14  ;;  %v2435_v53 = vadd.f32 %v17912_v3, %v17978_v63  ;;  %v4164_v22 = vor.u32 %v4163_v23, %v4159_v25  ;;  %v2456_v30 = vadd.f32 %v18007_v18, %v18073_v11  ;;  %v13412_v5 = vpop.f32.mrb[56].mxu0  ;;  %v1176_v14 = vld [vmem:[#allocation3 + $0x20] sm:$0x1]  ;;  %v21325_v47 = vld [vmem:[#allocation26_spill] sm:$0xff] }
 0x1b7   : > { %v4155_v37 = vrot.slane %v4154_v58, 4  ;;  %v2448_v50 = vadd.f32 %v18029_v39, %v18016_v54  ;;  %v2459_v59 = vadd.f32 %v18021_v56, %v18100_v60  ;;  %v2451_v3 = vadd.f32 %v18043_v41, %v18031_v27  ;;  %v21322_v39 = vld [vmem:[#allocation39_spill] sm:$0xff]  ;;  %v13413_v56 = vpop.f32.mrb[57].mxu0  ;;  %v21323_v60 = vld [vmem:[#allocation13_spill] sm:$0xff]  ;;  %v21324_v41 = vld [vmem:[#allocation10_spill] sm:$0xff] }
 0x1b8   : > { %v18283_v7 = vadd.f32 %v21321_v28, %v2435_v53  ;;  %v2472_v63 = vadd.f32 %v18077_v33, %v18153_v16  ;;  %v4165_v11 = vrot.slane %v4164_v22, 4  ;;  %v18294_v54 = vadd.f32 %v17908_v26, %v2456_v30  ;;  %13799 = vmatpush3.bf16.msra.mxu1 %v15276_v61  ;;  %v1131_v26 = vld [vmem:[#allocation3 + $0x24] sm:$0x1]  ;;  %v13415_v58 = vpop.f32.mrb[58].mxu0  ;;  %v21327_v22 = vld [vmem:[#allocation16_spill] sm:$0xff] }
 0x1b9   : > { %v4160_v18 = vsel %vm15716_vm2, %v4155_v37, %v4159_v25  ;;  %v18297_v40 = vadd.f32 %v21322_v39, %v2448_v50  ;;  %v18300_v27 = vadd.f32 %v21323_v60, %v2459_v59  ;;  %v18303_v33 = vadd.f32 %v21324_v41, %v2451_v3  ;;  %v1179_v25 = vld [vmem:[#allocation3 + $0x2c] sm:$0x1]  ;;  %v1134_v50 = vld [vmem:[#allocation3 + $0x30] sm:$0x1] }
 0x1ba   : > { %v18306_v16 = vadd.f32 %v18039_v10, %v2472_v63  ;;  %v2464_v46 = vadd.f32 %v18112_v52, %v18082_v49  ;;  %v4170_v23 = vsel %vm15716_vm2, %v4165_v11, %v4169_v36  ;;  %v2475_v61 = vadd.f32 %v18092_v24, %v18192_v13  ;;  %v13416_v10 = vpop.f32.mrb[59].mxu0  ;;  %v1182_v24 = vld [vmem:[#allocation3 + $0x38] sm:$0x1]  ;;  %v1137_v11 = vld [vmem:[#allocation3 + $0x3c] sm:$0x1] }
 0x1bb   : > { %v2467_v43 = vadd.f32 %v21325_v47, %v18104_v51  ;;  %v1126_v53 = vsel %vm15755_vm6, 0, %v1125_v17  ;;  %v12335_v37 = vcombine.low %v4160_v18, %v4170_v23  ;;  %v13402_v49 = vadd.f32 %v18155_v35, %v18143_v15  ;;  %v21329_v13 = vld [vmem:[#allocation12_spill] sm:$0xff]  ;;  %v21330_v51 = vld [vmem:[#allocation17_spill] sm:$0xff]  ;;  %v18334_v17 = vld [vmem:[%s21153_s4] ss:$0 sm:$0xff] }
 0x1bc   : > { %v18319_v30 = vadd.f32 %v21327_v22, %v2464_v46  ;;  %1127 = vst [vmem:[#allocation3 + $0xc] sm:$0x1] %v1126_v53  ;;  %v1174_v36 = vsel %vm15767_vm8, 0, %v1173_v0  ;;  %v18326_v28 = vadd.f32 %v21329_v13, %v2475_v61  ;;  %v13405_v15 = vadd.f32 %v18176_v55, %v18163_v4  ;;  %v18353_v4 = vld [vmem:[%s21154_s5] ss:$0 sm:$0xff]  ;;  %v13418_v39 = vpop.f32.mrb[60].mxu0 }
 0x1bd   : > { %v18329_v59 = vadd.f32 %v21330_v51, %v2467_v43  ;;  %1175 = vst [vmem:[#allocation3 + $0x14] sm:$0x1] %v1174_v36  ;;  %v1129_v35 = vsel %vm15755_vm6, 0, %v1128_v29  ;;  %5438 = vmatprep.mubr.bf16.mxu0 %v12335_v37  ;;  %v14670_v0 = vadd.f32 %v13402_v49, %v18233_v2  ;;  %v13408_v3 = vadd.f32 %v18236_v34, %v18222_v44  ;;  %v18358_v34 = vpop.f32.mrb[44].mxu1  ;;  %v13419_v46 = vpop.f32.mrb[61].mxu0  ;;  %v21334_v23 = vld [vmem:[#allocation9_spill] sm:$0xff] }
 0x1be   : > { %1130 = vst [vmem:[#allocation3 + $0x18] sm:$0x1] %v1129_v35  ;;  %v1177_v63 = vsel %vm15767_vm8, 0, %v1176_v14  ;;  %v13411_v18 = vadd.f32 %v18251_v32, %v18244_v31  ;;  %5439 = vmatmul.mubr.bf16.gmra.mrb[140].mxu0 %v12327_v19  ;;  %v14678_v55 = vadd.f32 %v13405_v15, %v18242_v45  ;;  %v1132_v44 = vsel %vm15755_vm6, 0, %v1131_v26  ;;  %v21331_v32 = vld [vmem:[#allocation19_spill] sm:$0xff]  ;;  %v18365_v29 = vpop.f32.mrb[45].mxu1 }
 0x1bf   : > { %1178 = vst [vmem:[#allocation3 + $0x20] sm:$0x1] %v1177_v63  ;;  %v13414_v2 = vadd.f32 %v13413_v56, %v13412_v5  ;;  %v1180_v31 = vsel %vm15767_vm8, 0, %v1179_v25  ;;  %v14671_v21 = vadd.f32 %v14670_v0, %v21331_v32  ;;  %v14666_v6 = vadd.f32 %v13408_v3, %v18206_v38  ;;  %1133 = vst [vmem:[#allocation3 + $0x24] sm:$0x1] %v1132_v44  ;;  %v21332_v14 = vld [vmem:[#allocation20_spill] sm:$0xff] }
 0x1c0   : > { %v14674_v19 = vadd.f32 %v13411_v18, %v18239_v12  ;;  %1181 = vst [vmem:[#allocation3 + $0x2c] sm:$0x1] %v1180_v31  ;;  %v13417_v45 = vadd.f32 %v13416_v10, %v13415_v58  ;;  %v14679_v60 = vadd.f32 %v14678_v55, %v21332_v14  ;;  %v18369_v56 = vpop.f32.mrb[46].mxu1  ;;  %v1135_v41 = vsel %vm15755_vm6, 0, %v1134_v50  ;;  %v21333_v26 = vld [vmem:[#allocation18_spill] sm:$0xff]  ;;  %v21335_v53 = vld [vmem:[#allocation25_spill] sm:$0xff] }
 0x1c1   : > { %v14686_v5 = vadd.f32 %v13414_v2, %v18271_v62  ;;  %v1183_v38 = vsel %vm15767_vm8, 0, %v1182_v24  ;;  %v3635_v12 = vmul.f32 %v14671_v21, %v18334_v17  ;;  %v14667_v25 = vadd.f32 %v14666_v6, %v21333_v26  ;;  %v18379_v47 = vpop.f32.mrb[47].mxu1  ;;  %1136 = vst [vmem:[#allocation3 + $0x30] sm:$0x1] %v1135_v41  ;;  %v13421_v62 = vpop.f32.mrb[62].mxu0  ;;  %v21336_v24 = vld [vmem:[#allocation27_spill] sm:$0xff] }
 0x1c2   : > { %v14675_v58 = vadd.f32 %v14674_v19, %v21334_v23  ;;  %v14694_v61 = vadd.f32 %v13417_v45, %v18283_v7  ;;  %1184 = vst [vmem:[#allocation3 + $0x38] sm:$0x1] %v1183_v38  ;;  %v3636_v43 = vmul.f32 %v14679_v60, %v18334_v17  ;;  %v13420_v37 = vadd.f32 %v13419_v46, %v13418_v39  ;;  %v13422_v22 = vpop.f32.mrb[63].mxu0  ;;  %v21337_v2 = vld [vmem:[#allocation24_spill] sm:$0xff] }
 0x1c3   : > { %v14687_v10 = vadd.f32 %v14686_v5, %v21335_v53  ;;  %v1138_v49 = vsel %vm15755_vm6, 0, %v1137_v11  ;;  %v3658_v36 = vadd.f32 %v18353_v4, %v3635_v12  ;;  %v3637_v50 = vmul.f32 %v14667_v25, %v18334_v17  ;;  %v21338_v5 = vld [vmem:[#allocation23_spill] sm:$0xff] }
 0x1c4   : > { %v3638_v7 = vmul.f32 %v14675_v58, %v18334_v17  ;;  %v14695_v13 = vadd.f32 %v14694_v61, %v21336_v24  ;;  %1139 = vst [vmem:[#allocation3 + $0x3c] sm:$0x1] %v1138_v49  ;;  %v3659_v51 = vadd.f32 %v18353_v4, %v3636_v43  ;;  %v14682_v35 = vadd.f32 %v13420_v37, %v18268_v8  ;;  %v18399_v45 = vpop.f32.mrb[64].mxu0  ;;  %v3902_v37 = vld [vmem:[#allocation3 + $0x14] sm:$0x1] }
 0x1c5   : > { %v3639_v15 = vmul.f32 %v14687_v10, %v18334_v17  ;;  %v13423_v0 = vadd.f32 %v13422_v22, %v13421_v62  ;;  %v3674_v3 = vmax.f32 %v3658_v36, 0.0  ;;  %v3660_v63 = vadd.f32 %v18353_v4, %v3637_v50  ;;  %v13425_v46 = vpop.f32.mrb[65].mxu0 }
 0x1c6   : > { %v3661_v18 = vadd.f32 %v18353_v4, %v3638_v7  ;;  %v3640_v11 = vmul.f32 %v14695_v13, %v18334_v17  ;;  %v3675_v55 = vmax.f32 %v3659_v51, 0.0  ;;  %v14683_v31 = vadd.f32 %v14682_v35, %v21337_v2  ;;  %v13427_v23 = vpop.f32.mrb[66].mxu0  ;;  %v3905_v7 = vld [vmem:[#allocation3 + $0x18] sm:$0xf] }
 0x1c7   : > { %v3662_v44 = vadd.f32 %v18353_v4, %v3639_v15  ;;  %v14690_v32 = vadd.f32 %v13423_v0, %v18274_v1  ;;  %v13192_v21 = vpack.c.bf16 %v3674_v3, %v3674_v3  ;;  %v3676_v6 = vmax.f32 %v3660_v63, 0.0  ;;  %v3898_v1 = vld [vmem:[#allocation3 + $0xc] sm:$0xf]  ;;  %v13428_v53 = vpop.f32.mrb[67].mxu0  ;;  %v3909_v63 = vld [vmem:[#allocation3 + $0x20] sm:$0x1] }
 0x1c8   : > { %v3677_v19 = vmax.f32 %v3661_v18, 0.0  ;;  %v3663_v8 = vadd.f32 %v18353_v4, %v3640_v11  ;;  %v13193_v39 = vpack.c.bf16 %v3675_v55, %v3675_v55  ;;  %v3641_v60 = vmul.f32 %v14683_v31, %v18334_v17  ;;  %v3912_v18 = vld [vmem:[#allocation3 + $0x24] sm:$0xf] }
 0x1c9   : > { %v3678_v14 = vmax.f32 %v3662_v44, 0.0  ;;  %v14691_v41 = vadd.f32 %v14690_v32, %v21338_v5  ;;  %v3739_v38 = vshrl.u32 %v13192_v21, 16  ;;  %v3742_v12 = vshll.u32 %v13192_v21, 16  ;;  %v1185_v31 = vld [vmem:[#allocation3 + $0x44] sm:$0x1]  ;;  %v15342_v32 = vld [vmem:[%s21155_s6 + $0x130] sm:$0xff]  }
 0x1ca   : > { %v13194_v26 = vpack.c.bf16 %v3676_v6, %v3676_v6  ;;  %v13195_v25 = vpack.c.bf16 %v3677_v19, %v3677_v19  ;;  %v3747_v58 = vshrl.u32 %v13193_v39, 16  ;;  %v3750_v61 = vshll.u32 %v13193_v39, 16 }
 0x1cb   : > { %v13196_v62 = vpack.c.bf16 %v3678_v14, %v3678_v14  ;;  %v3679_v43 = vmax.f32 %v3663_v8, 0.0  ;;  %v3741_v10 = vrot.slane %v3739_v38, 7 }
 0x1cc   : > { %v3756_v22 = vshrl.u32 %v13194_v26, 16  ;;  %v3759_v49 = vshll.u32 %v13194_v26, 16  ;;  %v3764_v36 = vshrl.u32 %v13195_v25, 16  ;;  %v3749_v50 = vrot.slane %v3747_v58, 7 }
 0x1cd   : > { %v3767_v24 = vshll.u32 %v13195_v25, 16  ;;  %v3773_v13 = vshrl.u32 %v13196_v62, 16  ;;  %v3776_v51 = vshll.u32 %v13196_v62, 16  ;;  %v3744_v15 = vor.u32 %v3742_v12, %v3741_v10 }
 0x1ce   : > { %v3745_v35 = vrot.slane %v3741_v10, 4  ;;  %v3758_v0 = vrot.slane %v3756_v22, 7  ;;  %v3766_v3 = vrot.slane %v3764_v36, 7  ;;  %v3752_v11 = vor.u32 %v3750_v61, %v3749_v50  ;;  %v18413_v61 = vld [vmem:[#allocation3] sm:$0xf] }
 0x1cf   : > { %v3754_v55 = vrot.slane %v3749_v50, 4  ;;  %v3775_v44 = vrot.slane %v3773_v13, 7  ;;  %v13197_v2 = vpack.c.bf16 %v3679_v43, %v3679_v43  ;;  %v3899_v21 = vsel %vm15803_vm10, %v3744_v15, %v3898_v1  ;;  %v18426_v15 = vld [vmem:[#allocation3 + $0x4] sm:$0xf] }
 0x1d0   : > { %v3761_v6 = vor.u32 %v3759_v49, %v3758_v0  ;;  %v3762_v19 = vrot.slane %v3758_v0, 4  ;;  %v3769_v8 = vor.u32 %v3767_v24, %v3766_v3  ;;  %3900 = vst [vmem:[#allocation3 + $0xc] sm:$0xf] %v3899_v21  ;;  %v3753_v14 = vsel %vm15813_vm11, %v3745_v35, %v3752_v11 }
 0x1d1   : > { %v3903_v5 = vsel %vm15755_vm6, %v3754_v55, %v3902_v37  ;;  %v3771_v38 = vrot.slane %v3766_v3, 4  ;;  %v3778_v12 = vor.u32 %v3776_v51, %v3775_v44  ;;  %3901 = vst [vmem:[#allocation3 + $0x10] sm:$0xf] %v3753_v14  ;;  %v3779_v1 = vrot.slane %v3775_v44, 4  ;;  %v3916_v37 = vld [vmem:[#allocation3 + $0x2c] sm:$0x1] }
 0x1d2   : > { %3904 = vst [vmem:[#allocation3 + $0x14] sm:$0x1] %v3903_v5  ;;  %v3906_v26 = vsel %vm15803_vm10, %v3761_v6, %v3905_v7  ;;  %v3770_v25 = vsel %vm15813_vm11, %v3762_v19, %v3769_v8  ;;  %v3781_v58 = vshrl.u32 %v13197_v2, 16  ;;  %v3784_v10 = vshll.u32 %v13197_v2, 16  ;;  %v18424_v24 = vpop.f32.mrb[68].mxu0 }
 0x1d3   : > { %3907 = vst [vmem:[#allocation3 + $0x18] sm:$0xf] %v3906_v26  ;;  %3908 = vst [vmem:[#allocation3 + $0x1c] sm:$0xf] %v3770_v25  ;;  %v3910_v62 = vsel %vm15755_vm6, %v3771_v38, %v3909_v63  ;;  %v3913_v43 = vsel %vm15803_vm10, %v3778_v12, %v3912_v18  ;;  %v3664_v22 = vadd.f32 %v18353_v4, %v3641_v60  ;;  %v1186_v7 = vsel %vm15767_vm8, 0, %v1185_v31  ;;  %v13431_v0 = vpop.f32.mrb[69].mxu0 }
 0x1d4   : > { %3911 = vst [vmem:[#allocation3 + $0x20] sm:$0x1] %v3910_v62  ;;  %3914 = vst [vmem:[#allocation3 + $0x24] sm:$0xf] %v3913_v43  ;;  %v3783_v49 = vrot.slane %v3781_v58, 7  ;;  %v3642_v36 = vmul.f32 %v14691_v41, %v18334_v17  ;;  %v13426_v50 = vadd.f32 %v13425_v46, %v18399_v45  ;;  %v13429_v51 = vadd.f32 %v13428_v53, %v13427_v23  ;;  %v18432_v46 = vpop.f32.mrb[70].mxu0 }
 0x1d5   : > { %v3680_v13 = vmax.f32 %v3664_v22, 0.0  ;;  %1187 = vst [vmem:[#allocation3 + $0x44] sm:$0x1] %v1186_v7  ;;  %v6707_v35 = vshrl.u32 %v18413_v61, 16  ;;  %v6710_v60 = vshll.u32 %v18413_v61, 16  ;;  %v18435_v53 = vpop.f32.mrb[71].mxu0 }
 0x1d6   : > { %v3786_v3 = vor.u32 %v3784_v10, %v3783_v49  ;;  %v3788_v63 = vrot.slane %v3783_v49, 4  ;;  %v3665_v41 = vadd.f32 %v18353_v4, %v3642_v36  ;;  %v14702_v45 = vadd.f32 %v13426_v50, %v18297_v40  ;;  %v6698_v6 = vld [vmem:[#allocation3 + $0x8] sm:$0x1]  ;;  %v3919_v58 = vld [vmem:[#allocation3 + $0x30] sm:$0xf] }
 0x1d7   : > { %v13198_v18 = vpack.c.bf16 %v3680_v13, %v3680_v13  ;;  %v14710_v11 = vadd.f32 %v13429_v51, %v18303_v33  ;;  %v6709_v55 = vrot.slane %v6707_v35, 4  ;;  %v6712_v23 = vrot.slane %v6710_v60, 5  ;;  %v1140_v50 = vld [vmem:[#allocation3 + $0x48] sm:$0x1]  ;;  %v1188_v60 = vld [vmem:[#allocation3 + $0x50] sm:$0x1] }
 0x1d8   : > { %v3787_v44 = vsel %vm15813_vm11, %v3779_v1, %v3786_v3  ;;  %v3917_v2 = vsel %vm15755_vm6, %v3788_v63, %v3916_v37  ;;  %v3681_v31 = vmax.f32 %v3665_v41, 0.0  ;;  %v14703_v21 = vadd.f32 %v14702_v45, %v18178_v57  ;;  %v3923_v63 = vld [vmem:[#allocation3 + $0x38] sm:$0x1] }
 0x1d9   : > { %3915 = vst [vmem:[#allocation3 + $0x28] sm:$0xf] %v3787_v44  ;;  %3918 = vst [vmem:[#allocation3 + $0x2c] sm:$0x1] %v3917_v2  ;;  %v3790_v40 = vshrl.u32 %v13198_v18, 16  ;;  %v3793_v19 = vshll.u32 %v13198_v18, 16  ;;  %v14711_v33 = vadd.f32 %v14710_v11, %v18196_v20  ;;  %v6713_v8 = vor.u32 %v6712_v23, %v6709_v55 }
 0x1da   : > { %v13199_v14 = vpack.c.bf16 %v3681_v31, %v3681_v31  ;;  %v3643_v5 = vmul.f32 %v14703_v21, %v18334_v17  ;;  %v6716_v38 = vshll.u32 %v18426_v15, 16  ;;  %v6720_v12 = vshrl.u32 %v18426_v15, 16 }
 0x1db   : > { %v3792_v26 = vrot.slane %v3790_v40, 7  ;;  %v3644_v25 = vmul.f32 %v14711_v33, %v18334_v17  ;;  %v6714_v1 = vrot.slane %v6713_v8, 4  ;;  %v6726_v57 = vshll.u32 %v6698_v6, 16  ;;  %v18460_v40 = vld [vmem:[#allocation3 + $0xc] sm:$0xf] }
 0x1dc   : > { %v3798_v62 = vshrl.u32 %v13199_v14, 16  ;;  %v3801_v43 = vshll.u32 %v13199_v14, 16  ;;  %v3666_v10 = vadd.f32 %v18353_v4, %v3643_v5  ;;  %v6718_v37 = vrot.slane %v6716_v38, 5  ;;  %v18466_v8 = vld [vmem:[#allocation3 + $0x10] sm:$0xf] }
 0x1dd   : > { %v3795_v20 = vor.u32 %v3793_v19, %v3792_v26  ;;  %v3796_v22 = vrot.slane %v3792_v26, 4  ;;  %v3667_v49 = vadd.f32 %v18353_v4, %v3644_v25  ;;  %v6722_v36 = vrot.slane %v6720_v12, 4 }
 0x1de   : > { %v3800_v7 = vrot.slane %v3798_v62, 7  ;;  %v3682_v13 = vmax.f32 %v3666_v10, 0.0  ;;  %v6719_v51 = vsel %vm15716_vm2, %v6714_v1, %v6718_v37  ;;  %v6728_v35 = vrot.slane %v6726_v57, 5  ;;  %v3926_v1 = vld [vmem:[#allocation3 + $0x3c] sm:$0xf] }
 0x1df   : > { %v3920_v3 = vsel %vm15803_vm10, %v3795_v20, %v3919_v58  ;;  %v3683_v41 = vmax.f32 %v3667_v49, 0.0  ;;  %v6723_v45 = vor.u32 %v6722_v36, %v6718_v37  ;;  %v12602_v18 = vcombine.low %v18413_v61, %v18426_v15  ;;  %v21341_v58 = vld [vmem:[#allocation30_spill] sm:$0xff] }
 0x1e0   : > { %3921 = vst [vmem:[#allocation3 + $0x30] sm:$0xf] %v3920_v3  ;;  %v3803_v11 = vor.u32 %v3801_v43, %v3800_v7  ;;  %v3805_v55 = vrot.slane %v3800_v7, 4  ;;  %v13200_v23 = vpack.c.bf16 %v3682_v13, %v3682_v13  ;;  %v1141_v44 = vsel %vm15755_vm6, 0, %v1140_v50  ;;  %v7154_v13 = vld [vmem:[#allocation3 + $0x14] sm:$0x1] }
 0x1e1   : > { %v13201_v2 = vpack.c.bf16 %v3683_v41, %v3683_v41  ;;  %v6724_v31 = vrot.slane %v6723_v45, 4  ;;  %1142 = vst [vmem:[#allocation3 + $0x48] sm:$0x1] %v1141_v44  ;;  %v13432_v21 = vadd.f32 %v13431_v0, %v18424_v24  ;;  %v1189_v6 = vsel %vm15767_vm8, 0, %v1188_v60  ;;  %v21342_v60 = vld [vmem:[#allocation31_spill] sm:$0xff] }
 0x1e2   : > { %v3804_v61 = vsel %vm15813_vm11, %v3796_v22, %v3803_v11  ;;  %v3924_v15 = vsel %vm15755_vm6, %v3805_v55, %v3923_v63  ;;  %v3807_v19 = vshrl.u32 %v13200_v23, 16  ;;  %v3810_v33 = vshll.u32 %v13200_v23, 16  ;;  %1190 = vst [vmem:[#allocation3 + $0x50] sm:$0x1] %v1189_v6  ;;  %v3930_v22 = vld [vmem:[#allocation3 + $0x44] sm:$0x1] }
 0x1e3   : > { %3922 = vst [vmem:[#allocation3 + $0x34] sm:$0xf] %v3804_v61  ;;  %3925 = vst [vmem:[#allocation3 + $0x38] sm:$0x1] %v3924_v15  ;;  %v3815_v14 = vshrl.u32 %v13201_v2, 16  ;;  %v3818_v24 = vshll.u32 %v13201_v2, 16  ;;  %v6729_v0 = vsel %vm15716_vm2, %v6724_v31, %v6728_v35  ;;  %v14698_v5 = vadd.f32 %v13432_v21, %v18294_v54 }
 0x1e4   : > { %v3809_v38 = vrot.slane %v3807_v19, 7  ;;  %v12610_v12 = vcombine.low %v6719_v51, %v6729_v0  ;;  %v13435_v26 = vadd.f32 %v18435_v53, %v18432_v46  ;;  %v7163_v25 = vshrl.u32 %v18460_v40, 16  ;;  %v15311_v46 = vld [vmem:[%s21155_s6 + $0x100] sm:$0xff]   ;;  %v18491_v45 = vld [vmem:[#allocation3 + $0x10] sm:$0xf] }
 0x1e5   : > { %v3817_v57 = vrot.slane %v3815_v14, 7  ;;  %v14699_v62 = vadd.f32 %v14698_v5, %v21341_v58  ;;  %v7166_v43 = vshll.u32 %v18460_v40, 16  ;;  %v7172_v10 = vshll.u32 %v18466_v8, 16  ;;  %v15312_v53 = vld [vmem:[%s21155_s6 + $0xc0] sm:$0xff]   ;;  %13960 = vmatprep.subr.bf16.mxu1 %v15311_v46  ;;  %v18501_v6 = vld [vmem:[#allocation3 + $0x14] sm:$0x1] }
 0x1e6   : > { %v3812_v37 = vor.u32 %v3810_v33, %v3809_v38  ;;  %v3813_v20 = vrot.slane %v3809_v38, 4  ;;  %8109 = vmatprep.mubr.bf16.mxu1 %v12610_v12  ;;  %v14706_v54 = vadd.f32 %v13435_v26, %v18300_v27  ;;  %v7165_v49 = vrot.slane %v7163_v25, 4  ;;  %v18485_v35 = vld [vmem:[#allocation3 + $0xc] sm:$0xf]  ;;  %21343 = vst [vmem:[#allocation32_spill] sm:$0xff] %v18501_v6 }
 0x1e7   : > { %v3820_v36 = vor.u32 %v3818_v24, %v3817_v57  ;;  %v3822_v50 = vrot.slane %v3817_v57, 4  ;;  %8110 = vmatmul.mubr.bf16.vlgmr.msra.gmra.mrb[96].mxu1 %v12602_v18  ;;  %v3645_v7 = vmul.f32 %v14699_v62, %v18334_v17  ;;  %v7168_v51 = vrot.slane %v7166_v43, 5  ;;  %v18498_v44 = vpop.f32.mrb[72].mxu0 }
 0x1e8   : > { %v3927_v27 = vsel %vm15803_vm10, %v3812_v37, %v3926_v1  ;;  %v14707_v3 = vadd.f32 %v14706_v54, %v21342_v60  ;;  %v7174_v63 = vrot.slane %v7172_v10, 5  ;;  %v7176_v41 = vshrl.u32 %v18466_v8, 16  ;;  %13961 = vmatpush3.bf16.msra.mxu1 %v15312_v53  ;;  %v13437_v15 = vpop.f32.mrb[73].mxu0  ;;  %v15316_v54 = vld [vmem:[%s21155_s6 + $0xc8] sm:$0xff]  }
 0x1e9   : > { %3928 = vst [vmem:[#allocation3 + $0x3c] sm:$0xf] %v3927_v27  ;;  %v3821_v18 = vsel %vm15813_vm11, %v3813_v20, %v3820_v36  ;;  %v3931_v11 = vsel %vm15755_vm6, %v3822_v50, %v3930_v22  ;;  %v3668_v55 = vadd.f32 %v18353_v4, %v3645_v7  ;;  %v7169_v23 = vor.u32 %v7168_v51, %v7165_v49  ;;  %v13439_v0 = vpop.f32.mrb[74].mxu0  ;;  %v15315_v22 = vld [vmem:[%s21155_s6 + $0x108] sm:$0xff]  }
 0x1ea   : > { %3929 = vst [vmem:[#allocation3 + $0x40] sm:$0xf] %v3821_v18  ;;  %3932 = vst [vmem:[#allocation3 + $0x44] sm:$0x1] %v3931_v11  ;;  %v3646_v2 = vmul.f32 %v14707_v3, %v18334_v17  ;;  %v7178_v31 = vrot.slane %v7176_v41, 4  ;;  %v7182_v21 = vshll.u32 %v7154_v13, 16  ;;  %13962 = vmatprep.subr.bf16.mxu1 %v15315_v22  ;;  %v12634_v41 = vcombine.low %v18460_v40, %v18466_v8 }
 0x1eb   : > { %v6731_v61 = vshrl.u32 %v18485_v35, 16  ;;  %v3684_v19 = vmax.f32 %v3668_v55, 0.0  ;;  %v7170_v33 = vrot.slane %v7169_v23, 4  ;;  %v6734_v14 = vshll.u32 %v18485_v35, 16  ;;  %v13440_v25 = vpop.f32.mrb[75].mxu0  ;;  %v15293_v11 = vld [vmem:[%s21155_s6 + $0x148] sm:$0xff]  }
 0x1ec   : > { %v6740_v24 = vshll.u32 %v18491_v45, 16  ;;  %v3669_v5 = vadd.f32 %v18353_v4, %v3646_v2  ;;  %v7179_v38 = vor.u32 %v7178_v31, %v7174_v63  ;;  %v7184_v12 = vrot.slane %v7182_v21, 5  ;;  %v1143_v27 = vld [vmem:[#allocation3 + $0x54] sm:$0x1]  ;;  %v1191_v18 = vld [vmem:[#allocation3 + $0x5c] sm:$0x1]  ;;  %13963 = vmatpush3.bf16.msra.mxu1 %v15316_v54 }
 0x1ed   : > { %v6733_v26 = vrot.slane %v6731_v61, 4  ;;  %v13202_v1 = vpack.c.bf16 %v3684_v19, %v3684_v19  ;;  %v7175_v57 = vsel %vm15716_vm2, %v7170_v33, %v7174_v63  ;;  %v6736_v58 = vrot.slane %v6734_v14, 5  ;;  %v3933_v55 = vld [vmem:[#allocation3 + $0x48] sm:$0xf]  ;;  %v18527_v61 = vld [vmem:[#allocation3 + $0x18] sm:$0xf] }
 0x1ee   : > { %v6742_v62 = vrot.slane %v6740_v24, 5  ;;  %v3685_v43 = vmax.f32 %v3669_v5, 0.0  ;;  %v7180_v10 = vrot.slane %v7179_v38, 4  ;;  %v6744_v37 = vshrl.u32 %v18491_v45, 16  ;;  %v18533_v14 = vld [vmem:[#allocation3 + $0x1c] sm:$0xf] }
 0x1ef   : > { %v6750_v20 = vshll.u32 %v18501_v6, 16  ;;  %v3824_v49 = vshrl.u32 %v13202_v1, 16  ;;  %v3827_v46 = vshll.u32 %v13202_v1, 16  ;;  %v6737_v53 = vor.u32 %v6736_v58, %v6733_v26  ;;  %v3937_v1 = vld [vmem:[#allocation3 + $0x50] sm:$0x1] }
 0x1f0   : > { %v13203_v50 = vpack.c.bf16 %v3685_v43, %v3685_v43  ;;  %v7185_v7 = vsel %vm15716_vm2, %v7180_v10, %v7184_v12  ;;  %v6746_v13 = vrot.slane %v6744_v37, 4  ;;  %v12603_v21 = vcombine.low %v18485_v35, %v18491_v45  ;;  %v18538_v45 = vld [vmem:[#allocation3 + $0x20] sm:$0x1]  ;;  %v15295_v12 = vld [vmem:[%s21155_s6 + $0x150] sm:$0xff]   ;;  %v15487_v6 = vld [vmem:[#allocation3 + $0x10] sm:$0xf] }
 0x1f1   : > { %v6752_v51 = vrot.slane %v6750_v20, 5  ;;  %v3826_v60 = vrot.slane %v3824_v49, 7  ;;  %v12642_v3 = vcombine.low %v7175_v57, %v7185_v7  ;;  %v6738_v63 = vrot.slane %v6737_v53, 4  ;;  %v18551_v37 = vld [vmem:[#allocation3 + $0x18] sm:$0xf] }
 0x1f2   : > { %v3832_v23 = vshrl.u32 %v13203_v50, 16  ;;  %v3835_v2 = vshll.u32 %v13203_v50, 16  ;;  %v6747_v31 = vor.u32 %v6746_v13, %v6742_v62  ;;  %v1144_v8 = vsel %vm15755_vm6, 0, %v1143_v27 }
 0x1f3   : > { %v3829_v19 = vor.u32 %v3827_v46, %v3826_v60  ;;  %v3830_v33 = vrot.slane %v3826_v60, 4  ;;  %7771 = vmatprep.mubr.bf16.mxu0 %v12642_v3  ;;  %v6743_v40 = vsel %vm15716_vm2, %v6738_v63, %v6742_v62  ;;  %1145 = vst [vmem:[#allocation3 + $0x54] sm:$0x1] %v1144_v8  ;;  %v13438_v38 = vadd.f32 %v13437_v15, %v18498_v44 }
 0x1f4   : > { %v3834_v24 = vrot.slane %v3832_v23, 7  ;;  %v6748_v5 = vrot.slane %v6747_v31, 4  ;;  %7772 = vmatmul.mubr.bf16.vlgmr.msra.gmra.mrb[144].mxu0 %v12634_v41  ;;  %v1192_v35 = vsel %vm15767_vm8, 0, %v1191_v18  ;;  %v13441_v57 = vadd.f32 %v13440_v25, %v13439_v0  ;;  %v15321_v0 = vld [vmem:[%s21155_s6 + $0x110] sm:$0xff]   ;;  %v6700_v23 = vld [vmem:[#allocation3 + $0x20] sm:$0x1] }
 0x1f5   : > { %v3934_v26 = vsel %vm15803_vm10, %v3829_v19, %v3933_v55  ;;  %1193 = vst [vmem:[#allocation3 + $0x5c] sm:$0x1] %v1192_v35  ;;  %v7187_v58 = vshrl.u32 %v18527_v61, 16  ;;  %v7190_v62 = vshll.u32 %v18527_v61, 16  ;;  %14409 = vmatpush3.bf16.msra.mxu0 %v18213_v9  ;;  %v14718_v10 = vadd.f32 %v13438_v38, %v18319_v30  ;;  %v15322_v25 = vld [vmem:[%s21155_s6 + $0xd0] sm:$0xff]   ;;  %13964 = vmatprep.subr.bf16.mxu1 %v15321_v0 }
 0x1f6   : > { %3935 = vst [vmem:[#allocation3 + $0x48] sm:$0xf] %v3934_v26  ;;  %v3837_v44 = vor.u32 %v3835_v2, %v3834_v24  ;;  %v3839_v15 = vrot.slane %v3834_v24, 4  ;;  %v6753_v43 = vsel %vm15716_vm2, %v6748_v5, %v6752_v51  ;;  %14410 = vmatprep.subr.bf16.mxu0 %v15293_v11  ;;  %v14726_v20 = vadd.f32 %v13441_v57, %v18329_v59  ;;  %v18569_v51 = vld [vmem:[#allocation3 + $0x1c] sm:$0xf] }
 0x1f7   : > { %v12611_v9 = vcombine.low %v6743_v40, %v6753_v43  ;;  %v7189_v22 = vrot.slane %v7187_v58, 4  ;;  %v7192_v54 = vrot.slane %v7190_v62, 5  ;;  %v14719_v46 = vadd.f32 %v14718_v10, %v18365_v29  ;;  %13965 = vmatpush3.bf16.msra.mxu1 %v15322_v25  ;;  %v1146_v38 = vld [vmem:[#allocation3 + $0x60] sm:$0x1] }
 0x1f8   : > { %v3838_v49 = vsel %vm15813_vm11, %v3830_v33, %v3837_v44  ;;  %v3938_v30 = vsel %vm15755_vm6, %v3839_v15, %v3937_v1  ;;  %v7196_v53 = vshll.u32 %v18533_v14, 16  ;;  %v14727_v50 = vadd.f32 %v14726_v20, %v18379_v47  ;;  %v15297_v47 = vld [vmem:[%s21155_s6 + $0x158] sm:$0xff]   ;;  %v15299_v44 = vld [vmem:[%s21155_s6 + $0x160] sm:$0xff]  }
 0x1f9   : > { %3936 = vst [vmem:[#allocation3 + $0x4c] sm:$0xf] %v3838_v49  ;;  %3939 = vst [vmem:[#allocation3 + $0x50] sm:$0x1] %v3938_v30  ;;  %8117 = vmatprep.mubr.bf16.mxu1 %v12611_v9  ;;  %v7193_v7 = vor.u32 %v7192_v54, %v7189_v22  ;;  %v7200_v59 = vshrl.u32 %v18533_v14, 16  ;;  %v7206_v13 = vshll.u32 %v18538_v45, 16  ;;  %14411 = vmatpush3.bf16.msra.mxu0 %v15293_v11 }
 0x1fa   : > { %8118 = vmatmul.mubr.bf16.gmra.mrb[100].mxu1 %v12603_v21  ;;  %v3647_v27 = vmul.f32 %v14719_v46, %v18334_v17  ;;  %v7198_v29 = vrot.slane %v7196_v53, 5  ;;  %v6755_v3 = vshrl.u32 %v18551_v37, 16  ;;  %14412 = vmatprep.subr.bf16.mxu0 %v15295_v12  ;;  %v3648_v63 = vmul.f32 %v14727_v50, %v18334_v17  ;;  %v13442_v11 = vpop.f32.mrb[76].mxu0  ;;  %v1194_v46 = vld [vmem:[#allocation3 + $0x68] sm:$0x1] }
 0x1fb   : > { %v7194_v41 = vrot.slane %v7193_v7, 4  ;;  %v7202_v18 = vrot.slane %v7200_v59, 4  ;;  %v7208_v55 = vrot.slane %v7206_v13, 5  ;;  %v6758_v21 = vshll.u32 %v18551_v37, 16  ;;  %v13443_v33 = vpop.f32.mrb[77].mxu0 }
 0x1fc   : > { %v3670_v2 = vadd.f32 %v18353_v4, %v3647_v27  ;;  %v6757_v31 = vrot.slane %v6755_v3, 4  ;;  %v6764_v19 = vshll.u32 %v18569_v51, 16  ;;  %v3671_v40 = vadd.f32 %v18353_v4, %v3648_v63  ;;  %v13445_v35 = vpop.f32.mrb[78].mxu0  ;;  %v15328_v3 = vld [vmem:[%s21155_s6 + $0xd8] sm:$0xff]  }
 0x1fd   : > { %v7199_v8 = vsel %vm15716_vm2, %v7194_v41, %v7198_v29  ;;  %v7203_v24 = vor.u32 %v7202_v18, %v7198_v29  ;;  %v6768_v5 = vshrl.u32 %v18569_v51, 16  ;;  %14413 = vmatpush3.bf16.msra.mxu0 %v15295_v12  ;;  %v6760_v1 = vrot.slane %v6758_v21, 5  ;;  %v13446_v62 = vpop.f32.mrb[79].mxu0  ;;  %v15301_v29 = vld [vmem:[%s21155_s6 + $0x168] sm:$0xff]   ;;  %v18616_v21 = vld [vmem:[#allocation3 + $0x2c] sm:$0x1] }
 0x1fe   : > { %v3686_v26 = vmax.f32 %v3670_v2, 0.0  ;;  %v6766_v57 = vrot.slane %v6764_v19, 5  ;;  %v6774_v58 = vshll.u32 %v6700_v23, 16  ;;  %14414 = vmatprep.subr.bf16.mxu0 %v15297_v47  ;;  %v3687_v15 = vmax.f32 %v3671_v40, 0.0  ;;  %v3940_v23 = vld [vmem:[#allocation3 + $0x54] sm:$0xf] }
 0x1ff   : > { %v7204_v43 = vrot.slane %v7203_v24, 4  ;;  %v6770_v10 = vrot.slane %v6768_v5, 4  ;;  %v12635_v0 = vcombine.low %v18527_v61, %v18533_v14  ;;  %v6761_v9 = vor.u32 %v6760_v1, %v6757_v31  ;;  %v18596_v14 = vld [vmem:[#allocation3 + $0x24] sm:$0xf] }
 0x200   : > { %v13204_v25 = vpack.c.bf16 %v3686_v26, %v3686_v26  ;;  %v6776_v20 = vrot.slane %v6774_v58, 5  ;;  %v12604_v12 = vcombine.low %v18551_v37, %v18569_v51  ;;  %v13205_v22 = vpack.c.bf16 %v3687_v15, %v3687_v15  ;;  %v15327_v37 = vld [vmem:[%s21155_s6 + $0x118] sm:$0xff]  }
 0x201   : > { %v7209_v54 = vsel %vm15716_vm2, %v7204_v43, %v7208_v55  ;;  %v6771_v49 = vor.u32 %v6770_v10, %v6766_v57  ;;  %v1147_v30 = vsel %vm15755_vm6, 0, %v1146_v38  ;;  %14415 = vmatpush3.bf16.msra.mxu0 %v15297_v47  ;;  %v6762_v61 = vrot.slane %v6761_v9, 4  ;;  %v18611_v55 = vld [vmem:[#allocation3 + $0x28] sm:$0xf]  ;;  %13966 = vmatprep.subr.bf16.mxu1 %v15327_v37  ;;  %v18620_v38 = vld [vmem:[#allocation3 + $0x24] sm:$0xf] }
 0x202   : > { %v3841_v53 = vshrl.u32 %v13204_v25, 16  ;;  %v3844_v50 = vshll.u32 %v13204_v25, 16  ;;  %v12643_v7 = vcombine.low %v7199_v8, %v7209_v54  ;;  %1148 = vst [vmem:[#allocation3 + $0x60] sm:$0x1] %v1147_v30  ;;  %14416 = vmatprep.subr.bf16.mxu0 %v15299_v44  ;;  %v3849_v59 = vshrl.u32 %v13205_v22, 16  ;;  %13967 = vmatpush3.bf16.msra.mxu1 %v15328_v3 }
 0x203   : > { %v3852_v13 = vshll.u32 %v13205_v22, 16  ;;  %v6772_v51 = vrot.slane %v6771_v49, 4  ;;  %v13444_v27 = vadd.f32 %v13443_v33, %v13442_v11  ;;  %v6767_v63 = vsel %vm15716_vm2, %v6762_v61, %v6766_v57  ;;  %v3944_v8 = vld [vmem:[#allocation3 + $0x5c] sm:$0x1] }
 0x204   : > { %v3843_v47 = vrot.slane %v3841_v53, 7  ;;  %7779 = vmatprep.mubr.bf16.mxu0 %v12643_v7  ;;  %v1195_v41 = vsel %vm15767_vm8, 0, %v1194_v46  ;;  %v13447_v18 = vadd.f32 %v13446_v62, %v13445_v35  ;;  %v3851_v11 = vrot.slane %v3849_v59, 7  ;;  %v18622_v35 = vpop.f32.mrb[80].mxu0  ;;  %v15303_v62 = vld [vmem:[%s21155_s6 + $0x170] sm:$0xff]  }
 0x205   : > { %v6777_v2 = vsel %vm15716_vm2, %v6772_v51, %v6776_v20  ;;  %7780 = vmatmul.mubr.bf16.gmra.mrb[148].mxu0 %v12635_v0  ;;  %v14714_v31 = vadd.f32 %v13444_v27, %v18306_v16  ;;  %1196 = vst [vmem:[#allocation3 + $0x68] sm:$0x1] %v1195_v41  ;;  %v7211_v19 = vshrl.u32 %v18596_v14, 16  ;;  %v18625_v58 = vpop.f32.mrb[81].mxu0  ;;  %v7220_v43 = vshll.u32 %v18611_v55, 16 }
 0x206   : > { %v3846_v33 = vor.u32 %v3844_v50, %v3843_v47  ;;  %v3847_v40 = vrot.slane %v3843_v47, 4  ;;  %v12612_v24 = vcombine.low %v6767_v63, %v6777_v2  ;;  %v14722_v5 = vadd.f32 %v13447_v18, %v18326_v28  ;;  %14417 = vmatpush3.bf16.msra.mxu0 %v15299_v44  ;;  %v18635_v10 = vpop.f32.mrb[82].mxu0  ;;  %v18643_v20 = vld [vmem:[#allocation3 + $0x28] sm:$0xf] }
 0x207   : > { %v3854_v26 = vor.u32 %v3852_v13, %v3851_v11  ;;  %v3856_v1 = vrot.slane %v3851_v11, 4  ;;  %v14715_v16 = vadd.f32 %v14714_v31, %v18358_v34  ;;  %v7213_v57 = vrot.slane %v7211_v19, 4  ;;  %14418 = vmatprep.subr.bf16.mxu0 %v15301_v29  ;;  %v6701_v13 = vld [vmem:[#allocation3 + $0x2c] sm:$0x1] }
 0x208   : > { %v3941_v28 = vsel %vm15803_vm10, %v3846_v33, %v3940_v23  ;;  %8125 = vmatprep.mubr.bf16.mxu1 %v12612_v24  ;;  %v14723_v15 = vadd.f32 %v14722_v5, %v18369_v56  ;;  %v7214_v44 = vshll.u32 %v18596_v14, 16  ;;  %v7224_v9 = vshrl.u32 %v18611_v55, 16  ;;  %v18645_v56 = vpop.f32.mrb[83].mxu0 }
 0x209   : > { %3942 = vst [vmem:[#allocation3 + $0x54] sm:$0xf] %v3941_v28  ;;  %v3855_v34 = vsel %vm15813_vm11, %v3847_v40, %v3854_v26  ;;  %v3945_v0 = vsel %vm15755_vm6, %v3856_v1, %v3944_v8  ;;  %8126 = vmatmul.mubr.bf16.gmra.mrb[104].mxu1 %v12604_v12  ;;  %v3649_v25 = vmul.f32 %v14715_v16, %v18334_v17  ;;  %v7222_v49 = vrot.slane %v7220_v43, 5  ;;  %v15304_v12 = vld [vmem:[%s21155_s6 + $0x178] sm:$0xff]  }
 0x20a   : > { %3943 = vst [vmem:[#allocation3 + $0x58] sm:$0xf] %v3855_v34  ;;  %3946 = vst [vmem:[#allocation3 + $0x5c] sm:$0x1] %v3945_v0  ;;  %v3650_v22 = vmul.f32 %v14723_v15, %v18334_v17  ;;  %v7216_v54 = vrot.slane %v7214_v44, 5  ;;  %v7230_v30 = vshll.u32 %v18616_v21, 16  ;;  %14419 = vmatpush3.bf16.msra.mxu0 %v15301_v29  ;;  %v12636_v24 = vcombine.low %v18596_v14, %v18611_v55 }
 0x20b   : > { %v3672_v46 = vadd.f32 %v18353_v4, %v3649_v25  ;;  %v7226_v53 = vrot.slane %v7224_v9, 4  ;;  %v6779_v50 = vshrl.u32 %v18620_v38, 16  ;;  %v6782_v7 = vshll.u32 %v18620_v38, 16  ;;  %14420 = vmatprep.subr.bf16.mxu0 %v15303_v62  ;;  %v15333_v17 = vld [vmem:[%s21155_s6 + $0x120] sm:$0xff]   ;;  %v18678_v0 = vld [vmem:[#allocation3 + $0x34] sm:$0xf] }
 0x20c   : > { %v3673_v61 = vadd.f32 %v18353_v4, %v3650_v22  ;;  %v7217_v37 = vor.u32 %v7216_v54, %v7213_v57  ;;  %v7232_v59 = vrot.slane %v7230_v30, 5  ;;  %v6788_v51 = vshll.u32 %v18643_v20, 16  ;;  %13968 = vmatprep.subr.bf16.mxu1 %v15333_v17  ;;  %v18664_v4 = vld [vmem:[%s21155_s6 + $0x80] sm:$0xff]   ;;  %v18693_v17 = vld [vmem:[#allocation3 + $0x30] sm:$0xf] }
 0x20d   : > { %v3688_v27 = vmax.f32 %v3672_v46, 0.0  ;;  %v7227_v29 = vor.u32 %v7226_v53, %v7222_v49  ;;  %v6781_v3 = vrot.slane %v6779_v50, 4  ;;  %v6784_v47 = vrot.slane %v6782_v7, 5  ;;  %v3947_v46 = vld [vmem:[#allocation3 + $0x60] sm:$0xf] }
 0x20e   : > { %v3689_v63 = vmax.f32 %v3673_v61, 0.0  ;;  %v7218_v41 = vrot.slane %v7217_v37, 4  ;;  %v6790_v18 = vrot.slane %v6788_v51, 5  ;;  %v6792_v23 = vshrl.u32 %v18643_v20, 16  ;;  %14421 = vmatpush3.bf16.msra.mxu0 %v15303_v62  ;;  %v18670_v5 = vpop.f32.mrb[84].mxu0 }
 0x20f   : > { %v13206_v11 = vpack.c.bf16 %v3688_v27, %v3688_v27  ;;  %v7228_v2 = vrot.slane %v7227_v29, 4  ;;  %v6785_v31 = vor.u32 %v6784_v47, %v6781_v3  ;;  %v6798_v19 = vshll.u32 %v6701_v13, 16  ;;  %14422 = vmatprep.subr.bf16.mxu0 %v15304_v12  ;;  %v18674_v62 = vld [vmem:[#allocation3 + $0x30] sm:$0xf]  ;;  %v18676_v28 = vpop.f32.mrb[85].mxu0  ;;  %v15334_v13 = vld [vmem:[%s21155_s6 + $0xe0] sm:$0xff]  }
 0x210   : > { %v13207_v33 = vpack.c.bf16 %v3689_v63, %v3689_v63  ;;  %v7223_v40 = vsel %vm15716_vm2, %v7218_v41, %v7222_v49  ;;  %v6794_v8 = vrot.slane %v6792_v23, 4  ;;  %v18680_v25 = vpop.f32.mrb[86].mxu0  ;;  %v12605_v54 = vcombine.low %v18620_v38, %v18643_v20  ;;  %v18686_v49 = vld [vmem:[#allocation3 + $0x38] sm:$0x1]  ;;  %v18702_v47 = vld [vmem:[#allocation3 + $0x34] sm:$0xf]  ;;  %13969 = vmatpush3.bf16.msra.mxu1 %v15334_v13 }
 0x211   : > { %v3858_v26 = vshrl.u32 %v13206_v11, 16  ;;  %v3861_v1 = vshll.u32 %v13206_v11, 16  ;;  %v7233_v16 = vsel %vm15716_vm2, %v7228_v2, %v7232_v59  ;;  %v6786_v57 = vrot.slane %v6785_v31, 4  ;;  %v18688_v30 = vpop.f32.mrb[87].mxu0  ;;  %v3951_v59 = vld [vmem:[#allocation3 + $0x68] sm:$0x1] }
 0x212   : > { %v3866_v15 = vshrl.u32 %v13207_v33, 16  ;;  %v3869_v44 = vshll.u32 %v13207_v33, 16  ;;  %v12644_v43 = vcombine.low %v7223_v40, %v7233_v16  ;;  %v6795_v34 = vor.u32 %v6794_v8, %v6790_v18  ;;  %14423 = vmatpush3.bf16.msra.mxu0 %v15304_v12  ;;  %21344 = vst [vmem:[#allocation33_spill] sm:$0xff] %v18702_v47  ;;  %v18704_v63 = vld [vmem:[#allocation3 + $0x38] sm:$0x1] }
 0x213   : > { %v3860_v14 = vrot.slane %v3858_v26, 7  ;;  %v6791_v9 = vsel %vm15716_vm2, %v6786_v57, %v6790_v18  ;;  %v6800_v22 = vrot.slane %v6798_v19, 5  ;;  %14440 = vmatprep.subr.bf16.mxu0 %v18664_v4  ;;  %v7235_v12 = vshrl.u32 %v18674_v62, 16  ;;  %21345 = vst [vmem:[#allocation38_spill] sm:$0xff] %v18704_v63  ;;  %v18713_v40 = vld [vmem:[#allocation3 + $0x3c] sm:$0xf] }
 0x214   : > { %v3868_v53 = vrot.slane %v3866_v15, 7  ;;  %7787 = vmatprep.mubr.bf16.mxu0 %v12644_v43  ;;  %v6796_v50 = vrot.slane %v6795_v34, 4  ;;  %v7238_v7 = vshll.u32 %v18674_v62, 16  ;;  %v7244_v38 = vshll.u32 %v18678_v0, 16  ;;  %v18736_v13 = vld [vmem:[#allocation3 + $0x44] sm:$0x1] }
 0x215   : > { %v3863_v61 = vor.u32 %v3861_v1, %v3860_v14  ;;  %v3864_v37 = vrot.slane %v3860_v14, 4  ;;  %7788 = vmatmul.mubr.bf16.gmra.mrb[152].mxu0 %v12636_v24  ;;  %v7248_v20 = vshrl.u32 %v18678_v0, 16  ;;  %v7237_v3 = vrot.slane %v7235_v12, 4  ;;  %v18724_v14 = vld [vmem:[#allocation3 + $0x40] sm:$0xf] }
 0x216   : > { %v3871_v51 = vor.u32 %v3869_v44, %v3868_v53  ;;  %v3873_v27 = vrot.slane %v3868_v53, 4  ;;  %v6801_v29 = vsel %vm15716_vm2, %v6796_v50, %v6800_v22  ;;  %v7240_v23 = vrot.slane %v7238_v7, 5  ;;  %v18715_v8 = vpop.f32.mrb[88].mxu0 }
 0x217   : > { %v3948_v41 = vsel %vm15803_vm10, %v3863_v61, %v3947_v46  ;;  %v12613_v18 = vcombine.low %v6791_v9, %v6801_v29  ;;  %v7246_v11 = vrot.slane %v7244_v38, 5  ;;  %v7250_v19 = vrot.slane %v7248_v20, 4  ;;  %v18720_v57 = vpop.f32.mrb[89].mxu0 }
 0x218   : > { %3949 = vst [vmem:[#allocation3 + $0x60] sm:$0xf] %v3948_v41  ;;  %v3872_v2 = vsel %vm15813_vm11, %v3864_v37, %v3871_v51  ;;  %v3952_v31 = vsel %vm15755_vm6, %v3873_v27, %v3951_v59  ;;  %v7254_v33 = vshll.u32 %v18686_v49, 16  ;;  %v7241_v24 = vor.u32 %v7240_v23, %v7237_v3  ;;  %v18726_v9 = vpop.f32.mrb[90].mxu0  ;;  %v15339_v27 = vld [vmem:[%s21155_s6 + $0x128] sm:$0xff]  }
 0x219   : > { %3950 = vst [vmem:[#allocation3 + $0x64] sm:$0xf] %v3872_v2  ;;  %3953 = vst [vmem:[#allocation3 + $0x68] sm:$0x1] %v3952_v31  ;;  %8133 = vmatprep.mubr.bf16.mxu1 %v12613_v18  ;;  %v6803_v26 = vshrl.u32 %v18693_v17, 16  ;;  %v6806_v1 = vshll.u32 %v18693_v17, 16  ;;  %v7251_v15 = vor.u32 %v7250_v19, %v7246_v11  ;;  %v12606_v20 = vcombine.low %v18693_v17, %v18702_v47 }
 0x21a   : > { %v6812_v16 = vshll.u32 %v18702_v47, 16  ;;  %8134 = vmatmul.mubr.bf16.gmra.mrb[108].mxu1 %v12605_v54  ;;  %v7256_v44 = vrot.slane %v7254_v33, 5  ;;  %v6816_v43 = vshrl.u32 %v18702_v47, 16  ;;  %v6822_v34 = vshll.u32 %v18704_v63, 16  ;;  %v18728_v12 = vpop.f32.mrb[91].mxu0  ;;  %13970 = vmatprep.subr.bf16.mxu1 %v15339_v27  ;;  %v15340_v19 = vld [vmem:[%s21155_s6 + $0xe8] sm:$0xff]  }
 0x21b   : > { %v7242_v22 = vrot.slane %v7241_v24, 4  ;;  %v6805_v46 = vrot.slane %v6803_v26, 4  ;;  %v6808_v53 = vrot.slane %v6806_v1, 5  ;;  %v7252_v7 = vrot.slane %v7251_v15, 4  ;;  %v18746_v18 = vld [vmem:[#allocation3 + $0x3c] sm:$0xf]  ;;  %13971 = vmatpush3.bf16.msra.mxu1 %v15340_v19 }
 0x21c   : > { %v6814_v50 = vrot.slane %v6812_v16, 5  ;;  %v6818_v61 = vrot.slane %v6816_v43, 4  ;;  %v6824_v37 = vrot.slane %v6822_v34, 5  ;;  %v12637_v54 = vcombine.low %v18674_v62, %v18678_v0  ;;  %v18749_v31 = vld [vmem:[#allocation3 + $0x40] sm:$0xf]  ;;  %13972 = vmatprep.subr.bf16.mxu1 %v15342_v32 }
 0x21d   : > { %v7247_v59 = vsel %vm15716_vm2, %v7242_v22, %v7246_v11  ;;  %v6809_v38 = vor.u32 %v6808_v53, %v6805_v46  ;;  %v7259_v51 = vshrl.u32 %v18713_v40, 16  ;;  %v7257_v29 = vsel %vm15716_vm2, %v7252_v7, %v7256_v44  ;;  %21346 = vst [vmem:[#allocation21_spill] sm:$0xff] %v18749_v31  ;;  %v18757_v44 = vld [vmem:[#allocation3 + $0x44] sm:$0x1] }
 0x21e   : > { %v6819_v3 = vor.u32 %v6818_v61, %v6814_v50  ;;  %v7262_v62 = vshll.u32 %v18713_v40, 16  ;;  %v7268_v41 = vshll.u32 %v18724_v14, 16  ;;  %v12645_v23 = vcombine.low %v7247_v59, %v7257_v29  ;;  %21347 = vst [vmem:[#allocation34_spill] sm:$0xff] %v18757_v44  ;;  %v18766_v59 = vld [vmem:[#allocation3 + $0x48] sm:$0xf] }
 0x21f   : > { %v6810_v17 = vrot.slane %v6809_v38, 4  ;;  %v7261_v11 = vrot.slane %v7259_v51, 4  ;;  %v7272_v2 = vshrl.u32 %v18724_v14, 16  ;;  %v7278_v1 = vshll.u32 %v18736_v13, 16  ;;  %v18761_v22 = vpop.f32.mrb[92].mxu0 }
 0x220   : > { %v6820_v33 = vrot.slane %v6819_v3, 4  ;;  %v7264_v24 = vrot.slane %v7262_v62, 5  ;;  %v7270_v26 = vrot.slane %v7268_v41, 5  ;;  %7795 = vmatprep.mubr.bf16.mxu0 %v12645_v23  ;;  %v6827_v43 = vshrl.u32 %v18746_v18, 16  ;;  %v18770_v3 = vld [vmem:[#allocation3 + $0x4c] sm:$0xf] }
 0x221   : > { %v6815_v16 = vsel %vm15716_vm2, %v6810_v17, %v6814_v50  ;;  %v7274_v15 = vrot.slane %v7272_v2, 4  ;;  %v6830_v34 = vshll.u32 %v18746_v18, 16  ;;  %7796 = vmatmul.mubr.bf16.gmra.mrb[156].mxu0 %v12637_v54  ;;  %v7280_v7 = vrot.slane %v7278_v1, 5  ;;  %v18768_v50 = vpop.f32.mrb[93].mxu0  ;;  %v18784_v1 = vld [vmem:[#allocation3 + $0x48] sm:$0xf] }
 0x222   : > { %v6825_v46 = vsel %vm15716_vm2, %v6820_v33, %v6824_v37  ;;  %v7265_v53 = vor.u32 %v7264_v24, %v7261_v11  ;;  %v6836_v61 = vshll.u32 %v18749_v31, 16  ;;  %v6829_v27 = vrot.slane %v6827_v43, 4  ;;  %v18772_v62 = vpop.f32.mrb[94].mxu0  ;;  %v18782_v24 = vld [vmem:[#allocation3 + $0x50] sm:$0x1] }
 0x223   : > { %v12614_v38 = vcombine.low %v6815_v16, %v6825_v46  ;;  %v7275_v51 = vor.u32 %v7274_v15, %v7270_v26  ;;  %v6832_v29 = vrot.slane %v6830_v34, 5  ;;  %v6840_v37 = vshrl.u32 %v18749_v31, 16  ;;  %v18776_v17 = vpop.f32.mrb[95].mxu0 }
 0x224   : > { %v7266_v41 = vrot.slane %v7265_v53, 4  ;;  %v6838_v23 = vrot.slane %v6836_v61, 5  ;;  %v6846_v54 = vshll.u32 %v18757_v44, 16  ;;  %v12638_v19 = vcombine.low %v18713_v40, %v18724_v14 }
 0x225   : > { %8141 = vmatprep.mubr.bf16.mxu1 %v12614_v38  ;;  %v7276_v11 = vrot.slane %v7275_v51, 4  ;;  %v6833_v2 = vor.u32 %v6832_v29, %v6829_v27  ;;  %v6842_v15 = vrot.slane %v6840_v37, 4  ;;  %v18790_v34 = vadd.f32 %v18625_v58, %v18622_v35 }
 0x226   : > { %8142 = vmatmul.mubr.bf16.gmra.mrb[112].mxu1 %v12606_v20  ;;  %v7271_v16 = vsel %vm15716_vm2, %v7266_v41, %v7270_v26  ;;  %v6848_v43 = vrot.slane %v6846_v54, 5  ;;  %v18796_v53 = vadd.f32 %v18645_v56, %v18635_v10  ;;  %v7283_v61 = vshrl.u32 %v18766_v59, 16  ;;  %v18799_v20 = vld [vmem:[#allocation3 + $0x4c] sm:$0xf]  ;;  %v18809_v56 = vld [vmem:[#allocation3 + $0x50] sm:$0x1] }
 0x227   : > { %v7281_v40 = vsel %vm15716_vm2, %v7276_v11, %v7280_v7  ;;  %v6834_v46 = vrot.slane %v6833_v2, 4  ;;  %21349 = vst [vmem:[#allocation36_spill] sm:$0xff] %v18799_v20  ;;  %v6843_v26 = vor.u32 %v6842_v15, %v6838_v23  ;;  %v7286_v51 = vshll.u32 %v18766_v59, 16  ;;  %v18803_v35 = vpop.f32.mrb[96].mxu0  ;;  %21350 = vst [vmem:[#allocation14_spill] sm:$0xff] %v18809_v56 }
 0x228   : > { %21348 = vst [vmem:[#allocation11_spill] sm:$0xff] %v18796_v53  ;;  %v12646_v38 = vcombine.low %v7271_v16, %v7281_v40  ;;  %v7292_v27 = vshll.u32 %v18770_v3, 16  ;;  %v7285_v7 = vrot.slane %v7283_v61, 4  ;;  %v7296_v29 = vshrl.u32 %v18770_v3, 16  ;;  %v18811_v41 = vpop.f32.mrb[97].mxu0 }
 0x229   : > { %v6839_v58 = vsel %vm15716_vm2, %v6834_v46, %v6838_v23  ;;  %v7302_v10 = vshll.u32 %v18782_v24, 16  ;;  %v6844_v37 = vrot.slane %v6843_v26, 4  ;;  %v7288_v54 = vrot.slane %v7286_v51, 5  ;;  %v18814_v16 = vpop.f32.mrb[98].mxu0 }
 0x22a   : > { %7803 = vmatprep.mubr.bf16.mxu0 %v12646_v38  ;;  %v7294_v11 = vrot.slane %v7292_v27, 5  ;;  %v6851_v2 = vshrl.u32 %v18784_v1, 16  ;;  %v7298_v15 = vrot.slane %v7296_v29, 4  ;;  %v6854_v40 = vshll.u32 %v18784_v1, 16  ;;  %v13640_v61 = vpop.f32.mrb[64].mxu1  ;;  %v18818_v36 = vpop.f32.mrb[99].mxu0 }
 0x22b   : > { %7804 = vmatmul.mubr.bf16.gmra.mrb[160].mxu0 %v12638_v19  ;;  %v7304_v23 = vrot.slane %v7302_v10, 5  ;;  %v6860_v46 = vshll.u32 %v18799_v20, 16  ;;  %v6849_v38 = vsel %vm15716_vm2, %v6844_v37, %v6848_v43  ;;  %v7289_v26 = vor.u32 %v7288_v54, %v7285_v7  ;;  %v13641_v60 = vpop.f32.mrb[65].mxu1  ;;  %v18829_v37 = vld [vmem:[#allocation3 + $0x54] sm:$0xf] }
 0x22c   : > { %v6853_v51 = vrot.slane %v6851_v2, 4  ;;  %v6864_v27 = vshrl.u32 %v18799_v20, 16  ;;  %v12615_v33 = vcombine.low %v6839_v58, %v6849_v38  ;;  %v7299_v39 = vor.u32 %v7298_v15, %v7294_v11  ;;  %v13643_v10 = vpop.f32.mrb[66].mxu1  ;;  %v18841_v38 = vld [vmem:[#allocation3 + $0x54] sm:$0xf] }
 0x22d   : > { %v6856_v19 = vrot.slane %v6854_v40, 5  ;;  %v6862_v29 = vrot.slane %v6860_v46, 5  ;;  %v7290_v44 = vrot.slane %v7289_v26, 4  ;;  %v6870_v48 = vshll.u32 %v18809_v56, 16  ;;  %v13644_v7 = vpop.f32.mrb[67].mxu1 }
 0x22e   : > { %v6866_v52 = vrot.slane %v6864_v27, 4  ;;  %v12639_v43 = vcombine.low %v18766_v59, %v18770_v3  ;;  %8149 = vmatprep.mubr.bf16.mxu1 %v12615_v33  ;;  %v7300_v58 = vrot.slane %v7299_v39, 4  ;;  %v12608_v2 = vcombine.low %v18784_v1, %v18799_v20  ;;  %v18837_v40 = vld [vmem:[#allocation3 + $0x58] sm:$0xf]  ;;  %v18839_v46 = vld [vmem:[#allocation3 + $0x5c] sm:$0x1] }
 0x22f   : > { %v6857_v54 = vor.u32 %v6856_v19, %v6853_v51  ;;  %v18835_v15 = vadd.f32 %v18676_v28, %v18670_v5  ;;  %v15343_v59 = vld [vmem:[%s21155_s6 + $0xf0] sm:$0xff]   ;;  %v21352_v39 = vcombine.low %v18746_v18, %v18749_v31  ;;  %v7295_v33 = vsel %vm15716_vm2, %v7290_v44, %v7294_v11  ;;  %v18863_v18 = vpop.f32.mrb[100].mxu0 }
 0x230   : > { %v6867_v5 = vor.u32 %v6866_v52, %v6862_v29  ;;  %v6872_v28 = vrot.slane %v6870_v48, 5  ;;  %v18851_v1 = vadd.f32 %v13641_v60, %v13640_v61  ;;  %v7305_v26 = vsel %vm15716_vm2, %v7300_v58, %v7304_v23  ;;  %v18861_v19 = vld [vmem:[#allocation3 + $0x58] sm:$0xf]  ;;  %13973 = vmatpush3.bf16.msra.mxu1 %v15343_v59  ;;  %v18867_v11 = vld [vmem:[#allocation3 + $0x5c] sm:$0x1]  ;;  %v18869_v23 = vpop.f32.mrb[101].mxu0 }
 0x231   : > { %21351 = vst [vmem:[#allocation22_spill] sm:$0xff] %v18835_v15  ;;  %8150 = vmatmul.mubr.bf16.gmra.mrb[116].mxu1 %v21352_v39  ;;  %v6858_v51 = vrot.slane %v6857_v54, 4  ;;  %v18857_v32 = vadd.f32 %v18688_v30, %v18680_v25  ;;  %v18859_v27 = vadd.f32 %v13644_v7, %v13643_v10  ;;  %v12647_v44 = vcombine.low %v7295_v33, %v7305_v26  ;;  %v18876_v58 = vpop.f32.mrb[102].mxu0  ;;  %v7355_v15 = vld [vmem:[#allocation3 + $0x18] sm:$0xe] }
 0x232   : > { %21353 = vst [vmem:[#allocation15_spill] sm:$0xff] %v18851_v1  ;;  %v6868_v52 = vrot.slane %v6867_v5, 4  ;;  %v7307_v48 = vshrl.u32 %v18829_v37, 16  ;;  %v7310_v60 = vshll.u32 %v18829_v37, 16  ;;  %21356 = vst [vmem:[#allocation37_spill] sm:$0xff] %v18867_v11  ;;  %v7316_v30 = vshll.u32 %v18837_v40, 16 }
 0x233   : > { %21354 = vst [vmem:[#allocation35_spill] sm:$0xff] %v18857_v32  ;;  %21355 = vst [vmem:[#allocation28_spill] sm:$0xff] %v18859_v27  ;;  %v6863_v25 = vsel %vm15716_vm2, %v6858_v51, %v6862_v29  ;;  %v7320_v61 = vshrl.u32 %v18837_v40, 16  ;;  %v7326_v10 = vshll.u32 %v18839_v46, 16  ;;  %v13646_v7 = vpop.f32.mrb[68].mxu1  ;;  %7811 = vmatprep.mubr.bf16.mxu0 %v12647_v44  ;;  %v6875_v33 = vshrl.u32 %v18841_v38, 16 }
 0x234   : > { %v6873_v54 = vsel %vm15716_vm2, %v6868_v52, %v6872_v28  ;;  %v7309_v59 = vrot.slane %v7307_v48, 4  ;;  %v7312_v39 = vrot.slane %v7310_v60, 5  ;;  %v13647_v5 = vpop.f32.mrb[69].mxu1  ;;  %v18881_v26 = vpop.f32.mrb[103].mxu0  ;;  %7812 = vmatmul.mubr.bf16.gmra.mrb[164].mxu0 %v12639_v43  ;;  %v7318_v51 = vrot.slane %v7316_v30, 5 }
 0x235   : > { %v12616_v29 = vcombine.low %v6863_v25, %v6873_v54  ;;  %v7322_v56 = vrot.slane %v7320_v61, 4  ;;  %v7328_v20 = vrot.slane %v7326_v10, 5  ;;  %v13649_v31 = vpop.f32.mrb[70].mxu1  ;;  %v6877_v1 = vrot.slane %v6875_v33, 4  ;;  %v18889_v25 = vld [vmem:[#allocation3 + $0x60] sm:$0xf] }
 0x236   : > { %v7313_v27 = vor.u32 %v7312_v39, %v7309_v59  ;;  %v6878_v44 = vshll.u32 %v18841_v38, 16  ;;  %v6884_v63 = vshll.u32 %v18861_v19, 16  ;;  %v13650_v28 = vpop.f32.mrb[71].mxu1  ;;  %v6888_v48 = vshrl.u32 %v18861_v19, 16  ;;  %v18891_v30 = vld [vmem:[#allocation3 + $0x64] sm:$0xf] }
 0x237   : > { %8157 = vmatprep.mubr.bf16.mxu1 %v12616_v29  ;;  %v7323_v52 = vor.u32 %v7322_v56, %v7318_v51  ;;  %v6894_v60 = vshll.u32 %v18867_v11, 16  ;;  %v12640_v43 = vcombine.low %v18829_v37, %v18837_v40  ;;  %v15345_v56 = vld [vmem:[%s21155_s6 + $0x138] sm:$0xff]   ;;  %v18900_v37 = vadd.f32 %v18720_v57, %v18715_v8 }
 0x238   : > { %v7314_v61 = vrot.slane %v7313_v27, 4  ;;  %v6880_v10 = vrot.slane %v6878_v44, 5  ;;  %v6886_v54 = vrot.slane %v6884_v63, 5  ;;  %v6890_v33 = vrot.slane %v6888_v48, 4  ;;  %v7354_v48 = vld [vmem:[#allocation3 + $0xc] sm:$0xe]  ;;  %13974 = vmatprep.subr.bf16.mxu1 %v15345_v56 }
 0x239   : > { %8158 = vmatmul.mubr.bf16.gmra.mrb[120].mxu1 %v12608_v2  ;;  %v7324_v39 = vrot.slane %v7323_v52, 4  ;;  %v6896_v29 = vrot.slane %v6894_v60, 5  ;;  %21357 = vst [vmem:[#allocation29_spill] sm:$0xff] %v18900_v37  ;;  %v15346_v2 = vld [vmem:[%s21155_s6 + $0xf8] sm:$0xff]   ;;  %v18907_v44 = vadd.f32 %v13647_v5, %v13646_v7  ;;  %v18911_v59 = vadd.f32 %v18728_v12, %v18726_v9  ;;  %v18913_v52 = vld [vmem:[#allocation3 + $0x68] sm:$0x1] }
 0x23a   : > { %v7319_v63 = vsel %vm15716_vm2, %v7314_v61, %v7318_v51  ;;  %v6881_v27 = vor.u32 %v6880_v10, %v6877_v1  ;;  %v18915_v60 = vpop.f32.mrb[104].mxu0  ;;  %v6891_v57 = vor.u32 %v6890_v33, %v6886_v54  ;;  %v18919_v11 = vadd.f32 %v13650_v28, %v13649_v31  ;;  %v13652_v7 = vpop.f32.mrb[72].mxu1  ;;  %13975 = vmatpush3.bf16.msra.mxu1 %v15346_v2  ;;  %v15349_v31 = vld [vmem:[%s21155_s6 + $0x140] sm:$0xff]  }
 0x23b   : > { %21358 = vst [vmem:[#allocation39_spill] sm:$0xff] %v18907_v44  ;;  %21359 = vst [vmem:[#allocation13_spill] sm:$0xff] %v18911_v59  ;;  %v7329_v8 = vsel %vm15716_vm2, %v7324_v39, %v7328_v20  ;;  %v7331_v1 = vshrl.u32 %v18889_v25, 16  ;;  %v18922_v5 = vpop.f32.mrb[105].mxu0  ;;  %v7334_v51 = vshll.u32 %v18889_v25, 16  ;;  %v7340_v61 = vshll.u32 %v18891_v30, 16  ;;  %14536 = vmatprep.subr.bf16.mxu1 %v15349_v31 }
 0x23c   : > { %21360 = vst [vmem:[#allocation10_spill] sm:$0xff] %v18919_v11  ;;  %v12648_v9 = vcombine.low %v7319_v63, %v7329_v8  ;;  %v6882_v12 = vrot.slane %v6881_v27, 4  ;;  %v13653_v10 = vpop.f32.mrb[73].mxu1  ;;  %v18926_v56 = vpop.f32.mrb[106].mxu0  ;;  %v6892_v20 = vrot.slane %v6891_v57, 4  ;;  %v7344_v39 = vshrl.u32 %v18891_v30, 16 }
 0x23d   : > { %v7333_v28 = vrot.slane %v7331_v1, 4  ;;  %v7350_v33 = vshll.u32 %v18913_v52, 16  ;;  %v13655_v2 = vpop.f32.mrb[74].mxu1  ;;  %v18933_v63 = vpop.f32.mrb[107].mxu0  ;;  %v7336_v8 = vrot.slane %v7334_v51, 5  ;;  %v7342_v59 = vrot.slane %v7340_v61, 5 }
 0x23e   : > { %7819 = vmatprep.mubr.bf16.mxu0 %v12648_v9  ;;  %v6887_v27 = vsel %vm15716_vm2, %v6882_v12, %v6886_v54  ;;  %v12641_v37 = vcombine.low %v18889_v25, %v18891_v30  ;;  %v13656_v11 = vpop.f32.mrb[75].mxu1  ;;  %v6897_v57 = vsel %vm15716_vm2, %v6892_v20, %v6896_v29  ;;  %v7346_v1 = vrot.slane %v7344_v39, 4  ;;  %v15488_v54 = vld [vmem:[#allocation3 + $0x14] sm:$0x1]  ;;  %v7356_v51 = vld [vmem:[#allocation3 + $0x24] sm:$0xe] }
 0x23f   : > { %7820 = vmatmul.mubr.bf16.gmra.mrb[168].mxu0 %v12640_v43  ;;  %v7352_v44 = vrot.slane %v7350_v33, 5  ;;  %v12626_v32 = vrot.slane %v7354_v48, 9  ;;  %v12617_v47 = vcombine.low %v6887_v27, %v6897_v57  ;;  %v7337_v9 = vor.u32 %v7336_v8, %v7333_v28 }
 0x240   : > { %v7388_v53 = vrot.slane %v15487_v6, 5  ;;  %v7391_v12 = vrot.slane %v15488_v54, 5  ;;  %v7347_v61 = vor.u32 %v7346_v1, %v7342_v59  ;;  %v18943_v25 = vadd.f32 %v18768_v50, %v18761_v22 }
 0x241   : > { %v18945_v31 = vadd.f32 %v13653_v10, %v13652_v7  ;;  %v18949_v43 = vadd.f32 %v18776_v17, %v18772_v62  ;;  %8165 = vmatprep.mubr.bf16.mxu1 %v12617_v47  ;;  %v7338_v29 = vrot.slane %v7337_v9, 4  ;;  %v18953_v28 = vadd.f32 %v13656_v11, %v13655_v2  ;;  %v15489_v7 = vld [vmem:[#allocation3 + $0x1c] sm:$0xf]  ;;  %v7357_v62 = vld [vmem:[#allocation3 + $0x30] sm:$0xe] }
 0x242   : > { %v7389_v20 = vsel %vm16202_vm14, %v12626_v32, %v7388_v53  ;;  %v7390_v6 = vrot.slane %v7388_v53, 4  ;;  %v21362_v39 = vcombine.low %v18841_v38, %v18861_v19  ;;  %v7348_v22 = vrot.slane %v7347_v61, 4  ;;  %v13658_v27 = vpop.f32.mrb[76].mxu1  ;;  %v7358_v38 = vld [vmem:[#allocation3 + $0x3c] sm:$0xe] }
 0x243   : > { %v12627_v50 = vrot.slane %v7355_v15, 9  ;;  %v7395_v10 = vrot.slane %v15489_v7, 5  ;;  %v12628_v33 = vrot.slane %v7356_v51, 9  ;;  %v7343_v47 = vsel %vm15716_vm2, %v7338_v29, %v7342_v59  ;;  %v13659_v11 = vpop.f32.mrb[77].mxu1 }
 0x244   : > { %8166 = vmatmul.mubr.bf16.gmra.mrb[124].mxu1 %v21362_v39  ;;  %v7392_v17 = vsel %vm16202_vm14, %v7390_v6, %v7391_v12  ;;  %v7402_v53 = vrot.slane %v18611_v55, 5  ;;  %v7405_v32 = vrot.slane %v18616_v21, 5  ;;  %v13522_v2 = vpop.f32.mrb[108].mxu0  ;;  %v7353_v15 = vsel %vm15716_vm2, %v7348_v22, %v7352_v44  ;;  %v13661_v59 = vpop.f32.mrb[78].mxu1 }
 0x245   : > { %v12650_v8 = vcombine.low %v7389_v20, %v7392_v17  ;;  %v18968_v57 = vsel %vm16202_vm14, %v12627_v50, %v7395_v10  ;;  %v7397_v1 = vrot.slane %v7395_v10, 4  ;;  %v13523_v9 = vpop.f32.mrb[109].mxu0  ;;  %v12649_v54 = vcombine.low %v7343_v47, %v7353_v15  ;;  %v13662_v51 = vpop.f32.mrb[79].mxu1 }
 0x246   : > { %v18972_v55 = vsel %vm16202_vm14, %v12628_v33, %v7402_v53  ;;  %v7404_v21 = vrot.slane %v7402_v53, 4  ;;  %v18976_v12 = vadd.f32 %v18811_v41, %v18803_v35  ;;  %v13525_v44 = vpop.f32.mrb[110].mxu0  ;;  %v21363_v61 = vrot.slane %v18538_v45, 5  ;;  %v7359_v33 = vld [vmem:[#allocation3 + $0x48] sm:$0xe] }
 0x247   : > { %v18982_v20 = vadd.f32 %v13659_v11, %v13658_v27  ;;  %v18986_v6 = vadd.f32 %v18818_v36, %v18814_v16  ;;  %v18988_v39 = vadd.f32 %v13662_v51, %v13661_v59  ;;  %v13526_v22 = vpop.f32.mrb[111].mxu0  ;;  %7827 = vmatprep.mubr.bf16.mxu0 %v12649_v54  ;;  %v18995_v45 = vadd.f32 %v18869_v23, %v18863_v18  ;;  %v7360_v23 = vld [vmem:[#allocation3 + $0x54] sm:$0xe] }
 0x248   : > { %v7399_v29 = vsel %vm16202_vm14, %v7397_v1, %v21363_v61  ;;  %v7406_v41 = vsel %vm16202_vm14, %v7404_v21, %v7405_v32  ;;  %v12629_v50 = vrot.slane %v7357_v62, 9  ;;  %7828 = vmatmul.mubr.bf16.gmra.mrb[172].mxu0 %v12641_v37  ;;  %v7409_v36 = vrot.slane %v18678_v0, 5  ;;  %v7361_v62 = vld [vmem:[#allocation3 + $0x60] sm:$0xe] }
 0x249   : > { %v12651_v35 = vcombine.low %v18968_v57, %v7399_v29  ;;  %v12652_v7 = vcombine.low %v18972_v55, %v7406_v41  ;;  %v7412_v16 = vrot.slane %v18686_v49, 5  ;;  %v12630_v10 = vrot.slane %v7358_v38, 9  ;;  %14424 = vmatprep.mubr.bf16.mxu0 %v12650_v8  ;;  %v6898_v61 = vld [vmem:[#allocation3] sm:$0xe] }
 0x24a   : > { %v7416_v27 = vrot.slane %v18724_v14, 5  ;;  %v7419_v47 = vrot.slane %v18736_v13, 5  ;;  %v19004_v17 = vadd.f32 %v18881_v26, %v18876_v58  ;;  %v19008_v18 = vadd.f32 %v18922_v5, %v18915_v60 }
 0x24b   : > { %v19012_v0 = vsel %vm16202_vm14, %v12629_v50, %v7409_v36  ;;  %v7411_v49 = vrot.slane %v7409_v36, 4  ;;  %v13664_v37 = vpop.f32.mrb[80].mxu1  ;;  %v19016_v14 = vadd.f32 %v18933_v63, %v18926_v56  ;;  %v19018_v13 = vadd.f32 %v13523_v9, %v13522_v2 }
 0x24c   : > { %21364 = vst [vmem:[#allocation26_spill] sm:$0xff] %v19008_v18  ;;  %v19022_v58 = vsel %vm16202_vm14, %v12630_v10, %v7416_v27  ;;  %v7418_v26 = vrot.slane %v7416_v27, 4  ;;  %v13665_v60 = vpop.f32.mrb[81].mxu1  ;;  %v12631_v5 = vrot.slane %v7359_v33, 9  ;;  %v7423_v53 = vrot.slane %v18770_v3, 5  ;;  %v13560_v2 = vpop.f32.mrb[112].mxu0 }
 0x24d   : > { %21365 = vst [vmem:[#allocation16_spill] sm:$0xff] %v19016_v14  ;;  %21366 = vst [vmem:[#allocation12_spill] sm:$0xff] %v19018_v13  ;;  %v19027_v32 = vsel %vm16202_vm14, %v7411_v49, %v7412_v16  ;;  %v19029_v11 = vadd.f32 %v13665_v60, %v13664_v37  ;;  %v13667_v56 = vpop.f32.mrb[82].mxu1  ;;  %v7426_v63 = vrot.slane %v18782_v24, 5  ;;  %v12632_v38 = vrot.slane %v7360_v23, 9  ;;  %v13561_v59 = vpop.f32.mrb[113].mxu0 }
 0x24e   : > { %v12653_v15 = vcombine.low %v19012_v0, %v19027_v32  ;;  %v19036_v8 = vsel %vm16202_vm14, %v7418_v26, %v7419_v47  ;;  %v13668_v57 = vpop.f32.mrb[83].mxu1  ;;  %v19040_v3 = vsel %vm16202_vm14, %v12631_v5, %v7423_v53  ;;  %v7425_v1 = vrot.slane %v7423_v53, 4  ;;  %v15306_v24 = vld [vmem:[%s21155_s6 + $0x88] sm:$0xff]   ;;  %v13563_v51 = vpop.f32.mrb[114].mxu0  ;;  %v6899_v27 = vld [vmem:[#allocation3 + $0xc] sm:$0xe] }
 0x24f   : > { %v12654_v9 = vcombine.low %v19022_v58, %v19036_v8  ;;  %v19047_v54 = vadd.f32 %v13668_v57, %v13667_v56  ;;  %v7430_v55 = vrot.slane %v18837_v40, 5  ;;  %v7433_v21 = vrot.slane %v18839_v46, 5  ;;  %v13564_v36 = vpop.f32.mrb[115].mxu0  ;;  %v6900_v47 = vld [vmem:[#allocation3 + $0x18] sm:$0xe]  ;;  %v21388_v14 = vld [vmem:[#allocation14_spill] sm:$0xff] }
 0x250   : > { %v19053_v29 = vsel %vm16202_vm14, %v7425_v1, %v7426_v63  ;;  %v19055_v41 = vadd.f32 %v13526_v22, %v13525_v44  ;;  %v13562_v50 = vadd.f32 %v13561_v59, %v13560_v2  ;;  %v12633_v16 = vrot.slane %v7361_v62, 9  ;;  %14425 = vmatmul.mubr.bf16.vlgmr.msra.gmra.mrb[176].mxu0 %v12651_v35  ;;  %v15307_v49 = vld [vmem:[%s21155_s6 + $0x90] sm:$0xff]   ;;  %v21368_v62 = vld [vmem:[#allocation11_spill] sm:$0xff]  ;;  %v15491_v60 = vld [vmem:[#allocation3 + $0x8] sm:$0x1] }
 0x251   : > { %v19061_v40 = vsel %vm16202_vm14, %v12632_v38, %v7430_v55  ;;  %v7432_v46 = vrot.slane %v7430_v55, 4  ;;  %v13565_v33 = vadd.f32 %v13564_v36, %v13563_v51  ;;  %14428 = vmatprep.mubr.bf16.mxu0 %v12652_v7  ;;  %14441 = vmatpush3.bf16.msra.mxu0 %v18664_v4  ;;  %v7437_v22 = vrot.slane %v18891_v30, 5  ;;  %v6901_v38 = vld [vmem:[#allocation3 + $0x24] sm:$0xe]  ;;  %v15492_v55 = vld [vmem:[#allocation3 + $0x10] sm:$0xf] }
 0x252   : > { %21367 = vst [vmem:[#allocation17_spill] sm:$0xff] %v19055_v41  ;;  %v19065_v44 = vadd.f32 %v13562_v50, %v18790_v34  ;;  %v7440_v35 = vrot.slane %v18913_v52, 5  ;;  %v12594_v23 = vrot.slane %v6898_v61, 9  ;;  %14442 = vmatprep.subr.bf16.mxu0 %v15306_v24  ;;  %v15490_v34 = vld [vmem:[#allocation3 + $0x4] sm:$0xf]  ;;  %v6935_v30 = vrot.slane %v15491_v60, 5 }
 0x253   : > { %v19074_v37 = vsel %vm16202_vm14, %v7432_v46, %v7433_v21  ;;  %v13670_v7 = vpop.f32.mrb[84].mxu1  ;;  %v19077_v4 = vadd.f32 %v13565_v33, %v21368_v62  ;;  %v6932_v26 = vrot.slane %v15490_v34, 5  ;;  %v19083_v53 = vsel %vm16202_vm14, %v12633_v16, %v7437_v22  ;;  %v6902_v51 = vld [vmem:[#allocation3 + $0x30] sm:$0xe]  ;;  %v15493_v16 = vld [vmem:[#allocation3 + $0x1c] sm:$0xf] }
 0x254   : > { %v13671_v5 = vpop.f32.mrb[85].mxu1  ;;  %v7439_v56 = vrot.slane %v7437_v22, 4  ;;  %v12595_v63 = vrot.slane %v6899_v27, 9  ;;  %v6939_v21 = vrot.slane %v15492_v55, 5  ;;  %v12596_v36 = vrot.slane %v6900_v47, 9  ;;  %v15308_v22 = vld [vmem:[%s21155_s6 + $0x98] sm:$0xff]  }
 0x255   : > { %v19085_v2 = vadd.f32 %v13671_v5, %v13670_v7  ;;  %v13673_v57 = vpop.f32.mrb[86].mxu1  ;;  %v19089_v1 = vsel %vm16202_vm14, %v12594_v23, %v6932_v26  ;;  %v6934_v59 = vrot.slane %v6932_v26, 4  ;;  %14443 = vmatpush3.bf16.msra.mxu0 %v15306_v24  ;;  %v6946_v46 = vrot.slane %v15493_v16, 5  ;;  %v15494_v33 = vld [vmem:[#allocation3 + $0x20] sm:$0x1]  ;;  %v21369_v0 = vld [vmem:[#allocation32_spill] sm:$0xff] }
 0x256   : > { %v13674_v61 = vpop.f32.mrb[87].mxu1  ;;  %v19093_v50 = vsel %vm16202_vm14, %v7439_v56, %v7440_v35  ;;  %v6949_v27 = vrot.slane %v15494_v33, 5  ;;  %14444 = vmatprep.subr.bf16.mxu0 %v15307_v49  ;;  %v13566_v7 = vpop.f32.mrb[116].mxu0  ;;  %v19108_v47 = vsel %vm16202_vm14, %v12595_v63, %v6939_v21  ;;  %v6941_v26 = vrot.slane %v6939_v21, 4  ;;  %v1152_v56 = vld [vmem:[#allocation3 + $0x78] sm:$0x1] }
 0x257   : > { %v19098_v23 = vadd.f32 %v13674_v61, %v13673_v57  ;;  %v19104_v35 = vsel %vm16202_vm14, %v6934_v59, %v6935_v30  ;;  %v13567_v62 = vpop.f32.mrb[117].mxu0  ;;  %v19114_v60 = vsel %vm16202_vm14, %v12596_v36, %v6946_v46  ;;  %v6948_v5 = vrot.slane %v6946_v46, 4  ;;  %v15495_v63 = vld [vmem:[#allocation3 + $0x28] sm:$0xf]  ;;  %v15496_v61 = vld [vmem:[#allocation3 + $0x2c] sm:$0x1] }
 0x258   : > { %14429 = vmatmul.mubr.bf16.gmra.mrb[180].mxu0 %v12653_v15  ;;  %v13568_v30 = vadd.f32 %v13567_v62, %v13566_v7  ;;  %v13569_v57 = vpop.f32.mrb[118].mxu0  ;;  %v12597_v59 = vrot.slane %v6901_v38, 9  ;;  %v6953_v55 = vrot.slane %v15495_v63, 5  ;;  %v6956_v16 = vrot.slane %v15496_v61, 5  ;;  %v1149_v33 = vld [vmem:[#allocation3 + $0x6c] sm:$0x1] }
 0x259   : > { %14432 = vmatprep.mubr.bf16.mxu0 %v12654_v9  ;;  %14445 = vmatpush3.bf16.msra.mxu0 %v15307_v49  ;;  %v15309_v21 = vld [vmem:[%s21155_s6 + $0xa0] sm:$0xff]   ;;  %v13570_v36 = vpop.f32.mrb[119].mxu0  ;;  %v21370_v32 = vrot.slane %v21369_v0, 5  ;;  %v19133_v38 = vsel %vm16202_vm14, %v6948_v5, %v6949_v27  ;;  %v12598_v46 = vrot.slane %v6902_v51, 9  ;;  %v21371_v7 = vld [vmem:[#allocation33_spill] sm:$0xff]  ;;  %v21376_v24 = vld [vmem:[#allocation39_spill] sm:$0xff] }
 0x25a   : > { %v6960_v58 = vrot.slane %v21371_v7, 5  ;;  %v1200_v8 = vld [vmem:[#allocation3 + $0x80] sm:$0x1]  ;;  %14446 = vmatprep.subr.bf16.mxu0 %v15308_v22  ;;  %v21372_v9 = vld [vmem:[#allocation22_spill] sm:$0xff]  ;;  %v13571_v62 = vadd.f32 %v13570_v36, %v13569_v57  ;;  %v19143_v27 = vsel %vm16202_vm14, %v12597_v59, %v6953_v55  ;;  %v6955_v51 = vrot.slane %v6953_v55, 4  ;;  %v19152_v36 = vld [vmem:[%s21155_s6 + $0xa8] sm:$0xff]  }
 0x25b   : > { %v19129_v15 = vsel %vm16202_vm14, %v6941_v26, %v21370_v32  ;;  %v14728_v49 = vadd.f32 %v13568_v30, %v21372_v9  ;;  %v1197_v26 = vld [vmem:[#allocation3 + $0x74] sm:$0x1]  ;;  %v13676_v0 = vpop.f32.mrb[88].mxu1  ;;  %v6903_v30 = vld [vmem:[#allocation3 + $0x3c] sm:$0xe]  ;;  %v21374_v63 = vld [vmem:[#allocation38_spill] sm:$0xff] }
 0x25c   : > { %v19147_v5 = vsel %vm16202_vm14, %v12598_v46, %v6960_v58  ;;  %v6962_v32 = vrot.slane %v6960_v58, 4  ;;  %v6904_v57 = vld [vmem:[#allocation3 + $0x48] sm:$0xe]  ;;  %v13677_v7 = vpop.f32.mrb[89].mxu1  ;;  %v21373_v9 = vld [vmem:[#allocation35_spill] sm:$0xff]  ;;  %v6963_v34 = vrot.slane %v21374_v63, 5  ;;  %v19165_v13 = vsel %vm16202_vm14, %v6955_v51, %v6956_v16 }
 0x25d   : > { %v14734_v61 = vadd.f32 %v13571_v62, %v21373_v9  ;;  %v1153_v55 = vsel %vm15755_vm6, 0, %v1152_v56  ;;  %v19159_v52 = vadd.f32 %v14728_v49, %v21376_v24  ;;  %v1158_v46 = vld [vmem:[#allocation3 + $0x90] sm:$0x1]  ;;  %v1155_v58 = vld [vmem:[#allocation3 + $0x84] sm:$0x1]  ;;  %14447 = vmatpush3.bf16.msra.mxu0 %v15308_v22  ;;  %v19161_v10 = vadd.f32 %v13677_v7, %v13676_v0  ;;  %v13679_v41 = vpop.f32.mrb[90].mxu1 }
 0x25e   : > { %1154 = vst [vmem:[#allocation3 + $0x78] sm:$0x1] %v1153_v55  ;;  %v1150_v62 = vsel %vm15755_vm6, 0, %v1149_v33  ;;  %v21378_v63 = vld [vmem:[#allocation15_spill] sm:$0xff]  ;;  %v1206_v24 = vld [vmem:[#allocation3 + $0x98] sm:$0x1]  ;;  %14448 = vmatprep.subr.bf16.mxu0 %v15309_v21  ;;  %v19177_v0 = vsel %vm16202_vm14, %v6962_v32, %v6963_v34 }
 0x25f   : > { %21377 = vst [vmem:[#allocation19_spill] sm:$0xff] %v19161_v10  ;;  %v19171_v56 = vadd.f32 %v19065_v44, %v21378_v63  ;;  %v13680_v49 = vpop.f32.mrb[91].mxu1  ;;  %1151 = vst [vmem:[#allocation3 + $0x6c] sm:$0x1] %v1150_v62  ;;  %v1201_v51 = vsel %vm15767_vm8, 0, %v1200_v8  ;;  %v21380_v7 = vld [vmem:[#allocation10_spill] sm:$0xff]  ;;  %v21383_v8 = vcombine.low %v19040_v3, %v19053_v29 }
 0x260   : > { %v19182_v33 = vadd.f32 %v14734_v61, %v21380_v7  ;;  %v1203_v9 = vld [vmem:[#allocation3 + $0x8c] sm:$0x1]  ;;  %v6905_v44 = vld [vmem:[#allocation3 + $0x54] sm:$0xe]  ;;  %v19184_v55 = vadd.f32 %v13680_v49, %v13679_v41  ;;  %1202 = vst [vmem:[#allocation3 + $0x80] sm:$0x1] %v1201_v51  ;;  %v21386_v51 = vcombine.low %v19061_v40, %v19074_v37 }
 0x261   : > { %v1198_v22 = vsel %vm15767_vm8, 0, %v1197_v26  ;;  %v21382_v34 = vld [vmem:[#allocation28_spill] sm:$0xff]  ;;  %14433 = vmatmul.mubr.bf16.gmra.mrb[184].mxu0 %v21383_v8  ;;  %v13572_v61 = vpop.f32.mrb[120].mxu0  ;;  %v12599_v62 = vrot.slane %v6903_v30, 9  ;;  %v21384_v41 = vld [vmem:[#allocation21_spill] sm:$0xff]  ;;  %v21385_v7 = vld [vmem:[#allocation34_spill] sm:$0xff] }
 0x262   : > { %21381 = vst [vmem:[#allocation20_spill] sm:$0xff] %v19184_v55  ;;  %v19192_v32 = vadd.f32 %v19077_v4, %v21382_v34  ;;  %1199 = vst [vmem:[#allocation3 + $0x74] sm:$0x1] %v1198_v22  ;;  %v6967_v49 = vrot.slane %v21384_v41, 5  ;;  %v6970_v55 = vrot.slane %v21385_v7, 5  ;;  %v12600_v63 = vrot.slane %v6904_v57, 9  ;;  %14436 = vmatprep.mubr.bf16.mxu0 %v21386_v51  ;;  %14449 = vmatpush3.bf16.msra.mxu0 %v15309_v21 }
 0x263   : > { %v13573_v26 = vpop.f32.mrb[121].mxu0  ;;  %v21387_v4 = vld [vmem:[#allocation36_spill] sm:$0xff]  ;;  %v6977_v10 = vrot.slane %v21388_v14, 5  ;;  %v1159_v3 = vsel %vm15755_vm6, 0, %v1158_v46  ;;  %v1156_v29 = vsel %vm15755_vm6, 0, %v1155_v58  ;;  %14450 = vmatprep.subr.bf16.mxu0 %v19152_v36  ;;  %v1207_v14 = vsel %vm15767_vm8, 0, %v1206_v24 }
 0x264   : > { %v6974_v34 = vrot.slane %v21387_v4, 5  ;;  %v15313_v30 = vld [vmem:[%s21155_s6 + $0xb0] sm:$0xff]   ;;  %v13574_v40 = vadd.f32 %v13573_v26, %v13572_v61  ;;  %v13575_v37 = vpop.f32.mrb[122].mxu0  ;;  %v19214_v21 = vsel %vm16202_vm14, %v12599_v62, %v6967_v49  ;;  %v6969_v57 = vrot.slane %v6967_v49, 4  ;;  %1160 = vst [vmem:[#allocation3 + $0x90] sm:$0x1] %v1159_v3 }
 0x265   : > { %1157 = vst [vmem:[#allocation3 + $0x84] sm:$0x1] %v1156_v29  ;;  %v19218_v46 = vld [vmem:[#allocation3 + $0x18] sm:$0xf]  ;;  %v13576_v58 = vpop.f32.mrb[123].mxu0  ;;  %v1204_v61 = vsel %vm15767_vm8, 0, %v1203_v9 }
 0x266   : > { %v19222_v22 = vsel %vm16202_vm14, %v12600_v63, %v6974_v34  ;;  %v6976_v8 = vrot.slane %v6974_v34, 4  ;;  %1208 = vst [vmem:[#allocation3 + $0x98] sm:$0x1] %v1207_v14  ;;  %v12601_v62 = vrot.slane %v6905_v44, 9  ;;  %v19226_v41 = vld [vmem:[#allocation3 + $0x1c] sm:$0xf]  ;;  %v13577_v51 = vadd.f32 %v13576_v58, %v13575_v37  ;;  %14451 = vmatpush3.bf16.msra.mxu0 %v19152_v36 }
 0x267   : > { %v21389_v49 = vld [vmem:[#allocation29_spill] sm:$0xff]  ;;  %v19231_v24 = vsel %vm16202_vm14, %v6969_v57, %v6970_v55  ;;  %1205 = vst [vmem:[#allocation3 + $0x8c] sm:$0x1] %v1204_v61  ;;  %v6981_v26 = vrot.slane %v18861_v19, 5  ;;  %v13682_v4 = vpop.f32.mrb[92].mxu1  ;;  %v8297_v29 = vshrl.u32 %v19218_v46, 16  ;;  %14452 = vmatprep.subr.bf16.mxu0 %v15313_v30 }
 0x268   : > { %v14743_v7 = vadd.f32 %v13574_v40, %v21389_v49  ;;  %v8288_v63 = vld [vmem:[#allocation3 + $0x20] sm:$0x1]  ;;  %v19239_v44 = vsel %vm16202_vm14, %v6976_v8, %v6977_v10  ;;  %v1164_v55 = vld [vmem:[#allocation3 + $0xa8] sm:$0x1]  ;;  %v13683_v40 = vpop.f32.mrb[93].mxu1  ;;  %v8300_v18 = vshll.u32 %v19218_v46, 16 }
 0x269   : > { %v21390_v34 = vld [vmem:[#allocation37_spill] sm:$0xff]  ;;  %v19254_v10 = vsel %vm16202_vm14, %v12601_v62, %v6981_v26  ;;  %v1161_v58 = vld [vmem:[#allocation3 + $0x9c] sm:$0x1]  ;;  %v1212_v8 = vld [vmem:[#allocation3 + $0xb0] sm:$0x1]  ;;  %v19256_v61 = vadd.f32 %v13683_v40, %v13682_v4  ;;  %v13685_v49 = vpop.f32.mrb[94].mxu1 }
 0x26a   : > { %v6984_v3 = vrot.slane %v21390_v34, 5  ;;  %v15314_v19 = vld [vmem:[%s21155_s6 + $0xb8] sm:$0xff]   ;;  %v19250_v14 = vadd.f32 %v14743_v7, %v18945_v31  ;;  %v6983_v34 = vrot.slane %v6981_v26, 4  ;;  %v8299_v9 = vrot.slane %v8297_v29, 4  ;;  %v13686_v31 = vpop.f32.mrb[95].mxu1  ;;  %14453 = vmatpush3.bf16.msra.mxu0 %v15313_v30  ;;  %v15317_v29 = vld [vmem:[%s21155_s6 + $0x1c0] sm:$0xff]  }
 0x26b   : > { %v21391_v36 = vld [vmem:[#allocation13_spill] sm:$0xff]  ;;  %21392 = vst [vmem:[#allocation18_spill] sm:$0xff] %v19256_v61  ;;  %v8306_v62 = vshll.u32 %v19226_v41, 16  ;;  %v8310_v57 = vshrl.u32 %v19226_v41, 16  ;;  %v8316_v4 = vshll.u32 %v8288_v63, 16  ;;  %v21394_v26 = vcombine.low %v19089_v1, %v19104_v35  ;;  %14454 = vmatprep.subr.bf16.mxu0 %v15314_v19 }
 0x26c   : > { %v14749_v37 = vadd.f32 %v13577_v51, %v21391_v36  ;;  %v1209_v51 = vld [vmem:[#allocation3 + $0xa4] sm:$0x1]  ;;  %v21393_v36 = vcombine.low %v19083_v53, %v19093_v50  ;;  %v19273_v53 = vadd.f32 %v13686_v31, %v13685_v49  ;;  %v8302_v50 = vrot.slane %v8300_v18, 5  ;;  %v13578_v30 = vpop.f32.mrb[124].mxu0  ;;  %v19285_v49 = vld [vmem:[#allocation3 + $0x28] sm:$0xf] }
 0x26d   : > { %v1165_v40 = vsel %vm15755_vm6, 0, %v1164_v55  ;;  %v19281_v63 = vld [vmem:[#allocation3 + $0x24] sm:$0xf]  ;;  %v8308_v35 = vrot.slane %v8306_v62, 5  ;;  %21397 = vst [vmem:[#allocation27_spill] sm:$0xff] %v19285_v49  ;;  %v13579_v31 = vpop.f32.mrb[125].mxu0 }
 0x26e   : > { %14437 = vmatmul.mubr.bf16.gmra.mrb[188].mxu0 %v21393_v36  ;;  %v19263_v7 = vadd.f32 %v14749_v37, %v18953_v28  ;;  %21395 = vst [vmem:[#allocation9_spill] sm:$0xff] %v19273_v53  ;;  %v19277_v28 = vsel %vm16202_vm14, %v6983_v34, %v6984_v3  ;;  %21396 = vst [vmem:[#allocation25_spill] sm:$0xff] %v19281_v63  ;;  %v8312_v37 = vrot.slane %v8310_v57, 4  ;;  %v8318_v36 = vrot.slane %v8316_v4, 5  ;;  %v15318_v62 = vld [vmem:[%s21155_s6 + $0x180] sm:$0xff]   ;;  %v15319_v57 = vld [vmem:[%s21155_s6 + $0x1c8] sm:$0xff]  }
 0x26f   : > { %14456 = vmatprep.mubr.bf16.mxu0 %v21394_v26  ;;  %1166 = vst [vmem:[#allocation3 + $0xa8] sm:$0x1] %v1165_v40  ;;  %v8303_v3 = vor.u32 %v8302_v50, %v8299_v9  ;;  %v1162_v18 = vsel %vm15755_vm6, 0, %v1161_v58  ;;  %v1213_v55 = vsel %vm15767_vm8, 0, %v1212_v8  ;;  %v1210_v34 = vsel %vm15767_vm8, 0, %v1209_v51  ;;  %v13581_v58 = vpop.f32.mrb[126].mxu0  ;;  %14455 = vmatpush3.bf16.msra.mxu0 %v15314_v19 }
 0x270   : > { %v13580_v4 = vadd.f32 %v13579_v31, %v13578_v30  ;;  %v19302_v9 = vld [vmem:[%s21153_s4] ss:$0 sm:$0xff]  ;;  %v8313_v26 = vor.u32 %v8312_v37, %v8308_v35  ;;  %1163 = vst [vmem:[#allocation3 + $0x9c] sm:$0x1] %v1162_v18  ;;  %1214 = vst [vmem:[#allocation3 + $0xb0] sm:$0x1] %v1213_v55  ;;  %13864 = vmatprep.subr.bf16.mxu0 %v15317_v29 }
 0x271   : > { %1211 = vst [vmem:[#allocation3 + $0xa4] sm:$0x1] %v1210_v34  ;;  %v8321_v51 = vshrl.u32 %v19281_v63, 16  ;;  %v14394_v50 = vpop.f32.mrb[48].mxu1  ;;  %v13582_v40 = vpop.f32.mrb[127].mxu0  ;;  %v8304_v1 = vrot.slane %v8303_v3, 4 }
 0x272   : > { %v8324_v30 = vshll.u32 %v19281_v63, 16  ;;  %v8330_v31 = vshll.u32 %v19285_v49, 16  ;;  %v8334_v48 = vshrl.u32 %v19285_v49, 16  ;;  %v14740_v37 = vadd.f32 %v13580_v4, %v18943_v25  ;;  %v19315_v55 = vld [vmem:[%s21154_s5] ss:$0 sm:$0xff]  ;;  %v6276_v19 = vpop.f32.mrb[49].mxu1 }
 0x273   : > { %v14730_v18 = vadd.f32 %v19159_v52, %v14394_v50  ;;  %v13583_v34 = vadd.f32 %v13582_v40, %v13581_v58  ;;  %v8314_v8 = vrot.slane %v8313_v26, 4  ;;  %v14733_v3 = vadd.f32 %v19171_v56, %v6276_v19  ;;  %v14395_v53 = vpop.f32.mrb[50].mxu1 }
 0x274   : > { %v8309_v61 = vsel %vm15716_vm2, %v8304_v1, %v8308_v35  ;;  %v8323_v16 = vrot.slane %v8321_v51, 4  ;;  %v8326_v29 = vrot.slane %v8324_v30, 5  ;;  %v21398_v25 = vcombine.low %v19108_v47, %v19129_v15  ;;  %v6279_v58 = vpop.f32.mrb[51].mxu1  ;;  %v15320_v1 = vld [vmem:[%s21155_s6 + $0x188] sm:$0xff]  }
 0x275   : > { %v6364_v52 = vmul.f32 %v14730_v18, %v19302_v9  ;;  %v14746_v4 = vadd.f32 %v13583_v34, %v18949_v43  ;;  %v14736_v50 = vadd.f32 %v19182_v33, %v14395_v53  ;;  %v14741_v26 = vadd.f32 %v14740_v37, %v18982_v20  ;;  %v19337_v33 = vld [vmem:[#allocation3 + $0x2c] sm:$0x1]  ;;  %v15323_v20 = vld [vmem:[%s21155_s6 + $0x1d0] sm:$0xff]   ;;  %v13584_v40 = vpop.f32.mrb[128].mxu0 }
 0x276   : > { %14457 = vmatmul.mubr.bf16.vlgmr.msra.gmra.mrb[176].mxu0 %v21398_v25  ;;  %v21399_v56 = vcombine.low %v19114_v60, %v19133_v38  ;;  %v6362_v47 = vmul.f32 %v14733_v3, %v19302_v9  ;;  %v14739_v15 = vadd.f32 %v19192_v32, %v6279_v58  ;;  %v8319_v43 = vsel %vm15716_vm2, %v8314_v8, %v8318_v36  ;;  %v14398_v19 = vpop.f32.mrb[52].mxu1  ;;  %v15325_v3 = vld [vmem:[%s21155_s6 + $0x1d8] sm:$0xff]  }
 0x277   : > { %13865 = vmatpush3.bf16.msra.mxu0 %v15318_v62  ;;  %v6387_v60 = vadd.f32 %v19315_v55, %v6364_v52  ;;  %v6365_v38 = vmul.f32 %v14736_v50, %v19302_v9  ;;  %v19345_v53 = vadd.f32 %v14746_v4, %v18988_v39  ;;  %v19347_v35 = vrot.slane %v8330_v31, 5  ;;  %v15324_v39 = vld [vmem:[%s21155_s6 + $0x190] sm:$0xff]   ;;  %v6292_v50 = vpop.f32.mrb[53].mxu1 }
 0x278   : > { %14460 = vmatprep.mubr.bf16.mxu0 %v21399_v56  ;;  %13866 = vmatprep.subr.bf16.mxu0 %v15319_v57  ;;  %v6385_v32 = vadd.f32 %v19315_v55, %v6362_v47  ;;  %v6363_v36 = vmul.f32 %v14739_v15, %v19302_v9  ;;  %v19351_v62 = vcombine.low %v8309_v61, %v8319_v43  ;;  %v19354_v30 = vrot.slane %v8334_v48, 4  ;;  %v13585_v61 = vpop.f32.mrb[129].mxu0  ;;  %v19371_v15 = vpop.f32.mrb[54].mxu1 }
 0x279   : > { %v8327_v57 = vor.u32 %v8326_v29, %v8323_v16  ;;  %v6403_v8 = vmax.f32 %v6387_v60, 0.0  ;;  %v6388_v51 = vadd.f32 %v19315_v55, %v6365_v38  ;;  %v13586_v25 = vadd.f32 %v13585_v61, %v13584_v40  ;;  %v19368_v4 = vpop.f32.mrb[130].mxu0 }
 0x27a   : > { %v6401_v31 = vmax.f32 %v6385_v32, 0.0  ;;  %v6386_v18 = vadd.f32 %v19315_v55, %v6363_v36  ;;  %v14742_v52 = vadd.f32 %v14741_v26, %v14398_v19  ;;  %v13588_v47 = vpop.f32.mrb[131].mxu0  ;;  %v19383_v36 = vpop.f32.mrb[55].mxu1  ;;  %v6637_v19 = vld [vmem:[#allocation3 + $0x80] sm:$0x1] }
 0x27b   : > { %13867 = vmatpush3.bf16.msra.mxu0 %v15320_v1  ;;  %v19362_v16 = vrot.slane %v8327_v57, 4  ;;  %v13210_v48 = vpack.c.bf16 %v6403_v8, %v6403_v8  ;;  %v6404_v29 = vmax.f32 %v6388_v51, 0.0  ;;  %v14745_v1 = vadd.f32 %v19250_v14, %v6292_v50  ;;  %v6633_v57 = vld [vmem:[#allocation3 + $0x78] sm:$0xf] }
 0x27c   : > { %13868 = vmatprep.subr.bf16.mxu0 %v15323_v20  ;;  %v13208_v58 = vpack.c.bf16 %v6401_v31, %v6401_v31  ;;  %v6402_v56 = vmax.f32 %v6386_v18, 0.0  ;;  %v21400_v20 = vcombine.low %v19143_v27, %v19165_v13  ;;  %v19381_v32 = vadd.f32 %v13586_v25, %v18976_v12  ;;  %v15326_v13 = vld [vmem:[%s21155_s6 + $0x198] sm:$0xff]   ;;  %v6626_v12 = vld [vmem:[#allocation3 + $0x6c] sm:$0xf] }
 0x27d   : > { %v6483_v26 = vshrl.u32 %v13210_v48, 16  ;;  %v6486_v60 = vshll.u32 %v13210_v48, 16  ;;  %v13211_v38 = vpack.c.bf16 %v6404_v29, %v6404_v29  ;;  %v21401_v14 = vcombine.low %v19147_v5, %v19177_v0  ;;  %v15329_v5 = vld [vmem:[%s21155_s6 + $0x1e0] sm:$0xff]  }
 0x27e   : > { %14461 = vmatmul.mubr.bf16.gmra.mrb[180].mxu0 %v21400_v20  ;;  %v6466_v8 = vshrl.u32 %v13208_v58, 16  ;;  %v6469_v51 = vshll.u32 %v13208_v58, 16  ;;  %v13209_v27 = vpack.c.bf16 %v6402_v56, %v6402_v56  ;;  %v6368_v40 = vmul.f32 %v14742_v52, %v19302_v9  ;;  %v15330_v25 = vld [vmem:[%s21155_s6 + $0x1a0] sm:$0xff]   ;;  %v6630_v56 = vld [vmem:[#allocation3 + $0x74] sm:$0x1]  ;;  %v19404_v37 = vpop.f32.mrb[56].mxu1 }
 0x27f   : > { %14464 = vmatprep.mubr.bf16.mxu0 %v21401_v14  ;;  %13869 = vmatpush3.bf16.msra.mxu0 %v15324_v39  ;;  %v6485_v31 = vrot.slane %v6483_v26, 7  ;;  %v6491_v18 = vshrl.u32 %v13211_v38, 16  ;;  %v6494_v61 = vshll.u32 %v13211_v38, 16  ;;  %v6366_v0 = vmul.f32 %v14745_v1, %v19302_v9 }
 0x280   : > { %13870 = vmatprep.subr.bf16.mxu0 %v15325_v3  ;;  %v6468_v39 = vrot.slane %v6466_v8, 7  ;;  %v6474_v48 = vshrl.u32 %v13209_v27, 16  ;;  %v6477_v29 = vshll.u32 %v13209_v27, 16  ;;  %v6391_v52 = vadd.f32 %v19315_v55, %v6368_v40  ;;  %v15331_v8 = vld [vmem:[%s21155_s6 + $0x1e8] sm:$0xff]   ;;  %v13590_v27 = vpop.f32.mrb[132].mxu0 }
 0x281   : > { %v6488_v3 = vor.u32 %v6486_v60, %v6485_v31  ;;  %v6489_v50 = vrot.slane %v6485_v31, 4  ;;  %v6493_v58 = vrot.slane %v6491_v18, 7  ;;  %v6389_v20 = vadd.f32 %v19315_v55, %v6366_v0  ;;  %v13591_v0 = vpop.f32.mrb[133].mxu0 }
 0x282   : > { %v6471_v26 = vor.u32 %v6469_v51, %v6468_v39  ;;  %v6472_v38 = vrot.slane %v6468_v39, 4  ;;  %v6476_v1 = vrot.slane %v6474_v48, 7  ;;  %v6407_v14 = vmax.f32 %v6391_v52, 0.0  ;;  %v6308_v51 = vpop.f32.mrb[57].mxu1  ;;  %v13593_v34 = vpop.f32.mrb[134].mxu0 }
 0x283   : > { %13871 = vmatpush3.bf16.msra.mxu0 %v15326_v13  ;;  %v6634_v60 = vsel %vm15803_vm10, %v6488_v3, %v6633_v57  ;;  %v6496_v40 = vor.u32 %v6494_v61, %v6493_v58  ;;  %v6498_v31 = vrot.slane %v6493_v58, 4  ;;  %v6405_v18 = vmax.f32 %v6389_v20, 0.0  ;;  %v19410_v49 = vpop.f32.mrb[58].mxu1 }
 0x284   : > { %13872 = vmatprep.subr.bf16.mxu0 %v15329_v5  ;;  %6635 = vst [vmem:[#allocation3 + $0x78] sm:$0xf] %v6634_v60  ;;  %v6627_v13 = vsel %vm15803_vm10, %v6471_v26, %v6626_v12  ;;  %v6479_v39 = vor.u32 %v6477_v29, %v6476_v1  ;;  %v6481_v48 = vrot.slane %v6476_v1, 4  ;;  %v13214_v52 = vpack.c.bf16 %v6407_v14, %v6407_v14  ;;  %v13594_v29 = vpop.f32.mrb[135].mxu0  ;;  %v6311_v58 = vpop.f32.mrb[59].mxu1 }
 0x285   : > { %6628 = vst [vmem:[#allocation3 + $0x6c] sm:$0xf] %v6627_v13  ;;  %v6497_v57 = vsel %vm15813_vm11, %v6489_v50, %v6496_v40  ;;  %v6638_v61 = vsel %vm15755_vm6, %v6498_v31, %v6637_v19  ;;  %v21404_v5 = vcombine.low %v19214_v21, %v19231_v24  ;;  %v13212_v3 = vpack.c.bf16 %v6405_v18, %v6405_v18  ;;  %v6647_v26 = vld [vmem:[#allocation3 + $0x90] sm:$0xf] }
 0x286   : > { %v13589_v12 = vadd.f32 %v13588_v47, %v19368_v4  ;;  %6636 = vst [vmem:[#allocation3 + $0x7c] sm:$0xf] %v6497_v57  ;;  %6639 = vst [vmem:[#allocation3 + $0x80] sm:$0x1] %v6638_v61  ;;  %v6480_v20 = vsel %vm15813_vm11, %v6472_v38, %v6479_v39  ;;  %v6631_v50 = vsel %vm15755_vm6, %v6481_v48, %v6630_v56  ;;  %v6517_v21 = vshrl.u32 %v13214_v52, 16  ;;  %v15332_v4 = vld [vmem:[%s21155_s6 + $0x1a8] sm:$0xff]  }
 0x287   : > { %14465 = vmatmul.mubr.bf16.gmra.mrb[184].mxu0 %v21404_v5  ;;  %v21405_v19 = vcombine.low %v19222_v22, %v19239_v44  ;;  %v6520_v24 = vshll.u32 %v13214_v52, 16  ;;  %v15335_v47 = vld [vmem:[%s21155_s6 + $0x1f0] sm:$0xff]   ;;  %6629 = vst [vmem:[#allocation3 + $0x70] sm:$0xf] %v6480_v20  ;;  %6632 = vst [vmem:[#allocation3 + $0x74] sm:$0x1] %v6631_v50  ;;  %v14748_v44 = vadd.f32 %v19345_v53, %v19371_v15 }
 0x288   : > { %13873 = vmatpush3.bf16.msra.mxu0 %v15330_v25  ;;  %v6500_v56 = vshrl.u32 %v13212_v3, 16  ;;  %v6503_v38 = vshll.u32 %v13212_v3, 16  ;;  %v14761_v22 = vadd.f32 %v13589_v12, %v18986_v6  ;;  %v19436_v25 = vrot.slane %v6517_v21, 7  ;;  %v6640_v15 = vld [vmem:[#allocation3 + $0x84] sm:$0xf] }
 0x289   : > { %14468 = vmatprep.mubr.bf16.mxu0 %v21405_v19  ;;  %13874 = vmatprep.subr.bf16.mxu0 %v15331_v8  ;;  %v14751_v1 = vadd.f32 %v19263_v7, %v19383_v36  ;;  %v13592_v14 = vadd.f32 %v13591_v0, %v13590_v27  ;;  %v14756_v60 = vadd.f32 %v19381_v32, %v19029_v11  ;;  %v15336_v7 = vld [vmem:[%s21155_s6 + $0x1b0] sm:$0xff]   ;;  %v19453_v32 = vpop.f32.mrb[60].mxu1  ;;  %v15337_v27 = vld [vmem:[%s21155_s6 + $0x1f8] sm:$0xff]   ;;  %v19468_v61 = vpop.f32.mrb[136].mxu0 }
 0x28a   : > { %v19442_v40 = vrot.slane %v6500_v56, 7  ;;  %v6369_v8 = vmul.f32 %v14748_v44, %v19302_v9  ;;  %v13595_v31 = vadd.f32 %v13594_v29, %v13593_v34  ;;  %v14762_v18 = vadd.f32 %v14761_v22, %v19047_v54  ;;  %v19461_v39 = vpop.f32.mrb[61].mxu1  ;;  %v19478_v50 = vpop.f32.mrb[137].mxu0  ;;  %v15338_v21 = vld [vmem:[%s21155_s6 + $0x1b8] sm:$0xff]  }
 0x28b   : > { %v6522_v6 = vor.u32 %v6520_v24, %v19436_v25  ;;  %v6523_v53 = vrot.slane %v19436_v25, 4  ;;  %v6367_v13 = vmul.f32 %v14751_v1, %v19302_v9  ;;  %v14752_v11 = vadd.f32 %v13592_v14, %v18995_v45  ;;  %v19470_v5 = vpop.f32.mrb[62].mxu1 }
 0x28c   : > { %13875 = vmatpush3.bf16.msra.mxu0 %v15332_v4  ;;  %v6505_v34 = vor.u32 %v6503_v38, %v19442_v40  ;;  %v6506_v54 = vrot.slane %v19442_v40, 4  ;;  %v6392_v36 = vadd.f32 %v19315_v55, %v6369_v8  ;;  %v14757_v0 = vadd.f32 %v14756_v60, %v6308_v51 }
 0x28d   : > { %13876 = vmatprep.subr.bf16.mxu0 %v15335_v47  ;;  %v6648_v48 = vsel %vm15803_vm10, %v6522_v6, %v6647_v26  ;;  %v6390_v45 = vadd.f32 %v19315_v55, %v6367_v13  ;;  %v14753_v52 = vadd.f32 %v14752_v11, %v19085_v2  ;;  %v14758_v57 = vadd.f32 %v13595_v31, %v19004_v17  ;;  %v19480_v2 = vpop.f32.mrb[63].mxu1  ;;  %v6651_v11 = vld [vmem:[#allocation3 + $0x98] sm:$0x1] }
 0x28e   : > { %6649 = vst [vmem:[#allocation3 + $0x90] sm:$0xf] %v6648_v48  ;;  %v6641_v3 = vsel %vm15803_vm10, %v6505_v34, %v6640_v15  ;;  %v6408_v51 = vmax.f32 %v6392_v36, 0.0  ;;  %v21406_v12 = vcombine.low %v19254_v10, %v19277_v28  ;;  %v6370_v29 = vmul.f32 %v14757_v0, %v19302_v9 }
 0x28f   : > { %v14763_v20 = vadd.f32 %v14762_v18, %v6311_v58  ;;  %6642 = vst [vmem:[#allocation3 + $0x84] sm:$0xf] %v6641_v3  ;;  %v6406_v17 = vmax.f32 %v6390_v45, 0.0  ;;  %v14754_v19 = vadd.f32 %v14753_v52, %v19404_v37  ;;  %v14759_v10 = vadd.f32 %v14758_v57, %v19098_v23  ;;  %v19490_v58 = vpop.f32.mrb[138].mxu0  ;;  %v15354_v23 = vld [vmem:[%s21155_s6 + $0x200] sm:$0xff]  }
 0x290   : > { %14469 = vmatmul.mubr.bf16.gmra.mrb[188].mxu0 %v21406_v12  ;;  %v8337_v28 = vor.u32 %v19354_v30, %v19347_v35  ;;  %v13215_v24 = vpack.c.bf16 %v6408_v51, %v6408_v51  ;;  %v6393_v4 = vadd.f32 %v19315_v55, %v6370_v29  ;;  %v19496_v26 = vpop.f32.mrb[139].mxu0  ;;  %v21408_v0 = vsel %vm15716_vm2, %v19362_v16, %v19347_v35  ;;  %v6644_v57 = vld [vmem:[#allocation3 + $0x8c] sm:$0x1]  ;;  %v1167_v29 = vld [vmem:[#allocation3 + $0xb4] sm:$0x1]  ;;  %v15359_v35 = vld [vmem:[%s21155_s6 + $0x210] sm:$0xff]  }
 0x291   : > { %13877 = vmatpush3.bf16.msra.mxu0 %v15336_v7  ;;  %8905 = vmatprep.mubr.bf16.mxu0 %v19351_v62  ;;  %v6371_v47 = vmul.f32 %v14763_v20, %v19302_v9  ;;  %v21407_v62 = vshll.u32 %v19337_v33, 16  ;;  %v13213_v56 = vpack.c.bf16 %v6406_v17, %v6406_v17  ;;  %v6372_v30 = vmul.f32 %v14754_v19, %v19302_v9 }
 0x292   : > { %13878 = vmatprep.subr.bf16.mxu0 %v15337_v27  ;;  %v14760_v38 = vadd.f32 %v14759_v10, %v19410_v49  ;;  %v8338_v22 = vrot.slane %v8337_v28, 4  ;;  %v6525_v44 = vshrl.u32 %v13215_v24, 16  ;;  %v6528_v1 = vshll.u32 %v13215_v24, 16  ;;  %v15355_v49 = vld [vmem:[%s21155_s6 + $0x208] sm:$0xff]   ;;  %v19520_v28 = vpop.f32.mrb[140].mxu0 }
 0x293   : > { %v8342_v37 = vrot.slane %v21407_v62, 5  ;;  %v6409_v14 = vmax.f32 %v6393_v4, 0.0  ;;  %v6394_v60 = vadd.f32 %v19315_v55, %v6371_v47  ;;  %v6508_v8 = vshrl.u32 %v13213_v56, 16  ;;  %v19531_v4 = vpop.f32.mrb[141].mxu0 }
 0x294   : > { %v6511_v33 = vshll.u32 %v13213_v56, 16  ;;  %v6395_v31 = vadd.f32 %v19315_v55, %v6372_v30  ;;  %v6373_v18 = vmul.f32 %v14760_v38, %v19302_v9  ;;  %v6527_v6 = vrot.slane %v6525_v44, 7  ;;  %v6661_v56 = vld [vmem:[#allocation3 + $0xa8] sm:$0xf] }
 0x295   : > { %13879 = vmatpush3.bf16.msra.mxu0 %v15338_v21  ;;  %v13216_v15 = vpack.c.bf16 %v6409_v14, %v6409_v14  ;;  %v6410_v13 = vmax.f32 %v6394_v60, 0.0  ;;  %v8343_v7 = vsel %vm15716_vm2, %v8338_v22, %v8342_v37  ;;  %v6510_v34 = vrot.slane %v6508_v8, 7  ;;  %v6654_v21 = vld [vmem:[#allocation3 + $0x9c] sm:$0xf]  ;;  %v6658_v60 = vld [vmem:[#allocation3 + $0xa4] sm:$0x1] }
 0x296   : > { %14472 = vmatprep.subr.bf16.mxu0 %v15354_v23  ;;  %v6411_v36 = vmax.f32 %v6395_v31, 0.0  ;;  %v6396_v27 = vadd.f32 %v19315_v55, %v6373_v18  ;;  %v12771_v48 = vcombine.low %v21408_v0, %v8343_v7  ;;  %v6530_v45 = vor.u32 %v6528_v1, %v6527_v6  ;;  %v1215_v37 = vld [vmem:[#allocation3 + $0xbc] sm:$0x1]  ;;  %v19541_v1 = vld [vmem:[#allocation3 + $0x30] sm:$0xf] }
 0x297   : > { %v6532_v52 = vrot.slane %v6527_v6, 4  ;;  %v6534_v3 = vshrl.u32 %v13216_v15, 16  ;;  %v6537_v51 = vshll.u32 %v13216_v15, 16  ;;  %v21409_v12 = vcombine.low %v19218_v46, %v19226_v41 }
 0x298   : > { %v6513_v20 = vor.u32 %v6511_v33, %v6510_v34  ;;  %v6515_v17 = vrot.slane %v6510_v34, 4  ;;  %v13218_v19 = vpack.c.bf16 %v6411_v36, %v6411_v36  ;;  %v6412_v10 = vmax.f32 %v6396_v27, 0.0  ;;  %v19557_v36 = vld [vmem:[#allocation3 + $0x34] sm:$0xf] }
 0x299   : > { %8906 = vmatmul.mubr.bf16.vlgmr.msra.gmra.mrb[192].mxu0 %v21409_v12  ;;  %v6531_v46 = vsel %vm15813_vm11, %v6523_v53, %v6530_v45  ;;  %v6652_v41 = vsel %vm15755_vm6, %v6532_v52, %v6651_v11  ;;  %v6536_v16 = vrot.slane %v6534_v3, 7  ;;  %v13217_v24 = vpack.c.bf16 %v6410_v13, %v6410_v13  ;;  %v15360_v13 = vld [vmem:[%s21155_s6 + $0x218] sm:$0xff]   ;;  %v21413_v3 = vld [vmem:[#allocation27_spill] sm:$0xff] }
 0x29a   : > { %8913 = vmatprep.mubr.bf16.mxu0 %v12771_v48  ;;  %14473 = vmatpush3.bf16.msra.mxu0 %v15354_v23  ;;  %6650 = vst [vmem:[#allocation3 + $0x94] sm:$0xf] %v6531_v46  ;;  %6653 = vst [vmem:[#allocation3 + $0x98] sm:$0x1] %v6652_v41  ;;  %v6514_v47 = vsel %vm15813_vm11, %v6506_v54, %v6513_v20  ;;  %v6645_v25 = vsel %vm15755_vm6, %v6515_v17, %v6644_v57  ;;  %v6551_v62 = vshrl.u32 %v13218_v19, 16  ;;  %v19539_v23 = vpop.f32.mrb[142].mxu0 }
 0x29b   : > { %14474 = vmatprep.subr.bf16.mxu0 %v15355_v49  ;;  %v6554_v53 = vshll.u32 %v13218_v19, 16  ;;  %6643 = vst [vmem:[#allocation3 + $0x88] sm:$0xf] %v6514_v47  ;;  %6646 = vst [vmem:[#allocation3 + $0x8c] sm:$0x1] %v6645_v25  ;;  %v6539_v30 = vor.u32 %v6537_v51, %v6536_v16  ;;  %v6540_v38 = vrot.slane %v6536_v16, 4  ;;  %v13219_v22 = vpack.c.bf16 %v6412_v10, %v6412_v10 }
 0x29c   : > { %v6542_v44 = vshrl.u32 %v13217_v24, 16  ;;  %v19543_v40 = vpop.f32.mrb[143].mxu0  ;;  %v6553_v54 = vrot.slane %v6551_v62, 7  ;;  %v6545_v14 = vshll.u32 %v13217_v24, 16  ;;  %v13598_v8 = vadd.f32 %v19478_v50, %v19468_v61  ;;  %v6665_v61 = vld [vmem:[#allocation3 + $0xb0] sm:$0x1] }
 0x29d   : > { %v1168_v33 = vsel %vm15755_vm6, 0, %v1167_v29  ;;  %v6655_v31 = vsel %vm15803_vm10, %v6539_v30, %v6654_v21  ;;  %v6559_v18 = vshrl.u32 %v13219_v22, 16  ;;  %v6562_v6 = vshll.u32 %v13219_v22, 16  ;;  %v21410_v50 = vld [vmem:[#allocation26_spill] sm:$0xff]  ;;  %v21412_v57 = vld [vmem:[#allocation25_spill] sm:$0xff]  ;;  %v21415_v29 = vld [vmem:[#allocation19_spill] sm:$0xff] }
 0x29e   : > { %14475 = vmatpush3.bf16.msra.mxu0 %v15355_v49  ;;  %v6544_v15 = vrot.slane %v6542_v44, 7  ;;  %1169 = vst [vmem:[#allocation3 + $0xb4] sm:$0x1] %v1168_v33  ;;  %v6556_v7 = vor.u32 %v6554_v53, %v6553_v54  ;;  %v6557_v11 = vrot.slane %v6553_v54, 4  ;;  %6656 = vst [vmem:[#allocation3 + $0x9c] sm:$0xf] %v6655_v31  ;;  %v14767_v34 = vadd.f32 %v13598_v8, %v21410_v50 }
 0x29f   : > { %14476 = vmatprep.subr.bf16.mxu0 %v15359_v35  ;;  %v13601_v49 = vadd.f32 %v19496_v26, %v19490_v58  ;;  %v6561_v27 = vrot.slane %v6559_v18, 7  ;;  %v1216_v52 = vsel %vm15767_vm8, 0, %v1215_v37  ;;  %v21414_v51 = vcombine.low %v21412_v57, %v21413_v3  ;;  %v21416_v17 = vld [vmem:[#allocation16_spill] sm:$0xff]  ;;  %v15364_v16 = vld [vmem:[%s21155_s6 + $0x220] sm:$0xff]   ;;  %v1170_v53 = vld [vmem:[#allocation3 + $0xc0] sm:$0x1] }
 0x2a0   : > { %v6547_v0 = vor.u32 %v6545_v14, %v6544_v15  ;;  %v6549_v48 = vrot.slane %v6544_v15, 4  ;;  %v6662_v12 = vsel %vm15803_vm10, %v6556_v7, %v6661_v56  ;;  %v14768_v20 = vadd.f32 %v14767_v34, %v21415_v29  ;;  %1217 = vst [vmem:[#allocation3 + $0xbc] sm:$0x1] %v1216_v52  ;;  %v19573_v41 = vld [vmem:[#allocation3 + $0x38] sm:$0x1]  ;;  %v15365_v18 = vld [vmem:[%s21155_s6 + $0x228] sm:$0xff]  }
 0x2a1   : > { %8914 = vmatmul.mubr.bf16.gmra.mrb[196].mxu0 %v21414_v51  ;;  %v14773_v19 = vadd.f32 %v13601_v49, %v21416_v17  ;;  %v8345_v58 = vshrl.u32 %v19541_v1, 16  ;;  %6663 = vst [vmem:[#allocation3 + $0xa8] sm:$0xf] %v6662_v12  ;;  %v6564_v26 = vor.u32 %v6562_v6, %v6561_v27  ;;  %v6566_v21 = vrot.slane %v6561_v27, 4  ;;  %v21417_v24 = vld [vmem:[#allocation20_spill] sm:$0xff]  ;;  %v21419_v52 = vld [vmem:[#allocation18_spill] sm:$0xff] }
 0x2a2   : > { %14477 = vmatpush3.bf16.msra.mxu0 %v15359_v35  ;;  %v6548_v10 = vsel %vm15813_vm11, %v6540_v38, %v6547_v0  ;;  %v6659_v46 = vsel %vm15755_vm6, %v6549_v48, %v6658_v60  ;;  %v14769_v35 = vadd.f32 %v14768_v20, %v19461_v39  ;;  %v8348_v62 = vshll.u32 %v19541_v1, 16  ;;  %v1218_v14 = vld [vmem:[#allocation3 + $0xc8] sm:$0x1]  ;;  %v21420_v3 = vld [vmem:[#allocation17_spill] sm:$0xff] }
 0x2a3   : > { %14478 = vmatprep.subr.bf16.mxu0 %v15360_v13  ;;  %6657 = vst [vmem:[#allocation3 + $0xa0] sm:$0xf] %v6548_v10  ;;  %6660 = vst [vmem:[#allocation3 + $0xa4] sm:$0x1] %v6659_v46  ;;  %v14774_v47 = vadd.f32 %v14773_v19, %v21417_v24  ;;  %v8347_v25 = vrot.slane %v8345_v58, 4  ;;  %v6565_v37 = vsel %vm15813_vm11, %v6557_v11, %v6564_v26  ;;  %v8354_v30 = vshll.u32 %v19557_v36, 16 }
 0x2a4   : > { %v6666_v56 = vsel %vm15755_vm6, %v6566_v21, %v6665_v61  ;;  %v8358_v38 = vshrl.u32 %v19557_v36, 16  ;;  %6664 = vst [vmem:[#allocation3 + $0xac] sm:$0xf] %v6565_v37  ;;  %v6374_v39 = vmul.f32 %v14769_v35, %v19302_v9  ;;  %v8350_v44 = vrot.slane %v8348_v62, 5  ;;  %v21418_v61 = vld [vmem:[#allocation12_spill] sm:$0xff]  ;;  %v21421_v58 = vld [vmem:[#allocation9_spill] sm:$0xff] }
 0x2a5   : > { %6667 = vst [vmem:[#allocation3 + $0xb0] sm:$0x1] %v6666_v56  ;;  %v14775_v22 = vadd.f32 %v14774_v47, %v19480_v2  ;;  %v8364_v54 = vshll.u32 %v19573_v41, 16  ;;  %v8356_v60 = vrot.slane %v8354_v30, 5  ;;  %v1171_v33 = vsel %vm15755_vm6, 0, %v1170_v53  ;;  %v15370_v10 = vld [vmem:[%s21155_s6 + $0x238] sm:$0xff]  }
 0x2a6   : > { %14479 = vmatpush3.bf16.msra.mxu0 %v15360_v13  ;;  %v8360_v8 = vrot.slane %v8358_v38, 4  ;;  %v13604_v31 = vadd.f32 %v19531_v4, %v19520_v28  ;;  %v6397_v2 = vadd.f32 %v19315_v55, %v6374_v39  ;;  %v8351_v15 = vor.u32 %v8350_v44, %v8347_v25  ;;  %1172 = vst [vmem:[#allocation3 + $0xc0] sm:$0x1] %v1171_v33  ;;  %v19599_v13 = vld [vmem:[#allocation3 + $0x3c] sm:$0xf] }
 0x2a7   : > { %14480 = vmatprep.subr.bf16.mxu0 %v15364_v16  ;;  %v6375_v6 = vmul.f32 %v14775_v22, %v19302_v9  ;;  %v8366_v7 = vrot.slane %v8364_v54, 5  ;;  %v1219_v28 = vsel %vm15767_vm8, 0, %v1218_v14  ;;  %v13607_v4 = vadd.f32 %v19543_v40, %v19539_v23  ;;  %v19611_v12 = vld [vmem:[#allocation3 + $0x40] sm:$0xf]  ;;  %v15369_v23 = vld [vmem:[%s21155_s6 + $0x230] sm:$0xff]  }
 0x2a8   : > { %v8361_v11 = vor.u32 %v8360_v8, %v8356_v60  ;;  %v14764_v50 = vadd.f32 %v13604_v31, %v21418_v61  ;;  %v6413_v34 = vmax.f32 %v6397_v2, 0.0  ;;  %v8352_v27 = vrot.slane %v8351_v15, 4  ;;  %1220 = vst [vmem:[#allocation3 + $0xc8] sm:$0x1] %v1219_v28  ;;  %v19627_v47 = vld [vmem:[#allocation3 + $0x44] sm:$0x1] }
 0x2a9   : > { %v6398_v49 = vadd.f32 %v19315_v55, %v6375_v6  ;;  %v12764_v0 = vcombine.low %v19541_v1, %v19557_v36  ;;  %v14770_v51 = vadd.f32 %v13607_v4, %v21420_v3  ;;  %v8369_v45 = vshrl.u32 %v19599_v13, 16  ;;  %v6668_v25 = vld [vmem:[#allocation3 + $0xb4] sm:$0xf]  ;;  %v6672_v22 = vld [vmem:[#allocation3 + $0xbc] sm:$0x1] }
 0x2aa   : > { %14481 = vmatpush3.bf16.msra.mxu0 %v15364_v16  ;;  %v8362_v48 = vrot.slane %v8361_v11, 4  ;;  %v14765_v57 = vadd.f32 %v14764_v50, %v21419_v52  ;;  %v13220_v40 = vpack.c.bf16 %v6413_v34, %v6413_v34  ;;  %v8357_v1 = vsel %vm15716_vm2, %v8352_v27, %v8356_v60  ;;  %v19635_v8 = vld [vmem:[#allocation3 + $0x6c] sm:$0xf]  ;;  %v19639_v11 = vld [vmem:[#allocation3 + $0x70] sm:$0xf] }
 0x2ab   : > { %14482 = vmatprep.subr.bf16.mxu0 %v15365_v18  ;;  %v6414_v29 = vmax.f32 %v6398_v49, 0.0  ;;  %v8372_v20 = vshll.u32 %v19599_v13, 16  ;;  %v14771_v26 = vadd.f32 %v14770_v51, %v21421_v58  ;;  %v8371_v21 = vrot.slane %v8369_v45, 4 }
 0x2ac   : > { %v8367_v17 = vsel %vm15716_vm2, %v8362_v48, %v8366_v7  ;;  %v14766_v19 = vadd.f32 %v14765_v57, %v19453_v32  ;;  %v6568_v46 = vshrl.u32 %v13220_v40, 16  ;;  %v6571_v16 = vshll.u32 %v13220_v40, 16 }
 0x2ad   : > { %v13221_v35 = vpack.c.bf16 %v6414_v29, %v6414_v29  ;;  %v12772_v24 = vcombine.low %v8357_v1, %v8367_v17  ;;  %v14772_v53 = vadd.f32 %v14771_v26, %v19470_v5  ;;  %v8374_v32 = vrot.slane %v8372_v20, 5  ;;  %v19658_v29 = vld [vmem:[#allocation3 + $0x78] sm:$0xf]  ;;  %v6675_v1 = vld [vmem:[#allocation3 + $0xc0] sm:$0xf] }
 0x2ae   : > { %14483 = vmatpush3.bf16.msra.mxu0 %v15365_v18  ;;  %v6376_v62 = vmul.f32 %v14766_v19, %v19302_v9  ;;  %v8378_v37 = vshll.u32 %v19611_v12, 16  ;;  %v6570_v56 = vrot.slane %v6568_v46, 7  ;;  %v8382_v39 = vshrl.u32 %v19611_v12, 16 }
 0x2af   : > { %14484 = vmatprep.subr.bf16.mxu0 %v15369_v23  ;;  %v6576_v30 = vshrl.u32 %v13221_v35, 16  ;;  %v6579_v38 = vshll.u32 %v13221_v35, 16  ;;  %8921 = vmatprep.mubr.bf16.mxu0 %v12772_v24  ;;  %v6377_v54 = vmul.f32 %v14772_v53, %v19302_v9  ;;  %v8375_v14 = vor.u32 %v8374_v32, %v8371_v21  ;;  %v19644_v9 = vld [vmem:[%s21157_s8] sm:$0xff]  }
 0x2b0   : > { %v6399_v44 = vadd.f32 %v19315_v55, %v6376_v62  ;;  %8922 = vmatmul.mubr.bf16.gmra.mrb[200].mxu0 %v12764_v0  ;;  %v8380_v60 = vrot.slane %v8378_v37, 5  ;;  %v6573_v5 = vor.u32 %v6571_v16, %v6570_v56  ;;  %v6574_v33 = vrot.slane %v6570_v56, 4  ;;  %v19665_v16 = vld [vmem:[#allocation3 + $0x7c] sm:$0xf]  ;;  %v6679_v56 = vld [vmem:[#allocation3 + $0xc8] sm:$0x1] }
 0x2b1   : > { %v6578_v31 = vrot.slane %v6576_v30, 7  ;;  %v8384_v18 = vrot.slane %v8382_v39, 4  ;;  %v6400_v6 = vadd.f32 %v19315_v55, %v6377_v54  ;;  %v8376_v15 = vrot.slane %v8375_v14, 4 }
 0x2b2   : > { %14485 = vmatpush3.bf16.msra.mxu0 %v15369_v23  ;;  %v6415_v2 = vmax.f32 %v6399_v44, 0.0  ;;  %v8388_v7 = vshll.u32 %v19627_v47, 16  ;;  %v6669_v61 = vsel %vm15803_vm10, %v6573_v5, %v6668_v25  ;;  %v9789_v57 = vshrl.u32 %v19635_v8, 16  ;;  %v19655_v23 = vld [vmem:[#allocation3 + $0x74] sm:$0x1] }
 0x2b3   : > { %14486 = vmatprep.subr.bf16.mxu0 %v15370_v10  ;;  %v6581_v50 = vor.u32 %v6579_v38, %v6578_v31  ;;  %v6583_v28 = vrot.slane %v6578_v31, 4  ;;  %v8385_v4 = vor.u32 %v8384_v18, %v8380_v60  ;;  %6670 = vst [vmem:[#allocation3 + $0xb4] sm:$0xf] %v6669_v61  ;;  %v6416_v55 = vmax.f32 %v6400_v6, 0.0 }
 0x2b4   : > { %v13222_v34 = vpack.c.bf16 %v6415_v2, %v6415_v2  ;;  %v8381_v49 = vsel %vm15716_vm2, %v8376_v15, %v8380_v60  ;;  %v8390_v27 = vrot.slane %v8388_v7, 5  ;;  %v9792_v40 = vshll.u32 %v19635_v8, 16  ;;  %v19677_v15 = vld [vmem:[#allocation3 + $0x4c] sm:$0xf] }
 0x2b5   : > { %v6582_v0 = vsel %vm15813_vm11, %v6574_v33, %v6581_v50  ;;  %v6673_v48 = vsel %vm15755_vm6, %v6583_v28, %v6672_v22  ;;  %v8386_v52 = vrot.slane %v8385_v4, 4  ;;  %v13223_v45 = vpack.c.bf16 %v6416_v55, %v6416_v55  ;;  %v19668_v22 = vld [vmem:[#allocation3 + $0x80] sm:$0x1]  ;;  %v19674_v33 = vld [vmem:[#allocation3 + $0x48] sm:$0xf] }
 0x2b6   : > { %14487 = vmatpush3.bf16.msra.mxu0 %v15370_v10  ;;  %6671 = vst [vmem:[#allocation3 + $0xb8] sm:$0xf] %v6582_v0  ;;  %6674 = vst [vmem:[#allocation3 + $0xbc] sm:$0x1] %v6673_v48  ;;  %v6585_v3 = vshrl.u32 %v13222_v34, 16  ;;  %v6588_v51 = vshll.u32 %v13222_v34, 16  ;;  %v12907_v59 = vcombine.low %v19635_v8, %v19639_v11 }
 0x2b7   : > { %14504 = vmatprep.subr.bf16.mxu0 %v19644_v9  ;;  %v8391_v20 = vsel %vm15716_vm2, %v8386_v52, %v8390_v27  ;;  %v9791_v17 = vrot.slane %v9789_v57, 4  ;;  %v9798_v19 = vshll.u32 %v19639_v11, 16  ;;  %v9802_v58 = vshrl.u32 %v19639_v11, 16  ;;  %v19684_v28 = vld [vmem:[#allocation3 + $0x50] sm:$0x1] }
 0x2b8   : > { %v6587_v26 = vrot.slane %v6585_v3, 7  ;;  %v6593_v21 = vshrl.u32 %v13223_v45, 16  ;;  %v6596_v10 = vshll.u32 %v13223_v45, 16  ;;  %v12773_v46 = vcombine.low %v8381_v49, %v8391_v20  ;;  %v15352_v48 = vld [vmem:[%s21155_s6 + $0x148] sm:$0xff]   ;;  %v19696_v52 = vld [vmem:[#allocation3 + $0x84] sm:$0xf] }
 0x2b9   : > { %v9794_v35 = vrot.slane %v9792_v40, 5  ;;  %v9800_v24 = vrot.slane %v9798_v19, 5  ;;  %v9804_v25 = vrot.slane %v9802_v58, 4  ;;  %v9808_v62 = vshll.u32 %v19655_v23, 16 }
 0x2ba   : > { %v6590_v53 = vor.u32 %v6588_v51, %v6587_v26  ;;  %v6591_v32 = vrot.slane %v6587_v26, 4  ;;  %v6595_v37 = vrot.slane %v6593_v21, 7  ;;  %8929 = vmatprep.mubr.bf16.mxu0 %v12773_v46  ;;  %v9813_v44 = vshrl.u32 %v19658_v29, 16  ;;  %v19702_v40 = vpop.f32.mrb[96].mxu1 }
 0x2bb   : > { %v9795_v30 = vor.u32 %v9794_v35, %v9791_v17  ;;  %v9805_v38 = vor.u32 %v9804_v25, %v9800_v24  ;;  %v9810_v39 = vrot.slane %v9808_v62, 5  ;;  %v9816_v5 = vshll.u32 %v19658_v29, 16  ;;  %v19706_v19 = vpop.f32.mrb[97].mxu1  ;;  %v15497_v25 = vld [vmem:[%s21155_s6 + $0x140] sm:$0xff]  }
 0x2bc   : > { %v6676_v54 = vsel %vm15803_vm10, %v6590_v53, %v6675_v1  ;;  %v6598_v14 = vor.u32 %v6596_v10, %v6595_v37  ;;  %v6600_v60 = vrot.slane %v6595_v37, 4  ;;  %v9815_v2 = vrot.slane %v9813_v44, 4  ;;  %v19711_v10 = vld [vmem:[#allocation3 + $0x88] sm:$0xf]  ;;  %v19713_v46 = vpop.f32.mrb[98].mxu1 }
 0x2bd   : > { %6677 = vst [vmem:[#allocation3 + $0xc0] sm:$0xf] %v6676_v54  ;;  %v9796_v31 = vrot.slane %v9795_v30, 4  ;;  %v9806_v18 = vrot.slane %v9805_v38, 4  ;;  %v9822_v6 = vshll.u32 %v19665_v16, 16  ;;  %v9818_v61 = vrot.slane %v9816_v5, 5 }
 0x2be   : > { %v6599_v7 = vsel %vm15813_vm11, %v6591_v32, %v6598_v14  ;;  %v6680_v43 = vsel %vm15755_vm6, %v6600_v60, %v6679_v56  ;;  %v9826_v50 = vshrl.u32 %v19665_v16, 16  ;;  %v9832_v63 = vshll.u32 %v19668_v22, 16  ;;  %v19720_v32 = vpop.f32.mrb[99].mxu1  ;;  %v19733_v5 = vld [vmem:[#allocation3 + $0x54] sm:$0xf] }
 0x2bf   : > { %6678 = vst [vmem:[#allocation3 + $0xc4] sm:$0xf] %v6599_v7  ;;  %6681 = vst [vmem:[#allocation3 + $0xc8] sm:$0x1] %v6680_v43  ;;  %v9801_v4 = vsel %vm15716_vm2, %v9796_v31, %v9800_v24  ;;  %v9811_v34 = vsel %vm15716_vm2, %v9806_v18, %v9810_v39  ;;  %v9824_v55 = vrot.slane %v9822_v6, 5  ;;  %v9819_v27 = vor.u32 %v9818_v61, %v9815_v2  ;;  %v15357_v39 = vld [vmem:[%s21155_s6 + $0x150] sm:$0xff]  }
 0x2c0   : > { %v12915_v49 = vcombine.low %v9801_v4, %v9811_v34  ;;  %v9828_v0 = vrot.slane %v9826_v50, 4  ;;  %v9834_v57 = vrot.slane %v9832_v63, 5  ;;  %v12765_v3 = vcombine.low %v19599_v13, %v19611_v12  ;;  %v19735_v31 = vld [vmem:[#allocation3 + $0x58] sm:$0xf]  ;;  %v19737_v43 = vld [vmem:[#allocation3 + $0x5c] sm:$0x1] }
 0x2c1   : > { %v8393_v51 = vshrl.u32 %v19674_v33, 16  ;;  %v8396_v45 = vshll.u32 %v19674_v33, 16  ;;  %v9820_v8 = vrot.slane %v9819_v27, 4  ;;  %v8402_v20 = vshll.u32 %v19677_v15, 16 }
 0x2c2   : > { %10396 = vmatprep.mubr.bf16.mxu1 %v12915_v49  ;;  %v9829_v1 = vor.u32 %v9828_v0, %v9824_v55  ;;  %v8406_v17 = vshrl.u32 %v19677_v15, 16  ;;  %8930 = vmatmul.mubr.bf16.gmra.mrb[204].mxu0 %v12765_v3  ;;  %v8412_v13 = vshll.u32 %v19684_v28, 16  ;;  %v12908_v21 = vcombine.low %v19658_v29, %v19665_v16  ;;  %v19722_v29 = vld [vmem:[#allocation3 + $0x8c] sm:$0x1]  ;;  %v15362_v0 = vld [vmem:[%s21155_s6 + $0x158] sm:$0xff]  }
 0x2c3   : > { %10397 = vmatmul.mubr.bf16.vlgmr.msra.gmra.mrb[128].mxu1 %v12907_v59  ;;  %v8395_v58 = vrot.slane %v8393_v51, 4  ;;  %v8398_v26 = vrot.slane %v8396_v45, 5  ;;  %v9825_v35 = vsel %vm15716_vm2, %v9820_v8, %v9824_v55  ;;  %v8404_v62 = vrot.slane %v8402_v20, 5  ;;  %v19740_v55 = vld [vmem:[#allocation3 + $0x90] sm:$0xf]  ;;  %v15367_v20 = vld [vmem:[%s21155_s6 + $0x160] sm:$0xff]  }
 0x2c4   : > { %v9830_v24 = vrot.slane %v9829_v1, 4  ;;  %14537 = vmatpush3.bf16.msra.mxu1 %v15497_v25  ;;  %v8408_v53 = vrot.slane %v8406_v17, 4  ;;  %v8414_v56 = vrot.slane %v8412_v13, 5  ;;  %v9837_v30 = vshrl.u32 %v19696_v52, 16 }
 0x2c5   : > { %v8399_v37 = vor.u32 %v8398_v26, %v8395_v58  ;;  %14538 = vmatprep.subr.bf16.mxu1 %v15352_v48  ;;  %v9840_v38 = vshll.u32 %v19696_v52, 16  ;;  %v9846_v14 = vshll.u32 %v19711_v10, 16  ;;  %v9850_v60 = vshrl.u32 %v19711_v10, 16 }
 0x2c6   : > { %v9835_v44 = vsel %vm15716_vm2, %v9830_v24, %v9834_v57  ;;  %v8409_v54 = vor.u32 %v8408_v53, %v8404_v62  ;;  %v9839_v6 = vrot.slane %v9837_v30, 4  ;;  %v9856_v34 = vshll.u32 %v19722_v29, 16  ;;  %v19761_v24 = vld [vmem:[#allocation3 + $0x60] sm:$0xf]  ;;  %v19767_v53 = vld [vmem:[#allocation3 + $0x98] sm:$0x1] }
 0x2c7   : > { %v12916_v18 = vcombine.low %v9825_v35, %v9835_v44  ;;  %v8400_v2 = vrot.slane %v8399_v37, 4  ;;  %v9842_v7 = vrot.slane %v9840_v38, 5  ;;  %v9848_v50 = vrot.slane %v9846_v14, 5  ;;  %v19759_v35 = vld [vmem:[#allocation3 + $0x94] sm:$0xf]  ;;  %21423 = vst [vmem:[#allocation23_spill] sm:$0xff] %v19767_v53 }
 0x2c8   : > { %v8410_v61 = vrot.slane %v8409_v54, 4  ;;  %v9852_v4 = vrot.slane %v9850_v60, 4  ;;  %14539 = vmatpush3.bf16.msra.mxu1 %v15352_v48  ;;  %v12766_v59 = vcombine.low %v19674_v33, %v19677_v15  ;;  %v8417_v27 = vshrl.u32 %v19733_v5, 16  ;;  %21422 = vst [vmem:[#allocation24_spill] sm:$0xff] %v19759_v35  ;;  %v19772_v44 = vld [vmem:[#allocation3 + $0x64] sm:$0xf] }
 0x2c9   : > { %10404 = vmatprep.mubr.bf16.mxu1 %v12916_v18  ;;  %v8405_v63 = vsel %vm15716_vm2, %v8400_v2, %v8404_v62  ;;  %v9843_v49 = vor.u32 %v9842_v7, %v9839_v6  ;;  %14540 = vmatprep.subr.bf16.mxu1 %v15357_v39  ;;  %v9858_v3 = vrot.slane %v9856_v34, 5  ;;  %v8420_v51 = vshll.u32 %v19733_v5, 16  ;;  %v19774_v54 = vpop.f32.mrb[144].mxu0  ;;  %v19778_v2 = vld [vmem:[#allocation3 + $0x68] sm:$0x1]  ;;  %v15372_v6 = vld [vmem:[%s21155_s6 + $0x168] sm:$0xff]  }
 0x2ca   : > { %v8415_v48 = vsel %vm15716_vm2, %v8410_v61, %v8414_v56  ;;  %v9853_v57 = vor.u32 %v9852_v4, %v9848_v50  ;;  %v8419_v1 = vrot.slane %v8417_v27, 4  ;;  %v8426_v33 = vshll.u32 %v19735_v31, 16  ;;  %v19783_v7 = vpop.f32.mrb[145].mxu0 }
 0x2cb   : > { %v12774_v45 = vcombine.low %v8405_v63, %v8415_v48  ;;  %10405 = vmatmul.mubr.bf16.gmra.mrb[132].mxu1 %v12908_v21  ;;  %v9844_v8 = vrot.slane %v9843_v49, 4  ;;  %v8422_v58 = vrot.slane %v8420_v51, 5  ;;  %v8430_v26 = vshrl.u32 %v19735_v31, 16  ;;  %v19787_v63 = vpop.f32.mrb[146].mxu0 }
 0x2cc   : > { %v9854_v17 = vrot.slane %v9853_v57, 4  ;;  %v8436_v13 = vshll.u32 %v19737_v43, 16  ;;  %14541 = vmatpush3.bf16.msra.mxu1 %v15357_v39  ;;  %v8428_v25 = vrot.slane %v8426_v33, 5  ;;  %v12909_v62 = vcombine.low %v19696_v52, %v19711_v10  ;;  %v19792_v57 = vpop.f32.mrb[147].mxu0 }
 0x2cd   : > { %8937 = vmatprep.mubr.bf16.mxu0 %v12774_v45  ;;  %v9849_v21 = vsel %vm15716_vm2, %v9844_v8, %v9848_v50  ;;  %v9861_v37 = vshrl.u32 %v19740_v55, 16  ;;  %14542 = vmatprep.subr.bf16.mxu1 %v15362_v0  ;;  %v8423_v30 = vor.u32 %v8422_v58, %v8419_v1  ;;  %v8432_v38 = vrot.slane %v8430_v26, 4 }
 0x2ce   : > { %v9859_v56 = vsel %vm15716_vm2, %v9854_v17, %v9858_v3  ;;  %8938 = vmatmul.mubr.bf16.gmra.mrb[208].mxu0 %v12766_v59  ;;  %v8438_v39 = vrot.slane %v8436_v13, 5  ;;  %v9864_v52 = vshll.u32 %v19740_v55, 16  ;;  %v9870_v18 = vshll.u32 %v19759_v35, 16 }
 0x2cf   : > { %v12917_v14 = vcombine.low %v9849_v21, %v9859_v56  ;;  %v9863_v60 = vrot.slane %v9861_v37, 4  ;;  %v8424_v61 = vrot.slane %v8423_v30, 4  ;;  %v8433_v50 = vor.u32 %v8432_v38, %v8428_v25  ;;  %v19802_v21 = vld [vmem:[#allocation3 + $0x9c] sm:$0xf] }
 0x2d0   : > { %v9874_v4 = vshrl.u32 %v19759_v35, 16  ;;  %v9880_v34 = vshll.u32 %v19767_v53, 16  ;;  %14543 = vmatpush3.bf16.msra.mxu1 %v15362_v0  ;;  %v9866_v49 = vrot.slane %v9864_v52, 5  ;;  %v9872_v59 = vrot.slane %v9870_v18, 5 }
 0x2d1   : > { %10412 = vmatprep.mubr.bf16.mxu1 %v12917_v14  ;;  %v12767_v27 = vcombine.low %v19733_v5, %v19735_v31  ;;  %v8441_v48 = vshrl.u32 %v19761_v24, 16  ;;  %14544 = vmatprep.subr.bf16.mxu1 %v15367_v20  ;;  %v8429_v3 = vsel %vm15716_vm2, %v8424_v61, %v8428_v25  ;;  %v8434_v51 = vrot.slane %v8433_v50, 4  ;;  %v15376_v25 = vld [vmem:[%s21155_s6 + $0x170] sm:$0xff]   ;;  %v19809_v14 = vld [vmem:[#allocation3 + $0xa0] sm:$0xf] }
 0x2d2   : > { %v9876_v45 = vrot.slane %v9874_v4, 4  ;;  %v9882_v8 = vrot.slane %v9880_v34, 5  ;;  %v9867_v0 = vor.u32 %v9866_v49, %v9863_v60  ;;  %v8444_v33 = vshll.u32 %v19761_v24, 16  ;;  %21424 = vst [vmem:[#allocation30_spill] sm:$0xff] %v19809_v14  ;;  %v19819_v34 = vld [vmem:[#allocation3 + $0xa4] sm:$0x1] }
 0x2d3   : > { %10413 = vmatmul.mubr.bf16.gmra.mrb[136].mxu1 %v12909_v62  ;;  %v8443_v1 = vrot.slane %v8441_v48, 4  ;;  %v8450_v17 = vshll.u32 %v19772_v44, 16  ;;  %v8439_v5 = vsel %vm15716_vm2, %v8434_v51, %v8438_v39  ;;  %v8454_v26 = vshrl.u32 %v19772_v44, 16  ;;  %v19807_v62 = vpop.f32.mrb[100].mxu1  ;;  %21425 = vst [vmem:[#allocation31_spill] sm:$0xff] %v19819_v34 }
 0x2d4   : > { %v9877_v58 = vor.u32 %v9876_v45, %v9872_v59  ;;  %v8460_v13 = vshll.u32 %v19778_v2, 16  ;;  %14545 = vmatpush3.bf16.msra.mxu1 %v15367_v20  ;;  %v12775_v37 = vcombine.low %v8429_v3, %v8439_v5  ;;  %v9868_v56 = vrot.slane %v9867_v0, 4  ;;  %v19811_v39 = vpop.f32.mrb[101].mxu1 }
 0x2d5   : > { %v8446_v30 = vrot.slane %v8444_v33, 5  ;;  %v8452_v38 = vrot.slane %v8450_v17, 5  ;;  %14546 = vmatprep.subr.bf16.mxu1 %v15372_v6  ;;  %v8456_v52 = vrot.slane %v8454_v26, 4  ;;  %v12910_v20 = vcombine.low %v19740_v55, %v19759_v35  ;;  %v19815_v61 = vpop.f32.mrb[102].mxu1  ;;  %v19829_v33 = vld [vmem:[#allocation3 + $0x6c] sm:$0xf] }
 0x2d6   : > { %v9878_v60 = vrot.slane %v9877_v58, 4  ;;  %v8462_v18 = vrot.slane %v8460_v13, 5  ;;  %8945 = vmatprep.mubr.bf16.mxu0 %v12775_v37  ;;  %v9873_v50 = vsel %vm15716_vm2, %v9868_v56, %v9872_v59  ;;  %v9885_v49 = vshrl.u32 %v19802_v21, 16  ;;  %v19823_v3 = vpop.f32.mrb[103].mxu1  ;;  %v15380_v58 = vld [vmem:[%s21155_s6 + $0x178] sm:$0xff]  }
 0x2d7   : > { %v8447_v4 = vor.u32 %v8446_v30, %v8443_v1  ;;  %v9888_v48 = vshll.u32 %v19802_v21, 16  ;;  %8946 = vmatmul.mubr.bf16.gmra.mrb[212].mxu0 %v12767_v27  ;;  %v8457_v55 = vor.u32 %v8456_v52, %v8452_v38  ;;  %v9894_v45 = vshll.u32 %v19809_v14, 16  ;;  %v19835_v37 = vld [vmem:[#allocation3 + $0x70] sm:$0xf]  ;;  %v19837_v56 = vld [vmem:[#allocation3 + $0x2c] sm:$0x1] }
 0x2d8   : > { %v9883_v51 = vsel %vm15716_vm2, %v9878_v60, %v9882_v8  ;;  %v9898_v0 = vshrl.u32 %v19809_v14, 16  ;;  %14547 = vmatpush3.bf16.msra.mxu1 %v15372_v6  ;;  %v9887_v17 = vrot.slane %v9885_v49, 4  ;;  %v9904_v13 = vshll.u32 %v19819_v34, 16  ;;  %v19842_v52 = vld [vmem:[#allocation3 + $0x74] sm:$0x1] }
 0x2d9   : > { %v12918_v59 = vcombine.low %v9873_v50, %v9883_v51  ;;  %v8448_v1 = vrot.slane %v8447_v4, 4  ;;  %v9890_v5 = vrot.slane %v9888_v48, 5  ;;  %14548 = vmatprep.subr.bf16.mxu1 %v15376_v25  ;;  %v8458_v26 = vrot.slane %v8457_v55, 4  ;;  %21426 = vst [vmem:[#allocation11_spill] sm:$0xff] %v19842_v52  ;;  %v19850_v55 = vld [vmem:[#allocation3 + $0xa8] sm:$0xf] }
 0x2da   : > { %v9896_v8 = vrot.slane %v9894_v45, 5  ;;  %v9900_v27 = vrot.slane %v9898_v0, 4  ;;  %v8465_v50 = vshrl.u32 %v19829_v33, 16  ;;  %v12768_v48 = vcombine.low %v19761_v24, %v19772_v44  ;;  %v19852_v45 = vld [vmem:[#allocation3 + $0xac] sm:$0xf] }
 0x2db   : > { %10420 = vmatprep.mubr.bf16.mxu1 %v12918_v59  ;;  %v8453_v30 = vsel %vm15716_vm2, %v8448_v1, %v8452_v38  ;;  %v9891_v60 = vor.u32 %v9890_v5, %v9887_v17  ;;  %v8463_v4 = vsel %vm15716_vm2, %v8458_v26, %v8462_v18  ;;  %v8468_v51 = vshll.u32 %v19829_v33, 16  ;;  %v19855_v17 = vld [vmem:[#allocation3 + $0xb0] sm:$0x1]  ;;  %v15383_v18 = vld [vmem:[%s21155_s6 + $0x40] sm:$0xff]   ;;  %v8488_v34 = vld [vmem:[#allocation3 + $0x18] sm:$0xe] }
 0x2dc   : > { %10421 = vmatmul.mubr.bf16.gmra.mrb[140].mxu1 %v12910_v20  ;;  %v9901_v49 = vor.u32 %v9900_v27, %v9896_v8  ;;  %v12776_v38 = vcombine.low %v8453_v30, %v8463_v4  ;;  %v8467_v59 = vrot.slane %v8465_v50, 4  ;;  %v8474_v1 = vshll.u32 %v19835_v37, 16  ;;  %21427 = vst [vmem:[#allocation32_spill] sm:$0xff] %v19855_v17 }
 0x2dd   : > { %v9892_v0 = vrot.slane %v9891_v60, 4  ;;  %14549 = vmatpush3.bf16.msra.mxu1 %v15376_v25  ;;  %v9906_v24 = vrot.slane %v9904_v13, 5  ;;  %v8470_v5 = vrot.slane %v8468_v51, 5  ;;  %v8478_v26 = vshrl.u32 %v19835_v37, 16  ;;  %v19865_v25 = vpop.f32.mrb[148].mxu0 }
 0x2de   : > { %v9902_v20 = vrot.slane %v9901_v49, 4  ;;  %14550 = vmatprep.subr.bf16.mxu1 %v15380_v58  ;;  %8953 = vmatprep.mubr.bf16.mxu0 %v12776_v38  ;;  %v8476_v30 = vrot.slane %v8474_v1, 5  ;;  %v8484_v60 = vshll.u32 %v19842_v52, 16  ;;  %v9909_v50 = vshrl.u32 %v19850_v55, 16  ;;  %21428 = vst [vmem:[#allocation33_spill] sm:$0xff] %v19865_v25  ;;  %v19871_v38 = vpop.f32.mrb[149].mxu0 }
 0x2df   : > { %v9897_v27 = vsel %vm15716_vm2, %v9892_v0, %v9896_v8  ;;  %8954 = vmatmul.mubr.bf16.gmra.mrb[216].mxu0 %v12768_v48  ;;  %v8471_v13 = vor.u32 %v8470_v5, %v8467_v59  ;;  %v8480_v49 = vrot.slane %v8478_v26, 4  ;;  %v12911_v51 = vcombine.low %v19802_v21, %v19809_v14  ;;  %21429 = vst [vmem:[#allocation22_spill] sm:$0xff] %v19871_v38  ;;  %v19875_v53 = vpop.f32.mrb[150].mxu0  ;;  %v8489_v38 = vld [vmem:[#allocation3 + $0x24] sm:$0xe] }
 0x2e0   : > { %v9907_v4 = vsel %vm15716_vm2, %v9902_v20, %v9906_v24  ;;  %v9911_v8 = vrot.slane %v9909_v50, 4  ;;  %v9912_v0 = vshll.u32 %v19850_v55, 16  ;;  %v9918_v1 = vshll.u32 %v19852_v45, 16  ;;  %21430 = vst [vmem:[#allocation35_spill] sm:$0xff] %v19875_v53  ;;  %v19879_v21 = vpop.f32.mrb[151].mxu0 }
 0x2e1   : > { %v12919_v6 = vcombine.low %v9897_v27, %v9907_v4  ;;  %14551 = vmatpush3.bf16.msra.mxu1 %v15380_v58  ;;  %v8472_v35 = vrot.slane %v8471_v13, 4  ;;  %v8481_v20 = vor.u32 %v8480_v49, %v8476_v30  ;;  %v9922_v48 = vshrl.u32 %v19852_v45, 16  ;;  %21431 = vst [vmem:[#allocation38_spill] sm:$0xff] %v19879_v21  ;;  %v19883_v50 = vld [vmem:[#allocation3 + $0xb4] sm:$0xf]  ;;  %v19885_v58 = vpop.f32.mrb[104].mxu1 }
 0x2e2   : > { %v9928_v59 = vshll.u32 %v19855_v17, 16  ;;  %14040 = vmatprep.subr.bf16.mxu1 %v15383_v18  ;;  %v8486_v24 = vrot.slane %v8484_v60, 5  ;;  %v9914_v5 = vrot.slane %v9912_v0, 5  ;;  %v9920_v26 = vrot.slane %v9918_v1, 5  ;;  %21432 = vst [vmem:[#allocation4_spill] sm:$0xff] %v19885_v58 }
 0x2e3   : > { %10428 = vmatprep.mubr.bf16.mxu1 %v12919_v6  ;;  %v12769_v27 = vcombine.low %v19829_v33, %v19835_v37  ;;  %v8477_v4 = vsel %vm15716_vm2, %v8472_v35, %v8476_v30  ;;  %v8482_v13 = vrot.slane %v8481_v20, 4  ;;  %v9924_v49 = vrot.slane %v9922_v48, 4  ;;  %v19889_v17 = vld [vmem:[#allocation3 + $0xb8] sm:$0xf]  ;;  %v19891_v6 = vpop.f32.mrb[105].mxu1 }
 0x2e4   : > { %10429 = vmatmul.mubr.bf16.gmra.mrb[144].mxu1 %v12911_v51  ;;  %v12754_v18 = vrot.slane %v8488_v34, 9  ;;  %21433 = vst [vmem:[#allocation39_spill] sm:$0xff] %v19891_v6  ;;  %v9915_v60 = vor.u32 %v9914_v5, %v9911_v8  ;;  %v9930_v0 = vrot.slane %v9928_v59, 5  ;;  %v15499_v1 = vld [vmem:[#allocation3 + $0x1c] sm:$0xf]  ;;  %v19895_v58 = vpop.f32.mrb[106].mxu1 }
 0x2e5   : > { %v8522_v14 = vrot.slane %v15499_v1, 5  ;;  %v15500_v33 = vld [vmem:[#allocation3 + $0x20] sm:$0x1]  ;;  %v19893_v53 = vld [vmem:[#allocation3 + $0xbc] sm:$0x1]  ;;  %21435 = vst [vmem:[#allocation10_spill] sm:$0xff] %v19895_v58  ;;  %v8487_v35 = vsel %vm15716_vm2, %v8482_v13, %v8486_v24  ;;  %v9925_v30 = vor.u32 %v9924_v49, %v9920_v26 }
 0x2e6   : > { %v8525_v21 = vrot.slane %v15500_v33, 5  ;;  %21434 = vst [vmem:[#allocation15_spill] sm:$0xff] %v19893_v53  ;;  %v9933_v34 = vshrl.u32 %v19883_v50, 16  ;;  %v9936_v51 = vshll.u32 %v19883_v50, 16  ;;  %v19901_v20 = vpop.f32.mrb[107].mxu1  ;;  %v12777_v8 = vcombine.low %v8477_v4, %v8487_v35  ;;  %v15521_v59 = vld [vmem:[%s15728_s21 + $0x88] sm:$0xff] }
 0x2e7   : > { %21436 = vst [vmem:[#allocation28_spill] sm:$0xff] %v19901_v20  ;;  %v9916_v48 = vrot.slane %v9915_v60, 4  ;;  %v8523_v5 = vsel %vm16202_vm14, %v12754_v18, %v8522_v14  ;;  %v8524_v1 = vrot.slane %v8522_v14, 4  ;;  %v9926_v33 = vrot.slane %v9925_v30, 4  ;;  %v8490_v60 = vld [vmem:[#allocation3 + $0x30] sm:$0xe] }
 0x2e8   : > { %v9935_v6 = vrot.slane %v9933_v34, 4  ;;  %v9938_v52 = vrot.slane %v9936_v51, 5  ;;  %v9942_v58 = vshll.u32 %v19889_v17, 16  ;;  %8961 = vmatprep.mubr.bf16.mxu0 %v12777_v8  ;;  %v9946_v4 = vshrl.u32 %v19889_v17, 16  ;;  %v19914_v34 = vld [vmem:[#allocation3 + $0xc0] sm:$0xf] }
 0x2e9   : > { %v9921_v24 = vsel %vm15716_vm2, %v9916_v48, %v9920_v26  ;;  %v8526_v13 = vsel %vm16202_vm14, %v8524_v1, %v8525_v21  ;;  %v9952_v49 = vshll.u32 %v19893_v53, 16  ;;  %v9931_v14 = vsel %vm15716_vm2, %v9926_v33, %v9930_v0  ;;  %8962 = vmatmul.mubr.bf16.gmra.mrb[220].mxu0 %v12769_v27  ;;  %v19918_v48 = vld [vmem:[#allocation3 + $0xc4] sm:$0xf]  ;;  %v15501_v53 = vld [vmem:[#allocation3 + $0x28] sm:$0xf] }
 0x2ea   : > { %v12778_v18 = vcombine.low %v8523_v5, %v8526_v13  ;;  %v9939_v35 = vor.u32 %v9938_v52, %v9935_v6  ;;  %v9944_v30 = vrot.slane %v9942_v58, 5  ;;  %v12920_v51 = vcombine.low %v9921_v24, %v9931_v14  ;;  %v19922_v0 = vld [vmem:[#allocation3 + $0xc8] sm:$0x1] }
 0x2eb   : > { %v12912_v26 = vcombine.low %v19850_v55, %v19852_v45  ;;  %v9948_v8 = vrot.slane %v9946_v4, 4  ;;  %v12755_v21 = vrot.slane %v8489_v38, 9  ;;  %v8529_v20 = vrot.slane %v15501_v53, 5  ;;  %v19932_v4 = vpop.f32.mrb[152].mxu0 }
 0x2ec   : > { %14488 = vmatprep.mubr.bf16.mxu0 %v12778_v18  ;;  %v9940_v1 = vrot.slane %v9939_v35, 4  ;;  %v12756_v25 = vrot.slane %v8490_v60, 9  ;;  %v8536_v27 = vrot.slane %v19557_v36, 5  ;;  %10436 = vmatprep.mubr.bf16.mxu1 %v12920_v51  ;;  %v9954_v58 = vrot.slane %v9952_v49, 5  ;;  %v8491_v35 = vld [vmem:[#allocation3 + $0x3c] sm:$0xe] }
 0x2ed   : > { %v9949_v52 = vor.u32 %v9948_v8, %v9944_v30  ;;  %v8539_v6 = vrot.slane %v19573_v41, 5  ;;  %v9957_v55 = vshrl.u32 %v19914_v34, 16  ;;  %10437 = vmatmul.mubr.bf16.gmra.mrb[148].mxu1 %v12912_v26  ;;  %v8530_v5 = vsel %vm16202_vm14, %v12755_v21, %v8529_v20  ;;  %v8492_v8 = vld [vmem:[#allocation3 + $0x48] sm:$0xe] }
 0x2ee   : > { %v9945_v38 = vsel %vm15716_vm2, %v9940_v1, %v9944_v30  ;;  %v8531_v53 = vrot.slane %v8529_v20, 4  ;;  %v8537_v36 = vsel %vm16202_vm14, %v12756_v25, %v8536_v27  ;;  %v8538_v24 = vrot.slane %v8536_v27, 4  ;;  %v19941_v25 = vpop.f32.mrb[153].mxu0 }
 0x2ef   : > { %v9950_v33 = vrot.slane %v9949_v52, 4  ;;  %v9959_v13 = vrot.slane %v9957_v55, 4  ;;  %v9960_v41 = vshll.u32 %v19914_v34, 16  ;;  %v21438_v49 = vrot.slane %v19837_v56, 5  ;;  %v19947_v21 = vpop.f32.mrb[154].mxu0  ;;  %v15374_v52 = vld [vmem:[%s21157_s8 + $0x8] sm:$0xff]  }
 0x2f0   : > { %v9966_v14 = vshll.u32 %v19918_v48, 16  ;;  %v9970_v18 = vshrl.u32 %v19918_v48, 16  ;;  %v9976_v20 = vshll.u32 %v19922_v0, 16  ;;  %v8540_v26 = vsel %vm16202_vm14, %v8538_v24, %v8539_v6 }
 0x2f1   : > { %v8533_v60 = vsel %vm16202_vm14, %v8531_v53, %v21438_v49  ;;  %v9955_v30 = vsel %vm15716_vm2, %v9950_v33, %v9954_v58  ;;  %v9962_v56 = vrot.slane %v9960_v41, 5  ;;  %v12780_v27 = vcombine.low %v8537_v36, %v8540_v26  ;;  %v19952_v49 = vpop.f32.mrb[155].mxu0 }
 0x2f2   : > { %v12779_v51 = vcombine.low %v8530_v5, %v8533_v60  ;;  %v12921_v1 = vcombine.low %v9945_v38, %v9955_v30  ;;  %v9968_v55 = vrot.slane %v9966_v14, 5  ;;  %v9972_v53 = vrot.slane %v9970_v18, 4  ;;  %v9980_v60 = vld [vmem:[#allocation3 + $0x6c] sm:$0xe]  ;;  %v19959_v14 = vpop.f32.mrb[108].mxu1 }
 0x2f3   : > { %v10024_v58 = vrot.slane %v19668_v22, 5  ;;  %v12913_v6 = vcombine.low %v19883_v50, %v19889_v17  ;;  %v9963_v5 = vor.u32 %v9962_v56, %v9959_v13  ;;  %v8543_v33 = vrot.slane %v19611_v12, 5  ;;  %v19963_v13 = vpop.f32.mrb[109].mxu1  ;;  %v21441_v22 = vld [vmem:[#allocation11_spill] sm:$0xff] }
 0x2f4   : > { %14489 = vmatmul.mubr.bf16.vlgmr.msra.gmra.mrb[176].mxu0 %v12779_v51  ;;  %10444 = vmatprep.mubr.bf16.mxu1 %v12921_v1  ;;  %v9973_v38 = vor.u32 %v9972_v53, %v9968_v55  ;;  %v9978_v36 = vrot.slane %v9976_v20, 5  ;;  %v12757_v24 = vrot.slane %v8491_v35, 9  ;;  %v8550_v41 = vrot.slane %v19677_v15, 5  ;;  %v15377_v15 = vld [vmem:[%s21157_s8 + $0x10] sm:$0xff]   ;;  %v19971_v26 = vpop.f32.mrb[110].mxu1 }
 0x2f5   : > { %14492 = vmatprep.mubr.bf16.mxu0 %v12780_v27  ;;  %14505 = vmatpush3.bf16.msra.mxu0 %v19644_v9  ;;  %v9964_v18 = vrot.slane %v9963_v5, 4  ;;  %v8545_v30 = vrot.slane %v8543_v33, 4  ;;  %v8546_v51 = vrot.slane %v19627_v47, 5  ;;  %v12758_v50 = vrot.slane %v8492_v8, 9  ;;  %v19980_v27 = vpop.f32.mrb[111].mxu1 }
 0x2f6   : > { %14506 = vmatprep.subr.bf16.mxu0 %v15374_v52  ;;  %10445 = vmatmul.mubr.bf16.gmra.mrb[152].mxu1 %v12913_v6  ;;  %v9974_v12 = vrot.slane %v9973_v38, 4  ;;  %v8544_v20 = vsel %vm16202_vm14, %v12757_v24, %v8543_v33  ;;  %v8552_v35 = vrot.slane %v8550_v41, 4  ;;  %v8553_v9 = vrot.slane %v19684_v28, 5  ;;  %v8493_v33 = vld [vmem:[#allocation3 + $0x54] sm:$0xe] }
 0x2f7   : > { %v8547_v47 = vsel %vm16202_vm14, %v8545_v30, %v8546_v51  ;;  %v8551_v56 = vsel %vm16202_vm14, %v12758_v50, %v8550_v41  ;;  %v12914_v8 = vcombine.low %v19914_v34, %v19918_v48  ;;  %v10014_v1 = vrot.slane %v19639_v11, 5  ;;  %v8494_v11 = vld [vmem:[#allocation3 + $0x60] sm:$0xe] }
 0x2f8   : > { %v9969_v53 = vsel %vm15716_vm2, %v9964_v18, %v9968_v55  ;;  %v9979_v28 = vsel %vm15716_vm2, %v9974_v12, %v9978_v36  ;;  %v8554_v6 = vsel %vm16202_vm14, %v8552_v35, %v8553_v9  ;;  %v12899_v5 = vrot.slane %v9980_v60, 9  ;;  %v15378_v55 = vld [vmem:[%s21157_s8 + $0x18] sm:$0xff]   ;;  %v9981_v18 = vld [vmem:[#allocation3 + $0x78] sm:$0xe] }
 0x2f9   : > { %14507 = vmatpush3.bf16.msra.mxu0 %v15374_v52  ;;  %v12922_v38 = vcombine.low %v9969_v53, %v9979_v28  ;;  %v12781_v24 = vcombine.low %v8544_v20, %v8547_v47  ;;  %v10016_v41 = vrot.slane %v10014_v1, 4  ;;  %v10017_v34 = vrot.slane %v19655_v23, 5 }
 0x2fa   : > { %14508 = vmatprep.subr.bf16.mxu0 %v15377_v15  ;;  %v12782_v30 = vcombine.low %v8551_v56, %v8554_v6  ;;  %v10015_v36 = vsel %vm16202_vm14, %v12899_v5, %v10014_v1  ;;  %v13802_v60 = vadd.f32 %v19706_v19, %v19702_v40  ;;  %v8557_v52 = vrot.slane %v19735_v31, 5  ;;  %v20004_v19 = vpop.f32.mrb[156].mxu0  ;;  %v8495_v5 = vld [vmem:[#allocation3 + $0x6c] sm:$0xe] }
 0x2fb   : > { %10452 = vmatprep.mubr.bf16.mxu1 %v12922_v38  ;;  %v10018_v23 = vsel %vm16202_vm14, %v10016_v41, %v10017_v34  ;;  %v12759_v51 = vrot.slane %v8493_v33, 9  ;;  %v8560_v50 = vrot.slane %v19737_v43, 5  ;;  %v8564_v12 = vrot.slane %v19772_v44, 5  ;;  %v20010_v44 = vpop.f32.mrb[157].mxu0  ;;  %v20036_v33 = vpop.f32.mrb[112].mxu1 }
 0x2fc   : > { %14493 = vmatmul.mubr.bf16.gmra.mrb[180].mxu0 %v12781_v24  ;;  %v8559_v20 = vrot.slane %v8557_v52, 4  ;;  %v12760_v35 = vrot.slane %v8494_v11, 9  ;;  %v8567_v9 = vrot.slane %v19778_v2, 5  ;;  %v13805_v40 = vadd.f32 %v19720_v32, %v19713_v46  ;;  %v15381_v32 = vld [vmem:[%s21157_s8 + $0x20] sm:$0xff]   ;;  %v15382_v24 = vld [vmem:[%s21157_s8 + $0x28] sm:$0xff]   ;;  %v20044_v11 = vpop.f32.mrb[113].mxu1 }
 0x2fd   : > { %14496 = vmatprep.mubr.bf16.mxu0 %v12782_v30  ;;  %14509 = vmatpush3.bf16.msra.mxu0 %v15377_v15  ;;  %v12923_v31 = vcombine.low %v10015_v36, %v10018_v23  ;;  %v8566_v47 = vrot.slane %v8564_v12, 4  ;;  %v13722_v56 = vadd.f32 %v19783_v7, %v19774_v54  ;;  %v13808_v43 = vadd.f32 %v19811_v39, %v19807_v62  ;;  %v9982_v7 = vld [vmem:[#allocation3 + $0x84] sm:$0xe]  ;;  %v20022_v62 = vpop.f32.mrb[158].mxu0  ;;  %v9983_v34 = vld [vmem:[#allocation3 + $0x90] sm:$0xe] }
 0x2fe   : > { %14510 = vmatprep.subr.bf16.mxu0 %v15378_v55  ;;  %10453 = vmatmul.mubr.bf16.gmra.mrb[156].mxu1 %v12914_v8  ;;  %v8558_v2 = vsel %vm16202_vm14, %v12759_v51, %v8557_v52  ;;  %v8561_v46 = vsel %vm16202_vm14, %v8559_v20, %v8560_v50  ;;  %v10021_v15 = vrot.slane %v19665_v16, 5  ;;  %v13725_v54 = vadd.f32 %v19792_v57, %v19787_v63  ;;  %v20030_v28 = vpop.f32.mrb[159].mxu0  ;;  %v15384_v36 = vld [vmem:[%s21155_s6] sm:$0xff]   ;;  %v21439_v52 = vld [vmem:[#allocation33_spill] sm:$0xff]  ;;  %v20057_v23 = vpop.f32.mrb[114].mxu1  ;;  %v21442_v20 = vld [vmem:[#allocation4_spill] sm:$0xff] }
 0x2ff   : > { %14552 = vmatprep.mubr.bf16.mxu1 %v12923_v31  ;;  %v8568_v39 = vsel %vm16202_vm14, %v8566_v47, %v8567_v9  ;;  %v20026_v8 = vadd.f32 %v13802_v60, %v13722_v56  ;;  %v12900_v1 = vrot.slane %v9981_v18, 9  ;;  %v13811_v53 = vadd.f32 %v19823_v3, %v19815_v61  ;;  %v21440_v18 = vld [vmem:[#allocation22_spill] sm:$0xff]  ;;  %v15386_v31 = vld [vmem:[%s21155_s6 + $0x48] sm:$0xff]   ;;  %v9984_v56 = vld [vmem:[#allocation3 + $0x9c] sm:$0xe] }
 0x300   : > { %v12783_v6 = vcombine.low %v8558_v2, %v8561_v46  ;;  %v8565_v16 = vsel %vm16202_vm14, %v12760_v35, %v8564_v12  ;;  %v10023_v63 = vrot.slane %v10021_v15, 4  ;;  %v20034_v57 = vadd.f32 %v13805_v40, %v13725_v54 }
 0x301   : > { %14511 = vmatpush3.bf16.msra.mxu0 %v15378_v55  ;;  %v12784_v38 = vcombine.low %v8565_v16, %v8568_v39  ;;  %v10022_v61 = vsel %vm16202_vm14, %v12900_v1, %v10021_v15  ;;  %v12901_v3 = vrot.slane %v9982_v7, 9  ;;  %v10028_v41 = vrot.slane %v19711_v10, 5  ;;  %v21444_v15 = vld [vmem:[#allocation24_spill] sm:$0xff]  ;;  %v21445_v7 = vld [vmem:[#allocation35_spill] sm:$0xff]  ;;  %v21446_v39 = vld [vmem:[#allocation38_spill] sm:$0xff] }
 0x302   : > { %14512 = vmatprep.subr.bf16.mxu0 %v15381_v32  ;;  %v10025_v30 = vsel %vm16202_vm14, %v10023_v63, %v10024_v58  ;;  %v10031_v55 = vrot.slane %v19722_v29, 5  ;;  %v8571_v60 = vrot.slane %v19835_v37, 5  ;;  %v13728_v10 = vadd.f32 %v21440_v18, %v21439_v52  ;;  %v21443_v58 = vld [vmem:[#allocation39_spill] sm:$0xff]  ;;  %v20062_v29 = vpop.f32.mrb[115].mxu1 }
 0x303   : > { %v10030_v51 = vrot.slane %v10028_v41, 4  ;;  %v12761_v50 = vrot.slane %v8495_v5, 9  ;;  %v8574_v12 = vrot.slane %v21441_v22, 5  ;;  %v13814_v35 = vadd.f32 %v21443_v58, %v21442_v20  ;;  %v15387_v63 = vld [vmem:[%s21155_s6 + $0x8] sm:$0xff]   ;;  %v9985_v58 = vld [vmem:[#allocation3 + $0xa8] sm:$0xe] }
 0x304   : > { %14497 = vmatmul.mubr.bf16.gmra.mrb[184].mxu0 %v12783_v6  ;;  %v12924_v9 = vcombine.low %v10022_v61, %v10025_v30  ;;  %v10029_v37 = vsel %vm16202_vm14, %v12901_v3, %v10028_v41  ;;  %v8573_v40 = vrot.slane %v8571_v60, 4  ;;  %v20069_v47 = vadd.f32 %v13808_v43, %v13728_v10  ;;  %v20076_v6 = vpop.f32.mrb[160].mxu0  ;;  %v21447_v5 = vld [vmem:[#allocation23_spill] sm:$0xff]  ;;  %v21448_v61 = vld [vmem:[#allocation10_spill] sm:$0xff]  ;;  %v21449_v3 = vld [vmem:[#allocation28_spill] sm:$0xff] }
 0x305   : > { %14500 = vmatprep.mubr.bf16.mxu0 %v12784_v38  ;;  %14513 = vmatpush3.bf16.msra.mxu0 %v15381_v32  ;;  %v10032_v2 = vsel %vm16202_vm14, %v10030_v51, %v10031_v55  ;;  %v12902_v46 = vrot.slane %v9983_v34, 9  ;;  %v10035_v54 = vrot.slane %v21444_v15, 5  ;;  %v13731_v1 = vadd.f32 %v21446_v39, %v21445_v7  ;;  %v15385_v32 = vld [vmem:[%s21157_s8 + $0x30] sm:$0xff]   ;;  %v20089_v34 = vpop.f32.mrb[161].mxu0  ;;  %v20100_v51 = vld [vmem:[%s21157_s8 + $0x38] sm:$0xff]   ;;  %v21451_v7 = vld [vmem:[#allocation31_spill] sm:$0xff] }
 0x306   : > { %14514 = vmatprep.subr.bf16.mxu0 %v15382_v24  ;;  %14553 = vmatmul.mubr.bf16.vlgmr.msra.gmra.mrb[160].mxu1 %v12924_v9  ;;  %v12925_v16 = vcombine.low %v10029_v37, %v10032_v2  ;;  %v8575_v43 = vsel %vm16202_vm14, %v8573_v40, %v8574_v12  ;;  %v10038_v38 = vrot.slane %v21447_v5, 5  ;;  %v13817_v41 = vadd.f32 %v21449_v3, %v21448_v61  ;;  %v20095_v18 = vpop.f32.mrb[162].mxu0  ;;  %v21450_v12 = vld [vmem:[#allocation30_spill] sm:$0xff]  ;;  %v15504_v61 = vld [vmem:[%s15728_s21 + $0x10] sm:$0xff]  ;;  %v15505_v3 = vld [vmem:[%s15728_s21 + $0x18] sm:$0xff] }
 0x307   : > { %14041 = vmatpush3.bf16.msra.mxu1 %v15384_v36  ;;  %v8572_v30 = vsel %vm16202_vm14, %v12761_v50, %v8571_v60  ;;  %v10037_v55 = vrot.slane %v10035_v54, 4  ;;  %v20093_v52 = vadd.f32 %v13811_v53, %v13731_v1  ;;  %v15389_v36 = vld [vmem:[%s21155_s6 + $0x50] sm:$0xff]   ;;  %v12903_v22 = vrot.slane %v9984_v56, 9  ;;  %v15502_v50 = vld [vmem:[%s15728_s21] sm:$0xff]  ;;  %v15503_v53 = vld [vmem:[%s15728_s21 + $0x8] sm:$0xff]  ;;  %v20108_v9 = vpop.f32.mrb[163].mxu0 }
 0x308   : > { %14556 = vmatprep.mubr.bf16.mxu1 %v12925_v16  ;;  %v12785_v10 = vcombine.low %v8572_v30, %v8575_v43  ;;  %14042 = vmatprep.subr.bf16.mxu1 %v15386_v31  ;;  %v10042_v60 = vrot.slane %v21450_v12, 5  ;;  %v9106_v20 = vpack.c.bf16 %v15503_v53, %v15502_v50  ;;  %v10036_v37 = vsel %vm16202_vm14, %v12902_v46, %v10035_v54  ;;  %v15390_v31 = vld [vmem:[%s21155_s6 + $0x10] sm:$0xff]   ;;  %v20125_v54 = vld [vmem:[#allocation3 + $0xb4] sm:$0xe]  ;;  %v20127_v1 = vpop.f32.mrb[116].mxu1 }
 0x309   : > { %14515 = vmatpush3.bf16.msra.mxu0 %v15382_v24  ;;  %v10039_v40 = vsel %vm16202_vm14, %v10037_v55, %v10038_v38  ;;  %v13734_v56 = vadd.f32 %v19941_v25, %v19932_v4  ;;  %v20121_v2 = vadd.f32 %v19963_v13, %v19959_v14  ;;  %v10045_v39 = vrot.slane %v21451_v7, 5  ;;  %v20135_v13 = vpop.f32.mrb[117].mxu1  ;;  %v15394_v55 = vld [vmem:[%s21155_s6 + $0x18] sm:$0xff]   ;;  %v21453_v50 = vld [vmem:[#allocation15_spill] sm:$0xff] }
 0x30a   : > { %14516 = vmatprep.subr.bf16.mxu0 %v15385_v32  ;;  %v12926_v15 = vcombine.low %v10036_v37, %v10039_v40  ;;  %v10044_v24 = vrot.slane %v10042_v60, 4  ;;  %v10049_v46 = vrot.slane %v19852_v45, 5  ;;  %v12904_v4 = vrot.slane %v9985_v58, 9  ;;  %v20150_v5 = vpop.f32.mrb[118].mxu1  ;;  %v20173_v53 = vld [vmem:[#allocation3 + $0x64] sm:$0xf] }
 0x30b   : > { %14043 = vmatpush3.bf16.msra.mxu1 %v15387_v63  ;;  %v20129_v16 = vadd.f32 %v13814_v35, %v13734_v56  ;;  %v13737_v25 = vadd.f32 %v19952_v49, %v19947_v21  ;;  %v13823_v14 = vadd.f32 %v19980_v27, %v19971_v26  ;;  %v10043_v45 = vsel %vm16202_vm14, %v12903_v22, %v10042_v60  ;;  %v15391_v35 = vld [vmem:[%s21155_s6 + $0x1c0] sm:$0xff]   ;;  %v15392_v21 = vld [vmem:[%s21155_s6 + $0x58] sm:$0xff]   ;;  %v21452_v26 = vld [vmem:[#allocation32_spill] sm:$0xff]  ;;  %v20160_v12 = vpop.f32.mrb[119].mxu1 }
 0x30c   : > { %14501 = vmatmul.mubr.bf16.gmra.mrb[188].mxu0 %v12785_v10  ;;  %14044 = vmatprep.subr.bf16.mxu1 %v15389_v36  ;;  %v10046_v43 = vsel %vm16202_vm14, %v10044_v24, %v10045_v39  ;;  %v10051_v49 = vrot.slane %v10049_v46, 4  ;;  %v10052_v27 = vrot.slane %v21452_v26, 5  ;;  %v20148_v63 = vld [vmem:[#allocation3 + $0x60] sm:$0xf]  ;;  %v9107_v30 = vpack.c.bf16 %v15505_v3, %v15504_v61  ;;  %v15506_v37 = vld [vmem:[%s15728_s21 + $0x20] sm:$0xff]  ;;  %v15507_v40 = vld [vmem:[%s15728_s21 + $0x28] sm:$0xff] }
 0x30d   : > { %14520 = vmatprep.mubr.bf16.mxu0 %v9106_v20  ;;  %14517 = vmatpush3.bf16.msra.mxu0 %v15385_v32  ;;  %v12927_v38 = vcombine.low %v10043_v45, %v10046_v43  ;;  %v20157_v10 = vadd.f32 %v13817_v41, %v13737_v25  ;;  %v10056_v36 = vrot.slane %v19889_v17, 5  ;;  %v9987_v22 = vld [vmem:[#allocation3 + $0xc0] sm:$0xe]  ;;  %v20165_v32 = vsel %vm16202_vm14, %v12904_v4, %v10049_v46  ;;  %v15393_v20 = vld [vmem:[%s21155_s6 + $0x180] sm:$0xff]   ;;  %v20190_v46 = vpop.f32.mrb[164].mxu0 }
 0x30e   : > { %14518 = vmatprep.subr.bf16.mxu0 %v20100_v51  ;;  %14557 = vmatmul.mubr.bf16.gmra.mrb[164].mxu1 %v12926_v15  ;;  %v20169_v60 = vsel %vm16202_vm14, %v10051_v49, %v10052_v27  ;;  %v12905_v41 = vrot.slane %v20125_v54, 9  ;;  %v10059_v17 = vrot.slane %v21453_v50, 5  ;;  %v9108_v56 = vpack.c.bf16 %v15507_v40, %v15506_v37  ;;  %v20181_v15 = vld [vmem:[%s15728_s21 + $0x30] sm:$0xff]  ;;  %v20184_v24 = vld [vmem:[%s15728_s21 + $0x38] sm:$0xff]  ;;  %v15396_v54 = vld [vmem:[%s21155_s6 + $0x60] sm:$0xff]   ;;  %v20207_v43 = vpop.f32.mrb[165].mxu0 }
 0x30f   : > { %14560 = vmatprep.mubr.bf16.mxu1 %v12927_v38  ;;  %14045 = vmatpush3.bf16.msra.mxu1 %v15390_v31  ;;  %v10058_v58 = vrot.slane %v10056_v36, 4  ;;  %v9109_v7 = vpack.c.bf16 %v20184_v24, %v20181_v15  ;;  %v13740_v39 = vadd.f32 %v20010_v44, %v20004_v19  ;;  %v15395_v31 = vld [vmem:[%s21155_s6 + $0x1c8] sm:$0xff]   ;;  %v20200_v4 = vadd.f32 %v20044_v11, %v20036_v33  ;;  %v20205_v44 = vld [vmem:[#allocation3 + $0x68] sm:$0x1]  ;;  %v20230_v38 = vld [vmem:[#allocation3 + $0x6c] sm:$0xf] }
 0x310   : > { %14046 = vmatprep.subr.bf16.mxu1 %v15392_v21  ;;  %v12906_v25 = vrot.slane %v9987_v22, 9  ;;  %v10063_v45 = vrot.slane %v19918_v48, 5  ;;  %v13743_v19 = vadd.f32 %v20030_v28, %v20022_v62  ;;  %v15398_v33 = vld [vmem:[%s21155_s6 + $0x20] sm:$0xff]   ;;  %v20220_v48 = vadd.f32 %v20062_v29, %v20057_v23  ;;  %v20223_v28 = vpop.f32.mrb[166].mxu0  ;;  %v15397_v23 = vld [vmem:[%s21155_s6 + $0x188] sm:$0xff]   ;;  %v15405_v24 = vld [vmem:[%s21155_s6 + $0x198] sm:$0xff]  }
 0x311   : > { %14519 = vmatpush3.bf16.msra.mxu0 %v20100_v51  ;;  %v10060_v21 = vsel %vm16202_vm14, %v10058_v58, %v10059_v17  ;;  %v20216_v11 = vadd.f32 %v20121_v2, %v13740_v39  ;;  %v9333_v62 = vshrl.u32 %v20148_v63, 16  ;;  %v10057_v51 = vsel %vm16202_vm14, %v12905_v41, %v10056_v36  ;;  %v20232_v2 = vpop.f32.mrb[120].mxu1  ;;  %v20234_v61 = vpop.f32.mrb[167].mxu0  ;;  %v15400_v29 = vld [vmem:[%s21155_s6 + $0x68] sm:$0xff]   ;;  %v15399_v41 = vld [vmem:[%s21155_s6 + $0x1d0] sm:$0xff]  }
 0x312   : > { %14120 = vmatprep.subr.bf16.mxu0 %v15391_v35  ;;  %v10065_v49 = vrot.slane %v10063_v45, 4  ;;  %v10066_v26 = vrot.slane %v19922_v0, 5  ;;  %v20228_v27 = vadd.f32 %v13823_v14, %v13743_v19  ;;  %v9336_v0 = vshll.u32 %v20148_v63, 16  ;;  %v20245_v36 = vpop.f32.mrb[121].mxu1  ;;  %v20265_v40 = vld [vmem:[#allocation3 + $0x70] sm:$0xf] }
 0x313   : > { %14047 = vmatpush3.bf16.msra.mxu1 %v15394_v55  ;;  %v9335_v35 = vrot.slane %v9333_v62, 4  ;;  %v9342_v14 = vshll.u32 %v20173_v53, 16  ;;  %v9346_v3 = vshrl.u32 %v20173_v53, 16  ;;  %v12928_v55 = vcombine.low %v20165_v32, %v20169_v60  ;;  %v20257_v58 = vpop.f32.mrb[122].mxu1  ;;  %v15404_v62 = vld [vmem:[%s21155_s6 + $0x70] sm:$0xff]  }
 0x314   : > { %21454 = vst [vmem:[#allocation21_spill] sm:$0xff] %v20228_v27  ;;  %14521 = vmatmul.mubr.bf16.vlgmr.msra.gmra.mrb[176].mxu0 %v9107_v30  ;;  %14048 = vmatprep.subr.bf16.mxu1 %v15396_v54  ;;  %v12929_v22 = vcombine.low %v10057_v51, %v10060_v21  ;;  %v20254_v50 = vsel %vm16202_vm14, %v12906_v25, %v10063_v45  ;;  %v9352_v17 = vshll.u32 %v20205_v44, 16  ;;  %v9338_v32 = vrot.slane %v9336_v0, 5  ;;  %v20267_v39 = vpop.f32.mrb[123].mxu1  ;;  %v15402_v54 = vld [vmem:[%s21155_s6 + $0x28] sm:$0xff]  }
 0x315   : > { %14121 = vmatpush3.bf16.msra.mxu0 %v15393_v20  ;;  %14524 = vmatprep.mubr.bf16.mxu0 %v9108_v56  ;;  %v20261_v30 = vsel %vm16202_vm14, %v10065_v49, %v10066_v26  ;;  %v20263_v60 = vrot.slane %v9342_v14, 5  ;;  %v9348_v37 = vrot.slane %v9346_v3, 4  ;;  %v15510_v56 = vld [vmem:[%s15728_s21 + $0x40] sm:$0xff]  ;;  %v15511_v25 = vld [vmem:[%s15728_s21 + $0x48] sm:$0xff]  ;;  %v13746_v19 = vadd.f32 %v20089_v34, %v20076_v6  ;;  %v20314_v3 = vpop.f32.mrb[168].mxu0 }
 0x316   : > { %14122 = vmatprep.subr.bf16.mxu0 %v15395_v31  ;;  %14561 = vmatmul.mubr.bf16.gmra.mrb[168].mxu1 %v12928_v55  ;;  %v9354_v20 = vrot.slane %v9352_v17, 5  ;;  %v9110_v45 = vpack.c.bf16 %v15511_v25, %v15510_v56  ;;  %v20278_v21 = vadd.f32 %v20135_v13, %v20127_v1  ;;  %v15401_v31 = vld [vmem:[%s21155_s6 + $0x190] sm:$0xff]   ;;  %v9339_v51 = vor.u32 %v9338_v32, %v9335_v35  ;;  %v15403_v1 = vld [vmem:[%s21155_s6 + $0x1d8] sm:$0xff]   ;;  %v20300_v26 = vld [vmem:[#allocation3 + $0x74] sm:$0x1]  ;;  %v20329_v56 = vpop.f32.mrb[169].mxu0 }
 0x317   : > { %14564 = vmatprep.mubr.bf16.mxu1 %v12929_v22  ;;  %14049 = vmatpush3.bf16.msra.mxu1 %v15398_v33  ;;  %v9349_v49 = vor.u32 %v9348_v37, %v20263_v60  ;;  %v13749_v6 = vadd.f32 %v20108_v9, %v20095_v18  ;;  %v9357_v34 = vshrl.u32 %v20230_v38, 16  ;;  %v20294_v13 = vadd.f32 %v20200_v4, %v13746_v19  ;;  %v15406_v35 = vld [vmem:[%s21155_s6 + $0x30] sm:$0xff]   ;;  %v20320_v22 = vld [vmem:[%s15728_s21 + $0x58] sm:$0xff] }
 0x318   : > { %14050 = vmatprep.subr.bf16.mxu1 %v15400_v29  ;;  %v20298_v33 = vadd.f32 %v20160_v12, %v20150_v5  ;;  %v9360_v18 = vshll.u32 %v20230_v38, 16  ;;  %v9366_v9 = vshll.u32 %v20265_v40, 16  ;;  %v20304_v29 = vld [vmem:[#allocation3 + $0x78] sm:$0xf]  ;;  %v9340_v4 = vrot.slane %v9339_v51, 4 }
 0x319   : > { %21455 = vst [vmem:[#allocation34_spill] sm:$0xff] %v20294_v13  ;;  %14123 = vmatpush3.bf16.msra.mxu0 %v15397_v23  ;;  %v9350_v0 = vrot.slane %v9349_v49, 4  ;;  %v20310_v14 = vadd.f32 %v20220_v48, %v13749_v6  ;;  %v9359_v5 = vrot.slane %v9357_v34, 4  ;;  %v20312_v12 = vld [vmem:[#allocation3 + $0x7c] sm:$0xf]  ;;  %v9370_v48 = vshrl.u32 %v20265_v40, 16 }
 0x31a   : > { %14124 = vmatprep.subr.bf16.mxu0 %v15399_v41  ;;  %v20317_v55 = vld [vmem:[%s15728_s21 + $0x50] sm:$0xff]  ;;  %v9362_v17 = vrot.slane %v9360_v18, 5  ;;  %v20324_v32 = vrot.slane %v9366_v9, 5  ;;  %v20327_v37 = vld [vmem:[#allocation3 + $0x80] sm:$0x1]  ;;  %v12930_v41 = vcombine.low %v20254_v50, %v20261_v30  ;;  %v9376_v51 = vshll.u32 %v20300_v26, 16 }
 0x31b   : > { %21456 = vst [vmem:[#allocation36_spill] sm:$0xff] %v20310_v14  ;;  %14051 = vmatpush3.bf16.msra.mxu1 %v15402_v54  ;;  %v9355_v25 = vsel %vm15716_vm2, %v9350_v0, %v9354_v20  ;;  %v20338_v49 = vpop.f32.mrb[170].mxu0  ;;  %v9345_v54 = vsel %vm15716_vm2, %v9340_v4, %v20263_v60  ;;  %v15408_v50 = vld [vmem:[%s21155_s6 + $0x78] sm:$0xff]   ;;  %v9372_v20 = vrot.slane %v9370_v48, 4  ;;  %v20350_v6 = vld [vmem:[%s15728_s21 + $0x60] sm:$0xff]  ;;  %v20353_v34 = vld [vmem:[%s15728_s21 + $0x68] sm:$0xff]  ;;  %v13758_v27 = vadd.f32 %v20329_v56, %v20314_v3 }
 0x31c   : > { %14525 = vmatmul.mubr.bf16.gmra.mrb[180].mxu0 %v9109_v7  ;;  %14052 = vmatprep.subr.bf16.mxu1 %v15404_v62  ;;  %v9363_v30 = vor.u32 %v9362_v17, %v9359_v5  ;;  %v20357_v15 = vpop.f32.mrb[171].mxu0  ;;  %v12883_v7 = vcombine.low %v9345_v54, %v9355_v25  ;;  %v15407_v60 = vld [vmem:[%s21155_s6 + $0x1e0] sm:$0xff]   ;;  %v10922_v62 = vshrl.u32 %v20304_v29, 16  ;;  %v10925_v9 = vshll.u32 %v20304_v29, 16  ;;  %v20368_v0 = vpop.f32.mrb[124].mxu1  ;;  %v15410_v25 = vld [vmem:[%s21155_s6 + $0x38] sm:$0xff]  }
 0x31d   : > { %14125 = vmatpush3.bf16.msra.mxu0 %v15401_v31  ;;  %14528 = vmatprep.mubr.bf16.mxu0 %v9110_v45  ;;  %v10931_v4 = vshll.u32 %v20312_v12, 16  ;;  %v9373_v5 = vor.u32 %v9372_v20, %v20324_v32  ;;  %v10935_v45 = vshrl.u32 %v20312_v12, 16  ;;  %v10941_v17 = vshll.u32 %v20327_v37, 16  ;;  %v20373_v48 = vpop.f32.mrb[125].mxu1  ;;  %v20388_v19 = vld [vmem:[%s15728_s21 + $0x70] sm:$0xff]  ;;  %v20391_v18 = vld [vmem:[%s15728_s21 + $0x78] sm:$0xff] }
 0x31e   : > { %14126 = vmatprep.subr.bf16.mxu0 %v15403_v1  ;;  %14565 = vmatmul.mubr.bf16.gmra.mrb[172].mxu1 %v12930_v41  ;;  %v9364_v31 = vrot.slane %v9363_v30, 4  ;;  %v15413_v1 = vld [vmem:[%s21155_s6 + $0x80] sm:$0xff]   ;;  %v10924_v41 = vrot.slane %v10922_v62, 4  ;;  %v10927_v54 = vrot.slane %v10925_v9, 5  ;;  %v13752_v20 = vadd.f32 %v20207_v43, %v20190_v46  ;;  %v20385_v37 = vpop.f32.mrb[126].mxu1  ;;  %v15420_v3 = vld [vmem:[%s21155_s6 + $0x1b8] sm:$0xff]  }
 0x31f   : > { %14053 = vmatpush3.bf16.msra.mxu1 %v15406_v35  ;;  %10734 = vmatprep.mubr.bf16.mxu1 %v12883_v7  ;;  %v20381_v30 = vrot.slane %v10931_v4, 5  ;;  %v9374_v35 = vrot.slane %v9373_v5, 4  ;;  %v9378_v7 = vrot.slane %v9376_v51, 5  ;;  %v10937_v14 = vrot.slane %v10935_v45, 4  ;;  %v20395_v62 = vld [vmem:[#allocation3 + $0x78] sm:$0xf] }
 0x320   : > { %14054 = vmatprep.subr.bf16.mxu1 %v15408_v50  ;;  %v20397_v9 = vpop.f32.mrb[127].mxu1  ;;  %v15409_v46 = vld [vmem:[%s21155_s6 + $0x1a0] sm:$0xff]   ;;  %v9369_v43 = vsel %vm15716_vm2, %v9364_v31, %v20324_v32  ;;  %v10928_v51 = vor.u32 %v10927_v54, %v10924_v41  ;;  %v20406_v50 = vadd.f32 %v20278_v21, %v13752_v20  ;;  %v20410_v4 = vadd.f32 %v20245_v36, %v20232_v2  ;;  %v20412_v5 = vld [vmem:[#allocation3 + $0x7c] sm:$0xf]  ;;  %v20426_v2 = vld [vmem:[#allocation3 + $0x80] sm:$0x1] }
 0x321   : > { %14127 = vmatpush3.bf16.msra.mxu0 %v15405_v24  ;;  %v15411_v24 = vld [vmem:[%s21155_s6 + $0x1e8] sm:$0xff]   ;;  %v9379_v45 = vsel %vm15716_vm2, %v9374_v35, %v9378_v7  ;;  %v10938_v32 = vor.u32 %v10937_v14, %v20381_v30  ;;  %v13755_v21 = vadd.f32 %v20234_v61, %v20223_v28  ;;  %v20424_v31 = vadd.f32 %v20267_v39, %v20257_v58  ;;  %v20436_v61 = vpop.f32.mrb[172].mxu0  ;;  %v20446_v35 = vld [vmem:[#allocation3 + $0x84] sm:$0xf] }
 0x322   : > { %21457 = vst [vmem:[#allocation14_spill] sm:$0xff] %v20406_v50  ;;  %14128 = vmatprep.subr.bf16.mxu0 %v15407_v60  ;;  %v15414_v36 = vld [vmem:[%s21155_s6 + $0x1a8] sm:$0xff]   ;;  %v10929_v60 = vrot.slane %v10928_v51, 4  ;;  %v10943_v41 = vrot.slane %v10941_v17, 5  ;;  %v9381_v54 = vshrl.u32 %v20395_v62, 16  ;;  %v9384_v28 = vshll.u32 %v20395_v62, 16 }
 0x323   : > { %14055 = vmatpush3.bf16.msra.mxu1 %v15410_v25  ;;  %v15419_v14 = vld [vmem:[%s21155_s6 + $0x88] sm:$0xff]   ;;  %v21458_v58 = vpack.c.bf16 %v20320_v22, %v20317_v55  ;;  %v10939_v39 = vrot.slane %v10938_v32, 4  ;;  %v20442_v25 = vadd.f32 %v20298_v33, %v13755_v21  ;;  %v9390_v17 = vshll.u32 %v20412_v5, 16  ;;  %v20448_v7 = vpop.f32.mrb[173].mxu0  ;;  %v20454_v33 = vld [vmem:[#allocation3 + $0x88] sm:$0xf] }
 0x324   : > { %14568 = vmatprep.subr.bf16.mxu1 %v15413_v1  ;;  %v9394_v20 = vshrl.u32 %v20412_v5, 16  ;;  %v12884_v51 = vcombine.low %v9369_v43, %v9379_v45  ;;  %v21460_v23 = vpack.c.bf16 %v20353_v34, %v20350_v6  ;;  %v9383_v55 = vrot.slane %v9381_v54, 4  ;;  %v20456_v21 = vpop.f32.mrb[174].mxu0  ;;  %v20469_v45 = vld [vmem:[#allocation3 + $0x8c] sm:$0x1] }
 0x325   : > { %14529 = vmatmul.mubr.bf16.gmra.mrb[184].mxu0 %v21458_v58  ;;  %21459 = vst [vmem:[#allocation29_spill] sm:$0xff] %v20442_v25  ;;  %v9386_v22 = vrot.slane %v9384_v28, 5  ;;  %v9400_v32 = vshll.u32 %v20426_v2, 16  ;;  %v21461_v58 = vcombine.low %v20148_v63, %v20173_v53  ;;  %v12876_v6 = vcombine.low %v20230_v38, %v20265_v40  ;;  %v20488_v50 = vld [vmem:[#allocation3 + $0x84] sm:$0xf] }
 0x326   : > { %14129 = vmatpush3.bf16.msra.mxu0 %v15409_v46  ;;  %14532 = vmatprep.mubr.bf16.mxu0 %v21460_v23  ;;  %v15415_v46 = vld [vmem:[%s21155_s6 + $0x1f0] sm:$0xff]   ;;  %v10934_v23 = vsel %vm15716_vm2, %v10929_v60, %v20381_v30  ;;  %v9392_v34 = vrot.slane %v9390_v17, 5  ;;  %v9396_v43 = vrot.slane %v9394_v20, 4  ;;  %v10944_v63 = vsel %vm15716_vm2, %v10939_v39, %v10943_v41  ;;  %v15417_v41 = vld [vmem:[%s21155_s6 + $0x1f8] sm:$0xff]  }
 0x327   : > { %14130 = vmatprep.subr.bf16.mxu0 %v15411_v24  ;;  %10735 = vmatmul.mubr.bf16.vlgmr.msra.gmra.mrb[176].mxu1 %v21461_v58  ;;  %v20471_v24 = vpop.f32.mrb[175].mxu0  ;;  %v9387_v54 = vor.u32 %v9386_v22, %v9383_v55  ;;  %v10946_v30 = vshrl.u32 %v20446_v35, 16  ;;  %v10949_v38 = vshll.u32 %v20446_v35, 16  ;;  %v10955_v17 = vshll.u32 %v20454_v33, 16 }
 0x328   : > { %10742 = vmatprep.mubr.bf16.mxu1 %v12884_v51  ;;  %14569 = vmatpush3.bf16.msra.mxu1 %v15413_v1  ;;  %v9397_v60 = vor.u32 %v9396_v43, %v9392_v34  ;;  %v10959_v20 = vshrl.u32 %v20454_v33, 16  ;;  %v15416_v1 = vld [vmem:[%s21155_s6 + $0x1b0] sm:$0xff]   ;;  %v9402_v51 = vrot.slane %v9400_v32, 5  ;;  %v10965_v22 = vshll.u32 %v20469_v45, 16 }
 0x329   : > { %14570 = vmatprep.subr.bf16.mxu1 %v15419_v14  ;;  %v9388_v39 = vrot.slane %v9387_v54, 4  ;;  %v10948_v55 = vrot.slane %v10946_v30, 4  ;;  %v10951_v43 = vrot.slane %v10949_v38, 5  ;;  %v10957_v28 = vrot.slane %v10955_v17, 5  ;;  %v20506_v30 = vld [vmem:[#allocation3 + $0x88] sm:$0xf] }
 0x32a   : > { %14131 = vmatpush3.bf16.msra.mxu0 %v15414_v36  ;;  %v9398_v58 = vrot.slane %v9397_v60, 4  ;;  %v10961_v25 = vrot.slane %v10959_v20, 4  ;;  %v13043_v36 = vcombine.low %v10934_v23, %v10944_v63  ;;  %v20496_v32 = vadd.f32 %v20373_v48, %v20368_v0  ;;  %v15426_v48 = vld [vmem:[%s21155_s6 + $0x98] sm:$0xff]   ;;  %v20532_v17 = vld [vmem:[#allocation3 + $0x90] sm:$0xf] }
 0x32b   : > { %14132 = vmatprep.subr.bf16.mxu0 %v15415_v46  ;;  %v9393_v13 = vsel %vm15716_vm2, %v9388_v39, %v9392_v34  ;;  %v15423_v46 = vld [vmem:[%s21155_s6 + $0x90] sm:$0xff]   ;;  %v21462_v54 = vpack.c.bf16 %v20391_v18, %v20388_v19  ;;  %v10952_v34 = vor.u32 %v10951_v43, %v10948_v55  ;;  %v10967_v63 = vrot.slane %v10965_v22, 5 }
 0x32c   : > { %14571 = vmatpush3.bf16.msra.mxu1 %v15419_v14  ;;  %v9403_v23 = vsel %vm15716_vm2, %v9398_v58, %v9402_v51  ;;  %v10962_v14 = vor.u32 %v10961_v25, %v10957_v28  ;;  %v20512_v0 = vadd.f32 %v20410_v4, %v13758_v27  ;;  %v13761_v19 = vadd.f32 %v20357_v15, %v20338_v49 }
 0x32d   : > { %14533 = vmatmul.mubr.bf16.gmra.mrb[188].mxu0 %v21462_v54  ;;  %v12885_v56 = vcombine.low %v9393_v13, %v9403_v23  ;;  %v9405_v18 = vshrl.u32 %v20488_v50, 16  ;;  %v10953_v25 = vrot.slane %v10952_v34, 4  ;;  %v20522_v38 = vadd.f32 %v20397_v9, %v20385_v37  ;;  %v20524_v13 = vld [vmem:[#allocation3 + $0x8c] sm:$0x1]  ;;  %14572 = vmatprep.subr.bf16.mxu1 %v15423_v46 }
 0x32e   : > { %14133 = vmatpush3.bf16.msra.mxu0 %v15416_v1  ;;  %11529 = vmatprep.mubr.bf16.mxu0 %v13043_v36  ;;  %v10963_v60 = vrot.slane %v10962_v14, 4  ;;  %v9408_v27 = vshll.u32 %v20488_v50, 16  ;;  %v20528_v49 = vadd.f32 %v20424_v31, %v13761_v19  ;;  %v9414_v4 = vshll.u32 %v20506_v30, 16  ;;  %v20540_v31 = vld [vmem:[#allocation3 + $0x94] sm:$0xf] }
 0x32f   : > { %14134 = vmatprep.subr.bf16.mxu0 %v15417_v41  ;;  %10743 = vmatmul.mubr.bf16.gmra.mrb[180].mxu1 %v12876_v6  ;;  %v9407_v15 = vrot.slane %v9405_v18, 4  ;;  %v9418_v6 = vshrl.u32 %v20506_v30, 16  ;;  %v10958_v37 = vsel %vm15716_vm2, %v10953_v25, %v10957_v28  ;;  %v12877_v20 = vcombine.low %v20395_v62, %v20412_v5  ;;  %v20542_v41 = vld [vmem:[#allocation3 + $0x98] sm:$0x1]  ;;  %v15429_v28 = vld [vmem:[%s21155_s6 + $0xa0] sm:$0xff]   ;;  %v15432_v18 = vld [vmem:[%s21155_s6 + $0xa8] sm:$0xff]  }
 0x330   : > { %10750 = vmatprep.mubr.bf16.mxu1 %v12885_v56  ;;  %21463 = vst [vmem:[#allocation37_spill] sm:$0xff] %v20528_v49  ;;  %v10968_v9 = vsel %vm15716_vm2, %v10963_v60, %v10967_v63  ;;  %v9410_v1 = vrot.slane %v9408_v27, 5  ;;  %14573 = vmatpush3.bf16.msra.mxu1 %v15423_v46  ;;  %v9416_v51 = vrot.slane %v9414_v4, 5  ;;  %v9424_v22 = vshll.u32 %v20524_v13, 16  ;;  %v20560_v19 = vld [vmem:[#allocation3 + $0x90] sm:$0xf] }
 0x331   : > { %v13044_v39 = vcombine.low %v10958_v37, %v10968_v9  ;;  %v9420_v55 = vrot.slane %v9418_v6, 4  ;;  %14574 = vmatprep.subr.bf16.mxu1 %v15426_v48  ;;  %v13036_v62 = vcombine.low %v20446_v35, %v20454_v33  ;;  %v10970_v43 = vshrl.u32 %v20532_v17, 16  ;;  %v20576_v9 = vld [vmem:[#allocation3 + $0x98] sm:$0x1] }
 0x332   : > { %14135 = vmatpush3.bf16.msra.mxu0 %v15420_v3  ;;  %v9411_v58 = vor.u32 %v9410_v1, %v9407_v15  ;;  %v10973_v36 = vshll.u32 %v20532_v17, 16  ;;  %v10979_v54 = vshll.u32 %v20540_v31, 16  ;;  %v10983_v23 = vshrl.u32 %v20540_v31, 16 }
 0x333   : > { %v9421_v46 = vor.u32 %v9420_v55, %v9416_v51  ;;  %v10989_v34 = vshll.u32 %v20542_v41, 16  ;;  %v21464_v14 = vcombine.low %v20304_v29, %v20312_v12  ;;  %v10972_v3 = vrot.slane %v10970_v43, 4  ;;  %v20565_v29 = vld [vmem:[#allocation3 + $0x94] sm:$0xf] }
 0x334   : > { %v9412_v63 = vrot.slane %v9411_v58, 4  ;;  %v10975_v56 = vrot.slane %v10973_v36, 5  ;;  %v13764_v35 = vadd.f32 %v20448_v7, %v20436_v61  ;;  %14575 = vmatpush3.bf16.msra.mxu1 %v15426_v48  ;;  %v9426_v60 = vrot.slane %v9424_v22, 5  ;;  %v20581_v22 = vld [vmem:[#allocation3 + $0x9c] sm:$0xf] }
 0x335   : > { %11530 = vmatmul.mubr.bf16.vlgmr.msra.gmra.mrb[224].mxu0 %v21464_v14  ;;  %v9422_v25 = vrot.slane %v9421_v46, 4  ;;  %v10981_v27 = vrot.slane %v10979_v54, 5  ;;  %v10985_v15 = vrot.slane %v10983_v23, 4  ;;  %14576 = vmatprep.subr.bf16.mxu1 %v15429_v28  ;;  %v10991_v7 = vrot.slane %v10989_v34, 5  ;;  %v20593_v23 = vld [vmem:[#allocation3 + $0xa0] sm:$0xf] }
 0x336   : > { %11537 = vmatprep.mubr.bf16.mxu0 %v13044_v39  ;;  %v9417_v12 = vsel %vm15716_vm2, %v9412_v63, %v9416_v51  ;;  %v10976_v61 = vor.u32 %v10975_v56, %v10972_v3  ;;  %v20570_v48 = vadd.f32 %v20496_v32, %v13764_v35  ;;  %v13767_v37 = vadd.f32 %v20471_v24, %v20456_v21  ;;  %v15435_v24 = vld [vmem:[%s21155_s6 + $0xb0] sm:$0xff]   ;;  %v20599_v63 = vld [vmem:[#allocation3 + $0xa4] sm:$0x1] }
 0x337   : > { %10751 = vmatmul.mubr.bf16.gmra.mrb[184].mxu1 %v12877_v20  ;;  %v9427_v4 = vsel %vm15716_vm2, %v9422_v25, %v9426_v60  ;;  %v10986_v6 = vor.u32 %v10985_v15, %v10981_v27  ;;  %v9429_v1 = vshrl.u32 %v20560_v19, 16  ;;  %v9432_v51 = vshll.u32 %v20560_v19, 16  ;;  %v20605_v60 = vld [vmem:[#allocation3 + $0x9c] sm:$0xf] }
 0x338   : > { %21465 = vst [vmem:[#allocation13_spill] sm:$0xff] %v20570_v48  ;;  %v12886_v20 = vcombine.low %v9417_v12, %v9427_v4  ;;  %v10977_v39 = vrot.slane %v10976_v61, 4  ;;  %v9438_v55 = vshll.u32 %v20565_v29, 16  ;;  %14577 = vmatpush3.bf16.msra.mxu1 %v15429_v28  ;;  %v20584_v58 = vadd.f32 %v20522_v38, %v13767_v37  ;;  %v20613_v37 = vld [vmem:[#allocation3 + $0xa0] sm:$0xf] }
 0x339   : > { %v10987_v32 = vrot.slane %v10986_v6, 4  ;;  %v9431_v43 = vrot.slane %v9429_v1, 4  ;;  %v9442_v21 = vshrl.u32 %v20565_v29, 16  ;;  %14578 = vmatprep.subr.bf16.mxu1 %v15432_v18  ;;  %v12878_v36 = vcombine.low %v20488_v50, %v20506_v30 }
 0x33a   : > { %21466 = vst [vmem:[#allocation6_spill] sm:$0xff] %v20584_v58  ;;  %10758 = vmatprep.mubr.bf16.mxu1 %v12886_v20  ;;  %v9434_v46 = vrot.slane %v9432_v51, 5  ;;  %v9440_v54 = vrot.slane %v9438_v55, 5  ;;  %v9448_v28 = vshll.u32 %v20576_v9, 16  ;;  %v10982_v38 = vsel %vm15716_vm2, %v10977_v39, %v10981_v27 }
 0x33b   : > { %v10992_v34 = vsel %vm15716_vm2, %v10987_v32, %v10991_v7  ;;  %v9444_v14 = vrot.slane %v9442_v21, 4  ;;  %v10994_v3 = vshrl.u32 %v20581_v22, 16  ;;  %v13037_v35 = vcombine.low %v20532_v17, %v20540_v31 }
 0x33c   : > { %v13045_v56 = vcombine.low %v10982_v38, %v10992_v34  ;;  %v9435_v50 = vor.u32 %v9434_v46, %v9431_v43  ;;  %v10997_v25 = vshll.u32 %v20581_v22, 16  ;;  %14579 = vmatpush3.bf16.msra.mxu1 %v15432_v18  ;;  %v11003_v12 = vshll.u32 %v20593_v23, 16  ;;  %v20620_v43 = vld [vmem:[#allocation3 + $0xa4] sm:$0x1]  ;;  %v20626_v34 = vld [vmem:[#allocation3 + $0xa8] sm:$0xf] }
 0x33d   : > { %11538 = vmatmul.mubr.bf16.gmra.mrb[228].mxu0 %v13036_v62  ;;  %v9445_v27 = vor.u32 %v9444_v14, %v9440_v54  ;;  %v10996_v15 = vrot.slane %v10994_v3, 4  ;;  %v11007_v61 = vshrl.u32 %v20593_v23, 16  ;;  %14580 = vmatprep.subr.bf16.mxu1 %v15435_v24  ;;  %v15438_v62 = vld [vmem:[%s21155_s6 + $0xb8] sm:$0xff]   ;;  %v9450_v17 = vrot.slane %v9448_v28, 5 }
 0x33e   : > { %11545 = vmatprep.mubr.bf16.mxu0 %v13045_v56  ;;  %v9436_v7 = vrot.slane %v9435_v50, 4  ;;  %v10999_v4 = vrot.slane %v10997_v25, 5  ;;  %v11013_v6 = vshll.u32 %v20599_v63, 16  ;;  %v11005_v1 = vrot.slane %v11003_v12, 5  ;;  %v20629_v56 = vld [vmem:[#allocation3 + $0xac] sm:$0xf] }
 0x33f   : > { %10759 = vmatmul.mubr.bf16.gmra.mrb[188].mxu1 %v12878_v36  ;;  %v9446_v18 = vrot.slane %v9445_v27, 4  ;;  %v11009_v20 = vrot.slane %v11007_v61, 4  ;;  %v9453_v39 = vshrl.u32 %v20605_v60, 16  ;;  %v12879_v32 = vcombine.low %v20560_v19, %v20565_v29 }
 0x340   : > { %v9441_v51 = vsel %vm15716_vm2, %v9436_v7, %v9440_v54  ;;  %v11000_v55 = vor.u32 %v10999_v4, %v10996_v15  ;;  %v9456_v21 = vshll.u32 %v20605_v60, 16  ;;  %14581 = vmatpush3.bf16.msra.mxu1 %v15435_v24  ;;  %v9462_v38 = vshll.u32 %v20613_v37, 16  ;;  %v20634_v24 = vld [vmem:[%s21155_s6 + $0x200] sm:$0xff]  }
 0x341   : > { %v9451_v36 = vsel %vm15716_vm2, %v9446_v18, %v9450_v17  ;;  %v11010_v46 = vor.u32 %v11009_v20, %v11005_v1  ;;  %v9455_v28 = vrot.slane %v9453_v39, 4  ;;  %14582 = vmatprep.subr.bf16.mxu1 %v15438_v62  ;;  %v9466_v19 = vshrl.u32 %v20613_v37, 16  ;;  %v20644_v20 = vld [vmem:[#allocation3 + $0xb0] sm:$0x1] }
 0x342   : > { %v12887_v54 = vcombine.low %v9441_v51, %v9451_v36  ;;  %v11001_v14 = vrot.slane %v11000_v55, 4  ;;  %v9458_v3 = vrot.slane %v9456_v21, 5  ;;  %v11015_v25 = vrot.slane %v11013_v6, 5 }
 0x343   : > { %v11011_v50 = vrot.slane %v11010_v46, 4  ;;  %v9464_v27 = vrot.slane %v9462_v38, 5  ;;  %v9472_v15 = vshll.u32 %v20620_v43, 16  ;;  %v9468_v61 = vrot.slane %v9466_v19, 4  ;;  %v20652_v38 = vld [vmem:[#allocation3 + $0xac] sm:$0xf] }
 0x344   : > { %10766 = vmatprep.mubr.bf16.mxu1 %v12887_v54  ;;  %v9459_v12 = vor.u32 %v9458_v3, %v9455_v28  ;;  %v13038_v7 = vcombine.low %v20581_v22, %v20593_v23  ;;  %v11018_v17 = vshrl.u32 %v20626_v34, 16  ;;  %v11006_v4 = vsel %vm15716_vm2, %v11001_v14, %v11005_v1  ;;  %14583 = vmatpush3.bf16.msra.mxu1 %v15438_v62 }
 0x345   : > { %11546 = vmatmul.mubr.bf16.gmra.mrb[232].mxu0 %v13037_v35  ;;  %v11016_v18 = vsel %vm15716_vm2, %v11011_v50, %v11015_v25  ;;  %v11021_v6 = vshll.u32 %v20626_v34, 16  ;;  %v11027_v39 = vshll.u32 %v20629_v56, 16  ;;  %v20648_v35 = vld [vmem:[#allocation3 + $0xa8] sm:$0xf]  ;;  %v9469_v55 = vor.u32 %v9468_v61, %v9464_v27  ;;  %14600 = vmatprep.subr.bf16.mxu1 %v20634_v24  ;;  %v20660_v25 = vld [vmem:[#allocation3 + $0xb0] sm:$0x1] }
 0x346   : > { %v13046_v51 = vcombine.low %v11006_v4, %v11016_v18  ;;  %v9460_v22 = vrot.slane %v9459_v12, 4  ;;  %v11020_v21 = vrot.slane %v11018_v17, 4  ;;  %v9474_v1 = vrot.slane %v9472_v15, 5  ;;  %v20667_v4 = vld [vmem:[#allocation3 + $0xb4] sm:$0xf] }
 0x347   : > { %10767 = vmatmul.mubr.bf16.gmra.mrb[192].mxu1 %v12879_v32  ;;  %v11023_v36 = vrot.slane %v11021_v6, 5  ;;  %v11029_v46 = vrot.slane %v11027_v39, 5  ;;  %v11031_v28 = vshrl.u32 %v20629_v56, 16  ;;  %v9470_v14 = vrot.slane %v9469_v55, 4 }
 0x348   : > { %11553 = vmatprep.mubr.bf16.mxu0 %v13046_v51  ;;  %v9465_v54 = vsel %vm15716_vm2, %v9460_v22, %v9464_v27  ;;  %v11037_v62 = vshll.u32 %v20644_v20, 16  ;;  %v9477_v32 = vshrl.u32 %v20648_v35, 16  ;;  %v12880_v50 = vcombine.low %v20605_v60, %v20613_v37  ;;  %v20669_v22 = vld [vmem:[#allocation3 + $0xb8] sm:$0xf] }
 0x349   : > { %v11024_v3 = vor.u32 %v11023_v36, %v11020_v21  ;;  %v11033_v19 = vrot.slane %v11031_v28, 4  ;;  %v9480_v15 = vshll.u32 %v20648_v35, 16  ;;  %v9475_v12 = vsel %vm15716_vm2, %v9470_v14, %v9474_v1 }
 0x34a   : > { %v9479_v61 = vrot.slane %v9477_v32, 4  ;;  %v9486_v27 = vshll.u32 %v20652_v38, 16  ;;  %v9490_v17 = vshrl.u32 %v20652_v38, 16  ;;  %v12888_v18 = vcombine.low %v9465_v54, %v9475_v12 }
 0x34b   : > { %v11025_v6 = vrot.slane %v11024_v3, 4  ;;  %v11034_v39 = vor.u32 %v11033_v19, %v11029_v46  ;;  %v9482_v51 = vrot.slane %v9480_v15, 5  ;;  %v11039_v60 = vrot.slane %v11037_v62, 5  ;;  %v20675_v19 = vld [vmem:[#allocation3 + $0xbc] sm:$0x1] }
 0x34c   : > { %v9488_v55 = vrot.slane %v9486_v27, 5  ;;  %v9492_v21 = vrot.slane %v9490_v17, 4  ;;  %v9496_v36 = vshll.u32 %v20660_v25, 16  ;;  %10774 = vmatprep.mubr.bf16.mxu1 %v12888_v18  ;;  %v11042_v32 = vshrl.u32 %v20667_v4, 16  ;;  %v20682_v17 = vld [vmem:[#allocation3 + $0xb4] sm:$0xf] }
 0x34d   : > { %11554 = vmatmul.mubr.bf16.gmra.mrb[236].mxu0 %v13038_v7  ;;  %v11030_v1 = vsel %vm15716_vm2, %v11025_v6, %v11029_v46  ;;  %v11035_v28 = vrot.slane %v11034_v39, 4  ;;  %v9483_v14 = vor.u32 %v9482_v51, %v9479_v61  ;;  %v11045_v7 = vshll.u32 %v20667_v4, 16  ;;  %v20684_v39 = vld [vmem:[#allocation3 + $0xb8] sm:$0xf] }
 0x34e   : > { %v9493_v54 = vor.u32 %v9492_v21, %v9488_v55  ;;  %v9498_v3 = vrot.slane %v9496_v36, 5  ;;  %v11051_v62 = vshll.u32 %v20669_v22, 16  ;;  %v11044_v27 = vrot.slane %v11042_v32, 4 }
 0x34f   : > { %10775 = vmatmul.mubr.bf16.gmra.mrb[196].mxu1 %v12880_v50  ;;  %v11040_v15 = vsel %vm15716_vm2, %v11035_v28, %v11039_v60  ;;  %v9484_v12 = vrot.slane %v9483_v14, 4  ;;  %v11055_v46 = vshrl.u32 %v20669_v22, 16  ;;  %v11047_v50 = vrot.slane %v11045_v7, 5 }
 0x350   : > { %v13047_v61 = vcombine.low %v11030_v1, %v11040_v15  ;;  %v9494_v18 = vrot.slane %v9493_v54, 4  ;;  %v11053_v6 = vrot.slane %v11051_v62, 5  ;;  %v13039_v21 = vcombine.low %v20626_v34, %v20629_v56  ;;  %v20697_v62 = vld [vmem:[#allocation3 + $0xbc] sm:$0x1]  ;;  %v20700_v15 = vld [vmem:[#allocation3 + $0xc0] sm:$0xf] }
 0x351   : > { %v9489_v51 = vsel %vm15716_vm2, %v9484_v12, %v9488_v55  ;;  %v11057_v36 = vrot.slane %v11055_v46, 4  ;;  %v11061_v60 = vshll.u32 %v20675_v19, 16  ;;  %v11048_v14 = vor.u32 %v11047_v50, %v11044_v27 }
 0x352   : > { %11561 = vmatprep.mubr.bf16.mxu0 %v13047_v61  ;;  %v9499_v28 = vsel %vm15716_vm2, %v9494_v18, %v9498_v3  ;;  %v9501_v1 = vshrl.u32 %v20682_v17, 16  ;;  %v9504_v32 = vshll.u32 %v20682_v17, 16  ;;  %v12881_v55 = vcombine.low %v20648_v35, %v20652_v38  ;;  %v20703_v61 = vld [vmem:[#allocation3 + $0xc4] sm:$0xf] }
 0x353   : > { %v12889_v54 = vcombine.low %v9489_v51, %v9499_v28  ;;  %v11058_v7 = vor.u32 %v11057_v36, %v11053_v6  ;;  %v9510_v34 = vshll.u32 %v20684_v39, 16  ;;  %v11049_v12 = vrot.slane %v11048_v14, 4 }
 0x354   : > { %v9503_v46 = vrot.slane %v9501_v1, 4  ;;  %v9506_v3 = vrot.slane %v9504_v32, 5  ;;  %v9514_v27 = vshrl.u32 %v20684_v39, 16  ;;  %v11063_v50 = vrot.slane %v11061_v60, 5 }
 0x355   : > { %11562 = vmatmul.mubr.bf16.gmra.mrb[240].mxu0 %v13039_v21  ;;  %10782 = vmatprep.mubr.bf16.mxu1 %v12889_v54  ;;  %v11059_v18 = vrot.slane %v11058_v7, 4  ;;  %v9512_v51 = vrot.slane %v9510_v34, 5  ;;  %v9520_v28 = vshll.u32 %v20697_v62, 16  ;;  %v11066_v58 = vshrl.u32 %v20700_v15, 16 }
 0x356   : > { %v9507_v35 = vor.u32 %v9506_v3, %v9503_v46  ;;  %v9516_v36 = vrot.slane %v9514_v27, 4  ;;  %v11054_v21 = vsel %vm15716_vm2, %v11049_v12, %v11053_v6  ;;  %v11069_v1 = vshll.u32 %v20700_v15, 16 }
 0x357   : > { %10783 = vmatmul.mubr.bf16.gmra.mrb[200].mxu1 %v12881_v55  ;;  %v11064_v14 = vsel %vm15716_vm2, %v11059_v18, %v11063_v50  ;;  %v11075_v32 = vshll.u32 %v20703_v61, 16  ;;  %v20713_v55 = vld [vmem:[#allocation3 + $0xc8] sm:$0x1]  ;;  %v11068_v34 = vrot.slane %v11066_v58, 4  ;;  %v11079_v27 = vshrl.u32 %v20703_v61, 16 }
 0x358   : > { %v13048_v54 = vcombine.low %v11054_v21, %v11064_v14  ;;  %v9508_v60 = vrot.slane %v9507_v35, 4  ;;  %v9517_v7 = vor.u32 %v9516_v36, %v9512_v51  ;;  %v11071_v46 = vrot.slane %v11069_v1, 5  ;;  %v9524_v18 = vld [vmem:[#allocation3 + $0x60] sm:$0xe] }
 0x359   : > { %v11077_v3 = vrot.slane %v11075_v32, 5  ;;  %v9522_v6 = vrot.slane %v9520_v28, 5  ;;  %v13040_v12 = vcombine.low %v20667_v4, %v20669_v22  ;;  %v11081_v49 = vrot.slane %v11079_v27, 4  ;;  %v20727_v4 = vld [vmem:[#allocation3 + $0xcc] sm:$0xf] }
 0x35a   : > { %11569 = vmatprep.mubr.bf16.mxu0 %v13048_v54  ;;  %v9518_v48 = vrot.slane %v9517_v7, 4  ;;  %v11072_v50 = vor.u32 %v11071_v46, %v11068_v34  ;;  %v11085_v21 = vshll.u32 %v20713_v55, 16  ;;  %v9558_v35 = vrot.slane %v20173_v53, 5 }
 0x35b   : > { %v9568_v36 = vrot.slane %v20300_v26, 5  ;;  %v9513_v58 = vsel %vm15716_vm2, %v9508_v60, %v9512_v51  ;;  %v12882_v28 = vcombine.low %v20682_v17, %v20684_v39  ;;  %v11082_v54 = vor.u32 %v11081_v49, %v11077_v3  ;;  %v20734_v17 = vld [vmem:[#allocation3 + $0xd0] sm:$0xf] }
 0x35c   : > { %v9523_v14 = vsel %vm15716_vm2, %v9518_v48, %v9522_v6  ;;  %v11073_v32 = vrot.slane %v11072_v50, 4  ;;  %v12867_v7 = vrot.slane %v9524_v18, 9  ;;  %v9560_v34 = vrot.slane %v9558_v35, 4  ;;  %v9526_v50 = vld [vmem:[#allocation3 + $0x78] sm:$0xe] }
 0x35d   : > { %11570 = vmatmul.mubr.bf16.gmra.mrb[244].mxu0 %v13040_v12  ;;  %v12890_v1 = vcombine.low %v9513_v58, %v9523_v14  ;;  %v9561_v53 = vrot.slane %v20205_v44, 5  ;;  %v9565_v26 = vrot.slane %v20265_v40, 5  ;;  %v9572_v51 = vrot.slane %v20412_v5, 5  ;;  %v9525_v5 = vld [vmem:[#allocation3 + $0x6c] sm:$0xe] }
 0x35e   : > { %v11083_v60 = vrot.slane %v11082_v54, 4  ;;  %v11087_v48 = vrot.slane %v11085_v21, 5  ;;  %v13041_v46 = vcombine.low %v20700_v15, %v20703_v61  ;;  %v11090_v27 = vshrl.u32 %v20727_v4, 16  ;;  %v20743_v12 = vld [vmem:[#allocation3 + $0xd4] sm:$0x1] }
 0x35f   : > { %10790 = vmatprep.mubr.bf16.mxu1 %v12890_v1  ;;  %v11078_v49 = vsel %vm15716_vm2, %v11073_v32, %v11077_v3  ;;  %v9559_v44 = vsel %vm16202_vm14, %v12867_v7, %v9558_v35  ;;  %v9562_v40 = vsel %vm16202_vm14, %v9560_v34, %v9561_v53  ;;  %v9567_v6 = vrot.slane %v9565_v26, 4 }
 0x360   : > { %10791 = vmatmul.mubr.bf16.gmra.mrb[204].mxu1 %v12882_v28  ;;  %v11088_v15 = vsel %vm15716_vm2, %v11083_v60, %v11087_v48  ;;  %v12891_v18 = vcombine.low %v9559_v44, %v9562_v40  ;;  %v9574_v21 = vrot.slane %v9572_v51, 4  ;;  %v9575_v58 = vrot.slane %v20426_v2, 5 }
 0x361   : > { %v13049_v3 = vcombine.low %v11078_v49, %v11088_v15  ;;  %v11092_v14 = vrot.slane %v11090_v27, 4  ;;  %v11093_v28 = vshll.u32 %v20727_v4, 16  ;;  %v11099_v35 = vshll.u32 %v20734_v17, 16 }
 0x362   : > { %14584 = vmatprep.mubr.bf16.mxu1 %v12891_v18  ;;  %v12868_v1 = vrot.slane %v9525_v5, 9  ;;  %v9569_v32 = vsel %vm16202_vm14, %v9567_v6, %v9568_v36  ;;  %v11103_v54 = vshrl.u32 %v20734_v17, 16  ;;  %v11109_v7 = vshll.u32 %v20743_v12, 16  ;;  %v15442_v5 = vld [vmem:[%s21155_s6 + $0x208] sm:$0xff]  }
 0x363   : > { %11577 = vmatprep.mubr.bf16.mxu0 %v13049_v3  ;;  %v12869_v34 = vrot.slane %v9526_v50, 9  ;;  %v9576_v2 = vsel %vm16202_vm14, %v9574_v21, %v9575_v58  ;;  %v11095_v53 = vrot.slane %v11093_v28, 5  ;;  %v11101_v60 = vrot.slane %v11099_v35, 5  ;;  %v9527_v21 = vld [vmem:[#allocation3 + $0x84] sm:$0xe] }
 0x364   : > { %v9566_v48 = vsel %vm16202_vm14, %v12868_v1, %v9565_v26  ;;  %v11105_v27 = vrot.slane %v11103_v54, 4  ;;  %v9579_v49 = vrot.slane %v20506_v30, 5  ;;  %v9586_v6 = vrot.slane %v20565_v29, 5  ;;  %v9528_v3 = vld [vmem:[#allocation3 + $0x90] sm:$0xe]  ;;  %v15443_v29 = vld [vmem:[%s21155_s6 + $0x210] sm:$0xff]  }
 0x365   : > { %11578 = vmatmul.mubr.bf16.gmra.mrb[248].mxu0 %v13041_v46  ;;  %v12892_v44 = vcombine.low %v9566_v48, %v9569_v32  ;;  %v9573_v36 = vsel %vm16202_vm14, %v12869_v34, %v9572_v51  ;;  %v11096_v40 = vor.u32 %v11095_v53, %v11092_v14  ;;  %v11111_v46 = vrot.slane %v11109_v7, 5  ;;  %v15444_v48 = vld [vmem:[%s21155_s6 + $0x218] sm:$0xff]  }
 0x366   : > { %v12893_v15 = vcombine.low %v9573_v36, %v9576_v2  ;;  %v11106_v18 = vor.u32 %v11105_v27, %v11101_v60  ;;  %v9581_v50 = vrot.slane %v9579_v49, 4  ;;  %v9588_v58 = vrot.slane %v9586_v6, 4  ;;  %v9529_v27 = vld [vmem:[#allocation3 + $0x9c] sm:$0xe] }
 0x367   : > { %v11097_v26 = vrot.slane %v11096_v40, 4  ;;  %v9582_v51 = vrot.slane %v20524_v13, 5  ;;  %v9589_v28 = vrot.slane %v20576_v9, 5  ;;  %v9593_v35 = vrot.slane %v20613_v37, 5 }
 0x368   : > { %14585 = vmatmul.mubr.bf16.vlgmr.msra.gmra.mrb[160].mxu1 %v12892_v44  ;;  %v11107_v30 = vrot.slane %v11106_v18, 4  ;;  %v12870_v13 = vrot.slane %v9527_v21, 9  ;;  %v12871_v34 = vrot.slane %v9528_v3, 9  ;;  %v9600_v9 = vrot.slane %v20652_v38, 5  ;;  %v20791_v18 = vld [vmem:[#allocation3 + $0xb4] sm:$0xe] }
 0x369   : > { %14588 = vmatprep.mubr.bf16.mxu1 %v12893_v15  ;;  %14601 = vmatpush3.bf16.msra.mxu1 %v20634_v24  ;;  %v11102_v14 = vsel %vm15716_vm2, %v11097_v26, %v11101_v60  ;;  %v13042_v24 = vcombine.low %v20727_v4, %v20734_v17  ;;  %v9583_v32 = vsel %vm16202_vm14, %v9581_v50, %v9582_v51  ;;  %v9595_v44 = vrot.slane %v9593_v35, 4  ;;  %v15445_v26 = vld [vmem:[%s21155_s6 + $0x220] sm:$0xff]  }
 0x36a   : > { %14602 = vmatprep.subr.bf16.mxu1 %v15442_v5  ;;  %v11112_v1 = vsel %vm15716_vm2, %v11107_v30, %v11111_v46  ;;  %v9590_v2 = vsel %vm16202_vm14, %v9588_v58, %v9589_v28  ;;  %v9580_v42 = vsel %vm16202_vm14, %v12870_v13, %v9579_v49  ;;  %v9587_v60 = vsel %vm16202_vm14, %v12871_v34, %v9586_v6  ;;  %v11113_v28 = vld [vmem:[#allocation3 + $0x78] sm:$0xe] }
 0x36b   : > { %v13050_v7 = vcombine.low %v11102_v14, %v11112_v1  ;;  %v12894_v4 = vcombine.low %v9580_v42, %v9583_v32  ;;  %v12895_v38 = vcombine.low %v9587_v60, %v9590_v2  ;;  %v9596_v49 = vrot.slane %v20620_v43, 5  ;;  %v11116_v14 = vld [vmem:[#allocation3 + $0x9c] sm:$0xe]  ;;  %v15446_v2 = vld [vmem:[%s21155_s6 + $0x228] sm:$0xff]  }
 0x36c   : > { %v13880_v54 = vpop.f32.mrb[192].mxu0  ;;  %v9602_v15 = vrot.slane %v9600_v9, 4  ;;  %v12872_v6 = vrot.slane %v9529_v27, 9  ;;  %v9603_v43 = vrot.slane %v20660_v25, 5  ;;  %v9607_v21 = vrot.slane %v20684_v39, 5 }
 0x36d   : > { %v13881_v53 = vpop.f32.mrb[193].mxu0  ;;  %14603 = vmatpush3.bf16.msra.mxu1 %v15442_v5  ;;  %11585 = vmatprep.mubr.bf16.mxu0 %v13050_v7  ;;  %v9530_v5 = vld [vmem:[#allocation3 + $0xa8] sm:$0xe]  ;;  %v9597_v50 = vsel %vm16202_vm14, %v9595_v44, %v9596_v49  ;;  %v15518_v1 = vld [vmem:[#allocation3 + $0x7c] sm:$0xf]  ;;  %v11168_v39 = vrot.slane %v20593_v23, 5 }
 0x36e   : > { %v13883_v37 = vpop.f32.mrb[194].mxu0  ;;  %14604 = vmatprep.subr.bf16.mxu1 %v15443_v29  ;;  %11586 = vmatmul.mubr.bf16.gmra.mrb[252].mxu0 %v13042_v24  ;;  %v13882_v40 = vadd.f32 %v13881_v53, %v13880_v54  ;;  %v9594_v30 = vsel %vm16202_vm14, %v12872_v6, %v9593_v35  ;;  %v12873_v51 = vrot.slane %v9530_v5, 9  ;;  %v11147_v24 = vrot.slane %v15518_v1, 5  ;;  %v15448_v1 = vld [vmem:[%s21155_s6 + $0x238] sm:$0xff]  }
 0x36f   : > { %v13884_v36 = vpop.f32.mrb[195].mxu0  ;;  %v12896_v32 = vcombine.low %v9594_v30, %v9597_v50  ;;  %v9610_v54 = vrot.slane %v20697_v62, 5  ;;  %v9609_v53 = vrot.slane %v9607_v21, 4  ;;  %v11170_v42 = vrot.slane %v11168_v39, 4  ;;  %v11117_v62 = vld [vmem:[#allocation3 + $0xa8] sm:$0xe] }
 0x370   : > { %14589 = vmatmul.mubr.bf16.gmra.mrb[164].mxu1 %v12894_v4  ;;  %v20794_v46 = vadd.f32 %v20026_v8, %v13882_v40  ;;  %v13885_v58 = vadd.f32 %v13884_v36, %v13883_v37  ;;  %v12874_v8 = vrot.slane %v20791_v18, 9  ;;  %v9601_v35 = vsel %vm16202_vm14, %v12873_v51, %v9600_v9  ;;  %v15519_v40 = vld [vmem:[#allocation3 + $0x80] sm:$0x1] }
 0x371   : > { %14592 = vmatprep.mubr.bf16.mxu1 %v12895_v38  ;;  %14605 = vmatpush3.bf16.msra.mxu1 %v15443_v29  ;;  %v9604_v29 = vsel %vm16202_vm14, %v9602_v15, %v9603_v43  ;;  %v11171_v37 = vrot.slane %v20599_v63, 5  ;;  %v13027_v60 = vrot.slane %v11113_v28, 9  ;;  %v11149_v27 = vrot.slane %v11147_v24, 4  ;;  %v11118_v38 = vld [vmem:[#allocation3 + $0xb4] sm:$0xe] }
 0x372   : > { %14606 = vmatprep.subr.bf16.mxu1 %v15444_v48  ;;  %v20809_v13 = vadd.f32 %v20034_v57, %v13885_v58  ;;  %v13030_v57 = vrot.slane %v11116_v14, 9  ;;  %v12897_v4 = vcombine.low %v9601_v35, %v9604_v29  ;;  %v11175_v63 = vrot.slane %v20629_v56, 5  ;;  %v15447_v56 = vld [vmem:[%s21155_s6 + $0x230] sm:$0xff]  }
 0x373   : > { %v20828_v36 = vsel %vm16202_vm14, %v11170_v42, %v11171_v37  ;;  %v11182_v15 = vrot.slane %v20669_v22, 5  ;;  %v9611_v18 = vsel %vm16202_vm14, %v9609_v53, %v9610_v54  ;;  %v13031_v6 = vrot.slane %v11117_v62, 9  ;;  %v11115_v54 = vld [vmem:[#allocation3 + $0x90] sm:$0xe] }
 0x374   : > { %v13886_v3 = vpop.f32.mrb[196].mxu0  ;;  %v20824_v44 = vsel %vm16202_vm14, %v13030_v57, %v11168_v39  ;;  %v11177_v50 = vrot.slane %v11175_v63, 4  ;;  %v11154_v43 = vrot.slane %v20454_v33, 5  ;;  %v13032_v58 = vrot.slane %v11118_v38, 9  ;;  %v11114_v39 = vld [vmem:[#allocation3 + $0x84] sm:$0xe] }
 0x375   : > { %v13887_v25 = vpop.f32.mrb[197].mxu0  ;;  %14607 = vmatpush3.bf16.msra.mxu1 %v15444_v48  ;;  %v13054_v49 = vcombine.low %v20824_v44, %v20828_v36  ;;  %v11184_v30 = vrot.slane %v11182_v15, 4  ;;  %v11161_v51 = vrot.slane %v20540_v31, 5  ;;  %v11148_v28 = vsel %vm16202_vm14, %v13027_v60, %v11147_v24  ;;  %v15449_v24 = vld [vmem:[%s21157_s8] sm:$0xff]  }
 0x376   : > { %v13888_v7 = vadd.f32 %v13887_v25, %v13886_v3  ;;  %v13889_v34 = vpop.f32.mrb[198].mxu0  ;;  %14608 = vmatprep.subr.bf16.mxu1 %v15445_v26  ;;  %v11176_v3 = vsel %vm16202_vm14, %v13031_v6, %v11175_v63  ;;  %v20856_v29 = vsel %vm16202_vm14, %v13032_v58, %v11182_v15  ;;  %v11156_v25 = vrot.slane %v11154_v43, 4 }
 0x377   : > { %v13890_v23 = vpop.f32.mrb[199].mxu0  ;;  %v11157_v35 = vrot.slane %v20469_v45, 5  ;;  %v13029_v57 = vrot.slane %v11115_v54, 9  ;;  %v11189_v15 = vrot.slane %v20703_v61, 5  ;;  %v15453_v61 = vld [vmem:[%s21157_s8 + $0x20] sm:$0xff]   ;;  %v11192_v6 = vrot.slane %v20713_v55, 5 }
 0x378   : > { %v20820_v48 = vadd.f32 %v20069_v47, %v13888_v7  ;;  %v13891_v9 = vadd.f32 %v13890_v23, %v13889_v34  ;;  %14593 = vmatmul.mubr.bf16.gmra.mrb[168].mxu1 %v12896_v32  ;;  %v11150_v47 = vrot.slane %v15519_v40, 5  ;;  %v11163_v32 = vrot.slane %v11161_v51, 4 }
 0x379   : > { %14596 = vmatprep.mubr.bf16.mxu1 %v12897_v4  ;;  %14609 = vmatpush3.bf16.msra.mxu1 %v15445_v26  ;;  %v11178_v26 = vrot.slane %v20644_v20, 5  ;;  %v9608_v20 = vsel %vm16202_vm14, %v12874_v8, %v9607_v21  ;;  %v11164_v7 = vrot.slane %v20542_v41, 5  ;;  %v13028_v34 = vrot.slane %v11114_v39, 9  ;;  %v21467_v39 = vld [vmem:[#allocation21_spill] sm:$0xff] }
 0x37a   : > { %v20834_v5 = vadd.f32 %v20093_v52, %v13891_v9  ;;  %14610 = vmatprep.subr.bf16.mxu1 %v15446_v2  ;;  %v11185_v52 = vrot.slane %v20675_v19, 5  ;;  %v11151_v22 = vsel %vm16202_vm14, %v11149_v27, %v11150_v47  ;;  %v12898_v31 = vcombine.low %v9608_v20, %v9611_v18  ;;  %v15450_v9 = vld [vmem:[%s21157_s8 + $0x8] sm:$0xff]   ;;  %v15451_v47 = vld [vmem:[%s21157_s8 + $0x10] sm:$0xff]  }
 0x37b   : > { %v11179_v14 = vsel %vm16202_vm14, %v11177_v50, %v11178_v26  ;;  %v13051_v8 = vcombine.low %v11148_v28, %v11151_v22  ;;  %v11165_v42 = vsel %vm16202_vm14, %v11163_v32, %v11164_v7  ;;  %v11155_v37 = vsel %vm16202_vm14, %v13028_v34, %v11154_v43  ;;  %v11120_v50 = vld [vmem:[#allocation3 + $0xcc] sm:$0xe] }
 0x37c   : > { %v13055_v33 = vcombine.low %v11176_v3, %v11179_v14  ;;  %v20860_v19 = vsel %vm16202_vm14, %v11184_v30, %v11185_v52  ;;  %v11162_v41 = vsel %vm16202_vm14, %v13029_v57, %v11161_v51  ;;  %v11191_v18 = vrot.slane %v11189_v15, 4  ;;  %v15454_v30 = vld [vmem:[%s21157_s8 + $0x28] sm:$0xff]  }
 0x37d   : > { %14611 = vmatpush3.bf16.msra.mxu1 %v15446_v2  ;;  %v13056_v21 = vcombine.low %v20856_v29, %v20860_v19  ;;  %v11158_v2 = vsel %vm16202_vm14, %v11156_v25, %v11157_v35  ;;  %v13053_v27 = vcombine.low %v11162_v41, %v11165_v42  ;;  %v13034_v44 = vrot.slane %v11120_v50, 9  ;;  %v15520_v35 = vld [vmem:[%s15728_s21 + $0x80] sm:$0xff] }
 0x37e   : > { %14612 = vmatprep.subr.bf16.mxu1 %v15447_v56  ;;  %v13052_v60 = vcombine.low %v11155_v37, %v11158_v2  ;;  %v11193_v43 = vsel %vm16202_vm14, %v11191_v18, %v11192_v6  ;;  %v11730_v54 = vpack.c.bf16 %v15521_v59, %v15520_v35 }
 0x380   : > { %14597 = vmatmul.mubr.bf16.gmra.mrb[172].mxu1 %v12898_v31 }
 0x381   : > { %14613 = vmatpush3.bf16.msra.mxu1 %v15447_v56  ;;  %14616 = vmatprep.mubr.bf16.mxu1 %v13051_v8  ;;  %v11196_v56 = vrot.slane %v20734_v17, 5 }
 0x382   : > { %14614 = vmatprep.subr.bf16.mxu1 %v15448_v1 }
 0x383   : > { %v13892_v53 = vpop.f32.mrb[200].mxu0  ;;  %v11198_v36 = vrot.slane %v11196_v56, 4  ;;  %v11197_v31 = vsel %vm16202_vm14, %v13034_v44, %v11196_v56 }
 0x384   : > { %v13893_v45 = vpop.f32.mrb[201].mxu0 }
 0x385   : > { %14615 = vmatpush3.bf16.msra.mxu1 %v15448_v1  ;;  %v13894_v23 = vadd.f32 %v13893_v45, %v13892_v53  ;;  %v13895_v4 = vpop.f32.mrb[202].mxu0 }
 0x386   : > { %14632 = vmatprep.subr.bf16.mxu1 %v15449_v24  ;;  %v13896_v62 = vpop.f32.mrb[203].mxu0 }
 0x387   : > { %v20886_v63 = vadd.f32 %v20129_v16, %v13894_v23  ;;  %v13897_v38 = vadd.f32 %v13896_v62, %v13895_v4  ;;  %v15452_v16 = vld [vmem:[%s21157_s8 + $0x18] sm:$0xff]   ;;  %v15522_v4 = vld [vmem:[%s15728_s21 + $0x90] sm:$0xff]  ;;  %v21468_v62 = vld [vmem:[#allocation34_spill] sm:$0xff] }
 0x388   : > { %14617 = vmatmul.mubr.bf16.vlgmr.msra.gmra.mrb[160].mxu1 %v13052_v60  ;;  %v15523_v60 = vld [vmem:[%s15728_s21 + $0x98] sm:$0xff] }
 0x389   : > { %14620 = vmatprep.mubr.bf16.mxu1 %v13053_v27  ;;  %14633 = vmatpush3.bf16.msra.mxu1 %v15449_v24  ;;  %v20889_v40 = vadd.f32 %v20157_v10, %v13897_v38  ;;  %v11119_v10 = vld [vmem:[#allocation3 + $0xc0] sm:$0xe]  ;;  %v11731_v41 = vpack.c.bf16 %v15523_v60, %v15522_v4 }
 0x38a   : > { %14634 = vmatprep.subr.bf16.mxu1 %v15450_v9  ;;  %v13033_v26 = vrot.slane %v11119_v10, 9  ;;  %v21469_v10 = vld [vmem:[#allocation36_spill] sm:$0xff] }
 0x38c   : > { %v11190_v17 = vsel %vm16202_vm14, %v13033_v26, %v11189_v15  ;;  %v15525_v15 = vld [vmem:[%s15728_s21 + $0xa8] sm:$0xff] }
 0x38d   : > { %14635 = vmatpush3.bf16.msra.mxu1 %v15450_v9  ;;  %v13057_v52 = vcombine.low %v11190_v17, %v11193_v43  ;;  %v15527_v17 = vld [vmem:[%s15728_s21 + $0xb8] sm:$0xff] }
 0x38e   : > { %14636 = vmatprep.subr.bf16.mxu1 %v15451_v47 }
 0x390   : > { %14621 = vmatmul.mubr.bf16.gmra.mrb[164].mxu1 %v13054_v49  ;;  %v11199_v49 = vrot.slane %v20743_v12, 5 }
 0x391   : > { %14624 = vmatprep.mubr.bf16.mxu1 %v13055_v33  ;;  %14637 = vmatpush3.bf16.msra.mxu1 %v15451_v47  ;;  %v15524_v47 = vld [vmem:[%s15728_s21 + $0xa0] sm:$0xff] }
 0x392   : > { %14638 = vmatprep.subr.bf16.mxu1 %v15452_v16  ;;  %v11200_v28 = vsel %vm16202_vm14, %v11198_v36, %v11199_v49  ;;  %v15526_v49 = vld [vmem:[%s15728_s21 + $0xb0] sm:$0xff] }
 0x393   : > { %v13058_v25 = vcombine.low %v11197_v31, %v11200_v28 }
 0x395   : > { %14639 = vmatpush3.bf16.msra.mxu1 %v15452_v16  ;;  %v13898_v55 = vpop.f32.mrb[204].mxu0  ;;  %v11732_v16 = vpack.c.bf16 %v15525_v15, %v15524_v47 }
 0x396   : > { %14640 = vmatprep.subr.bf16.mxu1 %v15453_v61  ;;  %v13976_v58 = vpop.f32.mrb[128].mxu1  ;;  %v13899_v51 = vpop.f32.mrb[205].mxu0 }
 0x397   : > { %v13977_v22 = vpop.f32.mrb[129].mxu1  ;;  %v13900_v14 = vadd.f32 %v13899_v51, %v13898_v55  ;;  %v13901_v20 = vpop.f32.mrb[206].mxu0 }
 0x398   : > { %14625 = vmatmul.mubr.bf16.gmra.mrb[168].mxu1 %v13056_v21  ;;  %v20917_v3 = vadd.f32 %v13977_v22, %v13976_v58  ;;  %v13979_v12 = vpop.f32.mrb[130].mxu1  ;;  %v13902_v1 = vpop.f32.mrb[207].mxu0  ;;  %v15455_v21 = vld [vmem:[%s21157_s8 + $0x30] sm:$0xff]   ;;  %v11733_v58 = vpack.c.bf16 %v15527_v17, %v15526_v49  ;;  %v15529_v22 = vld [vmem:[%s15728_s21 + $0xc8] sm:$0xff]  ;;  %v21473_v17 = vld [vmem:[#allocation13_spill] sm:$0xff] }
 0x399   : > { %14628 = vmatprep.mubr.bf16.mxu1 %v13057_v52  ;;  %14641 = vmatpush3.bf16.msra.mxu1 %v15453_v61  ;;  %v13980_v33 = vpop.f32.mrb[131].mxu1  ;;  %v20926_v19 = vadd.f32 %v20216_v11, %v13900_v14  ;;  %v13903_v8 = vadd.f32 %v13902_v1, %v13901_v20  ;;  %v15456_v11 = vld [vmem:[%s21157_s8 + $0x38] sm:$0xff]   ;;  %v15528_v52 = vld [vmem:[%s15728_s21 + $0xc0] sm:$0xff] }
 0x39a   : > { %14642 = vmatprep.subr.bf16.mxu1 %v15454_v30  ;;  %v20923_v29 = vadd.f32 %v13980_v33, %v13979_v12  ;;  %v11734_v51 = vpack.c.bf16 %v15529_v22, %v15528_v52  ;;  %v21470_v14 = vld [vmem:[#allocation14_spill] sm:$0xff]  ;;  %v21471_v1 = vld [vmem:[#allocation29_spill] sm:$0xff] }
 0x39b   : > { %v20932_v32 = vadd.f32 %v21467_v39, %v13903_v8  ;;  %v21474_v22 = vld [vmem:[#allocation6_spill] sm:$0xff] }
 0x39d   : > { %14643 = vmatpush3.bf16.msra.mxu1 %v15454_v30 }
 0x39e   : > { %14644 = vmatprep.subr.bf16.mxu1 %v15455_v21  ;;  %v13982_v24 = vpop.f32.mrb[132].mxu1 }
 0x39f   : > { %v13983_v7 = vpop.f32.mrb[133].mxu1 }
 0x3a0   : > { %14629 = vmatmul.mubr.bf16.gmra.mrb[172].mxu1 %v13058_v25  ;;  %v20939_v34 = vadd.f32 %v13983_v7, %v13982_v24  ;;  %v13985_v2 = vpop.f32.mrb[134].mxu1  ;;  %v15530_v24 = vld [vmem:[%s15728_s21 + $0xd0] sm:$0xff] }
 0x3a1   : > { %14645 = vmatpush3.bf16.msra.mxu1 %v15455_v21  ;;  %v13904_v53 = vpop.f32.mrb[208].mxu0  ;;  %v13986_v57 = vpop.f32.mrb[135].mxu1  ;;  %14648 = vmatprep.mubr.bf16.mxu1 %v11730_v54 }
 0x3a2   : > { %14646 = vmatprep.subr.bf16.mxu1 %v15456_v11  ;;  %v20941_v42 = vadd.f32 %v13986_v57, %v13985_v2  ;;  %v13905_v45 = vpop.f32.mrb[209].mxu0  ;;  %v15532_v57 = vld [vmem:[%s15728_s21 + $0xe0] sm:$0xff] }
 0x3a3   : > { %v13906_v37 = vadd.f32 %v13905_v45, %v13904_v53  ;;  %v13907_v23 = vpop.f32.mrb[210].mxu0  ;;  %v15533_v45 = vld [vmem:[%s15728_s21 + $0xe8] sm:$0xff] }
 0x3a4   : > { %v13908_v9 = vpop.f32.mrb[211].mxu0 }
 0x3a5   : > { %14647 = vmatpush3.bf16.msra.mxu1 %v15456_v11  ;;  %v20946_v27 = vadd.f32 %v21468_v62, %v13906_v37  ;;  %v13909_v38 = vadd.f32 %v13908_v9, %v13907_v23  ;;  %v15531_v11 = vld [vmem:[%s15728_s21 + $0xd8] sm:$0xff]  ;;  %v11736_v37 = vpack.c.bf16 %v15533_v45, %v15532_v57  ;;  %v21008_v45 = vld [vmem:[%s21156_s7] ss:$0 sm:$0xff] }
 0x3a6   : > { %v13988_v18 = vpop.f32.mrb[136].mxu1  ;;  %v11735_v7 = vpack.c.bf16 %v15531_v11, %v15530_v24  ;;  %v21472_v62 = vld [vmem:[#allocation37_spill] sm:$0xff] }
 0x3a7   : > { %v20951_v56 = vadd.f32 %v21469_v10, %v13909_v38  ;;  %v13989_v61 = vpop.f32.mrb[137].mxu1  ;;  %v15534_v10 = vld [vmem:[%s15728_s21 + $0xf0] sm:$0xff] }
 0x3a8   : > { %14649 = vmatmul.mubr.bf16.vlgmr.msra.gmra.mrb[160].mxu1 %v11731_v41  ;;  %v20953_v6 = vadd.f32 %v13989_v61, %v13988_v18  ;;  %v13991_v50 = vpop.f32.mrb[138].mxu1  ;;  %v15535_v61 = vld [vmem:[%s15728_s21 + $0xf8] sm:$0xff] }
 0x3a9   : > { %v13992_v26 = vpop.f32.mrb[139].mxu1  ;;  %14652 = vmatprep.mubr.bf16.mxu1 %v11732_v16 }
 0x3aa   : > { %v20955_v43 = vadd.f32 %v13992_v26, %v13991_v50  ;;  %v13910_v44 = vpop.f32.mrb[212].mxu0  ;;  %v11737_v50 = vpack.c.bf16 %v15535_v61, %v15534_v10 }
 0x3ab   : > { %v13911_v36 = vpop.f32.mrb[213].mxu0 }
 0x3ac   : > { %v13912_v30 = vadd.f32 %v13911_v36, %v13910_v44  ;;  %v13913_v55 = vpop.f32.mrb[214].mxu0 }
 0x3ad   : > { %v13914_v12 = vpop.f32.mrb[215].mxu0 }
 0x3ae   : > { %v20962_v20 = vadd.f32 %v21470_v14, %v13912_v30  ;;  %v13915_v33 = vadd.f32 %v13914_v12, %v13913_v55 }
 0x3af   : > { %v13994_v31 = vpop.f32.mrb[140].mxu1 }
 0x3b0   : > { %14653 = vmatmul.mubr.bf16.gmra.mrb[164].mxu1 %v11733_v58  ;;  %v13995_v28 = vpop.f32.mrb[141].mxu1  ;;  %v20965_v21 = vadd.f32 %v21471_v1, %v13915_v33 }
 0x3b1   : > { %v20967_v8 = vadd.f32 %v13995_v28, %v13994_v31  ;;  %v13997_v25 = vpop.f32.mrb[142].mxu1  ;;  %14656 = vmatprep.mubr.bf16.mxu1 %v11734_v51 }
 0x3b2   : > { %v13998_v39 = vpop.f32.mrb[143].mxu1  ;;  %v13916_v35 = vpop.f32.mrb[216].mxu0 }
 0x3b3   : > { %v20969_v59 = vadd.f32 %v13998_v39, %v13997_v25  ;;  %v13917_v54 = vpop.f32.mrb[217].mxu0 }
 0x3b4   : > { %v13918_v2 = vadd.f32 %v13917_v54, %v13916_v35  ;;  %v13919_v53 = vpop.f32.mrb[218].mxu0 }
 0x3b5   : > { %v13920_v23 = vpop.f32.mrb[219].mxu0 }
 0x3b6   : > { %v20976_v4 = vadd.f32 %v20512_v0, %v13918_v2  ;;  %v13921_v60 = vadd.f32 %v13920_v23, %v13919_v53 }
 0x3b7   : > { %v14000_v41 = vpop.f32.mrb[144].mxu1 }
 0x3b8   : > { %14657 = vmatmul.mubr.bf16.gmra.mrb[168].mxu1 %v11735_v7  ;;  %v14001_v9 = vpop.f32.mrb[145].mxu1  ;;  %v20979_v38 = vadd.f32 %v21472_v62, %v13921_v60  ;;  %v14782_v60 = vadd.f32 %v20794_v46, %v21008_v45  ;;  %v14786_v62 = vadd.f32 %v20834_v5, %v21008_v45  ;;  %v14794_v46 = vadd.f32 %v20926_v19, %v21008_v45 }
 0x3b9   : > { %v20981_v47 = vadd.f32 %v14001_v9, %v14000_v41  ;;  %v14003_v15 = vpop.f32.mrb[146].mxu1  ;;  %14660 = vmatprep.mubr.bf16.mxu1 %v11736_v37  ;;  %v14778_v37 = vadd.f32 %v20820_v48, %v21008_v45 }
 0x3ba   : > { %v14004_v16 = vpop.f32.mrb[147].mxu1 }
 0x3bb   : > { %v20983_v18 = vadd.f32 %v14004_v16, %v14003_v15  ;;  %v14790_v16 = vadd.f32 %v20809_v13, %v21008_v45 }
 0x3bc   : > { %v13922_v26 = vpop.f32.mrb[220].mxu0 }
 0x3bd   : > { %v13923_v0 = vpop.f32.mrb[221].mxu0 }
 0x3be   : > { %v13924_v44 = vadd.f32 %v13923_v0, %v13922_v26  ;;  %v13925_v36 = vpop.f32.mrb[222].mxu0  ;;  %v14798_v26 = vadd.f32 %v20886_v63, %v21008_v45  ;;  %v14810_v63 = vadd.f32 %v20962_v20, %v21008_v45 }
 0x3bf   : > { %v13926_v49 = vpop.f32.mrb[223].mxu0 }
 0x3c0   : > { %14661 = vmatmul.mubr.bf16.gmra.mrb[172].mxu1 %v11737_v50  ;;  %v20988_v58 = vadd.f32 %v21473_v17, %v13924_v44  ;;  %v13927_v30 = vadd.f32 %v13926_v49, %v13925_v36  ;;  %v14006_v55 = vpop.f32.mrb[148].mxu1  ;;  %v14802_v44 = vadd.f32 %v20932_v32, %v21008_v45  ;;  %v14806_v17 = vadd.f32 %v20889_v40, %v21008_v45 }
 0x3c1   : > { %v14007_v52 = vpop.f32.mrb[149].mxu1  ;;  %v14814_v32 = vadd.f32 %v20946_v27, %v21008_v45  ;;  %v14818_v40 = vadd.f32 %v20965_v21, %v21008_v45 }
 0x3c2   : > { %v20991_v51 = vadd.f32 %v21474_v22, %v13927_v30  ;;  %v20993_v12 = vadd.f32 %v14007_v52, %v14006_v55  ;;  %v14009_v14 = vpop.f32.mrb[150].mxu1 }
 0x3c3   : > { %v14010_v33 = vpop.f32.mrb[151].mxu1 }
 0x3c4   : > { %v20995_v31 = vadd.f32 %v14010_v33, %v14009_v14 }
 0x3c9   : > { %v14012_v28 = vpop.f32.mrb[152].mxu1 }
 0x3ca   : > { %v14013_v1 = vpop.f32.mrb[153].mxu1 }
 0x3cb   : > { %v20997_v25 = vadd.f32 %v14013_v1, %v14012_v28  ;;  %v14015_v39 = vpop.f32.mrb[154].mxu1  ;;  %v14822_v1 = vadd.f32 %v20951_v56, %v21008_v45  ;;  %v14826_v56 = vadd.f32 %v20988_v58, %v21008_v45 }
 0x3cc   : > { %v14016_v35 = vpop.f32.mrb[155].mxu1 }
 0x3cd   : > { %v20999_v54 = vadd.f32 %v14016_v35, %v14015_v39 }
 0x3d1   : > { %v14018_v24 = vpop.f32.mrb[156].mxu1 }
 0x3d2   : > { %v14019_v11 = vpop.f32.mrb[157].mxu1 }
 0x3d3   : > { %v21001_v7 = vadd.f32 %v14019_v11, %v14018_v24  ;;  %v14021_v2 = vpop.f32.mrb[158].mxu1 }
 0x3d4   : > { %v14022_v53 = vpop.f32.mrb[159].mxu1 }
 0x3d5   : > { %v21003_v57 = vadd.f32 %v14022_v53, %v14021_v2 }
 0x3e7   : > { %v14522_v23 = vpop.f32.mrb[176].mxu0 }
 0x3e8   : > { %v14779_v41 = vadd.f32 %v14778_v37, %v14522_v23  ;;  %v9212_v9 = vpop.f32.mrb[177].mxu0 }
 0x3e9   : > { %v14783_v48 = vadd.f32 %v14782_v60, %v9212_v9  ;;  %v14523_v15 = vpop.f32.mrb[178].mxu0 }
 0x3ea   : > { %9293 = vst [vmem:[%s21017_s28 + $0x10] sm:$0xff] %v14779_v41  ;;  %v14787_v10 = vadd.f32 %v14786_v62, %v14523_v15  ;;  %v9215_v61 = vpop.f32.mrb[179].mxu0  ;;  %v14830_v41 = vadd.f32 %v20976_v4, %v21008_v45 }
 0x3eb   : > { %9291 = vst [vmem:[%s21017_s28] sm:$0xff] %v14783_v48  ;;  %v14791_v50 = vadd.f32 %v14790_v16, %v9215_v61  ;;  %v14834_v48 = vadd.f32 %v20991_v51, %v21008_v45  ;;  %v14838_v16 = vadd.f32 %v20979_v38, %v21008_v45 }
 0x3ec   : > { %9294 = vst [vmem:[%s21017_s28 + $0x18] sm:$0xff] %v14787_v10 }
 0x3ed   : > { %9292 = vst [vmem:[%s21017_s28 + $0x8] sm:$0xff] %v14791_v50 }
 0x3ef   : > { %v14526_v5 = vpop.f32.mrb[180].mxu0 }
 0x3f0   : > { %v14795_v0 = vadd.f32 %v14794_v46, %v14526_v5  ;;  %v9228_v13 = vpop.f32.mrb[181].mxu0 }
 0x3f1   : > { %v14799_v36 = vadd.f32 %v14798_v26, %v9228_v13  ;;  %v14527_v49 = vpop.f32.mrb[182].mxu0 }
 0x3f2   : > { %9297 = vst [vmem:[%s21017_s28 + $0x30] sm:$0xff] %v14795_v0  ;;  %v14803_v30 = vadd.f32 %v14802_v44, %v14527_v49  ;;  %v9231_v55 = vpop.f32.mrb[183].mxu0 }
 0x3f3   : > { %9295 = vst [vmem:[%s21017_s28 + $0x20] sm:$0xff] %v14799_v36  ;;  %v14807_v19 = vadd.f32 %v14806_v17, %v9231_v55 }
 0x3f4   : > { %9298 = vst [vmem:[%s21017_s28 + $0x38] sm:$0xff] %v14803_v30 }
 0x3f5   : > { %9296 = vst [vmem:[%s21017_s28 + $0x28] sm:$0xff] %v14807_v19 }
 0x3f8   : > { %v14530_v52 = vpop.f32.mrb[184].mxu0 }
 0x3f9   : > { %v14811_v22 = vadd.f32 %v14810_v63, %v14530_v52  ;;  %v9244_v14 = vpop.f32.mrb[185].mxu0 }
 0x3fa   : > { %v14815_v33 = vadd.f32 %v14814_v32, %v9244_v14  ;;  %v14531_v28 = vpop.f32.mrb[186].mxu0  ;;  %v14056_v39 = vpop.f32.mrb[176].mxu1 }
 0x3fb   : > { %9301 = vst [vmem:[%s21017_s28 + $0x50] sm:$0xff] %v14811_v22  ;;  %v14819_v35 = vadd.f32 %v14818_v40, %v14531_v28  ;;  %v9247_v20 = vpop.f32.mrb[187].mxu0  ;;  %v14057_v24 = vpop.f32.mrb[177].mxu1 }
 0x3fc   : > { %9299 = vst [vmem:[%s21017_s28 + $0x40] sm:$0xff] %v14815_v33  ;;  %v14823_v11 = vadd.f32 %v14822_v1, %v9247_v20  ;;  %v14058_v27 = vadd.f32 %v14057_v24, %v14056_v39  ;;  %v14059_v2 = vpop.f32.mrb[178].mxu1 }
 0x3fd   : > { %9302 = vst [vmem:[%s21017_s28 + $0x58] sm:$0xff] %v14819_v35  ;;  %v14060_v53 = vpop.f32.mrb[179].mxu1 }
 0x3fe   : > { %9300 = vst [vmem:[%s21017_s28 + $0x48] sm:$0xff] %v14823_v11  ;;  %v14844_v21 = vadd.f32 %v14058_v27, %v20917_v3  ;;  %v14061_v37 = vadd.f32 %v14060_v53, %v14059_v2 }
 0x400   : > { %v14534_v23 = vpop.f32.mrb[188].mxu0  ;;  %v14852_v60 = vadd.f32 %v14061_v37, %v20923_v29 }
 0x401   : > { %v14827_v9 = vadd.f32 %v14826_v56, %v14534_v23  ;;  %v9260_v62 = vpop.f32.mrb[189].mxu0 }
 0x402   : > { %v14831_v15 = vadd.f32 %v14830_v41, %v9260_v62  ;;  %v14535_v3 = vpop.f32.mrb[190].mxu0  ;;  %v14062_v10 = vpop.f32.mrb[180].mxu1 }
 0x403   : > { %9305 = vst [vmem:[%s21017_s28 + $0x70] sm:$0xff] %v14827_v9  ;;  %v14835_v58 = vadd.f32 %v14834_v48, %v14535_v3  ;;  %v9263_v61 = vpop.f32.mrb[191].mxu0  ;;  %v14063_v29 = vpop.f32.mrb[181].mxu1 }
 0x404   : > { %9303 = vst [vmem:[%s21017_s28 + $0x60] sm:$0xff] %v14831_v15  ;;  %v14839_v50 = vadd.f32 %v14838_v16, %v9263_v61  ;;  %v14064_v4 = vadd.f32 %v14063_v29, %v14062_v10  ;;  %v14065_v46 = vpop.f32.mrb[182].mxu1 }
 0x405   : > { %9306 = vst [vmem:[%s21017_s28 + $0x78] sm:$0xff] %v14835_v58  ;;  %v14066_v5 = vpop.f32.mrb[183].mxu1 }
 0x406   : > { %9304 = vst [vmem:[%s21017_s28 + $0x68] sm:$0xff] %v14839_v50  ;;  %v14840_v26 = vadd.f32 %v14064_v4, %v20939_v34  ;;  %v14067_v51 = vadd.f32 %v14066_v5, %v14065_v46 }
 0x408   : > { %v14848_v0 = vadd.f32 %v14067_v51, %v20941_v42  ;;  %v14136_v13 = vpop.f32.mrb[224].mxu0 }
 0x409   : > { %v14137_v44 = vpop.f32.mrb[225].mxu0 }
 0x40a   : > { %v14138_v38 = vadd.f32 %v14137_v44, %v14136_v13  ;;  %v14139_v36 = vpop.f32.mrb[226].mxu0  ;;  %v14068_v49 = vpop.f32.mrb[184].mxu1 }
 0x40b   : > { %v14140_v17 = vpop.f32.mrb[227].mxu0  ;;  %v14069_v30 = vpop.f32.mrb[185].mxu1 }
 0x40c   : > { %v21069_v55 = vadd.f32 %v14844_v21, %v14138_v38  ;;  %v14141_v19 = vadd.f32 %v14140_v17, %v14139_v36  ;;  %v14070_v63 = vadd.f32 %v14069_v30, %v14068_v49  ;;  %v14071_v52 = vpop.f32.mrb[186].mxu1 }
 0x40d   : > { %v14072_v32 = vpop.f32.mrb[187].mxu1 }
 0x40e   : > { %v21071_v22 = vadd.f32 %v14852_v60, %v14141_v19  ;;  %v14860_v34 = vadd.f32 %v14070_v63, %v20953_v6  ;;  %v14073_v14 = vadd.f32 %v14072_v32, %v14071_v52 }
 0x410   : > { %v14868_v42 = vadd.f32 %v14073_v14, %v20955_v43  ;;  %v14142_v40 = vpop.f32.mrb[228].mxu0 }
 0x411   : > { %v14143_v33 = vpop.f32.mrb[229].mxu0 }
 0x412   : > { %v14144_v28 = vadd.f32 %v14143_v33, %v14142_v40  ;;  %v14145_v1 = vpop.f32.mrb[230].mxu0  ;;  %v14074_v39 = vpop.f32.mrb[188].mxu1 }
 0x413   : > { %v14146_v35 = vpop.f32.mrb[231].mxu0  ;;  %v14075_v20 = vpop.f32.mrb[189].mxu1 }
 0x414   : > { %v21075_v24 = vadd.f32 %v14840_v26, %v14144_v28  ;;  %v14147_v11 = vadd.f32 %v14146_v35, %v14145_v1  ;;  %v14076_v27 = vadd.f32 %v14075_v20, %v14074_v39  ;;  %v14077_v2 = vpop.f32.mrb[190].mxu1 }
 0x415   : > { %v14078_v53 = vpop.f32.mrb[191].mxu1 }
 0x416   : > { %v21077_v21 = vadd.f32 %v14848_v0, %v14147_v11  ;;  %v14856_v6 = vadd.f32 %v14076_v27, %v20967_v8  ;;  %v14079_v37 = vadd.f32 %v14078_v53, %v14077_v2 }
 0x418   : > { %v14864_v43 = vadd.f32 %v14079_v37, %v20969_v59  ;;  %v14148_v56 = vpop.f32.mrb[232].mxu0 }
 0x419   : > { %v14149_v23 = vpop.f32.mrb[233].mxu0 }
 0x41a   : > { %v14150_v60 = vadd.f32 %v14149_v23, %v14148_v56  ;;  %v14151_v41 = vpop.f32.mrb[234].mxu0  ;;  %v14080_v9 = vpop.f32.mrb[192].mxu1 }
 0x41b   : > { %v14152_v62 = vpop.f32.mrb[235].mxu0  ;;  %v14081_v48 = vpop.f32.mrb[193].mxu1 }
 0x41c   : > { %v21081_v15 = vadd.f32 %v14860_v34, %v14150_v60  ;;  %v14153_v3 = vadd.f32 %v14152_v62, %v14151_v41  ;;  %v14082_v16 = vadd.f32 %v14081_v48, %v14080_v9  ;;  %v14083_v10 = vpop.f32.mrb[194].mxu1 }
 0x41d   : > { %v14084_v58 = vpop.f32.mrb[195].mxu1 }
 0x41e   : > { %v21083_v61 = vadd.f32 %v14868_v42, %v14153_v3  ;;  %v14876_v8 = vadd.f32 %v14082_v16, %v20981_v47  ;;  %v14085_v29 = vadd.f32 %v14084_v58, %v14083_v10 }
 0x420   : > { %v14884_v59 = vadd.f32 %v14085_v29, %v20983_v18  ;;  %v14154_v50 = vpop.f32.mrb[236].mxu0 }
 0x421   : > { %v14155_v4 = vpop.f32.mrb[237].mxu0 }
 0x422   : > { %v14156_v46 = vadd.f32 %v14155_v4, %v14154_v50  ;;  %v14157_v5 = vpop.f32.mrb[238].mxu0  ;;  %v14086_v26 = vpop.f32.mrb[196].mxu1 }
 0x423   : > { %v14158_v51 = vpop.f32.mrb[239].mxu0  ;;  %v14087_v0 = vpop.f32.mrb[197].mxu1 }
 0x424   : > { %v21087_v13 = vadd.f32 %v14856_v6, %v14156_v46  ;;  %v14159_v44 = vadd.f32 %v14158_v51, %v14157_v5  ;;  %v14088_v38 = vadd.f32 %v14087_v0, %v14086_v26  ;;  %v14089_v36 = vpop.f32.mrb[198].mxu1 }
 0x425   : > { %v14090_v49 = vpop.f32.mrb[199].mxu1 }
 0x426   : > { %v21089_v17 = vadd.f32 %v14864_v43, %v14159_v44  ;;  %v14872_v47 = vadd.f32 %v14088_v38, %v20993_v12  ;;  %v14091_v30 = vadd.f32 %v14090_v49, %v14089_v36  ;;  %v14846_v36 = vadd.f32 %v21069_v55, %v21008_v45 }
 0x427   : > { %v14858_v55 = vadd.f32 %v21087_v13, %v21008_v45 }
 0x428   : > { %v14880_v18 = vadd.f32 %v14091_v30, %v20995_v31  ;;  %v14160_v19 = vpop.f32.mrb[240].mxu0  ;;  %v14850_v30 = vadd.f32 %v21077_v21, %v21008_v45 }
 0x429   : > { %v14161_v63 = vpop.f32.mrb[241].mxu0 }
 0x42a   : > { %v14162_v52 = vadd.f32 %v14161_v63, %v14160_v19  ;;  %v14163_v32 = vpop.f32.mrb[242].mxu0  ;;  %v14092_v34 = vpop.f32.mrb[200].mxu1  ;;  %v14854_v63 = vadd.f32 %v21071_v22, %v21008_v45 }
 0x42b   : > { %v14164_v14 = vpop.f32.mrb[243].mxu0  ;;  %v14093_v42 = vpop.f32.mrb[201].mxu1 }
 0x42c   : > { %v21093_v40 = vadd.f32 %v14876_v8, %v14162_v52  ;;  %v14165_v33 = vadd.f32 %v14164_v14, %v14163_v32  ;;  %v14094_v28 = vadd.f32 %v14093_v42, %v14092_v34  ;;  %v14095_v1 = vpop.f32.mrb[202].mxu1  ;;  %v14862_v34 = vadd.f32 %v21081_v15, %v21008_v45 }
 0x42d   : > { %v14096_v39 = vpop.f32.mrb[203].mxu1  ;;  %v14866_v42 = vadd.f32 %v21089_v17, %v21008_v45 }
 0x42e   : > { %v21095_v35 = vadd.f32 %v14884_v59, %v14165_v33  ;;  %v14892_v12 = vadd.f32 %v14094_v28, %v20997_v25  ;;  %v14097_v20 = vadd.f32 %v14096_v39, %v14095_v1  ;;  %v14870_v1 = vadd.f32 %v21083_v61, %v21008_v45 }
 0x42f   : > { %v14878_v17 = vadd.f32 %v21093_v40, %v21008_v45 }
 0x430   : > { %v14900_v31 = vadd.f32 %v14097_v20, %v20999_v54  ;;  %v14166_v11 = vpop.f32.mrb[244].mxu0 }
 0x431   : > { %v14167_v27 = vpop.f32.mrb[245].mxu0 }
 0x432   : > { %v14168_v2 = vadd.f32 %v14167_v27, %v14166_v11  ;;  %v14169_v53 = vpop.f32.mrb[246].mxu0 }
 0x433   : > { %v14170_v6 = vpop.f32.mrb[247].mxu0  ;;  %v14098_v56 = vpop.f32.mrb[204].mxu1 }
 0x434   : > { %v14873_v37 = vadd.f32 %v14872_v47, %v14168_v2  ;;  %v14171_v43 = vadd.f32 %v14170_v6, %v14169_v53  ;;  %v14099_v23 = vpop.f32.mrb[205].mxu1  ;;  %v14886_v53 = vadd.f32 %v21095_v35, %v21008_v45 }
 0x435   : > { %v14100_v41 = vadd.f32 %v14099_v23, %v14098_v56  ;;  %v14101_v9 = vpop.f32.mrb[206].mxu1 }
 0x436   : > { %v14881_v60 = vadd.f32 %v14880_v18, %v14171_v43  ;;  %v14102_v62 = vpop.f32.mrb[207].mxu1  ;;  %v14874_v15 = vadd.f32 %v14873_v37, %v21008_v45 }
 0x437   : > { %v14888_v48 = vadd.f32 %v14100_v41, %v21001_v7  ;;  %v14103_v3 = vadd.f32 %v14102_v62, %v14101_v9 }
 0x438   : > { %v14172_v25 = vpop.f32.mrb[248].mxu0  ;;  %v14882_v61 = vadd.f32 %v14881_v60, %v21008_v45 }
 0x439   : > { %v14896_v16 = vadd.f32 %v14103_v3, %v21003_v57  ;;  %v14173_v54 = vpop.f32.mrb[249].mxu0  ;;  %v14842_v57 = vadd.f32 %v21075_v24, %v21008_v45 }
 0x43a   : > { %v14174_v10 = vadd.f32 %v14173_v54, %v14172_v25  ;;  %v14175_v58 = vpop.f32.mrb[250].mxu0 }
 0x43b   : > { %v14176_v8 = vpop.f32.mrb[251].mxu0 }
 0x43c   : > { %v14893_v29 = vadd.f32 %v14892_v12, %v14174_v10  ;;  %v14177_v59 = vadd.f32 %v14176_v8, %v14175_v58 }
 0x43e   : > { %v21101_v50 = vadd.f32 %v14900_v31, %v14177_v59  ;;  %v14894_v23 = vadd.f32 %v14893_v29, %v21008_v45 }
 0x441   : > { %v14178_v4 = vpop.f32.mrb[252].mxu0 }
 0x442   : > { %v14179_v46 = vpop.f32.mrb[253].mxu0 }
 0x443   : > { %v14180_v5 = vadd.f32 %v14179_v46, %v14178_v4  ;;  %v14181_v26 = vpop.f32.mrb[254].mxu0 }
 0x444   : > { %v14182_v51 = vpop.f32.mrb[255].mxu0 }
 0x445   : > { %v14889_v7 = vadd.f32 %v14888_v48, %v14180_v5  ;;  %v14183_v0 = vadd.f32 %v14182_v51, %v14181_v26  ;;  %v14902_v48 = vadd.f32 %v21101_v50, %v21008_v45 }
 0x447   : > { %v14897_v44 = vadd.f32 %v14896_v16, %v14183_v0  ;;  %v14890_v40 = vadd.f32 %v14889_v7, %v21008_v45 }
 0x449   : > { %v14898_v35 = vadd.f32 %v14897_v44, %v21008_v45 }
 0x47b   : > { %v14650_v38 = vpop.f32.mrb[160].mxu1 }
 0x47c   : > { %v14843_v49 = vadd.f32 %v14842_v57, %v14650_v38  ;;  %v11836_v47 = vpop.f32.mrb[161].mxu1 }
 0x47d   : > { %v14847_v18 = vadd.f32 %v14846_v36, %v11836_v47  ;;  %v14651_v19 = vpop.f32.mrb[162].mxu1 }
 0x47e   : > { %13142 = vst [vmem:[%s21017_s28 + $0x90] sm:$0xff] %v14843_v49  ;;  %v14851_v52 = vadd.f32 %v14850_v30, %v14651_v19  ;;  %v11839_v32 = vpop.f32.mrb[163].mxu1 }
 0x47f   : > { %13140 = vst [vmem:[%s21017_s28 + $0x80] sm:$0xff] %v14847_v18  ;;  %v14855_v24 = vadd.f32 %v14854_v63, %v11839_v32 }
 0x480   : > { %13143 = vst [vmem:[%s21017_s28 + $0x98] sm:$0xff] %v14851_v52 }
 0x481   : > { %13141 = vst [vmem:[%s21017_s28 + $0x88] sm:$0xff] %v14855_v24 }
 0x483   : > { %v14654_v21 = vpop.f32.mrb[164].mxu1 }
 0x484   : > { %v14859_v14 = vadd.f32 %v14858_v55, %v14654_v21  ;;  %v11852_v22 = vpop.f32.mrb[165].mxu1 }
 0x485   : > { %v14863_v33 = vadd.f32 %v14862_v34, %v11852_v22  ;;  %v14655_v28 = vpop.f32.mrb[166].mxu1 }
 0x486   : > { %13146 = vst [vmem:[%s21017_s28 + $0xb0] sm:$0xff] %v14859_v14  ;;  %v14867_v39 = vadd.f32 %v14866_v42, %v14655_v28  ;;  %v11855_v12 = vpop.f32.mrb[167].mxu1 }
 0x487   : > { %13144 = vst [vmem:[%s21017_s28 + $0xa0] sm:$0xff] %v14863_v33  ;;  %v14871_v13 = vadd.f32 %v14870_v1, %v11855_v12 }
 0x488   : > { %13147 = vst [vmem:[%s21017_s28 + $0xb8] sm:$0xff] %v14867_v39 }
 0x489   : > { %13145 = vst [vmem:[%s21017_s28 + $0xa8] sm:$0xff] %v14871_v13 }
 0x48b   : > { %v14658_v20 = vpop.f32.mrb[168].mxu1 }
 0x48c   : > { %v14875_v31 = vadd.f32 %v14874_v15, %v14658_v20  ;;  %v11868_v11 = vpop.f32.mrb[169].mxu1 }
 0x48d   : > { %v14879_v27 = vadd.f32 %v14878_v17, %v11868_v11  ;;  %v14659_v2 = vpop.f32.mrb[170].mxu1 }
 0x48e   : > { %13150 = vst [vmem:[%s21017_s28 + $0xd0] sm:$0xff] %v14875_v31  ;;  %v14883_v6 = vadd.f32 %v14882_v61, %v14659_v2  ;;  %v11871_v43 = vpop.f32.mrb[171].mxu1 }
 0x48f   : > { %13148 = vst [vmem:[%s21017_s28 + $0xc0] sm:$0xff] %v14879_v27  ;;  %v14887_v37 = vadd.f32 %v14886_v53, %v11871_v43 }
 0x490   : > { %13151 = vst [vmem:[%s21017_s28 + $0xd8] sm:$0xff] %v14883_v6 }
 0x491   : > { %13149 = vst [vmem:[%s21017_s28 + $0xc8] sm:$0xff] %v14887_v37 }
 0x493   : > { %v14662_v56 = vpop.f32.mrb[172].mxu1 }
 0x494   : > { %v14891_v60 = vadd.f32 %v14890_v40, %v14662_v56  ;;  %v11884_v41 = vpop.f32.mrb[173].mxu1 }
 0x495   : > { %v14895_v9 = vadd.f32 %v14894_v23, %v11884_v41  ;;  %v14663_v62 = vpop.f32.mrb[174].mxu1 }
 0x496   : > { %13154 = vst [vmem:[%s21017_s28 + $0xf0] sm:$0xff] %v14891_v60  ;;  %v14899_v3 = vadd.f32 %v14898_v35, %v14663_v62  ;;  %v11887_v25 = vpop.f32.mrb[175].mxu1 }
 0x497   : > { %13152 = vst [vmem:[%s21017_s28 + $0xe0] sm:$0xff] %v14895_v9  ;;  %v14903_v16 = vadd.f32 %v14902_v48, %v11887_v25 }
 0x498   : > { %13155 = vst [vmem:[%s21017_s28 + $0xf8] sm:$0xff] %v14899_v3 }
 0x499   : > { %13153 = vst [vmem:[%s21017_s28 + $0xe8] sm:$0xff] %v14903_v16 }
 0x49a PF: > { %s19_s30 = sadd.s32 1, %s15542_s30  }
 0x49b   : > { %p16_p4 = scmp.ge.s32.totalorder %s19_s30, 4  }
 0x49d   :  { %18 = sbr.rel (!%p16_p4) target bundleno = 1 (0x1), region = 103 }

</bundles_post_ra>
